<compile_context>
chip_gen: v6e
topology: v6e:2x2x1
jax: 0.10.0
libtpu: 0.0.40
codegen_flags: <defaults>
</compile_context>

<pallas_src>
import functools

import jax
import jax.numpy as jnp
import numpy as np
from jax.experimental import pallas as pl
from jax.experimental.pallas import tpu as pltpu

# ------------------------- model configuration -----------------------------
IN_CHANNELS = 2
NUM_CLASSES = 3
KERNELS = [(3, 3, 3), (3, 3, 3), (3, 3, 3)]
STRIDES = [(1, 1, 1), (2, 2, 2), (2, 2, 2)]
FILTERS = [4, 8, 16]
NEG_SLOPE = 0.01
NORM_EPS = 1e-5
BOTTLENECK_DIM = 32
NDIM_NON_IMG = 6
BATCH = 2
SPATIAL = (8, 8, 8)

# TODO(synk): residual=True (ResidBlock) and depth_wise_conv_levels > 0
# (grouped / depth-wise convs) are not implemented; this config uses plain
# ConvBlocks with groups=1.


# ----------------------------- helpers (glue) -------------------------------
def get_padding(ksize, stride):
    # mirrors models/image_model.py::get_padding
    return tuple(int((k - s + 1) / 2) for k, s in zip(ksize, stride))


def im2col_3d(x, ksize, stride, pad):
    """Reference-only: (N,D,H,W,C) -> patches (N, Do*Ho*Wo, kd*kh*kw*C)."""
    n, d, h, w, c = x.shape
    kd, kh, kw = ksize
    sd, sh, sw = stride
    pd, ph, pw = pad
    xp = jnp.pad(x, ((0, 0), (pd, pd), (ph, ph), (pw, pw), (0, 0)))
    do = (d + 2 * pd - kd) // sd + 1
    ho = (h + 2 * ph - kh) // sh + 1
    wo = (w + 2 * pw - kw) // sw + 1
    cols = []
    for i in range(kd):
        for j in range(kh):
            for k in range(kw):
                cols.append(
                    xp[:, i:i + sd * do:sd, j:j + sh * ho:sh, k:k + sw * wo:sw, :]
                )
    patches = jnp.stack(cols, axis=4)
    return patches.reshape(n, do * ho * wo, kd * kh * kw * c), (do, ho, wo)


# ------------------------ fused kernel (whole network) ----------------------
def _apply_conv_layer(x, pref, cfg):
    """One Conv3d(bias=False)+InstanceNorm3d(affine)+LeakyReLU, per sample.

    x:    (Din, Hin*Win*Cin) activation value (lane-dense layout).
    pref: packed param ref, rows = [B0; B1; B2; Mproj; gamma_t; beta_t].
    cfg:  (Din, Lin, Do, Lout, stride) static python ints.
    """
    din, lin, do, lout, stride = cfg
    zero = jnp.zeros((1, lin), jnp.float32)
    xp = jnp.concatenate([zero, x, zero], axis=0)          # depth zero-padding
    acc = jnp.zeros((do, lout), jnp.float32)
    for i in range(3):                                     # kernel depth offsets
        b_i = pref[pl.ds(i * lin, lin), :]                 # (Lin, Lout)
        if stride == 1:
            lhs = xp[i:i + do, :]
        else:  # stride 2: pick padded depth rows {2*r + i}
            lhs = jnp.concatenate(
                [xp[stride * r + i:stride * r + i + 1, :] for r in range(do)],
                axis=0)
        acc = acc + jnp.dot(lhs, b_i, preferred_element_type=jnp.float32)
    mproj = pref[pl.ds(3 * lin, lout), :]                  # (Lout, Lout)
    gamma_t = pref[pl.ds(3 * lin + lout, 1), :]            # (1, Lout)
    beta_t = pref[pl.ds(3 * lin + lout + 1, 1), :]         # (1, Lout)
    # Instance norm: per-channel biased stats over all spatial positions.
    rsum = jnp.sum(acc, axis=0, keepdims=True)             # (1, Lout)
    rsumsq = jnp.sum(acc * acc, axis=0, keepdims=True)
    mean_t = jnp.dot(rsum, mproj, preferred_element_type=jnp.float32)
    meansq_t = jnp.dot(rsumsq, mproj, preferred_element_type=jnp.float32)
    var_t = meansq_t - mean_t * mean_t
    scale_t = gamma_t * jax.lax.rsqrt(var_t + NORM_EPS)
    y = (acc - mean_t) * scale_t + beta_t
    return jnp.where(y >= 0.0, y, NEG_SLOPE * y)           # LeakyReLU


def _fused_kernel(img_ref, tab_ref,
                  l0_ref, l1_ref, l2_ref, l3_ref, l4_ref, l5_ref,
                  hw1_ref, hw2_ref, rpool_ref,
                  out_ref, *, layer_cfgs):
    layer_refs = (l0_ref, l1_ref, l2_ref, l3_ref, l4_ref, l5_ref)
    cfeat = FILTERS[-1]
    tab = tab_ref[...]                                     # (N, T)
    rpool = rpool_ref[...]                                 # (Lfinal, Cfeat), incl. 1/P
    w1a = hw1_ref[pl.ds(0, cfeat), :]                      # (Cfeat, B)
    w1b = hw1_ref[pl.ds(cfeat, NDIM_NON_IMG), :]           # (T, B)
    b1 = hw1_ref[pl.ds(cfeat + NDIM_NON_IMG, 1), :]        # (1, B)
    w2 = hw2_ref[pl.ds(0, BOTTLENECK_DIM), :]              # (B, NUM_CLASSES)
    b2 = hw2_ref[pl.ds(BOTTLENECK_DIM, 1), :]              # (1, NUM_CLASSES)

    logits = []
    for n in range(BATCH):
        x = img_ref[n]                                     # (D, H*W*Cin)
        for pref, cfg in zip(layer_refs, layer_cfgs):
            x = _apply_conv_layer(x, pref, cfg)
        # AdaptiveAvgPool3d(1,1,1) as sublane reduction + channel projection.
        rsum = jnp.sum(x, axis=0, keepdims=True)           # (1, Lfinal)
        pooled = jnp.dot(rsum, rpool, preferred_element_type=jnp.float32)
        tab_n = tab[n:n + 1, :]                            # (1, T)
        h = (jnp.dot(pooled, w1a, preferred_element_type=jnp.float32)
             + jnp.dot(tab_n, w1b, preferred_element_type=jnp.float32) + b1)
        h = jnp.maximum(h, 0.0)                            # ReLU
        logits.append(jnp.dot(h, w2, preferred_element_type=jnp.float32) + b2)
    out_ref[...] = jnp.concatenate(logits, axis=0)         # (N, NUM_CLASSES)


# -------------------- host-side weight packing (one-time) -------------------
def _layer_sequence(params):
    """(w, gamma, beta, stride) for the 6 conv layers in forward order."""
    blocks = ([params["input_block"]] + list(params["downsamples"])
              + [params["bottleneck"]])
    strides = [STRIDES[0]] + list(STRIDES[1:-1]) + [STRIDES[-1]]
    seq = []
    for blk, st in zip(blocks, strides):
        seq.append((blk["w1"], blk["g1"], blk["b1"], st[0]))
        seq.append((blk["w2"], blk["g2"], blk["b2"], 1))
    return seq


def _build_layer_pack(w, gamma, beta, in_dims, stride):
    """Fold Conv3d+InstanceNorm params into the fused-kernel matrices."""
    kd, kh, kw, cin, cout = w.shape
    assert (kd, kh, kw) == (3, 3, 3)
    din, hin, win = in_dims
    s = stride
    pad = (kd - s + 1) // 2
    assert pad == 1
    do = (din + 2 * pad - kd) // s + 1
    ho = (hin + 2 * pad - kh) // s + 1
    wo = (win + 2 * pad - kw) // s + 1
    lin = hin * win * cin
    lout = ho * wo * cout
    # B_i: for depth offset i, maps (hin, win, cin) -> (ho, wo, cout) with the
    # H/W kernel offsets, stride and zero padding baked in.
    b_mats = np.zeros((kd, lin, lout), np.float32)
    for i in range(kd):
        for j in range(kh):
            for k in range(kw):
                blk = w[i, j, k]                           # (cin, cout)
                for oh in range(ho):
                    ih = s * oh + j - pad
                    if ih < 0 or ih >= hin:
                        continue
                    for ow in range(wo):
                        iw = s * ow + k - pad
                        if iw < 0 or iw >= win:
                            continue
                        r = (ih * win + iw) * cin
                        c = (oh * wo + ow) * cout
                        b_mats[i, r:r + cin, c:c + cout] = blk
    # Mproj: sums the H*W lane blocks per channel, scales by 1/P and tiles
    # the per-channel stat back across the lane layout.
    p_total = do * ho * wo
    mproj = np.zeros((lout, lout), np.float32)
    for c in range(cout):
        mproj[c::cout, c::cout] = 1.0 / p_total
    gamma_t = np.tile(gamma, ho * wo)[None, :].astype(np.float32)
    beta_t = np.tile(beta, ho * wo)[None, :].astype(np.float32)
    packed = np.concatenate(
        [b_mats[0], b_mats[1], b_mats[2], mproj, gamma_t, beta_t], axis=0)
    cfg = (din, lin, do, lout, s)
    return packed.astype(np.float32), cfg, (do, ho, wo, cout)


def _cost_estimate(cfgs, packed_arrays, io_bytes):
    flops = 0
    transcendentals = 0
    for (_, lin, do, lout, _) in cfgs:
        flops += BATCH * (2 * 3 * do * lin * lout + 2 * 2 * lout * lout)
        transcendentals += BATCH * lout
    flops += BATCH * 2 * (cfgs[-1][3] * FILTERS[-1]
                          + FILTERS[-1] * BOTTLENECK_DIM
                          + NDIM_NON_IMG * BOTTLENECK_DIM
                          + BOTTLENECK_DIM * NUM_CLASSES)
    bytes_accessed = int(io_bytes) + int(sum(int(a.size) * 4 for a in packed_arrays))
    return int(flops), int(transcendentals), int(bytes_accessed)


def build_forward(params):
    """Pack weights once (host side) and return a jitted fused forward fn."""
    packed_list, cfgs = [], []
    dims = SPATIAL
    geom = None
    for (w, g, b, s) in _layer_sequence(params):
        packed, cfg, geom = _build_layer_pack(
            np.asarray(w), np.asarray(g), np.asarray(b), dims, s)
        packed_list.append(jnp.asarray(packed))
        cfgs.append(cfg)
        dims = geom[:3]
    do, ho, wo, cout = geom

    hp = params["head"]
    rpool = np.zeros((ho * wo * cout, cout), np.float32)
    for c in range(cout):
        rpool[c::cout, c] = 1.0 / (do * ho * wo)           # mean-pooling matrix
    hw1 = np.concatenate([np.asarray(hp["w1a"]), np.asarray(hp["w1b"]),
                          np.asarray(hp["b1"])[None, :]], axis=0).astype(np.float32)
    hw2 = np.concatenate([np.asarray(hp["w2"]),
                          np.asarray(hp["b2"])[None, :]], axis=0).astype(np.float32)
    packed_all = packed_list + [jnp.asarray(hw1), jnp.asarray(hw2),
                                jnp.asarray(rpool)]
    cfgs = tuple(cfgs)

    n_in = 2 + len(packed_all)
    io_bytes = (BATCH * IN_CHANNELS * SPATIAL[0] * SPATIAL[1] * SPATIAL[2] * 4
                + BATCH * NDIM_NON_IMG * 4 + BATCH * NUM_CLASSES * 4)
    flops, transc, bytes_acc = _cost_estimate(cfgs, packed_all, io_bytes)

    call = pl.pallas_call(
        functools.partial(_fused_kernel, layer_cfgs=cfgs),
        out_shape=jax.ShapeDtypeStruct((BATCH, NUM_CLASSES), jnp.float32),
        in_specs=[pl.BlockSpec(memory_space=pltpu.MemorySpace.VMEM)] * n_in,
        out_specs=pl.BlockSpec(memory_space=pltpu.MemorySpace.VMEM),
        cost_estimate=pl.CostEstimate(flops=flops, transcendentals=transc,
                                      bytes_accessed=bytes_acc),
    )

    def fwd(image, tabular):
        n, cch, d, h, wdt = image.shape
        # NCDHW -> (N, D, H*W*C) lane-dense layout (one-time boundary reshape).
        x = jnp.transpose(image, (0, 2, 3, 4, 1)).astype(jnp.float32)
        x = x.reshape(n, d, h * wdt * cch)
        return call(x, tabular.astype(jnp.float32), *packed_all)

    return jax.jit(fwd)


# ------------------------------ parameters ----------------------------------
def _kaiming_conv(key, kd, kh, kw, cin, cout, a):
    fan_in = cin * kd * kh * kw
    gain = (2.0 / (1.0 + a * a)) ** 0.5
    std = gain / (fan_in ** 0.5)
    return std * jax.random.normal(key, (kd, kh, kw, cin, cout), jnp.float32)


def _linear(key, fan_in, fan_out):
    kw_, kb_ = jax.random.split(key)
    bound = 1.0 / (fan_in ** 0.5)
    w = jax.random.uniform(kw_, (fan_in, fan_out), jnp.float32, -bound, bound)
    b = jax.random.uniform(kb_, (fan_out,), jnp.float32, -bound, bound)
    return w, b


def _conv_block_params(key, cin, cout, ksize, a):
    k1, k2 = jax.random.split(key)
    kd, kh, kw = ksize
    return {
        "w1": _kaiming_conv(k1, kd, kh, kw, cin, cout, a),
        "g1": jnp.ones((cout,), jnp.float32),
        "b1": jnp.zeros((cout,), jnp.float32),
        "w2": _kaiming_conv(k2, kd, kh, kw, cout, cout, a),
        "g2": jnp.ones((cout,), jnp.float32),
        "b2": jnp.zeros((cout,), jnp.float32),
    }


def init_params(key):
    n_blocks = len(KERNELS)
    keys = jax.random.split(key, n_blocks + 2)
    params = {}
    params["input_block"] = _conv_block_params(
        keys[0], IN_CHANNELS, FILTERS[0], KERNELS[0], NEG_SLOPE)
    downs = []
    for i in range(len(KERNELS) - 2):
        downs.append(_conv_block_params(
            keys[1 + i], FILTERS[i], FILTERS[i + 1], KERNELS[1 + i], NEG_SLOPE))
    params["downsamples"] = downs
    params["bottleneck"] = _conv_block_params(
        keys[n_blocks - 1], FILTERS[-2], FILTERS[-1], KERNELS[-1], NEG_SLOPE)
    w1, b1 = _linear(keys[n_blocks], FILTERS[-1] + NDIM_NON_IMG, BOTTLENECK_DIM)
    w2, b2 = _linear(keys[n_blocks + 1], BOTTLENECK_DIM, NUM_CLASSES)
    params["head"] = {"w1a": w1[:FILTERS[-1]], "w1b": w1[FILTERS[-1]:],
                      "b1": b1, "w2": w2, "b2": b2}
    return params


# -------------------------- pure-JAX reference -------------------------------
def _ref_conv_layer(x, w, gamma, beta, stride, neg_slope):
    kd, kh, kw, cin, cout = w.shape
    pad = get_padding((kd, kh, kw), stride)
    patches, (do, ho, wo) = im2col_3d(x, (kd, kh, kw), stride, pad)
    y = jnp.einsum("npk,kc->npc", patches,
                   w.reshape(kd * kh * kw * cin, cout))
    mean = y.mean(axis=1, keepdims=True)
    var = jnp.mean(jnp.square(y - mean), axis=1, keepdims=True)
    y = (y - mean) * jax.lax.rsqrt(var + NORM_EPS) * gamma + beta
    y = jnp.where(y >= 0.0, y, neg_slope * y)
    return y.reshape(x.shape[0], do, ho, wo, cout)


def reference_forward(params, image, tabular):
    x = jnp.transpose(image, (0, 2, 3, 4, 1)).astype(jnp.float32)

    def block(x, p, stride):
        x = _ref_conv_layer(x, p["w1"], p["g1"], p["b1"], stride, NEG_SLOPE)
        x = _ref_conv_layer(x, p["w2"], p["g2"], p["b2"], (1, 1, 1), NEG_SLOPE)
        return x

    x = block(x, params["input_block"], STRIDES[0])
    for i, blk in enumerate(params["downsamples"]):
        x = block(x, blk, STRIDES[1 + i])
    x = block(x, params["bottleneck"], STRIDES[-1])
    pooled = jnp.mean(x, axis=(1, 2, 3))
    hp = params["head"]
    h = jnp.concatenate([pooled, tabular.astype(jnp.float32)], axis=1)
    w1 = jnp.concatenate([hp["w1a"], hp["w1b"]], axis=0)
    h = jnp.maximum(h @ w1 + hp["b1"], 0.0)
    return h @ hp["w2"] + hp["b2"]


# ---------------------------------- main -------------------------------------
if __name__ == "__main__":
    key = jax.random.PRNGKey(0)
    pkey, ikey, tkey = jax.random.split(key, 3)
    params = init_params(pkey)
    image = jax.random.normal(ikey, (BATCH, IN_CHANNELS) + SPATIAL, jnp.float32)
    tabular = jax.random.normal(tkey, (BATCH, NDIM_NON_IMG), jnp.float32)

    forward_fn = build_forward(params)          # one-time weight packing
    out = forward_fn(image, tabular)
    out = jax.block_until_ready(out)

    ref = reference_forward(params, image, tabular)
    assert out.shape == (BATCH, NUM_CLASSES), out.shape
    assert bool(jnp.all(jnp.isfinite(out)))
    assert bool(jnp.allclose(out, ref, rtol=5e-2, atol=5e-2)), (out, ref)
    print("KERNEL_OK")
</pallas_src>

<mosaic_0001>
module attributes {stable_mosaic.version = 11 : i64} {
  func.func @_fused_kernel(%arg0: memref<2x8x128xf32, #tpu.memory_space<vmem>>, %arg1: memref<2x6xf32, #tpu.memory_space<vmem>>, %arg2: memref<642x256xf32, #tpu.memory_space<vmem>>, %arg3: memref<1026x256xf32, #tpu.memory_space<vmem>>, %arg4: memref<898x128xf32, #tpu.memory_space<vmem>>, %arg5: memref<514x128xf32, #tpu.memory_space<vmem>>, %arg6: memref<450x64xf32, #tpu.memory_space<vmem>>, %arg7: memref<258x64xf32, #tpu.memory_space<vmem>>, %arg8: memref<23x32xf32, #tpu.memory_space<vmem>>, %arg9: memref<33x3xf32, #tpu.memory_space<vmem>>, %arg10: memref<64x16xf32, #tpu.memory_space<vmem>>, %arg11: memref<2x3xf32, #tpu.memory_space<vmem>>) attributes {dimension_semantics = [], scalar_prefetch = 0 : i64, scratch_operands = 0 : i64, tpu.core_type = #tpu.core_type<tc>} {
    %c0 = arith.constant 0 : index
    %c0_0 = arith.constant 0 : index
    %0 = vector.load %arg1[%c0, %c0_0] : memref<2x6xf32, #tpu.memory_space<vmem>>, vector<2x6xf32>
    %c0_1 = arith.constant 0 : index
    %c0_2 = arith.constant 0 : index
    %1 = vector.load %arg10[%c0_1, %c0_2] : memref<64x16xf32, #tpu.memory_space<vmem>>, vector<64x16xf32>
    %c0_3 = arith.constant 0 : index
    %c0_4 = arith.constant 0 : index
    %2 = vector.load %arg8[%c0_3, %c0_4] : memref<23x32xf32, #tpu.memory_space<vmem>>, vector<16x32xf32>
    %c16 = arith.constant 16 : index
    %c0_5 = arith.constant 0 : index
    %3 = vector.load %arg8[%c16, %c0_5] : memref<23x32xf32, #tpu.memory_space<vmem>>, vector<6x32xf32>
    %c22 = arith.constant 22 : index
    %c0_6 = arith.constant 0 : index
    %4 = vector.load %arg8[%c22, %c0_6] : memref<23x32xf32, #tpu.memory_space<vmem>>, vector<1x32xf32>
    %c0_7 = arith.constant 0 : index
    %c0_8 = arith.constant 0 : index
    %5 = vector.load %arg9[%c0_7, %c0_8] : memref<33x3xf32, #tpu.memory_space<vmem>>, vector<32x3xf32>
    %c32 = arith.constant 32 : index
    %c0_9 = arith.constant 0 : index
    %6 = vector.load %arg9[%c32, %c0_9] : memref<33x3xf32, #tpu.memory_space<vmem>>, vector<1x3xf32>
    %c0_10 = arith.constant 0 : index
    %c0_11 = arith.constant 0 : index
    %c0_12 = arith.constant 0 : index
    %7 = vector.load %arg0[%c0_10, %c0_11, %c0_12] : memref<2x8x128xf32, #tpu.memory_space<vmem>>, vector<1x8x128xf32>
    %8 = vector.shape_cast %7 : vector<1x8x128xf32> to vector<8x128xf32>
    %cst = arith.constant 0.000000e+00 : f32
    %9 = vector.broadcast %cst : f32 to vector<1x128xf32>
    %10 = tpu.concatenate %9, %8, %9 in 0 : vector<1x128xf32>, vector<8x128xf32>, vector<1x128xf32> -> vector<10x128xf32>
    %cst_13 = arith.constant 0.000000e+00 : f32
    %11 = vector.broadcast %cst_13 : f32 to vector<8x256xf32>
    %c0_14 = arith.constant 0 : index
    %c0_15 = arith.constant 0 : index
    %12 = vector.load %arg2[%c0_14, %c0_15] : memref<642x256xf32, #tpu.memory_space<vmem>>, vector<128x256xf32>
    %13 = vector.extract_strided_slice %10 {offsets = [0, 0], sizes = [8, 128], strides = [1, 1]} : vector<10x128xf32> to vector<8x128xf32>
    %cst_16 = arith.constant dense<0.000000e+00> : vector<8x256xf32>
    %14 = tpu.matmul %13, %12, %cst_16 {dimension_numbers = #tpu.dot_dimension_numbers<[1], [0], [0], [1], [0, 0, 1, 1], [], []>} : vector<8x128xf32>, vector<128x256xf32>, vector<8x256xf32> -> vector<8x256xf32>
    %15 = arith.addf %11, %14 : vector<8x256xf32>
    %c128 = arith.constant 128 : index
    %c0_17 = arith.constant 0 : index
    %16 = vector.load %arg2[%c128, %c0_17] : memref<642x256xf32, #tpu.memory_space<vmem>>, vector<128x256xf32>
    %17 = vector.extract_strided_slice %10 {offsets = [1, 0], sizes = [8, 128], strides = [1, 1]} : vector<10x128xf32> to vector<8x128xf32>
    %cst_18 = arith.constant dense<0.000000e+00> : vector<8x256xf32>
    %18 = tpu.matmul %17, %16, %cst_18 {dimension_numbers = #tpu.dot_dimension_numbers<[1], [0], [0], [1], [0, 0, 1, 1], [], []>} : vector<8x128xf32>, vector<128x256xf32>, vector<8x256xf32> -> vector<8x256xf32>
    %19 = arith.addf %15, %18 : vector<8x256xf32>
    %c256 = arith.constant 256 : index
    %c0_19 = arith.constant 0 : index
    %20 = vector.load %arg2[%c256, %c0_19] : memref<642x256xf32, #tpu.memory_space<vmem>>, vector<128x256xf32>
    %21 = vector.extract_strided_slice %10 {offsets = [2, 0], sizes = [8, 128], strides = [1, 1]} : vector<10x128xf32> to vector<8x128xf32>
    %cst_20 = arith.constant dense<0.000000e+00> : vector<8x256xf32>
    %22 = tpu.matmul %21, %20, %cst_20 {dimension_numbers = #tpu.dot_dimension_numbers<[1], [0], [0], [1], [0, 0, 1, 1], [], []>} : vector<8x128xf32>, vector<128x256xf32>, vector<8x256xf32> -> vector<8x256xf32>
    %23 = arith.addf %19, %22 : vector<8x256xf32>
    %c384 = arith.constant 384 : index
    %c0_21 = arith.constant 0 : index
    %24 = vector.load %arg2[%c384, %c0_21] : memref<642x256xf32, #tpu.memory_space<vmem>>, vector<256x256xf32>
    %c640 = arith.constant 640 : index
    %c0_22 = arith.constant 0 : index
    %25 = vector.load %arg2[%c640, %c0_22] : memref<642x256xf32, #tpu.memory_space<vmem>>, vector<1x256xf32>
    %c641 = arith.constant 641 : index
    %c0_23 = arith.constant 0 : index
    %26 = vector.load %arg2[%c641, %c0_23] : memref<642x256xf32, #tpu.memory_space<vmem>>, vector<1x256xf32>
    %cst_24 = arith.constant dense<0.000000e+00> : vector<256xf32>
    %27 = vector.multi_reduction <add>, %23, %cst_24 [0] : vector<8x256xf32> to vector<256xf32>
    %28 = vector.shape_cast %27 : vector<256xf32> to vector<1x256xf32>
    %29 = arith.mulf %23, %23 : vector<8x256xf32>
    %cst_25 = arith.constant dense<0.000000e+00> : vector<256xf32>
    %30 = vector.multi_reduction <add>, %29, %cst_25 [0] : vector<8x256xf32> to vector<256xf32>
    %31 = vector.shape_cast %30 : vector<256xf32> to vector<1x256xf32>
    %cst_26 = arith.constant dense<0.000000e+00> : vector<1x256xf32>
    %32 = tpu.matmul %28, %24, %cst_26 {dimension_numbers = #tpu.dot_dimension_numbers<[1], [0], [0], [1], [0, 0, 1, 1], [], []>} : vector<1x256xf32>, vector<256x256xf32>, vector<1x256xf32> -> vector<1x256xf32>
    %cst_27 = arith.constant dense<0.000000e+00> : vector<1x256xf32>
    %33 = tpu.matmul %31, %24, %cst_27 {dimension_numbers = #tpu.dot_dimension_numbers<[1], [0], [0], [1], [0, 0, 1, 1], [], []>} : vector<1x256xf32>, vector<256x256xf32>, vector<1x256xf32> -> vector<1x256xf32>
    %34 = arith.mulf %32, %32 : vector<1x256xf32>
    %35 = arith.subf %33, %34 : vector<1x256xf32>
    %cst_28 = arith.constant 9.99999974E-6 : f32
    %36 = vector.broadcast %cst_28 : f32 to vector<1x256xf32>
    %37 = arith.addf %35, %36 : vector<1x256xf32>
    %38 = math.rsqrt %37 : vector<1x256xf32>
    %39 = arith.mulf %25, %38 : vector<1x256xf32>
    %40 = vector.broadcast %32 : vector<1x256xf32> to vector<8x256xf32>
    %41 = arith.subf %23, %40 : vector<8x256xf32>
    %42 = vector.broadcast %39 : vector<1x256xf32> to vector<8x256xf32>
    %43 = arith.mulf %41, %42 : vector<8x256xf32>
    %44 = vector.broadcast %26 : vector<1x256xf32> to vector<8x256xf32>
    %45 = arith.addf %43, %44 : vector<8x256xf32>
    %cst_29 = arith.constant 0.000000e+00 : f32
    %46 = vector.broadcast %cst_29 : f32 to vector<8x256xf32>
    %47 = arith.cmpf oge, %45, %46 : vector<8x256xf32>
    %cst_30 = arith.constant 0.00999999977 : f32
    %48 = vector.broadcast %cst_30 : f32 to vector<8x256xf32>
    %49 = arith.mulf %48, %45 : vector<8x256xf32>
    %50 = arith.select %47, %45, %49 : vector<8x256xi1>, vector<8x256xf32>
    %cst_31 = arith.constant 0.000000e+00 : f32
    %51 = vector.broadcast %cst_31 : f32 to vector<1x256xf32>
    %52 = tpu.concatenate %51, %50, %51 in 0 : vector<1x256xf32>, vector<8x256xf32>, vector<1x256xf32> -> vector<10x256xf32>
    %cst_32 = arith.constant 0.000000e+00 : f32
    %53 = vector.broadcast %cst_32 : f32 to vector<8x256xf32>
    %c0_33 = arith.constant 0 : index
    %c0_34 = arith.constant 0 : index
    %54 = vector.load %arg3[%c0_33, %c0_34] : memref<1026x256xf32, #tpu.memory_space<vmem>>, vector<256x256xf32>
    %55 = vector.extract_strided_slice %52 {offsets = [0, 0], sizes = [8, 256], strides = [1, 1]} : vector<10x256xf32> to vector<8x256xf32>
    %cst_35 = arith.constant dense<0.000000e+00> : vector<8x256xf32>
    %56 = tpu.matmul %55, %54, %cst_35 {dimension_numbers = #tpu.dot_dimension_numbers<[1], [0], [0], [1], [0, 0, 1, 1], [], []>} : vector<8x256xf32>, vector<256x256xf32>, vector<8x256xf32> -> vector<8x256xf32>
    %57 = arith.addf %53, %56 : vector<8x256xf32>
    %c256_36 = arith.constant 256 : index
    %c0_37 = arith.constant 0 : index
    %58 = vector.load %arg3[%c256_36, %c0_37] : memref<1026x256xf32, #tpu.memory_space<vmem>>, vector<256x256xf32>
    %59 = vector.extract_strided_slice %52 {offsets = [1, 0], sizes = [8, 256], strides = [1, 1]} : vector<10x256xf32> to vector<8x256xf32>
    %cst_38 = arith.constant dense<0.000000e+00> : vector<8x256xf32>
    %60 = tpu.matmul %59, %58, %cst_38 {dimension_numbers = #tpu.dot_dimension_numbers<[1], [0], [0], [1], [0, 0, 1, 1], [], []>} : vector<8x256xf32>, vector<256x256xf32>, vector<8x256xf32> -> vector<8x256xf32>
    %61 = arith.addf %57, %60 : vector<8x256xf32>
    %c512 = arith.constant 512 : index
    %c0_39 = arith.constant 0 : index
    %62 = vector.load %arg3[%c512, %c0_39] : memref<1026x256xf32, #tpu.memory_space<vmem>>, vector<256x256xf32>
    %63 = vector.extract_strided_slice %52 {offsets = [2, 0], sizes = [8, 256], strides = [1, 1]} : vector<10x256xf32> to vector<8x256xf32>
    %cst_40 = arith.constant dense<0.000000e+00> : vector<8x256xf32>
    %64 = tpu.matmul %63, %62, %cst_40 {dimension_numbers = #tpu.dot_dimension_numbers<[1], [0], [0], [1], [0, 0, 1, 1], [], []>} : vector<8x256xf32>, vector<256x256xf32>, vector<8x256xf32> -> vector<8x256xf32>
    %65 = arith.addf %61, %64 : vector<8x256xf32>
    %c768 = arith.constant 768 : index
    %c0_41 = arith.constant 0 : index
    %66 = vector.load %arg3[%c768, %c0_41] : memref<1026x256xf32, #tpu.memory_space<vmem>>, vector<256x256xf32>
    %c1024 = arith.constant 1024 : index
    %c0_42 = arith.constant 0 : index
    %67 = vector.load %arg3[%c1024, %c0_42] : memref<1026x256xf32, #tpu.memory_space<vmem>>, vector<1x256xf32>
    %c1025 = arith.constant 1025 : index
    %c0_43 = arith.constant 0 : index
    %68 = vector.load %arg3[%c1025, %c0_43] : memref<1026x256xf32, #tpu.memory_space<vmem>>, vector<1x256xf32>
    %cst_44 = arith.constant dense<0.000000e+00> : vector<256xf32>
    %69 = vector.multi_reduction <add>, %65, %cst_44 [0] : vector<8x256xf32> to vector<256xf32>
    %70 = vector.shape_cast %69 : vector<256xf32> to vector<1x256xf32>
    %71 = arith.mulf %65, %65 : vector<8x256xf32>
    %cst_45 = arith.constant dense<0.000000e+00> : vector<256xf32>
    %72 = vector.multi_reduction <add>, %71, %cst_45 [0] : vector<8x256xf32> to vector<256xf32>
    %73 = vector.shape_cast %72 : vector<256xf32> to vector<1x256xf32>
    %cst_46 = arith.constant dense<0.000000e+00> : vector<1x256xf32>
    %74 = tpu.matmul %70, %66, %cst_46 {dimension_numbers = #tpu.dot_dimension_numbers<[1], [0], [0], [1], [0, 0, 1, 1], [], []>} : vector<1x256xf32>, vector<256x256xf32>, vector<1x256xf32> -> vector<1x256xf32>
    %cst_47 = arith.constant dense<0.000000e+00> : vector<1x256xf32>
    %75 = tpu.matmul %73, %66, %cst_47 {dimension_numbers = #tpu.dot_dimension_numbers<[1], [0], [0], [1], [0, 0, 1, 1], [], []>} : vector<1x256xf32>, vector<256x256xf32>, vector<1x256xf32> -> vector<1x256xf32>
    %76 = arith.mulf %74, %74 : vector<1x256xf32>
    %77 = arith.subf %75, %76 : vector<1x256xf32>
    %cst_48 = arith.constant 9.99999974E-6 : f32
    %78 = vector.broadcast %cst_48 : f32 to vector<1x256xf32>
    %79 = arith.addf %77, %78 : vector<1x256xf32>
    %80 = math.rsqrt %79 : vector<1x256xf32>
    %81 = arith.mulf %67, %80 : vector<1x256xf32>
    %82 = vector.broadcast %74 : vector<1x256xf32> to vector<8x256xf32>
    %83 = arith.subf %65, %82 : vector<8x256xf32>
    %84 = vector.broadcast %81 : vector<1x256xf32> to vector<8x256xf32>
    %85 = arith.mulf %83, %84 : vector<8x256xf32>
    %86 = vector.broadcast %68 : vector<1x256xf32> to vector<8x256xf32>
    %87 = arith.addf %85, %86 : vector<8x256xf32>
    %cst_49 = arith.constant 0.000000e+00 : f32
    %88 = vector.broadcast %cst_49 : f32 to vector<8x256xf32>
    %89 = arith.cmpf oge, %87, %88 : vector<8x256xf32>
    %cst_50 = arith.constant 0.00999999977 : f32
    %90 = vector.broadcast %cst_50 : f32 to vector<8x256xf32>
    %91 = arith.mulf %90, %87 : vector<8x256xf32>
    %92 = arith.select %89, %87, %91 : vector<8x256xi1>, vector<8x256xf32>
    %cst_51 = arith.constant 0.000000e+00 : f32
    %93 = vector.broadcast %cst_51 : f32 to vector<1x256xf32>
    %94 = tpu.concatenate %93, %92, %93 in 0 : vector<1x256xf32>, vector<8x256xf32>, vector<1x256xf32> -> vector<10x256xf32>
    %cst_52 = arith.constant 0.000000e+00 : f32
    %95 = vector.broadcast %cst_52 : f32 to vector<4x128xf32>
    %c0_53 = arith.constant 0 : index
    %c0_54 = arith.constant 0 : index
    %96 = vector.load %arg4[%c0_53, %c0_54] : memref<898x128xf32, #tpu.memory_space<vmem>>, vector<256x128xf32>
    %97 = vector.extract_strided_slice %94 {offsets = [0, 0], sizes = [1, 256], strides = [1, 1]} : vector<10x256xf32> to vector<1x256xf32>
    %98 = vector.extract_strided_slice %94 {offsets = [2, 0], sizes = [1, 256], strides = [1, 1]} : vector<10x256xf32> to vector<1x256xf32>
    %99 = vector.extract_strided_slice %94 {offsets = [4, 0], sizes = [1, 256], strides = [1, 1]} : vector<10x256xf32> to vector<1x256xf32>
    %100 = vector.extract_strided_slice %94 {offsets = [6, 0], sizes = [1, 256], strides = [1, 1]} : vector<10x256xf32> to vector<1x256xf32>
    %101 = tpu.concatenate %97, %98, %99, %100 in 0 : vector<1x256xf32>, vector<1x256xf32>, vector<1x256xf32>, vector<1x256xf32> -> vector<4x256xf32>
    %cst_55 = arith.constant dense<0.000000e+00> : vector<4x128xf32>
    %102 = tpu.matmul %101, %96, %cst_55 {dimension_numbers = #tpu.dot_dimension_numbers<[1], [0], [0], [1], [0, 0, 1, 1], [], []>} : vector<4x256xf32>, vector<256x128xf32>, vector<4x128xf32> -> vector<4x128xf32>
    %103 = arith.addf %95, %102 : vector<4x128xf32>
    %c256_56 = arith.constant 256 : index
    %c0_57 = arith.constant 0 : index
    %104 = vector.load %arg4[%c256_56, %c0_57] : memref<898x128xf32, #tpu.memory_space<vmem>>, vector<256x128xf32>
    %105 = vector.extract_strided_slice %94 {offsets = [1, 0], sizes = [1, 256], strides = [1, 1]} : vector<10x256xf32> to vector<1x256xf32>
    %106 = vector.extract_strided_slice %94 {offsets = [3, 0], sizes = [1, 256], strides = [1, 1]} : vector<10x256xf32> to vector<1x256xf32>
    %107 = vector.extract_strided_slice %94 {offsets = [5, 0], sizes = [1, 256], strides = [1, 1]} : vector<10x256xf32> to vector<1x256xf32>
    %108 = vector.extract_strided_slice %94 {offsets = [7, 0], sizes = [1, 256], strides = [1, 1]} : vector<10x256xf32> to vector<1x256xf32>
    %109 = tpu.concatenate %105, %106, %107, %108 in 0 : vector<1x256xf32>, vector<1x256xf32>, vector<1x256xf32>, vector<1x256xf32> -> vector<4x256xf32>
    %cst_58 = arith.constant dense<0.000000e+00> : vector<4x128xf32>
    %110 = tpu.matmul %109, %104, %cst_58 {dimension_numbers = #tpu.dot_dimension_numbers<[1], [0], [0], [1], [0, 0, 1, 1], [], []>} : vector<4x256xf32>, vector<256x128xf32>, vector<4x128xf32> -> vector<4x128xf32>
    %111 = arith.addf %103, %110 : vector<4x128xf32>
    %c512_59 = arith.constant 512 : index
    %c0_60 = arith.constant 0 : index
    %112 = vector.load %arg4[%c512_59, %c0_60] : memref<898x128xf32, #tpu.memory_space<vmem>>, vector<256x128xf32>
    %113 = vector.extract_strided_slice %94 {offsets = [2, 0], sizes = [1, 256], strides = [1, 1]} : vector<10x256xf32> to vector<1x256xf32>
    %114 = vector.extract_strided_slice %94 {offsets = [4, 0], sizes = [1, 256], strides = [1, 1]} : vector<10x256xf32> to vector<1x256xf32>
    %115 = vector.extract_strided_slice %94 {offsets = [6, 0], sizes = [1, 256], strides = [1, 1]} : vector<10x256xf32> to vector<1x256xf32>
    %116 = vector.extract_strided_slice %94 {offsets = [8, 0], sizes = [1, 256], strides = [1, 1]} : vector<10x256xf32> to vector<1x256xf32>
    %117 = tpu.concatenate %113, %114, %115, %116 in 0 : vector<1x256xf32>, vector<1x256xf32>, vector<1x256xf32>, vector<1x256xf32> -> vector<4x256xf32>
    %cst_61 = arith.constant dense<0.000000e+00> : vector<4x128xf32>
    %118 = tpu.matmul %117, %112, %cst_61 {dimension_numbers = #tpu.dot_dimension_numbers<[1], [0], [0], [1], [0, 0, 1, 1], [], []>} : vector<4x256xf32>, vector<256x128xf32>, vector<4x128xf32> -> vector<4x128xf32>
    %119 = arith.addf %111, %118 : vector<4x128xf32>
    %c768_62 = arith.constant 768 : index
    %c0_63 = arith.constant 0 : index
    %120 = vector.load %arg4[%c768_62, %c0_63] : memref<898x128xf32, #tpu.memory_space<vmem>>, vector<128x128xf32>
    %c896 = arith.constant 896 : index
    %c0_64 = arith.constant 0 : index
    %121 = vector.load %arg4[%c896, %c0_64] : memref<898x128xf32, #tpu.memory_space<vmem>>, vector<1x128xf32>
    %c897 = arith.constant 897 : index
    %c0_65 = arith.constant 0 : index
    %122 = vector.load %arg4[%c897, %c0_65] : memref<898x128xf32, #tpu.memory_space<vmem>>, vector<1x128xf32>
    %cst_66 = arith.constant dense<0.000000e+00> : vector<128xf32>
    %123 = vector.multi_reduction <add>, %119, %cst_66 [0] : vector<4x128xf32> to vector<128xf32>
    %124 = vector.shape_cast %123 : vector<128xf32> to vector<1x128xf32>
    %125 = arith.mulf %119, %119 : vector<4x128xf32>
    %cst_67 = arith.constant dense<0.000000e+00> : vector<128xf32>
    %126 = vector.multi_reduction <add>, %125, %cst_67 [0] : vector<4x128xf32> to vector<128xf32>
    %127 = vector.shape_cast %126 : vector<128xf32> to vector<1x128xf32>
    %cst_68 = arith.constant dense<0.000000e+00> : vector<1x128xf32>
    %128 = tpu.matmul %124, %120, %cst_68 {dimension_numbers = #tpu.dot_dimension_numbers<[1], [0], [0], [1], [0, 0, 1, 1], [], []>} : vector<1x128xf32>, vector<128x128xf32>, vector<1x128xf32> -> vector<1x128xf32>
    %cst_69 = arith.constant dense<0.000000e+00> : vector<1x128xf32>
    %129 = tpu.matmul %127, %120, %cst_69 {dimension_numbers = #tpu.dot_dimension_numbers<[1], [0], [0], [1], [0, 0, 1, 1], [], []>} : vector<1x128xf32>, vector<128x128xf32>, vector<1x128xf32> -> vector<1x128xf32>
    %130 = arith.mulf %128, %128 : vector<1x128xf32>
    %131 = arith.subf %129, %130 : vector<1x128xf32>
    %cst_70 = arith.constant 9.99999974E-6 : f32
    %132 = vector.broadcast %cst_70 : f32 to vector<1x128xf32>
    %133 = arith.addf %131, %132 : vector<1x128xf32>
    %134 = math.rsqrt %133 : vector<1x128xf32>
    %135 = arith.mulf %121, %134 : vector<1x128xf32>
    %136 = vector.broadcast %128 : vector<1x128xf32> to vector<4x128xf32>
    %137 = arith.subf %119, %136 : vector<4x128xf32>
    %138 = vector.broadcast %135 : vector<1x128xf32> to vector<4x128xf32>
    %139 = arith.mulf %137, %138 : vector<4x128xf32>
    %140 = vector.broadcast %122 : vector<1x128xf32> to vector<4x128xf32>
    %141 = arith.addf %139, %140 : vector<4x128xf32>
    %cst_71 = arith.constant 0.000000e+00 : f32
    %142 = vector.broadcast %cst_71 : f32 to vector<4x128xf32>
    %143 = arith.cmpf oge, %141, %142 : vector<4x128xf32>
    %cst_72 = arith.constant 0.00999999977 : f32
    %144 = vector.broadcast %cst_72 : f32 to vector<4x128xf32>
    %145 = arith.mulf %144, %141 : vector<4x128xf32>
    %146 = arith.select %143, %141, %145 : vector<4x128xi1>, vector<4x128xf32>
    %cst_73 = arith.constant 0.000000e+00 : f32
    %147 = vector.broadcast %cst_73 : f32 to vector<1x128xf32>
    %148 = tpu.concatenate %147, %146, %147 in 0 : vector<1x128xf32>, vector<4x128xf32>, vector<1x128xf32> -> vector<6x128xf32>
    %cst_74 = arith.constant 0.000000e+00 : f32
    %149 = vector.broadcast %cst_74 : f32 to vector<4x128xf32>
    %c0_75 = arith.constant 0 : index
    %c0_76 = arith.constant 0 : index
    %150 = vector.load %arg5[%c0_75, %c0_76] : memref<514x128xf32, #tpu.memory_space<vmem>>, vector<128x128xf32>
    %151 = vector.extract_strided_slice %148 {offsets = [0, 0], sizes = [4, 128], strides = [1, 1]} : vector<6x128xf32> to vector<4x128xf32>
    %cst_77 = arith.constant dense<0.000000e+00> : vector<4x128xf32>
    %152 = tpu.matmul %151, %150, %cst_77 {dimension_numbers = #tpu.dot_dimension_numbers<[1], [0], [0], [1], [0, 0, 1, 1], [], []>} : vector<4x128xf32>, vector<128x128xf32>, vector<4x128xf32> -> vector<4x128xf32>
    %153 = arith.addf %149, %152 : vector<4x128xf32>
    %c128_78 = arith.constant 128 : index
    %c0_79 = arith.constant 0 : index
    %154 = vector.load %arg5[%c128_78, %c0_79] : memref<514x128xf32, #tpu.memory_space<vmem>>, vector<128x128xf32>
    %155 = vector.extract_strided_slice %148 {offsets = [1, 0], sizes = [4, 128], strides = [1, 1]} : vector<6x128xf32> to vector<4x128xf32>
    %cst_80 = arith.constant dense<0.000000e+00> : vector<4x128xf32>
    %156 = tpu.matmul %155, %154, %cst_80 {dimension_numbers = #tpu.dot_dimension_numbers<[1], [0], [0], [1], [0, 0, 1, 1], [], []>} : vector<4x128xf32>, vector<128x128xf32>, vector<4x128xf32> -> vector<4x128xf32>
    %157 = arith.addf %153, %156 : vector<4x128xf32>
    %c256_81 = arith.constant 256 : index
    %c0_82 = arith.constant 0 : index
    %158 = vector.load %arg5[%c256_81, %c0_82] : memref<514x128xf32, #tpu.memory_space<vmem>>, vector<128x128xf32>
    %159 = vector.extract_strided_slice %148 {offsets = [2, 0], sizes = [4, 128], strides = [1, 1]} : vector<6x128xf32> to vector<4x128xf32>
    %cst_83 = arith.constant dense<0.000000e+00> : vector<4x128xf32>
    %160 = tpu.matmul %159, %158, %cst_83 {dimension_numbers = #tpu.dot_dimension_numbers<[1], [0], [0], [1], [0, 0, 1, 1], [], []>} : vector<4x128xf32>, vector<128x128xf32>, vector<4x128xf32> -> vector<4x128xf32>
    %161 = arith.addf %157, %160 : vector<4x128xf32>
    %c384_84 = arith.constant 384 : index
    %c0_85 = arith.constant 0 : index
    %162 = vector.load %arg5[%c384_84, %c0_85] : memref<514x128xf32, #tpu.memory_space<vmem>>, vector<128x128xf32>
    %c512_86 = arith.constant 512 : index
    %c0_87 = arith.constant 0 : index
    %163 = vector.load %arg5[%c512_86, %c0_87] : memref<514x128xf32, #tpu.memory_space<vmem>>, vector<1x128xf32>
    %c513 = arith.constant 513 : index
    %c0_88 = arith.constant 0 : index
    %164 = vector.load %arg5[%c513, %c0_88] : memref<514x128xf32, #tpu.memory_space<vmem>>, vector<1x128xf32>
    %cst_89 = arith.constant dense<0.000000e+00> : vector<128xf32>
    %165 = vector.multi_reduction <add>, %161, %cst_89 [0] : vector<4x128xf32> to vector<128xf32>
    %166 = vector.shape_cast %165 : vector<128xf32> to vector<1x128xf32>
    %167 = arith.mulf %161, %161 : vector<4x128xf32>
    %cst_90 = arith.constant dense<0.000000e+00> : vector<128xf32>
    %168 = vector.multi_reduction <add>, %167, %cst_90 [0] : vector<4x128xf32> to vector<128xf32>
    %169 = vector.shape_cast %168 : vector<128xf32> to vector<1x128xf32>
    %cst_91 = arith.constant dense<0.000000e+00> : vector<1x128xf32>
    %170 = tpu.matmul %166, %162, %cst_91 {dimension_numbers = #tpu.dot_dimension_numbers<[1], [0], [0], [1], [0, 0, 1, 1], [], []>} : vector<1x128xf32>, vector<128x128xf32>, vector<1x128xf32> -> vector<1x128xf32>
    %cst_92 = arith.constant dense<0.000000e+00> : vector<1x128xf32>
    %171 = tpu.matmul %169, %162, %cst_92 {dimension_numbers = #tpu.dot_dimension_numbers<[1], [0], [0], [1], [0, 0, 1, 1], [], []>} : vector<1x128xf32>, vector<128x128xf32>, vector<1x128xf32> -> vector<1x128xf32>
    %172 = arith.mulf %170, %170 : vector<1x128xf32>
    %173 = arith.subf %171, %172 : vector<1x128xf32>
    %cst_93 = arith.constant 9.99999974E-6 : f32
    %174 = vector.broadcast %cst_93 : f32 to vector<1x128xf32>
    %175 = arith.addf %173, %174 : vector<1x128xf32>
    %176 = math.rsqrt %175 : vector<1x128xf32>
    %177 = arith.mulf %163, %176 : vector<1x128xf32>
    %178 = vector.broadcast %170 : vector<1x128xf32> to vector<4x128xf32>
    %179 = arith.subf %161, %178 : vector<4x128xf32>
    %180 = vector.broadcast %177 : vector<1x128xf32> to vector<4x128xf32>
    %181 = arith.mulf %179, %180 : vector<4x128xf32>
    %182 = vector.broadcast %164 : vector<1x128xf32> to vector<4x128xf32>
    %183 = arith.addf %181, %182 : vector<4x128xf32>
    %cst_94 = arith.constant 0.000000e+00 : f32
    %184 = vector.broadcast %cst_94 : f32 to vector<4x128xf32>
    %185 = arith.cmpf oge, %183, %184 : vector<4x128xf32>
    %cst_95 = arith.constant 0.00999999977 : f32
    %186 = vector.broadcast %cst_95 : f32 to vector<4x128xf32>
    %187 = arith.mulf %186, %183 : vector<4x128xf32>
    %188 = arith.select %185, %183, %187 : vector<4x128xi1>, vector<4x128xf32>
    %cst_96 = arith.constant 0.000000e+00 : f32
    %189 = vector.broadcast %cst_96 : f32 to vector<1x128xf32>
    %190 = tpu.concatenate %189, %188, %189 in 0 : vector<1x128xf32>, vector<4x128xf32>, vector<1x128xf32> -> vector<6x128xf32>
    %cst_97 = arith.constant 0.000000e+00 : f32
    %191 = vector.broadcast %cst_97 : f32 to vector<2x64xf32>
    %c0_98 = arith.constant 0 : index
    %c0_99 = arith.constant 0 : index
    %192 = vector.load %arg6[%c0_98, %c0_99] : memref<450x64xf32, #tpu.memory_space<vmem>>, vector<128x64xf32>
    %193 = vector.extract_strided_slice %190 {offsets = [0, 0], sizes = [1, 128], strides = [1, 1]} : vector<6x128xf32> to vector<1x128xf32>
    %194 = vector.extract_strided_slice %190 {offsets = [2, 0], sizes = [1, 128], strides = [1, 1]} : vector<6x128xf32> to vector<1x128xf32>
    %195 = tpu.concatenate %193, %194 in 0 : vector<1x128xf32>, vector<1x128xf32> -> vector<2x128xf32>
    %cst_100 = arith.constant dense<0.000000e+00> : vector<2x64xf32>
    %196 = tpu.matmul %195, %192, %cst_100 {dimension_numbers = #tpu.dot_dimension_numbers<[1], [0], [0], [1], [0, 0, 1, 1], [], []>} : vector<2x128xf32>, vector<128x64xf32>, vector<2x64xf32> -> vector<2x64xf32>
    %197 = arith.addf %191, %196 : vector<2x64xf32>
    %c128_101 = arith.constant 128 : index
    %c0_102 = arith.constant 0 : index
    %198 = vector.load %arg6[%c128_101, %c0_102] : memref<450x64xf32, #tpu.memory_space<vmem>>, vector<128x64xf32>
    %199 = vector.extract_strided_slice %190 {offsets = [1, 0], sizes = [1, 128], strides = [1, 1]} : vector<6x128xf32> to vector<1x128xf32>
    %200 = vector.extract_strided_slice %190 {offsets = [3, 0], sizes = [1, 128], strides = [1, 1]} : vector<6x128xf32> to vector<1x128xf32>
    %201 = tpu.concatenate %199, %200 in 0 : vector<1x128xf32>, vector<1x128xf32> -> vector<2x128xf32>
    %cst_103 = arith.constant dense<0.000000e+00> : vector<2x64xf32>
    %202 = tpu.matmul %201, %198, %cst_103 {dimension_numbers = #tpu.dot_dimension_numbers<[1], [0], [0], [1], [0, 0, 1, 1], [], []>} : vector<2x128xf32>, vector<128x64xf32>, vector<2x64xf32> -> vector<2x64xf32>
    %203 = arith.addf %197, %202 : vector<2x64xf32>
    %c256_104 = arith.constant 256 : index
    %c0_105 = arith.constant 0 : index
    %204 = vector.load %arg6[%c256_104, %c0_105] : memref<450x64xf32, #tpu.memory_space<vmem>>, vector<128x64xf32>
    %205 = vector.extract_strided_slice %190 {offsets = [2, 0], sizes = [1, 128], strides = [1, 1]} : vector<6x128xf32> to vector<1x128xf32>
    %206 = vector.extract_strided_slice %190 {offsets = [4, 0], sizes = [1, 128], strides = [1, 1]} : vector<6x128xf32> to vector<1x128xf32>
    %207 = tpu.concatenate %205, %206 in 0 : vector<1x128xf32>, vector<1x128xf32> -> vector<2x128xf32>
    %cst_106 = arith.constant dense<0.000000e+00> : vector<2x64xf32>
    %208 = tpu.matmul %207, %204, %cst_106 {dimension_numbers = #tpu.dot_dimension_numbers<[1], [0], [0], [1], [0, 0, 1, 1], [], []>} : vector<2x128xf32>, vector<128x64xf32>, vector<2x64xf32> -> vector<2x64xf32>
    %209 = arith.addf %203, %208 : vector<2x64xf32>
    %c384_107 = arith.constant 384 : index
    %c0_108 = arith.constant 0 : index
    %210 = vector.load %arg6[%c384_107, %c0_108] : memref<450x64xf32, #tpu.memory_space<vmem>>, vector<64x64xf32>
    %c448 = arith.constant 448 : index
    %c0_109 = arith.constant 0 : index
    %211 = vector.load %arg6[%c448, %c0_109] : memref<450x64xf32, #tpu.memory_space<vmem>>, vector<1x64xf32>
    %c449 = arith.constant 449 : index
    %c0_110 = arith.constant 0 : index
    %212 = vector.load %arg6[%c449, %c0_110] : memref<450x64xf32, #tpu.memory_space<vmem>>, vector<1x64xf32>
    %cst_111 = arith.constant dense<0.000000e+00> : vector<64xf32>
    %213 = vector.multi_reduction <add>, %209, %cst_111 [0] : vector<2x64xf32> to vector<64xf32>
    %214 = vector.shape_cast %213 : vector<64xf32> to vector<1x64xf32>
    %215 = arith.mulf %209, %209 : vector<2x64xf32>
    %cst_112 = arith.constant dense<0.000000e+00> : vector<64xf32>
    %216 = vector.multi_reduction <add>, %215, %cst_112 [0] : vector<2x64xf32> to vector<64xf32>
    %217 = vector.shape_cast %216 : vector<64xf32> to vector<1x64xf32>
    %cst_113 = arith.constant dense<0.000000e+00> : vector<1x64xf32>
    %218 = tpu.matmul %214, %210, %cst_113 {dimension_numbers = #tpu.dot_dimension_numbers<[1], [0], [0], [1], [0, 0, 1, 1], [], []>} : vector<1x64xf32>, vector<64x64xf32>, vector<1x64xf32> -> vector<1x64xf32>
    %cst_114 = arith.constant dense<0.000000e+00> : vector<1x64xf32>
    %219 = tpu.matmul %217, %210, %cst_114 {dimension_numbers = #tpu.dot_dimension_numbers<[1], [0], [0], [1], [0, 0, 1, 1], [], []>} : vector<1x64xf32>, vector<64x64xf32>, vector<1x64xf32> -> vector<1x64xf32>
    %220 = arith.mulf %218, %218 : vector<1x64xf32>
    %221 = arith.subf %219, %220 : vector<1x64xf32>
    %cst_115 = arith.constant 9.99999974E-6 : f32
    %222 = vector.broadcast %cst_115 : f32 to vector<1x64xf32>
    %223 = arith.addf %221, %222 : vector<1x64xf32>
    %224 = math.rsqrt %223 : vector<1x64xf32>
    %225 = arith.mulf %211, %224 : vector<1x64xf32>
    %226 = vector.broadcast %218 : vector<1x64xf32> to vector<2x64xf32>
    %227 = arith.subf %209, %226 : vector<2x64xf32>
    %228 = vector.broadcast %225 : vector<1x64xf32> to vector<2x64xf32>
    %229 = arith.mulf %227, %228 : vector<2x64xf32>
    %230 = vector.broadcast %212 : vector<1x64xf32> to vector<2x64xf32>
    %231 = arith.addf %229, %230 : vector<2x64xf32>
    %cst_116 = arith.constant 0.000000e+00 : f32
    %232 = vector.broadcast %cst_116 : f32 to vector<2x64xf32>
    %233 = arith.cmpf oge, %231, %232 : vector<2x64xf32>
    %cst_117 = arith.constant 0.00999999977 : f32
    %234 = vector.broadcast %cst_117 : f32 to vector<2x64xf32>
    %235 = arith.mulf %234, %231 : vector<2x64xf32>
    %236 = arith.select %233, %231, %235 : vector<2x64xi1>, vector<2x64xf32>
    %cst_118 = arith.constant 0.000000e+00 : f32
    %237 = vector.broadcast %cst_118 : f32 to vector<1x64xf32>
    %238 = tpu.concatenate %237, %236, %237 in 0 : vector<1x64xf32>, vector<2x64xf32>, vector<1x64xf32> -> vector<4x64xf32>
    %cst_119 = arith.constant 0.000000e+00 : f32
    %239 = vector.broadcast %cst_119 : f32 to vector<2x64xf32>
    %c0_120 = arith.constant 0 : index
    %c0_121 = arith.constant 0 : index
    %240 = vector.load %arg7[%c0_120, %c0_121] : memref<258x64xf32, #tpu.memory_space<vmem>>, vector<64x64xf32>
    %241 = vector.extract_strided_slice %238 {offsets = [0, 0], sizes = [2, 64], strides = [1, 1]} : vector<4x64xf32> to vector<2x64xf32>
    %cst_122 = arith.constant dense<0.000000e+00> : vector<2x64xf32>
    %242 = tpu.matmul %241, %240, %cst_122 {dimension_numbers = #tpu.dot_dimension_numbers<[1], [0], [0], [1], [0, 0, 1, 1], [], []>} : vector<2x64xf32>, vector<64x64xf32>, vector<2x64xf32> -> vector<2x64xf32>
    %243 = arith.addf %239, %242 : vector<2x64xf32>
    %c64 = arith.constant 64 : index
    %c0_123 = arith.constant 0 : index
    %244 = vector.load %arg7[%c64, %c0_123] : memref<258x64xf32, #tpu.memory_space<vmem>>, vector<64x64xf32>
    %245 = vector.extract_strided_slice %238 {offsets = [1, 0], sizes = [2, 64], strides = [1, 1]} : vector<4x64xf32> to vector<2x64xf32>
    %cst_124 = arith.constant dense<0.000000e+00> : vector<2x64xf32>
    %246 = tpu.matmul %245, %244, %cst_124 {dimension_numbers = #tpu.dot_dimension_numbers<[1], [0], [0], [1], [0, 0, 1, 1], [], []>} : vector<2x64xf32>, vector<64x64xf32>, vector<2x64xf32> -> vector<2x64xf32>
    %247 = arith.addf %243, %246 : vector<2x64xf32>
    %c128_125 = arith.constant 128 : index
    %c0_126 = arith.constant 0 : index
    %248 = vector.load %arg7[%c128_125, %c0_126] : memref<258x64xf32, #tpu.memory_space<vmem>>, vector<64x64xf32>
    %249 = vector.extract_strided_slice %238 {offsets = [2, 0], sizes = [2, 64], strides = [1, 1]} : vector<4x64xf32> to vector<2x64xf32>
    %cst_127 = arith.constant dense<0.000000e+00> : vector<2x64xf32>
    %250 = tpu.matmul %249, %248, %cst_127 {dimension_numbers = #tpu.dot_dimension_numbers<[1], [0], [0], [1], [0, 0, 1, 1], [], []>} : vector<2x64xf32>, vector<64x64xf32>, vector<2x64xf32> -> vector<2x64xf32>
    %251 = arith.addf %247, %250 : vector<2x64xf32>
    %c192 = arith.constant 192 : index
    %c0_128 = arith.constant 0 : index
    %252 = vector.load %arg7[%c192, %c0_128] : memref<258x64xf32, #tpu.memory_space<vmem>>, vector<64x64xf32>
    %c256_129 = arith.constant 256 : index
    %c0_130 = arith.constant 0 : index
    %253 = vector.load %arg7[%c256_129, %c0_130] : memref<258x64xf32, #tpu.memory_space<vmem>>, vector<1x64xf32>
    %c257 = arith.constant 257 : index
    %c0_131 = arith.constant 0 : index
    %254 = vector.load %arg7[%c257, %c0_131] : memref<258x64xf32, #tpu.memory_space<vmem>>, vector<1x64xf32>
    %cst_132 = arith.constant dense<0.000000e+00> : vector<64xf32>
    %255 = vector.multi_reduction <add>, %251, %cst_132 [0] : vector<2x64xf32> to vector<64xf32>
    %256 = vector.shape_cast %255 : vector<64xf32> to vector<1x64xf32>
    %257 = arith.mulf %251, %251 : vector<2x64xf32>
    %cst_133 = arith.constant dense<0.000000e+00> : vector<64xf32>
    %258 = vector.multi_reduction <add>, %257, %cst_133 [0] : vector<2x64xf32> to vector<64xf32>
    %259 = vector.shape_cast %258 : vector<64xf32> to vector<1x64xf32>
    %cst_134 = arith.constant dense<0.000000e+00> : vector<1x64xf32>
    %260 = tpu.matmul %256, %252, %cst_134 {dimension_numbers = #tpu.dot_dimension_numbers<[1], [0], [0], [1], [0, 0, 1, 1], [], []>} : vector<1x64xf32>, vector<64x64xf32>, vector<1x64xf32> -> vector<1x64xf32>
    %cst_135 = arith.constant dense<0.000000e+00> : vector<1x64xf32>
    %261 = tpu.matmul %259, %252, %cst_135 {dimension_numbers = #tpu.dot_dimension_numbers<[1], [0], [0], [1], [0, 0, 1, 1], [], []>} : vector<1x64xf32>, vector<64x64xf32>, vector<1x64xf32> -> vector<1x64xf32>
    %262 = arith.mulf %260, %260 : vector<1x64xf32>
    %263 = arith.subf %261, %262 : vector<1x64xf32>
    %cst_136 = arith.constant 9.99999974E-6 : f32
    %264 = vector.broadcast %cst_136 : f32 to vector<1x64xf32>
    %265 = arith.addf %263, %264 : vector<1x64xf32>
    %266 = math.rsqrt %265 : vector<1x64xf32>
    %267 = arith.mulf %253, %266 : vector<1x64xf32>
    %268 = vector.broadcast %260 : vector<1x64xf32> to vector<2x64xf32>
    %269 = arith.subf %251, %268 : vector<2x64xf32>
    %270 = vector.broadcast %267 : vector<1x64xf32> to vector<2x64xf32>
    %271 = arith.mulf %269, %270 : vector<2x64xf32>
    %272 = vector.broadcast %254 : vector<1x64xf32> to vector<2x64xf32>
    %273 = arith.addf %271, %272 : vector<2x64xf32>
    %cst_137 = arith.constant 0.000000e+00 : f32
    %274 = vector.broadcast %cst_137 : f32 to vector<2x64xf32>
    %275 = arith.cmpf oge, %273, %274 : vector<2x64xf32>
    %cst_138 = arith.constant 0.00999999977 : f32
    %276 = vector.broadcast %cst_138 : f32 to vector<2x64xf32>
    %277 = arith.mulf %276, %273 : vector<2x64xf32>
    %278 = arith.select %275, %273, %277 : vector<2x64xi1>, vector<2x64xf32>
    %cst_139 = arith.constant dense<0.000000e+00> : vector<64xf32>
    %279 = vector.multi_reduction <add>, %278, %cst_139 [0] : vector<2x64xf32> to vector<64xf32>
    %280 = vector.shape_cast %279 : vector<64xf32> to vector<1x64xf32>
    %cst_140 = arith.constant dense<0.000000e+00> : vector<1x16xf32>
    %281 = tpu.matmul %280, %1, %cst_140 {dimension_numbers = #tpu.dot_dimension_numbers<[1], [0], [0], [1], [0, 0, 1, 1], [], []>} : vector<1x64xf32>, vector<64x16xf32>, vector<1x16xf32> -> vector<1x16xf32>
    %282 = vector.extract_strided_slice %0 {offsets = [0, 0], sizes = [1, 6], strides = [1, 1]} : vector<2x6xf32> to vector<1x6xf32>
    %cst_141 = arith.constant dense<0.000000e+00> : vector<1x32xf32>
    %283 = tpu.matmul %281, %2, %cst_141 {dimension_numbers = #tpu.dot_dimension_numbers<[1], [0], [0], [1], [0, 0, 1, 1], [], []>} : vector<1x16xf32>, vector<16x32xf32>, vector<1x32xf32> -> vector<1x32xf32>
    %cst_142 = arith.constant dense<0.000000e+00> : vector<1x32xf32>
    %284 = tpu.matmul %282, %3, %cst_142 {dimension_numbers = #tpu.dot_dimension_numbers<[1], [0], [0], [1], [0, 0, 1, 1], [], []>} : vector<1x6xf32>, vector<6x32xf32>, vector<1x32xf32> -> vector<1x32xf32>
    %285 = arith.addf %283, %284 : vector<1x32xf32>
    %286 = arith.addf %285, %4 : vector<1x32xf32>
    %cst_143 = arith.constant 0.000000e+00 : f32
    %287 = vector.broadcast %cst_143 : f32 to vector<1x32xf32>
    %288 = arith.maximumf %286, %287 : vector<1x32xf32>
    %cst_144 = arith.constant dense<0.000000e+00> : vector<1x3xf32>
    %289 = tpu.matmul %288, %5, %cst_144 {dimension_numbers = #tpu.dot_dimension_numbers<[1], [0], [0], [1], [0, 0, 1, 1], [], []>} : vector<1x32xf32>, vector<32x3xf32>, vector<1x3xf32> -> vector<1x3xf32>
    %290 = arith.addf %289, %6 : vector<1x3xf32>
    %c1 = arith.constant 1 : index
    %c0_145 = arith.constant 0 : index
    %c0_146 = arith.constant 0 : index
    %291 = vector.load %arg0[%c1, %c0_145, %c0_146] : memref<2x8x128xf32, #tpu.memory_space<vmem>>, vector<1x8x128xf32>
    %292 = vector.shape_cast %291 : vector<1x8x128xf32> to vector<8x128xf32>
    %cst_147 = arith.constant 0.000000e+00 : f32
    %293 = vector.broadcast %cst_147 : f32 to vector<1x128xf32>
    %294 = tpu.concatenate %293, %292, %293 in 0 : vector<1x128xf32>, vector<8x128xf32>, vector<1x128xf32> -> vector<10x128xf32>
    %cst_148 = arith.constant 0.000000e+00 : f32
    %295 = vector.broadcast %cst_148 : f32 to vector<8x256xf32>
    %c0_149 = arith.constant 0 : index
    %c0_150 = arith.constant 0 : index
    %296 = vector.load %arg2[%c0_149, %c0_150] : memref<642x256xf32, #tpu.memory_space<vmem>>, vector<128x256xf32>
    %297 = vector.extract_strided_slice %294 {offsets = [0, 0], sizes = [8, 128], strides = [1, 1]} : vector<10x128xf32> to vector<8x128xf32>
    %cst_151 = arith.constant dense<0.000000e+00> : vector<8x256xf32>
    %298 = tpu.matmul %297, %296, %cst_151 {dimension_numbers = #tpu.dot_dimension_numbers<[1], [0], [0], [1], [0, 0, 1, 1], [], []>} : vector<8x128xf32>, vector<128x256xf32>, vector<8x256xf32> -> vector<8x256xf32>
    %299 = arith.addf %295, %298 : vector<8x256xf32>
    %c128_152 = arith.constant 128 : index
    %c0_153 = arith.constant 0 : index
    %300 = vector.load %arg2[%c128_152, %c0_153] : memref<642x256xf32, #tpu.memory_space<vmem>>, vector<128x256xf32>
    %301 = vector.extract_strided_slice %294 {offsets = [1, 0], sizes = [8, 128], strides = [1, 1]} : vector<10x128xf32> to vector<8x128xf32>
    %cst_154 = arith.constant dense<0.000000e+00> : vector<8x256xf32>
    %302 = tpu.matmul %301, %300, %cst_154 {dimension_numbers = #tpu.dot_dimension_numbers<[1], [0], [0], [1], [0, 0, 1, 1], [], []>} : vector<8x128xf32>, vector<128x256xf32>, vector<8x256xf32> -> vector<8x256xf32>
    %303 = arith.addf %299, %302 : vector<8x256xf32>
    %c256_155 = arith.constant 256 : index
    %c0_156 = arith.constant 0 : index
    %304 = vector.load %arg2[%c256_155, %c0_156] : memref<642x256xf32, #tpu.memory_space<vmem>>, vector<128x256xf32>
    %305 = vector.extract_strided_slice %294 {offsets = [2, 0], sizes = [8, 128], strides = [1, 1]} : vector<10x128xf32> to vector<8x128xf32>
    %cst_157 = arith.constant dense<0.000000e+00> : vector<8x256xf32>
    %306 = tpu.matmul %305, %304, %cst_157 {dimension_numbers = #tpu.dot_dimension_numbers<[1], [0], [0], [1], [0, 0, 1, 1], [], []>} : vector<8x128xf32>, vector<128x256xf32>, vector<8x256xf32> -> vector<8x256xf32>
    %307 = arith.addf %303, %306 : vector<8x256xf32>
    %c384_158 = arith.constant 384 : index
    %c0_159 = arith.constant 0 : index
    %308 = vector.load %arg2[%c384_158, %c0_159] : memref<642x256xf32, #tpu.memory_space<vmem>>, vector<256x256xf32>
    %c640_160 = arith.constant 640 : index
    %c0_161 = arith.constant 0 : index
    %309 = vector.load %arg2[%c640_160, %c0_161] : memref<642x256xf32, #tpu.memory_space<vmem>>, vector<1x256xf32>
    %c641_162 = arith.constant 641 : index
    %c0_163 = arith.constant 0 : index
    %310 = vector.load %arg2[%c641_162, %c0_163] : memref<642x256xf32, #tpu.memory_space<vmem>>, vector<1x256xf32>
    %cst_164 = arith.constant dense<0.000000e+00> : vector<256xf32>
    %311 = vector.multi_reduction <add>, %307, %cst_164 [0] : vector<8x256xf32> to vector<256xf32>
    %312 = vector.shape_cast %311 : vector<256xf32> to vector<1x256xf32>
    %313 = arith.mulf %307, %307 : vector<8x256xf32>
    %cst_165 = arith.constant dense<0.000000e+00> : vector<256xf32>
    %314 = vector.multi_reduction <add>, %313, %cst_165 [0] : vector<8x256xf32> to vector<256xf32>
    %315 = vector.shape_cast %314 : vector<256xf32> to vector<1x256xf32>
    %cst_166 = arith.constant dense<0.000000e+00> : vector<1x256xf32>
    %316 = tpu.matmul %312, %308, %cst_166 {dimension_numbers = #tpu.dot_dimension_numbers<[1], [0], [0], [1], [0, 0, 1, 1], [], []>} : vector<1x256xf32>, vector<256x256xf32>, vector<1x256xf32> -> vector<1x256xf32>
    %cst_167 = arith.constant dense<0.000000e+00> : vector<1x256xf32>
    %317 = tpu.matmul %315, %308, %cst_167 {dimension_numbers = #tpu.dot_dimension_numbers<[1], [0], [0], [1], [0, 0, 1, 1], [], []>} : vector<1x256xf32>, vector<256x256xf32>, vector<1x256xf32> -> vector<1x256xf32>
    %318 = arith.mulf %316, %316 : vector<1x256xf32>
    %319 = arith.subf %317, %318 : vector<1x256xf32>
    %cst_168 = arith.constant 9.99999974E-6 : f32
    %320 = vector.broadcast %cst_168 : f32 to vector<1x256xf32>
    %321 = arith.addf %319, %320 : vector<1x256xf32>
    %322 = math.rsqrt %321 : vector<1x256xf32>
    %323 = arith.mulf %309, %322 : vector<1x256xf32>
    %324 = vector.broadcast %316 : vector<1x256xf32> to vector<8x256xf32>
    %325 = arith.subf %307, %324 : vector<8x256xf32>
    %326 = vector.broadcast %323 : vector<1x256xf32> to vector<8x256xf32>
    %327 = arith.mulf %325, %326 : vector<8x256xf32>
    %328 = vector.broadcast %310 : vector<1x256xf32> to vector<8x256xf32>
    %329 = arith.addf %327, %328 : vector<8x256xf32>
    %cst_169 = arith.constant 0.000000e+00 : f32
    %330 = vector.broadcast %cst_169 : f32 to vector<8x256xf32>
    %331 = arith.cmpf oge, %329, %330 : vector<8x256xf32>
    %cst_170 = arith.constant 0.00999999977 : f32
    %332 = vector.broadcast %cst_170 : f32 to vector<8x256xf32>
    %333 = arith.mulf %332, %329 : vector<8x256xf32>
    %334 = arith.select %331, %329, %333 : vector<8x256xi1>, vector<8x256xf32>
    %cst_171 = arith.constant 0.000000e+00 : f32
    %335 = vector.broadcast %cst_171 : f32 to vector<1x256xf32>
    %336 = tpu.concatenate %335, %334, %335 in 0 : vector<1x256xf32>, vector<8x256xf32>, vector<1x256xf32> -> vector<10x256xf32>
    %cst_172 = arith.constant 0.000000e+00 : f32
    %337 = vector.broadcast %cst_172 : f32 to vector<8x256xf32>
    %c0_173 = arith.constant 0 : index
    %c0_174 = arith.constant 0 : index
    %338 = vector.load %arg3[%c0_173, %c0_174] : memref<1026x256xf32, #tpu.memory_space<vmem>>, vector<256x256xf32>
    %339 = vector.extract_strided_slice %336 {offsets = [0, 0], sizes = [8, 256], strides = [1, 1]} : vector<10x256xf32> to vector<8x256xf32>
    %cst_175 = arith.constant dense<0.000000e+00> : vector<8x256xf32>
    %340 = tpu.matmul %339, %338, %cst_175 {dimension_numbers = #tpu.dot_dimension_numbers<[1], [0], [0], [1], [0, 0, 1, 1], [], []>} : vector<8x256xf32>, vector<256x256xf32>, vector<8x256xf32> -> vector<8x256xf32>
    %341 = arith.addf %337, %340 : vector<8x256xf32>
    %c256_176 = arith.constant 256 : index
    %c0_177 = arith.constant 0 : index
    %342 = vector.load %arg3[%c256_176, %c0_177] : memref<1026x256xf32, #tpu.memory_space<vmem>>, vector<256x256xf32>
    %343 = vector.extract_strided_slice %336 {offsets = [1, 0], sizes = [8, 256], strides = [1, 1]} : vector<10x256xf32> to vector<8x256xf32>
    %cst_178 = arith.constant dense<0.000000e+00> : vector<8x256xf32>
    %344 = tpu.matmul %343, %342, %cst_178 {dimension_numbers = #tpu.dot_dimension_numbers<[1], [0], [0], [1], [0, 0, 1, 1], [], []>} : vector<8x256xf32>, vector<256x256xf32>, vector<8x256xf32> -> vector<8x256xf32>
    %345 = arith.addf %341, %344 : vector<8x256xf32>
    %c512_179 = arith.constant 512 : index
    %c0_180 = arith.constant 0 : index
    %346 = vector.load %arg3[%c512_179, %c0_180] : memref<1026x256xf32, #tpu.memory_space<vmem>>, vector<256x256xf32>
    %347 = vector.extract_strided_slice %336 {offsets = [2, 0], sizes = [8, 256], strides = [1, 1]} : vector<10x256xf32> to vector<8x256xf32>
    %cst_181 = arith.constant dense<0.000000e+00> : vector<8x256xf32>
    %348 = tpu.matmul %347, %346, %cst_181 {dimension_numbers = #tpu.dot_dimension_numbers<[1], [0], [0], [1], [0, 0, 1, 1], [], []>} : vector<8x256xf32>, vector<256x256xf32>, vector<8x256xf32> -> vector<8x256xf32>
    %349 = arith.addf %345, %348 : vector<8x256xf32>
    %c768_182 = arith.constant 768 : index
    %c0_183 = arith.constant 0 : index
    %350 = vector.load %arg3[%c768_182, %c0_183] : memref<1026x256xf32, #tpu.memory_space<vmem>>, vector<256x256xf32>
    %c1024_184 = arith.constant 1024 : index
    %c0_185 = arith.constant 0 : index
    %351 = vector.load %arg3[%c1024_184, %c0_185] : memref<1026x256xf32, #tpu.memory_space<vmem>>, vector<1x256xf32>
    %c1025_186 = arith.constant 1025 : index
    %c0_187 = arith.constant 0 : index
    %352 = vector.load %arg3[%c1025_186, %c0_187] : memref<1026x256xf32, #tpu.memory_space<vmem>>, vector<1x256xf32>
    %cst_188 = arith.constant dense<0.000000e+00> : vector<256xf32>
    %353 = vector.multi_reduction <add>, %349, %cst_188 [0] : vector<8x256xf32> to vector<256xf32>
    %354 = vector.shape_cast %353 : vector<256xf32> to vector<1x256xf32>
    %355 = arith.mulf %349, %349 : vector<8x256xf32>
    %cst_189 = arith.constant dense<0.000000e+00> : vector<256xf32>
    %356 = vector.multi_reduction <add>, %355, %cst_189 [0] : vector<8x256xf32> to vector<256xf32>
    %357 = vector.shape_cast %356 : vector<256xf32> to vector<1x256xf32>
    %cst_190 = arith.constant dense<0.000000e+00> : vector<1x256xf32>
    %358 = tpu.matmul %354, %350, %cst_190 {dimension_numbers = #tpu.dot_dimension_numbers<[1], [0], [0], [1], [0, 0, 1, 1], [], []>} : vector<1x256xf32>, vector<256x256xf32>, vector<1x256xf32> -> vector<1x256xf32>
    %cst_191 = arith.constant dense<0.000000e+00> : vector<1x256xf32>
    %359 = tpu.matmul %357, %350, %cst_191 {dimension_numbers = #tpu.dot_dimension_numbers<[1], [0], [0], [1], [0, 0, 1, 1], [], []>} : vector<1x256xf32>, vector<256x256xf32>, vector<1x256xf32> -> vector<1x256xf32>
    %360 = arith.mulf %358, %358 : vector<1x256xf32>
    %361 = arith.subf %359, %360 : vector<1x256xf32>
    %cst_192 = arith.constant 9.99999974E-6 : f32
    %362 = vector.broadcast %cst_192 : f32 to vector<1x256xf32>
    %363 = arith.addf %361, %362 : vector<1x256xf32>
    %364 = math.rsqrt %363 : vector<1x256xf32>
    %365 = arith.mulf %351, %364 : vector<1x256xf32>
    %366 = vector.broadcast %358 : vector<1x256xf32> to vector<8x256xf32>
    %367 = arith.subf %349, %366 : vector<8x256xf32>
    %368 = vector.broadcast %365 : vector<1x256xf32> to vector<8x256xf32>
    %369 = arith.mulf %367, %368 : vector<8x256xf32>
    %370 = vector.broadcast %352 : vector<1x256xf32> to vector<8x256xf32>
    %371 = arith.addf %369, %370 : vector<8x256xf32>
    %cst_193 = arith.constant 0.000000e+00 : f32
    %372 = vector.broadcast %cst_193 : f32 to vector<8x256xf32>
    %373 = arith.cmpf oge, %371, %372 : vector<8x256xf32>
    %cst_194 = arith.constant 0.00999999977 : f32
    %374 = vector.broadcast %cst_194 : f32 to vector<8x256xf32>
    %375 = arith.mulf %374, %371 : vector<8x256xf32>
    %376 = arith.select %373, %371, %375 : vector<8x256xi1>, vector<8x256xf32>
    %cst_195 = arith.constant 0.000000e+00 : f32
    %377 = vector.broadcast %cst_195 : f32 to vector<1x256xf32>
    %378 = tpu.concatenate %377, %376, %377 in 0 : vector<1x256xf32>, vector<8x256xf32>, vector<1x256xf32> -> vector<10x256xf32>
    %cst_196 = arith.constant 0.000000e+00 : f32
    %379 = vector.broadcast %cst_196 : f32 to vector<4x128xf32>
    %c0_197 = arith.constant 0 : index
    %c0_198 = arith.constant 0 : index
    %380 = vector.load %arg4[%c0_197, %c0_198] : memref<898x128xf32, #tpu.memory_space<vmem>>, vector<256x128xf32>
    %381 = vector.extract_strided_slice %378 {offsets = [0, 0], sizes = [1, 256], strides = [1, 1]} : vector<10x256xf32> to vector<1x256xf32>
    %382 = vector.extract_strided_slice %378 {offsets = [2, 0], sizes = [1, 256], strides = [1, 1]} : vector<10x256xf32> to vector<1x256xf32>
    %383 = vector.extract_strided_slice %378 {offsets = [4, 0], sizes = [1, 256], strides = [1, 1]} : vector<10x256xf32> to vector<1x256xf32>
    %384 = vector.extract_strided_slice %378 {offsets = [6, 0], sizes = [1, 256], strides = [1, 1]} : vector<10x256xf32> to vector<1x256xf32>
    %385 = tpu.concatenate %381, %382, %383, %384 in 0 : vector<1x256xf32>, vector<1x256xf32>, vector<1x256xf32>, vector<1x256xf32> -> vector<4x256xf32>
    %cst_199 = arith.constant dense<0.000000e+00> : vector<4x128xf32>
    %386 = tpu.matmul %385, %380, %cst_199 {dimension_numbers = #tpu.dot_dimension_numbers<[1], [0], [0], [1], [0, 0, 1, 1], [], []>} : vector<4x256xf32>, vector<256x128xf32>, vector<4x128xf32> -> vector<4x128xf32>
    %387 = arith.addf %379, %386 : vector<4x128xf32>
    %c256_200 = arith.constant 256 : index
    %c0_201 = arith.constant 0 : index
    %388 = vector.load %arg4[%c256_200, %c0_201] : memref<898x128xf32, #tpu.memory_space<vmem>>, vector<256x128xf32>
    %389 = vector.extract_strided_slice %378 {offsets = [1, 0], sizes = [1, 256], strides = [1, 1]} : vector<10x256xf32> to vector<1x256xf32>
    %390 = vector.extract_strided_slice %378 {offsets = [3, 0], sizes = [1, 256], strides = [1, 1]} : vector<10x256xf32> to vector<1x256xf32>
    %391 = vector.extract_strided_slice %378 {offsets = [5, 0], sizes = [1, 256], strides = [1, 1]} : vector<10x256xf32> to vector<1x256xf32>
    %392 = vector.extract_strided_slice %378 {offsets = [7, 0], sizes = [1, 256], strides = [1, 1]} : vector<10x256xf32> to vector<1x256xf32>
    %393 = tpu.concatenate %389, %390, %391, %392 in 0 : vector<1x256xf32>, vector<1x256xf32>, vector<1x256xf32>, vector<1x256xf32> -> vector<4x256xf32>
    %cst_202 = arith.constant dense<0.000000e+00> : vector<4x128xf32>
    %394 = tpu.matmul %393, %388, %cst_202 {dimension_numbers = #tpu.dot_dimension_numbers<[1], [0], [0], [1], [0, 0, 1, 1], [], []>} : vector<4x256xf32>, vector<256x128xf32>, vector<4x128xf32> -> vector<4x128xf32>
    %395 = arith.addf %387, %394 : vector<4x128xf32>
    %c512_203 = arith.constant 512 : index
    %c0_204 = arith.constant 0 : index
    %396 = vector.load %arg4[%c512_203, %c0_204] : memref<898x128xf32, #tpu.memory_space<vmem>>, vector<256x128xf32>
    %397 = vector.extract_strided_slice %378 {offsets = [2, 0], sizes = [1, 256], strides = [1, 1]} : vector<10x256xf32> to vector<1x256xf32>
    %398 = vector.extract_strided_slice %378 {offsets = [4, 0], sizes = [1, 256], strides = [1, 1]} : vector<10x256xf32> to vector<1x256xf32>
    %399 = vector.extract_strided_slice %378 {offsets = [6, 0], sizes = [1, 256], strides = [1, 1]} : vector<10x256xf32> to vector<1x256xf32>
    %400 = vector.extract_strided_slice %378 {offsets = [8, 0], sizes = [1, 256], strides = [1, 1]} : vector<10x256xf32> to vector<1x256xf32>
    %401 = tpu.concatenate %397, %398, %399, %400 in 0 : vector<1x256xf32>, vector<1x256xf32>, vector<1x256xf32>, vector<1x256xf32> -> vector<4x256xf32>
    %cst_205 = arith.constant dense<0.000000e+00> : vector<4x128xf32>
    %402 = tpu.matmul %401, %396, %cst_205 {dimension_numbers = #tpu.dot_dimension_numbers<[1], [0], [0], [1], [0, 0, 1, 1], [], []>} : vector<4x256xf32>, vector<256x128xf32>, vector<4x128xf32> -> vector<4x128xf32>
    %403 = arith.addf %395, %402 : vector<4x128xf32>
    %c768_206 = arith.constant 768 : index
    %c0_207 = arith.constant 0 : index
    %404 = vector.load %arg4[%c768_206, %c0_207] : memref<898x128xf32, #tpu.memory_space<vmem>>, vector<128x128xf32>
    %c896_208 = arith.constant 896 : index
    %c0_209 = arith.constant 0 : index
    %405 = vector.load %arg4[%c896_208, %c0_209] : memref<898x128xf32, #tpu.memory_space<vmem>>, vector<1x128xf32>
    %c897_210 = arith.constant 897 : index
    %c0_211 = arith.constant 0 : index
    %406 = vector.load %arg4[%c897_210, %c0_211] : memref<898x128xf32, #tpu.memory_space<vmem>>, vector<1x128xf32>
    %cst_212 = arith.constant dense<0.000000e+00> : vector<128xf32>
    %407 = vector.multi_reduction <add>, %403, %cst_212 [0] : vector<4x128xf32> to vector<128xf32>
    %408 = vector.shape_cast %407 : vector<128xf32> to vector<1x128xf32>
    %409 = arith.mulf %403, %403 : vector<4x128xf32>
    %cst_213 = arith.constant dense<0.000000e+00> : vector<128xf32>
    %410 = vector.multi_reduction <add>, %409, %cst_213 [0] : vector<4x128xf32> to vector<128xf32>
    %411 = vector.shape_cast %410 : vector<128xf32> to vector<1x128xf32>
    %cst_214 = arith.constant dense<0.000000e+00> : vector<1x128xf32>
    %412 = tpu.matmul %408, %404, %cst_214 {dimension_numbers = #tpu.dot_dimension_numbers<[1], [0], [0], [1], [0, 0, 1, 1], [], []>} : vector<1x128xf32>, vector<128x128xf32>, vector<1x128xf32> -> vector<1x128xf32>
    %cst_215 = arith.constant dense<0.000000e+00> : vector<1x128xf32>
    %413 = tpu.matmul %411, %404, %cst_215 {dimension_numbers = #tpu.dot_dimension_numbers<[1], [0], [0], [1], [0, 0, 1, 1], [], []>} : vector<1x128xf32>, vector<128x128xf32>, vector<1x128xf32> -> vector<1x128xf32>
    %414 = arith.mulf %412, %412 : vector<1x128xf32>
    %415 = arith.subf %413, %414 : vector<1x128xf32>
    %cst_216 = arith.constant 9.99999974E-6 : f32
    %416 = vector.broadcast %cst_216 : f32 to vector<1x128xf32>
    %417 = arith.addf %415, %416 : vector<1x128xf32>
    %418 = math.rsqrt %417 : vector<1x128xf32>
    %419 = arith.mulf %405, %418 : vector<1x128xf32>
    %420 = vector.broadcast %412 : vector<1x128xf32> to vector<4x128xf32>
    %421 = arith.subf %403, %420 : vector<4x128xf32>
    %422 = vector.broadcast %419 : vector<1x128xf32> to vector<4x128xf32>
    %423 = arith.mulf %421, %422 : vector<4x128xf32>
    %424 = vector.broadcast %406 : vector<1x128xf32> to vector<4x128xf32>
    %425 = arith.addf %423, %424 : vector<4x128xf32>
    %cst_217 = arith.constant 0.000000e+00 : f32
    %426 = vector.broadcast %cst_217 : f32 to vector<4x128xf32>
    %427 = arith.cmpf oge, %425, %426 : vector<4x128xf32>
    %cst_218 = arith.constant 0.00999999977 : f32
    %428 = vector.broadcast %cst_218 : f32 to vector<4x128xf32>
    %429 = arith.mulf %428, %425 : vector<4x128xf32>
    %430 = arith.select %427, %425, %429 : vector<4x128xi1>, vector<4x128xf32>
    %cst_219 = arith.constant 0.000000e+00 : f32
    %431 = vector.broadcast %cst_219 : f32 to vector<1x128xf32>
    %432 = tpu.concatenate %431, %430, %431 in 0 : vector<1x128xf32>, vector<4x128xf32>, vector<1x128xf32> -> vector<6x128xf32>
    %cst_220 = arith.constant 0.000000e+00 : f32
    %433 = vector.broadcast %cst_220 : f32 to vector<4x128xf32>
    %c0_221 = arith.constant 0 : index
    %c0_222 = arith.constant 0 : index
    %434 = vector.load %arg5[%c0_221, %c0_222] : memref<514x128xf32, #tpu.memory_space<vmem>>, vector<128x128xf32>
    %435 = vector.extract_strided_slice %432 {offsets = [0, 0], sizes = [4, 128], strides = [1, 1]} : vector<6x128xf32> to vector<4x128xf32>
    %cst_223 = arith.constant dense<0.000000e+00> : vector<4x128xf32>
    %436 = tpu.matmul %435, %434, %cst_223 {dimension_numbers = #tpu.dot_dimension_numbers<[1], [0], [0], [1], [0, 0, 1, 1], [], []>} : vector<4x128xf32>, vector<128x128xf32>, vector<4x128xf32> -> vector<4x128xf32>
    %437 = arith.addf %433, %436 : vector<4x128xf32>
    %c128_224 = arith.constant 128 : index
    %c0_225 = arith.constant 0 : index
    %438 = vector.load %arg5[%c128_224, %c0_225] : memref<514x128xf32, #tpu.memory_space<vmem>>, vector<128x128xf32>
    %439 = vector.extract_strided_slice %432 {offsets = [1, 0], sizes = [4, 128], strides = [1, 1]} : vector<6x128xf32> to vector<4x128xf32>
    %cst_226 = arith.constant dense<0.000000e+00> : vector<4x128xf32>
    %440 = tpu.matmul %439, %438, %cst_226 {dimension_numbers = #tpu.dot_dimension_numbers<[1], [0], [0], [1], [0, 0, 1, 1], [], []>} : vector<4x128xf32>, vector<128x128xf32>, vector<4x128xf32> -> vector<4x128xf32>
    %441 = arith.addf %437, %440 : vector<4x128xf32>
    %c256_227 = arith.constant 256 : index
    %c0_228 = arith.constant 0 : index
    %442 = vector.load %arg5[%c256_227, %c0_228] : memref<514x128xf32, #tpu.memory_space<vmem>>, vector<128x128xf32>
    %443 = vector.extract_strided_slice %432 {offsets = [2, 0], sizes = [4, 128], strides = [1, 1]} : vector<6x128xf32> to vector<4x128xf32>
    %cst_229 = arith.constant dense<0.000000e+00> : vector<4x128xf32>
    %444 = tpu.matmul %443, %442, %cst_229 {dimension_numbers = #tpu.dot_dimension_numbers<[1], [0], [0], [1], [0, 0, 1, 1], [], []>} : vector<4x128xf32>, vector<128x128xf32>, vector<4x128xf32> -> vector<4x128xf32>
    %445 = arith.addf %441, %444 : vector<4x128xf32>
    %c384_230 = arith.constant 384 : index
    %c0_231 = arith.constant 0 : index
    %446 = vector.load %arg5[%c384_230, %c0_231] : memref<514x128xf32, #tpu.memory_space<vmem>>, vector<128x128xf32>
    %c512_232 = arith.constant 512 : index
    %c0_233 = arith.constant 0 : index
    %447 = vector.load %arg5[%c512_232, %c0_233] : memref<514x128xf32, #tpu.memory_space<vmem>>, vector<1x128xf32>
    %c513_234 = arith.constant 513 : index
    %c0_235 = arith.constant 0 : index
    %448 = vector.load %arg5[%c513_234, %c0_235] : memref<514x128xf32, #tpu.memory_space<vmem>>, vector<1x128xf32>
    %cst_236 = arith.constant dense<0.000000e+00> : vector<128xf32>
    %449 = vector.multi_reduction <add>, %445, %cst_236 [0] : vector<4x128xf32> to vector<128xf32>
    %450 = vector.shape_cast %449 : vector<128xf32> to vector<1x128xf32>
    %451 = arith.mulf %445, %445 : vector<4x128xf32>
    %cst_237 = arith.constant dense<0.000000e+00> : vector<128xf32>
    %452 = vector.multi_reduction <add>, %451, %cst_237 [0] : vector<4x128xf32> to vector<128xf32>
    %453 = vector.shape_cast %452 : vector<128xf32> to vector<1x128xf32>
    %cst_238 = arith.constant dense<0.000000e+00> : vector<1x128xf32>
    %454 = tpu.matmul %450, %446, %cst_238 {dimension_numbers = #tpu.dot_dimension_numbers<[1], [0], [0], [1], [0, 0, 1, 1], [], []>} : vector<1x128xf32>, vector<128x128xf32>, vector<1x128xf32> -> vector<1x128xf32>
    %cst_239 = arith.constant dense<0.000000e+00> : vector<1x128xf32>
    %455 = tpu.matmul %453, %446, %cst_239 {dimension_numbers = #tpu.dot_dimension_numbers<[1], [0], [0], [1], [0, 0, 1, 1], [], []>} : vector<1x128xf32>, vector<128x128xf32>, vector<1x128xf32> -> vector<1x128xf32>
    %456 = arith.mulf %454, %454 : vector<1x128xf32>
    %457 = arith.subf %455, %456 : vector<1x128xf32>
    %cst_240 = arith.constant 9.99999974E-6 : f32
    %458 = vector.broadcast %cst_240 : f32 to vector<1x128xf32>
    %459 = arith.addf %457, %458 : vector<1x128xf32>
    %460 = math.rsqrt %459 : vector<1x128xf32>
    %461 = arith.mulf %447, %460 : vector<1x128xf32>
    %462 = vector.broadcast %454 : vector<1x128xf32> to vector<4x128xf32>
    %463 = arith.subf %445, %462 : vector<4x128xf32>
    %464 = vector.broadcast %461 : vector<1x128xf32> to vector<4x128xf32>
    %465 = arith.mulf %463, %464 : vector<4x128xf32>
    %466 = vector.broadcast %448 : vector<1x128xf32> to vector<4x128xf32>
    %467 = arith.addf %465, %466 : vector<4x128xf32>
    %cst_241 = arith.constant 0.000000e+00 : f32
    %468 = vector.broadcast %cst_241 : f32 to vector<4x128xf32>
    %469 = arith.cmpf oge, %467, %468 : vector<4x128xf32>
    %cst_242 = arith.constant 0.00999999977 : f32
    %470 = vector.broadcast %cst_242 : f32 to vector<4x128xf32>
    %471 = arith.mulf %470, %467 : vector<4x128xf32>
    %472 = arith.select %469, %467, %471 : vector<4x128xi1>, vector<4x128xf32>
    %cst_243 = arith.constant 0.000000e+00 : f32
    %473 = vector.broadcast %cst_243 : f32 to vector<1x128xf32>
    %474 = tpu.concatenate %473, %472, %473 in 0 : vector<1x128xf32>, vector<4x128xf32>, vector<1x128xf32> -> vector<6x128xf32>
    %cst_244 = arith.constant 0.000000e+00 : f32
    %475 = vector.broadcast %cst_244 : f32 to vector<2x64xf32>
    %c0_245 = arith.constant 0 : index
    %c0_246 = arith.constant 0 : index
    %476 = vector.load %arg6[%c0_245, %c0_246] : memref<450x64xf32, #tpu.memory_space<vmem>>, vector<128x64xf32>
    %477 = vector.extract_strided_slice %474 {offsets = [0, 0], sizes = [1, 128], strides = [1, 1]} : vector<6x128xf32> to vector<1x128xf32>
    %478 = vector.extract_strided_slice %474 {offsets = [2, 0], sizes = [1, 128], strides = [1, 1]} : vector<6x128xf32> to vector<1x128xf32>
    %479 = tpu.concatenate %477, %478 in 0 : vector<1x128xf32>, vector<1x128xf32> -> vector<2x128xf32>
    %cst_247 = arith.constant dense<0.000000e+00> : vector<2x64xf32>
    %480 = tpu.matmul %479, %476, %cst_247 {dimension_numbers = #tpu.dot_dimension_numbers<[1], [0], [0], [1], [0, 0, 1, 1], [], []>} : vector<2x128xf32>, vector<128x64xf32>, vector<2x64xf32> -> vector<2x64xf32>
    %481 = arith.addf %475, %480 : vector<2x64xf32>
    %c128_248 = arith.constant 128 : index
    %c0_249 = arith.constant 0 : index
    %482 = vector.load %arg6[%c128_248, %c0_249] : memref<450x64xf32, #tpu.memory_space<vmem>>, vector<128x64xf32>
    %483 = vector.extract_strided_slice %474 {offsets = [1, 0], sizes = [1, 128], strides = [1, 1]} : vector<6x128xf32> to vector<1x128xf32>
    %484 = vector.extract_strided_slice %474 {offsets = [3, 0], sizes = [1, 128], strides = [1, 1]} : vector<6x128xf32> to vector<1x128xf32>
    %485 = tpu.concatenate %483, %484 in 0 : vector<1x128xf32>, vector<1x128xf32> -> vector<2x128xf32>
    %cst_250 = arith.constant dense<0.000000e+00> : vector<2x64xf32>
    %486 = tpu.matmul %485, %482, %cst_250 {dimension_numbers = #tpu.dot_dimension_numbers<[1], [0], [0], [1], [0, 0, 1, 1], [], []>} : vector<2x128xf32>, vector<128x64xf32>, vector<2x64xf32> -> vector<2x64xf32>
    %487 = arith.addf %481, %486 : vector<2x64xf32>
    %c256_251 = arith.constant 256 : index
    %c0_252 = arith.constant 0 : index
    %488 = vector.load %arg6[%c256_251, %c0_252] : memref<450x64xf32, #tpu.memory_space<vmem>>, vector<128x64xf32>
    %489 = vector.extract_strided_slice %474 {offsets = [2, 0], sizes = [1, 128], strides = [1, 1]} : vector<6x128xf32> to vector<1x128xf32>
    %490 = vector.extract_strided_slice %474 {offsets = [4, 0], sizes = [1, 128], strides = [1, 1]} : vector<6x128xf32> to vector<1x128xf32>
    %491 = tpu.concatenate %489, %490 in 0 : vector<1x128xf32>, vector<1x128xf32> -> vector<2x128xf32>
    %cst_253 = arith.constant dense<0.000000e+00> : vector<2x64xf32>
    %492 = tpu.matmul %491, %488, %cst_253 {dimension_numbers = #tpu.dot_dimension_numbers<[1], [0], [0], [1], [0, 0, 1, 1], [], []>} : vector<2x128xf32>, vector<128x64xf32>, vector<2x64xf32> -> vector<2x64xf32>
    %493 = arith.addf %487, %492 : vector<2x64xf32>
    %c384_254 = arith.constant 384 : index
    %c0_255 = arith.constant 0 : index
    %494 = vector.load %arg6[%c384_254, %c0_255] : memref<450x64xf32, #tpu.memory_space<vmem>>, vector<64x64xf32>
    %c448_256 = arith.constant 448 : index
    %c0_257 = arith.constant 0 : index
    %495 = vector.load %arg6[%c448_256, %c0_257] : memref<450x64xf32, #tpu.memory_space<vmem>>, vector<1x64xf32>
    %c449_258 = arith.constant 449 : index
    %c0_259 = arith.constant 0 : index
    %496 = vector.load %arg6[%c449_258, %c0_259] : memref<450x64xf32, #tpu.memory_space<vmem>>, vector<1x64xf32>
    %cst_260 = arith.constant dense<0.000000e+00> : vector<64xf32>
    %497 = vector.multi_reduction <add>, %493, %cst_260 [0] : vector<2x64xf32> to vector<64xf32>
    %498 = vector.shape_cast %497 : vector<64xf32> to vector<1x64xf32>
    %499 = arith.mulf %493, %493 : vector<2x64xf32>
    %cst_261 = arith.constant dense<0.000000e+00> : vector<64xf32>
    %500 = vector.multi_reduction <add>, %499, %cst_261 [0] : vector<2x64xf32> to vector<64xf32>
    %501 = vector.shape_cast %500 : vector<64xf32> to vector<1x64xf32>
    %cst_262 = arith.constant dense<0.000000e+00> : vector<1x64xf32>
    %502 = tpu.matmul %498, %494, %cst_262 {dimension_numbers = #tpu.dot_dimension_numbers<[1], [0], [0], [1], [0, 0, 1, 1], [], []>} : vector<1x64xf32>, vector<64x64xf32>, vector<1x64xf32> -> vector<1x64xf32>
    %cst_263 = arith.constant dense<0.000000e+00> : vector<1x64xf32>
    %503 = tpu.matmul %501, %494, %cst_263 {dimension_numbers = #tpu.dot_dimension_numbers<[1], [0], [0], [1], [0, 0, 1, 1], [], []>} : vector<1x64xf32>, vector<64x64xf32>, vector<1x64xf32> -> vector<1x64xf32>
    %504 = arith.mulf %502, %502 : vector<1x64xf32>
    %505 = arith.subf %503, %504 : vector<1x64xf32>
    %cst_264 = arith.constant 9.99999974E-6 : f32
    %506 = vector.broadcast %cst_264 : f32 to vector<1x64xf32>
    %507 = arith.addf %505, %506 : vector<1x64xf32>
    %508 = math.rsqrt %507 : vector<1x64xf32>
    %509 = arith.mulf %495, %508 : vector<1x64xf32>
    %510 = vector.broadcast %502 : vector<1x64xf32> to vector<2x64xf32>
    %511 = arith.subf %493, %510 : vector<2x64xf32>
    %512 = vector.broadcast %509 : vector<1x64xf32> to vector<2x64xf32>
    %513 = arith.mulf %511, %512 : vector<2x64xf32>
    %514 = vector.broadcast %496 : vector<1x64xf32> to vector<2x64xf32>
    %515 = arith.addf %513, %514 : vector<2x64xf32>
    %cst_265 = arith.constant 0.000000e+00 : f32
    %516 = vector.broadcast %cst_265 : f32 to vector<2x64xf32>
    %517 = arith.cmpf oge, %515, %516 : vector<2x64xf32>
    %cst_266 = arith.constant 0.00999999977 : f32
    %518 = vector.broadcast %cst_266 : f32 to vector<2x64xf32>
    %519 = arith.mulf %518, %515 : vector<2x64xf32>
    %520 = arith.select %517, %515, %519 : vector<2x64xi1>, vector<2x64xf32>
    %cst_267 = arith.constant 0.000000e+00 : f32
    %521 = vector.broadcast %cst_267 : f32 to vector<1x64xf32>
    %522 = tpu.concatenate %521, %520, %521 in 0 : vector<1x64xf32>, vector<2x64xf32>, vector<1x64xf32> -> vector<4x64xf32>
    %cst_268 = arith.constant 0.000000e+00 : f32
    %523 = vector.broadcast %cst_268 : f32 to vector<2x64xf32>
    %c0_269 = arith.constant 0 : index
    %c0_270 = arith.constant 0 : index
    %524 = vector.load %arg7[%c0_269, %c0_270] : memref<258x64xf32, #tpu.memory_space<vmem>>, vector<64x64xf32>
    %525 = vector.extract_strided_slice %522 {offsets = [0, 0], sizes = [2, 64], strides = [1, 1]} : vector<4x64xf32> to vector<2x64xf32>
    %cst_271 = arith.constant dense<0.000000e+00> : vector<2x64xf32>
    %526 = tpu.matmul %525, %524, %cst_271 {dimension_numbers = #tpu.dot_dimension_numbers<[1], [0], [0], [1], [0, 0, 1, 1], [], []>} : vector<2x64xf32>, vector<64x64xf32>, vector<2x64xf32> -> vector<2x64xf32>
    %527 = arith.addf %523, %526 : vector<2x64xf32>
    %c64_272 = arith.constant 64 : index
    %c0_273 = arith.constant 0 : index
    %528 = vector.load %arg7[%c64_272, %c0_273] : memref<258x64xf32, #tpu.memory_space<vmem>>, vector<64x64xf32>
    %529 = vector.extract_strided_slice %522 {offsets = [1, 0], sizes = [2, 64], strides = [1, 1]} : vector<4x64xf32> to vector<2x64xf32>
    %cst_274 = arith.constant dense<0.000000e+00> : vector<2x64xf32>
    %530 = tpu.matmul %529, %528, %cst_274 {dimension_numbers = #tpu.dot_dimension_numbers<[1], [0], [0], [1], [0, 0, 1, 1], [], []>} : vector<2x64xf32>, vector<64x64xf32>, vector<2x64xf32> -> vector<2x64xf32>
    %531 = arith.addf %527, %530 : vector<2x64xf32>
    %c128_275 = arith.constant 128 : index
    %c0_276 = arith.constant 0 : index
    %532 = vector.load %arg7[%c128_275, %c0_276] : memref<258x64xf32, #tpu.memory_space<vmem>>, vector<64x64xf32>
    %533 = vector.extract_strided_slice %522 {offsets = [2, 0], sizes = [2, 64], strides = [1, 1]} : vector<4x64xf32> to vector<2x64xf32>
    %cst_277 = arith.constant dense<0.000000e+00> : vector<2x64xf32>
    %534 = tpu.matmul %533, %532, %cst_277 {dimension_numbers = #tpu.dot_dimension_numbers<[1], [0], [0], [1], [0, 0, 1, 1], [], []>} : vector<2x64xf32>, vector<64x64xf32>, vector<2x64xf32> -> vector<2x64xf32>
    %535 = arith.addf %531, %534 : vector<2x64xf32>
    %c192_278 = arith.constant 192 : index
    %c0_279 = arith.constant 0 : index
    %536 = vector.load %arg7[%c192_278, %c0_279] : memref<258x64xf32, #tpu.memory_space<vmem>>, vector<64x64xf32>
    %c256_280 = arith.constant 256 : index
    %c0_281 = arith.constant 0 : index
    %537 = vector.load %arg7[%c256_280, %c0_281] : memref<258x64xf32, #tpu.memory_space<vmem>>, vector<1x64xf32>
    %c257_282 = arith.constant 257 : index
    %c0_283 = arith.constant 0 : index
    %538 = vector.load %arg7[%c257_282, %c0_283] : memref<258x64xf32, #tpu.memory_space<vmem>>, vector<1x64xf32>
    %cst_284 = arith.constant dense<0.000000e+00> : vector<64xf32>
    %539 = vector.multi_reduction <add>, %535, %cst_284 [0] : vector<2x64xf32> to vector<64xf32>
    %540 = vector.shape_cast %539 : vector<64xf32> to vector<1x64xf32>
    %541 = arith.mulf %535, %535 : vector<2x64xf32>
    %cst_285 = arith.constant dense<0.000000e+00> : vector<64xf32>
    %542 = vector.multi_reduction <add>, %541, %cst_285 [0] : vector<2x64xf32> to vector<64xf32>
    %543 = vector.shape_cast %542 : vector<64xf32> to vector<1x64xf32>
    %cst_286 = arith.constant dense<0.000000e+00> : vector<1x64xf32>
    %544 = tpu.matmul %540, %536, %cst_286 {dimension_numbers = #tpu.dot_dimension_numbers<[1], [0], [0], [1], [0, 0, 1, 1], [], []>} : vector<1x64xf32>, vector<64x64xf32>, vector<1x64xf32> -> vector<1x64xf32>
    %cst_287 = arith.constant dense<0.000000e+00> : vector<1x64xf32>
    %545 = tpu.matmul %543, %536, %cst_287 {dimension_numbers = #tpu.dot_dimension_numbers<[1], [0], [0], [1], [0, 0, 1, 1], [], []>} : vector<1x64xf32>, vector<64x64xf32>, vector<1x64xf32> -> vector<1x64xf32>
    %546 = arith.mulf %544, %544 : vector<1x64xf32>
    %547 = arith.subf %545, %546 : vector<1x64xf32>
    %cst_288 = arith.constant 9.99999974E-6 : f32
    %548 = vector.broadcast %cst_288 : f32 to vector<1x64xf32>
    %549 = arith.addf %547, %548 : vector<1x64xf32>
    %550 = math.rsqrt %549 : vector<1x64xf32>
    %551 = arith.mulf %537, %550 : vector<1x64xf32>
    %552 = vector.broadcast %544 : vector<1x64xf32> to vector<2x64xf32>
    %553 = arith.subf %535, %552 : vector<2x64xf32>
    %554 = vector.broadcast %551 : vector<1x64xf32> to vector<2x64xf32>
    %555 = arith.mulf %553, %554 : vector<2x64xf32>
    %556 = vector.broadcast %538 : vector<1x64xf32> to vector<2x64xf32>
    %557 = arith.addf %555, %556 : vector<2x64xf32>
    %cst_289 = arith.constant 0.000000e+00 : f32
    %558 = vector.broadcast %cst_289 : f32 to vector<2x64xf32>
    %559 = arith.cmpf oge, %557, %558 : vector<2x64xf32>
    %cst_290 = arith.constant 0.00999999977 : f32
    %560 = vector.broadcast %cst_290 : f32 to vector<2x64xf32>
    %561 = arith.mulf %560, %557 : vector<2x64xf32>
    %562 = arith.select %559, %557, %561 : vector<2x64xi1>, vector<2x64xf32>
    %cst_291 = arith.constant dense<0.000000e+00> : vector<64xf32>
    %563 = vector.multi_reduction <add>, %562, %cst_291 [0] : vector<2x64xf32> to vector<64xf32>
    %564 = vector.shape_cast %563 : vector<64xf32> to vector<1x64xf32>
    %cst_292 = arith.constant dense<0.000000e+00> : vector<1x16xf32>
    %565 = tpu.matmul %564, %1, %cst_292 {dimension_numbers = #tpu.dot_dimension_numbers<[1], [0], [0], [1], [0, 0, 1, 1], [], []>} : vector<1x64xf32>, vector<64x16xf32>, vector<1x16xf32> -> vector<1x16xf32>
    %566 = vector.extract_strided_slice %0 {offsets = [1, 0], sizes = [1, 6], strides = [1, 1]} : vector<2x6xf32> to vector<1x6xf32>
    %cst_293 = arith.constant dense<0.000000e+00> : vector<1x32xf32>
    %567 = tpu.matmul %565, %2, %cst_293 {dimension_numbers = #tpu.dot_dimension_numbers<[1], [0], [0], [1], [0, 0, 1, 1], [], []>} : vector<1x16xf32>, vector<16x32xf32>, vector<1x32xf32> -> vector<1x32xf32>
    %cst_294 = arith.constant dense<0.000000e+00> : vector<1x32xf32>
    %568 = tpu.matmul %566, %3, %cst_294 {dimension_numbers = #tpu.dot_dimension_numbers<[1], [0], [0], [1], [0, 0, 1, 1], [], []>} : vector<1x6xf32>, vector<6x32xf32>, vector<1x32xf32> -> vector<1x32xf32>
    %569 = arith.addf %567, %568 : vector<1x32xf32>
    %570 = arith.addf %569, %4 : vector<1x32xf32>
    %cst_295 = arith.constant 0.000000e+00 : f32
    %571 = vector.broadcast %cst_295 : f32 to vector<1x32xf32>
    %572 = arith.maximumf %570, %571 : vector<1x32xf32>
    %cst_296 = arith.constant dense<0.000000e+00> : vector<1x3xf32>
    %573 = tpu.matmul %572, %5, %cst_296 {dimension_numbers = #tpu.dot_dimension_numbers<[1], [0], [0], [1], [0, 0, 1, 1], [], []>} : vector<1x32xf32>, vector<32x3xf32>, vector<1x3xf32> -> vector<1x3xf32>
    %574 = arith.addf %573, %6 : vector<1x3xf32>
    %575 = tpu.concatenate %290, %574 in 0 : vector<1x3xf32>, vector<1x3xf32> -> vector<2x3xf32>
    %c0_297 = arith.constant 0 : index
    %c0_298 = arith.constant 0 : index
    %576 = vector.load %arg11[%c0_297, %c0_298] : memref<2x3xf32, #tpu.memory_space<vmem>>, vector<2x3xf32>
    tpu.vector_store %arg11[%c0_297, %c0_298], %575 {strides = array<i32>} : memref<2x3xf32, #tpu.memory_space<vmem>>, vector<2x3xf32>,
    return
  }
}

</mosaic_0001>

<bundles_post_ra>
// kernel: fwd.1
= control target key start
LH: loop header
LB: loop body
LE: loop exit
PB: predicated region body
PF: predicated region fallthrough
CT: control target
= control target key end

     0   :  { %16 = vsyncpa [#allocation3], 0  ;;  %s11258_s0 = inlined_call_operand.vmem [shape: f32[2,8,128], index: 0, kind: input, shape index: {}]   ;;  %s11259_s1 = inlined_call_operand.hbm [shape: f32[2,6], index: 1, kind: input, shape index: {}]   ;;  %s11260_s2 = inlined_call_operand.hbm [shape: f32[642,256], index: 2, kind: input, shape index: {}]   ;;  %s11261_s3 = inlined_call_operand.hbm [shape: f32[1026,256], index: 3, kind: input, shape index: {}]   ;;  %s11262_s4 = inlined_call_operand.hbm [shape: f32[898,128], index: 4, kind: input, shape index: {}]   ;;  %s11263_s5 = inlined_call_operand.hbm [shape: f32[514,128], index: 5, kind: input, shape index: {}]   ;;  %s11264_s6 = inlined_call_operand.hbm [shape: f32[450,64], index: 6, kind: input, shape index: {}]   ;;  %s11265_s7 = inlined_call_operand.hbm [shape: f32[258,64], index: 7, kind: input, shape index: {}]   ;;  %s11266_s8 = inlined_call_operand.hbm [shape: f32[23,32], index: 8, kind: input, shape index: {}]   ;;  %s11267_s9 = inlined_call_operand.hbm [shape: f32[33,3], index: 9, kind: input, shape index: {}]   ;;  %s11268_s10 = inlined_call_operand.hbm [shape: f32[64,16], index: 10, kind: input, shape index: {}]   ;;  %s11269_s11 = inlined_call_operand.hbm [shape: f32[2,3], index: 11, kind: output, shape index: {}]  }
   0x1   :  { %17 = vsyncpa [#allocation6], 0 }
   0x2   :  { %18 = vsyncpa [#allocation9], 0 }
   0x3   :  { %19 = vsyncpa [#allocation12], 0 }
   0x4   :  { %20 = vsyncpa [#allocation15], 0 }
   0x5   :  { %21 = vsyncpa [#allocation18], 0 }
   0x6   :  { %22 = vsyncpa [#allocation4], 0  ;;  %s9509_s17 = smov [#allocation5]  }
   0x7   :  { %s40_s18 = sshll.u32 %s9509_s17, 4  ;;  %s41_s18 = int_to_ptr.vmem [resolvable:$true] %s40_s18 }
   0x8   :  { %s9283_s19 = scalar_lea.vmem %s41_s18, 20736  ;;  %p9288_p1 = scmp.lt.s32.totalorder %s41_s18, %s41_s18 }
   0x9   :  { %p9284_p0 = scmp.ne.s32.totalorder %s41_s18, %s9283_s19  ;;  %p9289_p2 = scmp.lt.s32.totalorder %s9283_s19, %s9283_s19 }
   0xb   :  { %p9290_p3 = por %p9289_p2, %p9288_p1 }
   0xd   :  { %p9291_p4 = pnand %p9290_p3, %p9284_p0 }
   0xf   :  { %9294 = shalt.err (!%p9291_p4)
}
  0x10   :  { %s9510_s20 = smov 256   ;;  %s9511_s21 = smov 16  }
  0x11   :  { %46 = dma.hbm_to_vmem [thread:$0]  %s11260_s2, 20736, %s41_s18, [#allocation6], %s9510_s20, %s9510_s20, %s9511_s21  }
  0x12   :  { %s9512_s24 = smov [#allocation8]  }
  0x13   :  { %s64_s25 = sshll.u32 %s9512_s24, 4  ;;  %s65_s25 = int_to_ptr.vmem [resolvable:$true] %s64_s25 }
  0x14   :  { %s9303_s26 = scalar_lea.vmem %s65_s25, 14464  ;;  %p9308_p6 = scmp.lt.s32.totalorder %s65_s25, %s65_s25 }
  0x15   :  { %p9304_p5 = scmp.ne.s32.totalorder %s65_s25, %s9303_s26  ;;  %p9309_p7 = scmp.lt.s32.totalorder %s9303_s26, %s9303_s26 }
  0x17   :  { %p9310_p8 = por %p9309_p7, %p9308_p6 }
  0x19   :  { %p9311_p9 = pnand %p9310_p8, %p9304_p5 }
  0x1b   :  { %9314 = shalt.err (!%p9311_p9)
}
  0x1c   :  { %s9513_s27 = smov 128   ;;  %s9514_s28 = smov 8  }
  0x1d   :  { %70 = dma.hbm_to_vmem [thread:$0]  %s11262_s4, 14464, %s65_s25, [#allocation9], %s9513_s27, %s9513_s27, %s9514_s28  }
  0x1e   :  { %s9515_s2 = smov [#allocation11]   ;;  %s9516_s13 = smov [#allocation14]  }
  0x1f   :  { %s88_s12 = sshll.u32 %s9515_s2, 4  ;;  %s112_s14 = sshll.u32 %s9516_s13, 4  ;;  %s89_s12 = int_to_ptr.vmem [resolvable:$true] %s88_s12  ;;  %s113_s14 = int_to_ptr.vmem [resolvable:$true] %s112_s14 }
  0x20   :  { %s9323_s15 = scalar_lea.vmem %s89_s12, 7296  ;;  %p9328_p11 = scmp.lt.s32.totalorder %s89_s12, %s89_s12 }
  0x21   :  { %p9324_p10 = scmp.ne.s32.totalorder %s89_s12, %s9323_s15  ;;  %p9329_p12 = scmp.lt.s32.totalorder %s9323_s15, %s9323_s15 }
  0x23   :  { %p9330_p13 = por %p9329_p12, %p9328_p11 }
  0x25   :  { %p9331_p0 = pnand %p9330_p13, %p9324_p10 }
  0x27   :  { %9334 = shalt.err (!%p9331_p0)
}
  0x28   :  { %94 = dma.hbm_to_vmem [thread:$0]  %s11264_s6, 7296, %s89_s12, [#allocation12], %s9513_s27, %s9513_s27, %s9514_s28  }
  0x29   :  { %s9343_s4 = scalar_lea.vmem %s113_s14, 384  ;;  %p9348_p2 = scmp.lt.s32.totalorder %s113_s14, %s113_s14 }
  0x2a   :  { %p9344_p1 = scmp.ne.s32.totalorder %s113_s14, %s9343_s4  ;;  %p9349_p3 = scmp.lt.s32.totalorder %s9343_s4, %s9343_s4 }
  0x2c   :  { %p9350_p4 = por %p9349_p3, %p9348_p2 }
  0x2e   :  { %p9351_p5 = pnand %p9350_p4, %p9344_p1 }
  0x30   :  { %9354 = shalt.err (!%p9351_p5)
}
  0x31   :  { %118 = dma.hbm_to_vmem [thread:$0]  %s11266_s8, 384, %s113_s14, [#allocation15], %s9513_s27, %s9513_s27, %s9514_s28  }
  0x32   :  { %s9517_s22 = smov [#allocation2]   ;;  %s9518_s24 = smov [#allocation7]  }
  0x33   :  { %s31_s23 = sshll.u32 %s9517_s22, 4  ;;  %s52_s25 = sshll.u32 %s9518_s24, 4  ;;  %s32_s23 = int_to_ptr.vmem [resolvable:$true] %s31_s23  ;;  %s53_s25 = int_to_ptr.vmem [resolvable:$true] %s52_s25 }
  0x34   :  { %s9363_s6 = scalar_lea.vmem %s32_s23, 32  ;;  %p9368_p7 = scmp.lt.s32.totalorder %s32_s23, %s32_s23 }
  0x35   :  { %p9364_p6 = scmp.ne.s32.totalorder %s32_s23, %s9363_s6  ;;  %p9369_p8 = scmp.lt.s32.totalorder %s9363_s6, %s9363_s6 }
  0x37   :  { %p9370_p9 = por %p9369_p8, %p9368_p7 }
  0x39   :  { %p9371_p10 = pnand %p9370_p9, %p9364_p6 }
  0x3b   :  { %9374 = shalt.err (!%p9371_p10)
}
  0x3c   :  { %34 = dma.hbm_to_vmem [thread:$0]  %s11259_s1, 32, %s32_s23, [#allocation3]  }
  0x3d   :  { %s9383_s30 = scalar_lea.vmem %s53_s25, 33024  ;;  %p9388_p12 = scmp.lt.s32.totalorder %s53_s25, %s53_s25 }
  0x3e   :  { %p9384_p11 = scmp.ne.s32.totalorder %s53_s25, %s9383_s30  ;;  %p9389_p13 = scmp.lt.s32.totalorder %s9383_s30, %s9383_s30 }
  0x40   :  { %p9390_p0 = por %p9389_p13, %p9388_p12 }
  0x42   :  { %p9391_p1 = pnand %p9390_p0, %p9384_p11 }
  0x44   :  { %9394 = shalt.err (!%p9391_p1)
}
  0x45   :  { %58 = dma.hbm_to_vmem [thread:$0]  %s11261_s3, 33024, %s53_s25, [#allocation6], %s9510_s20, %s9510_s20, %s9511_s21  }
  0x46   :  { %s9519_s12 = smov [#allocation10]   ;;  %s9520_s14 = smov [#allocation13]  }
  0x47   :  { %s76_s13 = sshll.u32 %s9519_s12, 4  ;;  %s100_s15 = sshll.u32 %s9520_s14, 4  ;;  %s77_s13 = int_to_ptr.vmem [resolvable:$true] %s76_s13  ;;  %s101_s15 = int_to_ptr.vmem [resolvable:$true] %s100_s15 }
  0x48   :  { %s9403_s1 = scalar_lea.vmem %s77_s13, 8320  ;;  %p9408_p3 = scmp.lt.s32.totalorder %s77_s13, %s77_s13 }
  0x49   :  { %p9404_p2 = scmp.ne.s32.totalorder %s77_s13, %s9403_s1  ;;  %p9409_p4 = scmp.lt.s32.totalorder %s9403_s1, %s9403_s1 }
  0x4b   :  { %p9410_p5 = por %p9409_p4, %p9408_p3 }
  0x4d   :  { %p9411_p6 = pnand %p9410_p5, %p9404_p2 }
  0x4f   :  { %9414 = shalt.err (!%p9411_p6)
}
  0x50   :  { %82 = dma.hbm_to_vmem [thread:$0]  %s11263_s5, 8320, %s77_s13, [#allocation9], %s9513_s27, %s9513_s27, %s9514_s28  }
  0x51   :  { %s9423_s3 = scalar_lea.vmem %s101_s15, 4224  ;;  %p9428_p8 = scmp.lt.s32.totalorder %s101_s15, %s101_s15 }
  0x52   :  { %p9424_p7 = scmp.ne.s32.totalorder %s101_s15, %s9423_s3  ;;  %p9429_p9 = scmp.lt.s32.totalorder %s9423_s3, %s9423_s3 }
  0x54   :  { %p9430_p10 = por %p9429_p9, %p9428_p8 }
  0x56   :  { %p9431_p11 = pnand %p9430_p10, %p9424_p7 }
  0x58   :  { %9434 = shalt.err (!%p9431_p11)
}
  0x59   :  { %106 = dma.hbm_to_vmem [thread:$0]  %s11265_s7, 4224, %s101_s15, [#allocation12], %s9513_s27, %s9513_s27, %s9514_s28  }
  0x5a   :  { %s9521_s4 = smov [#allocation16]   ;;  %s9522_s19 = smov [#allocation17]  }
  0x5b   :  { %s124_s18 = sshll.u32 %s9521_s4, 4  ;;  %s136_s22 = sshll.u32 %s9522_s19, 4  ;;  %s125_s18 = int_to_ptr.vmem [resolvable:$true] %s124_s18  ;;  %s137_s22 = int_to_ptr.vmem [resolvable:$true] %s136_s22 }
  0x5c   :  { %s9443_s5 = scalar_lea.vmem %s125_s18, 640  ;;  %p9448_p13 = scmp.lt.s32.totalorder %s125_s18, %s125_s18 }
  0x5d   :  { %p9444_p12 = scmp.ne.s32.totalorder %s125_s18, %s9443_s5  ;;  %p9449_p0 = scmp.lt.s32.totalorder %s9443_s5, %s9443_s5 }
  0x5f   :  { %p9450_p1 = por %p9449_p0, %p9448_p13 }
  0x61   :  { %p9451_p2 = pnand %p9450_p1, %p9444_p12 }
  0x63   :  { %9454 = shalt.err (!%p9451_p2)
}
  0x64   :  { %130 = dma.hbm_to_vmem [thread:$0]  %s11267_s9, 640, %s125_s18, [#allocation15], %s9513_s27, %s9513_s27, %s9514_s28  }
  0x65   :  { %s9463_s7 = scalar_lea.vmem %s137_s22, 1024  ;;  %p9468_p4 = scmp.lt.s32.totalorder %s137_s22, %s137_s22 }
  0x66   :  { %p9464_p3 = scmp.ne.s32.totalorder %s137_s22, %s9463_s7  ;;  %p9469_p5 = scmp.lt.s32.totalorder %s9463_s7, %s9463_s7 }
  0x68   :  { %p9470_p6 = por %p9469_p5, %p9468_p4 }
  0x6a   :  { %p9471_p7 = pnand %p9470_p6, %p9464_p3 }
  0x6c   :  { %9474 = shalt.err (!%p9471_p7)
}
  0x6d   :  { %142 = dma.hbm_to_vmem [thread:$0]  %s11268_s10, 1024, %s137_s22, [#allocation18], %s9513_s27, %s9513_s27, %s9514_s28  }
  0x6e   :  { %9495 = dma.done.wait [#allocation3], 32  }
  0x6f   :  { %9496 = vsyncadd [#allocation3], 4294967264 }
  0x70   :  { %9497 = dma.done.wait [#allocation6], 53760  }
  0x71   :  { %9498 = vsyncadd [#allocation6], 4294913536 }
  0x72   :  { %9499 = dma.done.wait [#allocation9], 22784  }
  0x73   :  { %9500 = vsyncadd [#allocation9], 4294944512 }
  0x74   :  { %9501 = dma.done.wait [#allocation12], 11520  }
  0x75   :  { %9502 = vsyncadd [#allocation12], 4294955776 }
  0x76   :  { %9503 = dma.done.wait [#allocation15], 1024  }
  0x77   :  { %9504 = vsyncadd [#allocation15], 4294966272 }
  0x78   :  { %9505 = dma.done.wait [#allocation18], 1024  }
  0x79   :  { %9506 = vsyncadd [#allocation18], 4294966272  ;;  %v11270_v0 = vmov 0.0   ;;  %v261_v1 = vld [vmem:[#allocation5 + $0x1f8] sm:$0xff]  ;;  %v260_v3 = vld [vmem:[#allocation5 + $0x1f0] sm:$0xff]  ;;  %vm195_vm0 = vcmask 1040384  }
  0x7a   :  { %333 = vmatprep.mubr.f32.mxu0 %v11270_v0  ;;  %404 = vmatprep.mubr.f32.mxu1 %v11270_v0  ;;  %v229_v2 = vld [vmem:[#allocation5 + $0xf8] sm:$0xff]  ;;  %v228_v4 = vld [vmem:[#allocation5 + $0xf0] sm:$0xff]  ;;  %v259_v5 = vld [vmem:[#allocation5 + $0x1e8] sm:$0xff]  ;;  %vm264_vm1 = vcmask 1046528   ;;  %vm443_vm3 = vcmask 1045504   ;;  %vm1626_vm8 = vcmask 1041408  }
  0x7b   :  { %269 = vmatprep.subr.mxu0 %v261_v1  ;;  %340 = vmatprep.subr.mxu1 %v229_v2  ;;  %v227_v6 = vld [vmem:[#allocation5 + $0xe8] sm:$0xff]  ;;  %v258_v7 = vld [vmem:[#allocation5 + $0x1e0] sm:$0xff]  ;;  %v257_v9 = vld [vmem:[#allocation5 + $0x1d8] sm:$0xff]  ;;  %vm1629_vm9 = vcmask 1042432   ;;  %vm9525_vm10 = vmmov 0   ;;  %vm1947_vm11 = vcmask 1043456  }
  0x7c   :  { %270 = vmatpush1.msra.mxu0 %v260_v3  ;;  %341 = vmatpush1.msra.mxu1 %v228_v4  ;;  %v226_v8 = vld [vmem:[#allocation5 + $0xe0] sm:$0xff]  ;;  %v225_v10 = vld [vmem:[#allocation5 + $0xd8] sm:$0xff]  ;;  %v256_v11 = vld [vmem:[#allocation5 + $0x1d0] sm:$0xff]  ;;  %vm2130_vm13 = vcmask 1044480   ;;  %vm2876_vm15 = vcmask 517120  }
  0x7d   :  { %271 = vmatprep.subr.mxu0 %v259_v5  ;;  %342 = vmatprep.subr.mxu1 %v227_v6  ;;  %v224_v12 = vld [vmem:[#allocation5 + $0xd0] sm:$0xff]  ;;  %v255_v13 = vld [vmem:[#allocation5 + $0x1c8] sm:$0xff]  ;;  %v254_v15 = vld [vmem:[#allocation5 + $0x1c0] sm:$0xff] }
  0x7e   :  { %272 = vmatpush1.msra.mxu0 %v258_v7  ;;  %343 = vmatpush1.msra.mxu1 %v226_v8  ;;  %v223_v14 = vld [vmem:[#allocation5 + $0xc8] sm:$0xff]  ;;  %v222_v16 = vld [vmem:[#allocation5 + $0xc0] sm:$0xff]  ;;  %v253_v17 = vld [vmem:[#allocation5 + $0x1b8] sm:$0xff] }
  0x7f   :  { %273 = vmatprep.subr.mxu0 %v257_v9  ;;  %344 = vmatprep.subr.mxu1 %v225_v10  ;;  %v221_v18 = vld [vmem:[#allocation5 + $0xb8] sm:$0xff]  ;;  %v252_v19 = vld [vmem:[#allocation5 + $0x1b0] sm:$0xff]  ;;  %v251_v21 = vld [vmem:[#allocation5 + $0x1a8] sm:$0xff] }
  0x80   :  { %274 = vmatpush1.msra.mxu0 %v256_v11  ;;  %345 = vmatpush1.msra.mxu1 %v224_v12  ;;  %v220_v20 = vld [vmem:[#allocation5 + $0xb0] sm:$0xff]  ;;  %v219_v22 = vld [vmem:[#allocation5 + $0xa8] sm:$0xff]  ;;  %v250_v23 = vld [vmem:[#allocation5 + $0x1a0] sm:$0xff] }
  0x81   :  { %275 = vmatprep.subr.mxu0 %v255_v13  ;;  %346 = vmatprep.subr.mxu1 %v223_v14  ;;  %v218_v24 = vld [vmem:[#allocation5 + $0xa0] sm:$0xff]  ;;  %v249_v25 = vld [vmem:[#allocation5 + $0x198] sm:$0xff]  ;;  %v248_v27 = vld [vmem:[#allocation5 + $0x190] sm:$0xff] }
  0x82   :  { %276 = vmatpush1.msra.mxu0 %v254_v15  ;;  %347 = vmatpush1.msra.mxu1 %v222_v16  ;;  %v217_v26 = vld [vmem:[#allocation5 + $0x98] sm:$0xff]  ;;  %v216_v28 = vld [vmem:[#allocation5 + $0x90] sm:$0xff]  ;;  %v247_v29 = vld [vmem:[#allocation5 + $0x188] sm:$0xff] }
  0x83   :  { %277 = vmatprep.subr.mxu0 %v253_v17  ;;  %348 = vmatprep.subr.mxu1 %v221_v18  ;;  %v215_v30 = vld [vmem:[#allocation5 + $0x88] sm:$0xff]  ;;  %v246_v31 = vld [vmem:[#allocation5 + $0x180] sm:$0xff]  ;;  %v245_v33 = vld [vmem:[#allocation5 + $0x178] sm:$0xff] }
  0x84   :  { %278 = vmatpush1.msra.mxu0 %v252_v19  ;;  %349 = vmatpush1.msra.mxu1 %v220_v20  ;;  %v214_v32 = vld [vmem:[#allocation5 + $0x80] sm:$0xff]  ;;  %v213_v34 = vld [vmem:[#allocation5 + $0x78] sm:$0xff]  ;;  %v244_v35 = vld [vmem:[#allocation5 + $0x170] sm:$0xff] }
  0x85   :  { %279 = vmatprep.subr.mxu0 %v251_v21  ;;  %350 = vmatprep.subr.mxu1 %v219_v22  ;;  %v212_v36 = vld [vmem:[#allocation5 + $0x70] sm:$0xff]  ;;  %v243_v37 = vld [vmem:[#allocation5 + $0x168] sm:$0xff]  ;;  %v242_v39 = vld [vmem:[#allocation5 + $0x160] sm:$0xff] }
  0x86   :  { %280 = vmatpush1.msra.mxu0 %v250_v23  ;;  %351 = vmatpush1.msra.mxu1 %v218_v24  ;;  %v211_v38 = vld [vmem:[#allocation5 + $0x68] sm:$0xff]  ;;  %v210_v40 = vld [vmem:[#allocation5 + $0x60] sm:$0xff]  ;;  %v241_v41 = vld [vmem:[#allocation5 + $0x158] sm:$0xff] }
  0x87   :  { %281 = vmatprep.subr.mxu0 %v249_v25  ;;  %352 = vmatprep.subr.mxu1 %v217_v26  ;;  %v209_v42 = vld [vmem:[#allocation5 + $0x58] sm:$0xff]  ;;  %v240_v43 = vld [vmem:[#allocation5 + $0x150] sm:$0xff]  ;;  %v239_v45 = vld [vmem:[#allocation5 + $0x148] sm:$0xff] }
  0x88   :  { %282 = vmatpush1.msra.mxu0 %v248_v27  ;;  %353 = vmatpush1.msra.mxu1 %v216_v28  ;;  %v208_v44 = vld [vmem:[#allocation5 + $0x50] sm:$0xff]  ;;  %v207_v46 = vld [vmem:[#allocation5 + $0x48] sm:$0xff]  ;;  %v238_v47 = vld [vmem:[#allocation5 + $0x140] sm:$0xff] }
  0x89   :  { %283 = vmatprep.subr.mxu0 %v247_v29  ;;  %354 = vmatprep.subr.mxu1 %v215_v30  ;;  %v206_v48 = vld [vmem:[#allocation5 + $0x40] sm:$0xff]  ;;  %v237_v50 = vld [vmem:[#allocation5 + $0x138] sm:$0xff]  ;;  %v236_v53 = vld [vmem:[#allocation5 + $0x130] sm:$0xff] }
  0x8a   :  { %284 = vmatpush1.msra.mxu0 %v246_v31  ;;  %355 = vmatpush1.msra.mxu1 %v214_v32  ;;  %v191_v49 = vld [vmem:[%s11258_s0] sm:$0xff]  ;;  %v204_v54 = vld [vmem:[#allocation5 + $0x30] sm:$0xff]  ;;  %v235_v55 = vld [vmem:[#allocation5 + $0x128] sm:$0xff] }
  0x8b   :  { %285 = vmatprep.subr.mxu0 %v245_v33  ;;  %356 = vmatprep.subr.mxu1 %v213_v34  ;;  %v205_v51 = vld [vmem:[#allocation5 + $0x38] sm:$0xff]  ;;  %v193_v52 = vrot.slane %v191_v49, 7  ;;  %v203_v56 = vld [vmem:[#allocation5 + $0x28] sm:$0xff]  ;;  %v234_v59 = vld [vmem:[#allocation5 + $0x120] sm:$0xff] }
  0x8c   :  { %286 = vmatpush1.msra.mxu0 %v244_v35  ;;  %357 = vmatpush1.msra.mxu1 %v212_v36  ;;  %v202_v60 = vld [vmem:[#allocation5 + $0x20] sm:$0xff]  ;;  %v233_v61 = vld [vmem:[#allocation5 + $0x118] sm:$0xff]  ;;  %v232_v2 = vld [vmem:[#allocation5 + $0x110] sm:$0xff] }
  0x8d   :  { %287 = vmatprep.subr.mxu0 %v243_v37  ;;  %358 = vmatprep.subr.mxu1 %v211_v38  ;;  %v9650_v57 = vsel %vm195_vm0, 0.0, %v193_v52  ;;  %v9653_v58 = vsel %vm195_vm0, %v193_v52, 0.0  ;;  %v201_v62 = vld [vmem:[#allocation5 + $0x18] sm:$0xff]  ;;  %v200_v3 = vld [vmem:[#allocation5 + $0x10] sm:$0xff]  ;;  %v231_v4 = vld [vmem:[#allocation5 + $0x108] sm:$0xff] }
  0x8e   :  { %288 = vmatpush1.msra.mxu0 %v242_v39  ;;  %359 = vmatpush1.msra.mxu1 %v210_v40  ;;  %v265_v63 = vrot.slane %v9650_v57, 1  ;;  %v266_v1 = vrot.slane %v9653_v58, 1  ;;  %v199_v5 = vld [vmem:[#allocation5 + $0x8] sm:$0xff]  ;;  %v230_v6 = vld [vmem:[#allocation5 + $0x100] sm:$0xff]  ;;  %vm9659_vm2 = vmneg %vm195_vm0 }
  0x8f   :  { %289 = vmatprep.subr.mxu0 %v241_v41  ;;  %360 = vmatprep.subr.mxu1 %v209_v42  ;;  %v198_v7 = vld [vmem:[#allocation5] sm:$0xff]  ;;  %v442_v10 = vld [vmem:[#allocation5 + $0x2f8] sm:$0xff]  ;;  %v441_v11 = vld [vmem:[#allocation5 + $0x2f0] sm:$0xff] }
  0x90   :  { %290 = vmatpush1.msra.mxu0 %v240_v43  ;;  %361 = vmatpush1.msra.mxu1 %v208_v44  ;;  %v267_v8 = vsel %vm264_vm1, %v265_v63, %v266_v1  ;;  %v9663_v12 = vld [vmem:[#allocation5 + $0x3f8] sm:$0xff]  ;;  %v440_v13 = vld [vmem:[#allocation5 + $0x2e8] sm:$0xff]  ;;  %v9667_v14 = vld [vmem:[#allocation5 + $0x3f0] sm:$0xff] }
  0x91   :  { %291 = vmatprep.subr.mxu0 %v239_v45  ;;  %362 = vmatprep.subr.mxu1 %v207_v46  ;;  %v439_v15 = vld [vmem:[#allocation5 + $0x2e0] sm:$0xff]  ;;  %v9670_v16 = vld [vmem:[#allocation5 + $0x3e8] sm:$0xff]  ;;  %v438_v17 = vld [vmem:[#allocation5 + $0x2d8] sm:$0xff] }
  0x92   :  { %292 = vmatpush1.msra.mxu0 %v238_v47  ;;  %363 = vmatpush1.msra.mxu1 %v206_v48  ;;  %v9673_v18 = vld [vmem:[#allocation5 + $0x3e0] sm:$0xff]  ;;  %v437_v19 = vld [vmem:[#allocation5 + $0x2d0] sm:$0xff]  ;;  %v9676_v20 = vld [vmem:[#allocation5 + $0x3d8] sm:$0xff] }
  0x93   :  { %293 = vmatprep.subr.mxu0 %v237_v50  ;;  %364 = vmatprep.subr.mxu1 %v205_v51  ;;  %v436_v21 = vld [vmem:[#allocation5 + $0x2c8] sm:$0xff]  ;;  %v9679_v22 = vld [vmem:[#allocation5 + $0x3d0] sm:$0xff]  ;;  %v435_v23 = vld [vmem:[#allocation5 + $0x2c0] sm:$0xff] }
  0x94   :  { %294 = vmatpush1.msra.mxu0 %v236_v53  ;;  %365 = vmatpush1.msra.mxu1 %v204_v54  ;;  %v9682_v24 = vld [vmem:[#allocation5 + $0x3c8] sm:$0xff]  ;;  %v434_v25 = vld [vmem:[#allocation5 + $0x2b8] sm:$0xff]  ;;  %v9685_v26 = vld [vmem:[#allocation5 + $0x3c0] sm:$0xff]  ;;  %v444_v53 = vrot.slane %v9650_v57, 2  ;;  %v445_v54 = vrot.slane %v9653_v58, 2 }
  0x95   :  { %295 = vmatprep.subr.mxu0 %v235_v55  ;;  %366 = vmatprep.subr.mxu1 %v203_v56  ;;  %v433_v27 = vld [vmem:[#allocation5 + $0x2b0] sm:$0xff]  ;;  %v9688_v28 = vld [vmem:[#allocation5 + $0x3b8] sm:$0xff]  ;;  %v432_v29 = vld [vmem:[#allocation5 + $0x2a8] sm:$0xff] }
  0x96   :  { %296 = vmatpush1.msra.mxu0 %v234_v59  ;;  %367 = vmatpush1.msra.mxu1 %v202_v60  ;;  %v9691_v30 = vld [vmem:[#allocation5 + $0x3b0] sm:$0xff]  ;;  %v431_v31 = vld [vmem:[#allocation5 + $0x2a0] sm:$0xff]  ;;  %v9694_v32 = vld [vmem:[#allocation5 + $0x3a8] sm:$0xff]  ;;  %v446_v60 = vsel %vm443_vm3, %v444_v53, %v445_v54 }
  0x97   :  { %297 = vmatprep.subr.mxu0 %v233_v61  ;;  %368 = vmatprep.subr.mxu1 %v201_v62  ;;  %v430_v33 = vld [vmem:[#allocation5 + $0x298] sm:$0xff]  ;;  %v9697_v34 = vld [vmem:[#allocation5 + $0x3a0] sm:$0xff]  ;;  %v429_v35 = vld [vmem:[#allocation5 + $0x290] sm:$0xff] }
  0x98   :  { %298 = vmatpush1.msra.mxu0 %v232_v2  ;;  %369 = vmatpush1.msra.mxu1 %v200_v3  ;;  %v540_v36 = vld [vmem:[#allocation5 + $0x398] sm:$0xff]  ;;  %v428_v37 = vld [vmem:[#allocation5 + $0x288] sm:$0xff]  ;;  %v539_v38 = vld [vmem:[#allocation5 + $0x390] sm:$0xff] }
  0x99   :  { %299 = vmatprep.subr.mxu0 %v231_v4  ;;  %370 = vmatprep.subr.mxu1 %v199_v5  ;;  %v427_v39 = vld [vmem:[#allocation5 + $0x280] sm:$0xff]  ;;  %v426_v40 = vld [vmem:[#allocation5 + $0x278] sm:$0xff]  ;;  %v425_v41 = vld [vmem:[#allocation5 + $0x270] sm:$0xff] }
  0x9a   :  { %300 = vmatpush1.msra.mxu0 %v230_v6  ;;  %371 = vmatpush1.msra.mxu1 %v198_v7  ;;  %v424_v42 = vld [vmem:[#allocation5 + $0x268] sm:$0xff]  ;;  %v423_v43 = vld [vmem:[#allocation5 + $0x260] sm:$0xff]  ;;  %v422_v44 = vld [vmem:[#allocation5 + $0x258] sm:$0xff] }
  0x9b   :  { %334 = vmatmul.mubr.f32.vlgmr.msra.gmra.mxu0 %v267_v8  ;;  %6712 = vmatmul.mubr.msk.f32.vlgmr.msra.gmra.mxu1 %vm9659_vm2, %v193_v52  ;;  %v421_v45 = vld [vmem:[#allocation5 + $0x250] sm:$0xff]  ;;  %v420_v46 = vld [vmem:[#allocation5 + $0x248] sm:$0xff]  ;;  %v419_v47 = vld [vmem:[#allocation5 + $0x240] sm:$0xff] }
  0x9c   :  { %448 = vmatprep.subr.mxu0 %v442_v10  ;;  %512 = vmatprep.mubr.f32.mxu0 %v11270_v0  ;;  %v418_v48 = vld [vmem:[#allocation5 + $0x238] sm:$0xff]  ;;  %v417_v49 = vld [vmem:[#allocation5 + $0x230] sm:$0xff]  ;;  %v416_v50 = vld [vmem:[#allocation5 + $0x228] sm:$0xff] }
  0x9d   :  { %449 = vmatpush1.msra.mxu0 %v441_v11  ;;  %615 = vmatprep.subr.mxu1 %v9663_v12  ;;  %v415_v51 = vld [vmem:[#allocation5 + $0x220] sm:$0xff]  ;;  %v414_v52 = vld [vmem:[#allocation5 + $0x218] sm:$0xff]  ;;  %v413_v55 = vld [vmem:[#allocation5 + $0x210] sm:$0xff] }
  0x9e   :  { %450 = vmatprep.subr.mxu0 %v440_v13  ;;  %616 = vmatpush1.msra.mxu1 %v9667_v14  ;;  %v412_v56 = vld [vmem:[#allocation5 + $0x208] sm:$0xff]  ;;  %v411_v59 = vld [vmem:[#allocation5 + $0x200] sm:$0xff]  ;;  %v536_v61 = vld [vmem:[#allocation5 + $0x378] sm:$0xff] }
  0x9f   :  { %451 = vmatpush1.msra.mxu0 %v439_v15  ;;  %617 = vmatprep.subr.mxu1 %v9670_v16  ;;  %v538_v57 = vld [vmem:[#allocation5 + $0x388] sm:$0xff]  ;;  %v537_v58 = vld [vmem:[#allocation5 + $0x380] sm:$0xff]  ;;  %v535_v62 = vld [vmem:[#allocation5 + $0x370] sm:$0xff] }
  0xa0   :  { %452 = vmatprep.subr.mxu0 %v438_v17  ;;  %618 = vmatpush1.msra.mxu1 %v9673_v18  ;;  %v534_v63 = vld [vmem:[#allocation5 + $0x368] sm:$0xff]  ;;  %v533_v1 = vld [vmem:[#allocation5 + $0x360] sm:$0xff]  ;;  %v532_v2 = vld [vmem:[#allocation5 + $0x358] sm:$0xff] }
  0xa1   :  { %453 = vmatpush1.msra.mxu0 %v437_v19  ;;  %619 = vmatprep.subr.mxu1 %v9676_v20  ;;  %v531_v3 = vld [vmem:[#allocation5 + $0x350] sm:$0xff]  ;;  %v530_v4 = vld [vmem:[#allocation5 + $0x348] sm:$0xff]  ;;  %v529_v5 = vld [vmem:[#allocation5 + $0x340] sm:$0xff] }
  0xa2   :  { %454 = vmatprep.subr.mxu0 %v436_v21  ;;  %620 = vmatpush1.msra.mxu1 %v9679_v22  ;;  %v528_v6 = vld [vmem:[#allocation5 + $0x338] sm:$0xff]  ;;  %v527_v7 = vld [vmem:[#allocation5 + $0x330] sm:$0xff]  ;;  %v526_v8 = vld [vmem:[#allocation5 + $0x328] sm:$0xff] }
  0xa3   :  { %455 = vmatpush1.msra.mxu0 %v435_v23  ;;  %621 = vmatprep.subr.mxu1 %v9682_v24  ;;  %v525_v10 = vld [vmem:[#allocation5 + $0x320] sm:$0xff]  ;;  %v524_v11 = vld [vmem:[#allocation5 + $0x318] sm:$0xff]  ;;  %v522_v13 = vld [vmem:[#allocation5 + $0x308] sm:$0xff] }
  0xa4   :  { %456 = vmatprep.subr.mxu0 %v434_v25  ;;  %622 = vmatpush1.msra.mxu1 %v9685_v26  ;;  %v584_v15 = vld [vmem:[#allocation5 + $0x4f8] sm:$0xff]  ;;  %v582_v17 = vld [vmem:[#allocation5 + $0x4e8] sm:$0xff] }
  0xa5   :  { %457 = vmatpush1.msra.mxu0 %v433_v27  ;;  %623 = vmatprep.subr.mxu1 %v9688_v28  ;;  %v580_v19 = vld [vmem:[#allocation5 + $0x4d8] sm:$0xff]  ;;  %v578_v21 = vld [vmem:[#allocation5 + $0x4c8] sm:$0xff] }
  0xa6   :  { %458 = vmatprep.subr.mxu0 %v432_v29  ;;  %624 = vmatpush1.msra.mxu1 %v9691_v30  ;;  %v576_v23 = vld [vmem:[#allocation5 + $0x4b8] sm:$0xff]  ;;  %v574_v25 = vld [vmem:[#allocation5 + $0x4a8] sm:$0xff] }
  0xa7   :  { %459 = vmatpush1.msra.mxu0 %v431_v31  ;;  %625 = vmatprep.subr.mxu1 %v9694_v32  ;;  %v572_v27 = vld [vmem:[#allocation5 + $0x498] sm:$0xff]  ;;  %v570_v29 = vld [vmem:[#allocation5 + $0x488] sm:$0xff] }
  0xa8   :  { %460 = vmatprep.subr.mxu0 %v430_v33  ;;  %626 = vmatpush1.msra.mxu1 %v9697_v34  ;;  %v568_v31 = vld [vmem:[#allocation5 + $0x478] sm:$0xff]  ;;  %v566_v33 = vld [vmem:[#allocation5 + $0x468] sm:$0xff] }
  0xa9   :  { %461 = vmatpush1.msra.mxu0 %v429_v35  ;;  %627 = vmatprep.subr.mxu1 %v540_v36  ;;  %v564_v35 = vld [vmem:[#allocation5 + $0x458] sm:$0xff] }
  0xaa   :  { %462 = vmatprep.subr.mxu0 %v428_v37  ;;  %628 = vmatpush1.msra.mxu1 %v539_v38  ;;  %v562_v37 = vld [vmem:[#allocation5 + $0x448] sm:$0xff] }
  0xab   :  { %463 = vmatpush1.msra.mxu0 %v427_v39  ;;  %629 = vmatprep.subr.mxu1 %v538_v57  ;;  %v560_v39 = vld [vmem:[#allocation5 + $0x438] sm:$0xff] }
  0xac   :  { %464 = vmatprep.subr.mxu0 %v426_v40  ;;  %630 = vmatpush1.msra.mxu1 %v537_v58  ;;  %v559_v40 = vld [vmem:[#allocation5 + $0x430] sm:$0xff] }
  0xad   :  { %465 = vmatpush1.msra.mxu0 %v425_v41  ;;  %631 = vmatprep.subr.mxu1 %v536_v61  ;;  %v558_v41 = vld [vmem:[#allocation5 + $0x428] sm:$0xff] }
  0xae   :  { %466 = vmatprep.subr.mxu0 %v424_v42  ;;  %632 = vmatpush1.msra.mxu1 %v535_v62  ;;  %v557_v42 = vld [vmem:[#allocation5 + $0x420] sm:$0xff] }
  0xaf   :  { %467 = vmatpush1.msra.mxu0 %v423_v43  ;;  %633 = vmatprep.subr.mxu1 %v534_v63  ;;  %v556_v43 = vld [vmem:[#allocation5 + $0x418] sm:$0xff] }
  0xb0   :  { %468 = vmatprep.subr.mxu0 %v422_v44  ;;  %634 = vmatpush1.msra.mxu1 %v533_v1  ;;  %v555_v44 = vld [vmem:[#allocation5 + $0x410] sm:$0xff] }
  0xb1   :  { %469 = vmatpush1.msra.mxu0 %v421_v45  ;;  %635 = vmatprep.subr.mxu1 %v532_v2  ;;  %v554_v45 = vld [vmem:[#allocation5 + $0x408] sm:$0xff] }
  0xb2   :  { %470 = vmatprep.subr.mxu0 %v420_v46  ;;  %636 = vmatpush1.msra.mxu1 %v531_v3  ;;  %v553_v46 = vld [vmem:[#allocation5 + $0x400] sm:$0xff] }
  0xb3   :  { %471 = vmatpush1.msra.mxu0 %v419_v47  ;;  %637 = vmatprep.subr.mxu1 %v530_v4  ;;  %v867_v47 = vld [vmem:[#allocation7 + $0xf8] sm:$0xff] }
  0xb4   :  { %472 = vmatprep.subr.mxu0 %v418_v48  ;;  %638 = vmatpush1.msra.mxu1 %v529_v5  ;;  %v931_v48 = vld [vmem:[#allocation7 + $0x2f8] sm:$0xff] }
  0xb5   :  { %473 = vmatpush1.msra.mxu0 %v417_v49  ;;  %639 = vmatprep.subr.mxu1 %v528_v6 }
  0xb6   :  { %474 = vmatprep.subr.mxu0 %v416_v50  ;;  %640 = vmatpush1.msra.mxu1 %v527_v7 }
  0xb7   :  { %475 = vmatpush1.msra.mxu0 %v415_v51  ;;  %641 = vmatprep.subr.mxu1 %v526_v8 }
  0xb8   :  { %476 = vmatprep.subr.mxu0 %v414_v52  ;;  %642 = vmatpush1.msra.mxu1 %v525_v10 }
  0xb9   :  { %477 = vmatpush1.msra.mxu0 %v413_v55  ;;  %643 = vmatprep.subr.mxu1 %v524_v11 }
  0xba   :  { %478 = vmatprep.subr.mxu0 %v412_v56 }
  0xbb   :  { %479 = vmatpush1.msra.mxu0 %v411_v59 }
  0xbc   :  { %513 = vmatmul.mubr.f32.vlgmr.msra.gmra.mxu0 %v446_v60  ;;  %686 = vmatprep.subr.mxu0 %v9663_v12  ;;  %v523_v12 = vld [vmem:[#allocation5 + $0x310] sm:$0xff] }
  0xbd   :  { %687 = vmatpush1.msra.mxu0 %v9667_v14  ;;  %v521_v14 = vld [vmem:[#allocation5 + $0x300] sm:$0xff]  ;;  %644 = vmatpush1.msra.mxu1 %v523_v12 }
  0xbe   :  { %688 = vmatprep.subr.mxu0 %v9670_v16  ;;  %645 = vmatprep.subr.mxu1 %v522_v13  ;;  %v583_v16 = vld [vmem:[#allocation5 + $0x4f0] sm:$0xff] }
  0xbf   :  { %689 = vmatpush1.msra.mxu0 %v9673_v18  ;;  %646 = vmatpush1.msra.mxu1 %v521_v14  ;;  %v581_v18 = vld [vmem:[#allocation5 + $0x4e0] sm:$0xff] }
  0xc0   :  { %690 = vmatprep.subr.mxu0 %v9676_v20  ;;  %647 = vmatprep.subr.mxu1 %v584_v15  ;;  %v579_v20 = vld [vmem:[#allocation5 + $0x4d0] sm:$0xff] }
  0xc1   :  { %691 = vmatpush1.msra.mxu0 %v9679_v22  ;;  %648 = vmatpush2.msra.mxu1 %v583_v16  ;;  %v577_v22 = vld [vmem:[#allocation5 + $0x4c0] sm:$0xff] }
  0xc2   :  { %692 = vmatprep.subr.mxu0 %v9682_v24  ;;  %649 = vmatprep.subr.mxu1 %v582_v17  ;;  %v575_v24 = vld [vmem:[#allocation5 + $0x4b0] sm:$0xff] }
  0xc3   :  { %693 = vmatpush1.msra.mxu0 %v9685_v26  ;;  %650 = vmatpush2.msra.mxu1 %v581_v18  ;;  %v573_v26 = vld [vmem:[#allocation5 + $0x4a0] sm:$0xff] }
  0xc4   :  { %694 = vmatprep.subr.mxu0 %v9688_v28  ;;  %651 = vmatprep.subr.mxu1 %v580_v19  ;;  %v571_v28 = vld [vmem:[#allocation5 + $0x490] sm:$0xff] }
  0xc5   :  { %695 = vmatpush1.msra.mxu0 %v9691_v30  ;;  %652 = vmatpush2.msra.mxu1 %v579_v20  ;;  %v569_v30 = vld [vmem:[#allocation5 + $0x480] sm:$0xff] }
  0xc6   :  { %696 = vmatprep.subr.mxu0 %v9694_v32  ;;  %653 = vmatprep.subr.mxu1 %v578_v21  ;;  %v567_v32 = vld [vmem:[#allocation5 + $0x470] sm:$0xff] }
  0xc7   :  { %697 = vmatpush1.msra.mxu0 %v9697_v34  ;;  %654 = vmatpush2.msra.mxu1 %v577_v22  ;;  %v565_v34 = vld [vmem:[#allocation5 + $0x460] sm:$0xff] }
  0xc8   :  { %698 = vmatprep.subr.mxu0 %v540_v36  ;;  %655 = vmatprep.subr.mxu1 %v576_v23  ;;  %v563_v36 = vld [vmem:[#allocation5 + $0x450] sm:$0xff] }
  0xc9   :  { %699 = vmatpush1.msra.mxu0 %v539_v38  ;;  %656 = vmatpush2.msra.mxu1 %v575_v24  ;;  %v561_v38 = vld [vmem:[#allocation5 + $0x440] sm:$0xff] }
  0xca   :  { %700 = vmatprep.subr.mxu0 %v538_v57  ;;  %657 = vmatprep.subr.mxu1 %v574_v25 }
  0xcb   :  { %701 = vmatpush1.msra.mxu0 %v537_v58  ;;  %658 = vmatpush2.msra.mxu1 %v573_v26 }
  0xcc   :  { %702 = vmatprep.subr.mxu0 %v536_v61  ;;  %659 = vmatprep.subr.mxu1 %v572_v27 }
  0xcd   :  { %703 = vmatpush1.msra.mxu0 %v535_v62  ;;  %660 = vmatpush2.msra.mxu1 %v571_v28 }
  0xce   :  { %704 = vmatprep.subr.mxu0 %v534_v63  ;;  %661 = vmatprep.subr.mxu1 %v570_v29 }
  0xcf   :  { %705 = vmatpush1.msra.mxu0 %v533_v1  ;;  %662 = vmatpush2.msra.mxu1 %v569_v30 }
  0xd0   :  { %706 = vmatprep.subr.mxu0 %v532_v2  ;;  %663 = vmatprep.subr.mxu1 %v568_v31 }
  0xd1   :  { %707 = vmatpush1.msra.mxu0 %v531_v3  ;;  %664 = vmatpush2.msra.mxu1 %v567_v32 }
  0xd2   :  { %708 = vmatprep.subr.mxu0 %v530_v4  ;;  %665 = vmatprep.subr.mxu1 %v566_v33 }
  0xd3   :  { %709 = vmatpush1.msra.mxu0 %v529_v5  ;;  %666 = vmatpush2.msra.mxu1 %v565_v34 }
  0xd4   :  { %710 = vmatprep.subr.mxu0 %v528_v6  ;;  %667 = vmatprep.subr.mxu1 %v564_v35 }
  0xd5   :  { %711 = vmatpush1.msra.mxu0 %v527_v7  ;;  %668 = vmatpush2.msra.mxu1 %v563_v36 }
  0xd6   :  { %712 = vmatprep.subr.mxu0 %v526_v8  ;;  %669 = vmatprep.subr.mxu1 %v562_v37 }
  0xd7   :  { %713 = vmatpush1.msra.mxu0 %v525_v10  ;;  %670 = vmatpush2.msra.mxu1 %v561_v38 }
  0xd8   :  { %714 = vmatprep.subr.mxu0 %v524_v11  ;;  %671 = vmatprep.subr.mxu1 %v560_v39 }
  0xd9   :  { %715 = vmatpush1.msra.mxu0 %v523_v12  ;;  %672 = vmatpush2.msra.mxu1 %v559_v40 }
  0xda   :  { %716 = vmatprep.subr.mxu0 %v522_v13  ;;  %673 = vmatprep.subr.mxu1 %v558_v41 }
  0xdb   :  { %717 = vmatpush1.msra.mxu0 %v521_v14  ;;  %674 = vmatpush2.msra.mxu1 %v557_v42 }
  0xdc   :  { %718 = vmatprep.subr.mxu0 %v584_v15  ;;  %675 = vmatprep.subr.mxu1 %v556_v43 }
  0xdd   :  { %719 = vmatpush2.msra.mxu0 %v583_v16  ;;  %676 = vmatpush2.msra.mxu1 %v555_v44 }
  0xde   :  { %720 = vmatprep.subr.mxu0 %v582_v17  ;;  %677 = vmatprep.subr.mxu1 %v554_v45 }
  0xdf   :  { %721 = vmatpush2.msra.mxu0 %v581_v18  ;;  %678 = vmatpush2.msra.mxu1 %v553_v46 }
  0xe0   :  { %722 = vmatprep.subr.mxu0 %v580_v19  ;;  %976 = vmatprep.subr.mxu1 %v931_v48  ;;  %v917_v48 = vld [vmem:[#allocation7 + $0x288] sm:$0xff] }
  0xe1   :  { %723 = vmatpush2.msra.mxu0 %v579_v20 }
  0xe2   :  { %724 = vmatprep.subr.mxu0 %v578_v21  ;;  %v930_v21 = vld [vmem:[#allocation7 + $0x2f0] sm:$0xff] }
  0xe3   :  { %725 = vmatpush2.msra.mxu0 %v577_v22 }
  0xe4   :  { %726 = vmatprep.subr.mxu0 %v576_v23  ;;  %v929_v23 = vld [vmem:[#allocation7 + $0x2e8] sm:$0xff] }
  0xe5   :  { %727 = vmatpush2.msra.mxu0 %v575_v24 }
  0xe6   :  { %728 = vmatprep.subr.mxu0 %v574_v25  ;;  %v866_v25 = vld [vmem:[#allocation7 + $0xf0] sm:$0xff] }
  0xe7   :  { %729 = vmatpush2.msra.mxu0 %v573_v26  ;;  %v928_v26 = vld [vmem:[#allocation7 + $0x2e0] sm:$0xff] }
  0xe8   :  { %730 = vmatprep.subr.mxu0 %v572_v27  ;;  %v865_v27 = vld [vmem:[#allocation7 + $0xe8] sm:$0xff] }
  0xe9   :  { %731 = vmatpush2.msra.mxu0 %v571_v28  ;;  %v927_v28 = vld [vmem:[#allocation7 + $0x2d8] sm:$0xff] }
  0xea   :  { %732 = vmatprep.subr.mxu0 %v570_v29  ;;  %v864_v29 = vld [vmem:[#allocation7 + $0xe0] sm:$0xff] }
  0xeb   :  { %733 = vmatpush2.msra.mxu0 %v569_v30  ;;  %v926_v30 = vld [vmem:[#allocation7 + $0x2d0] sm:$0xff] }
  0xec   :  { %734 = vmatprep.subr.mxu0 %v568_v31  ;;  %v863_v31 = vld [vmem:[#allocation7 + $0xd8] sm:$0xff] }
  0xed   :  { %735 = vmatpush2.msra.mxu0 %v567_v32  ;;  %v925_v32 = vld [vmem:[#allocation7 + $0x2c8] sm:$0xff] }
  0xee   :  { %736 = vmatprep.subr.mxu0 %v566_v33  ;;  %v862_v33 = vld [vmem:[#allocation7 + $0xd0] sm:$0xff] }
  0xef   :  { %737 = vmatpush2.msra.mxu0 %v565_v34  ;;  %v924_v34 = vld [vmem:[#allocation7 + $0x2c0] sm:$0xff] }
  0xf0   :  { %738 = vmatprep.subr.mxu0 %v564_v35  ;;  %v861_v35 = vld [vmem:[#allocation7 + $0xc8] sm:$0xff] }
  0xf1   :  { %739 = vmatpush2.msra.mxu0 %v563_v36  ;;  %v923_v36 = vld [vmem:[#allocation7 + $0x2b8] sm:$0xff] }
  0xf2   :  { %740 = vmatprep.subr.mxu0 %v562_v37  ;;  %v860_v37 = vld [vmem:[#allocation7 + $0xc0] sm:$0xff] }
  0xf3   :  { %741 = vmatpush2.msra.mxu0 %v561_v38  ;;  %v922_v38 = vld [vmem:[#allocation7 + $0x2b0] sm:$0xff] }
  0xf4   :  { %742 = vmatprep.subr.mxu0 %v560_v39  ;;  %v859_v39 = vld [vmem:[#allocation7 + $0xb8] sm:$0xff] }
  0xf5   :  { %743 = vmatpush2.msra.mxu0 %v559_v40  ;;  %v921_v40 = vld [vmem:[#allocation7 + $0x2a8] sm:$0xff] }
  0xf6   :  { %744 = vmatprep.subr.mxu0 %v558_v41  ;;  %v858_v41 = vld [vmem:[#allocation7 + $0xb0] sm:$0xff] }
  0xf7   :  { %745 = vmatpush2.msra.mxu0 %v557_v42  ;;  %v920_v42 = vld [vmem:[#allocation7 + $0x2a0] sm:$0xff] }
  0xf8   :  { %746 = vmatprep.subr.mxu0 %v556_v43  ;;  %v857_v43 = vld [vmem:[#allocation7 + $0xa8] sm:$0xff] }
  0xf9   :  { %747 = vmatpush2.msra.mxu0 %v555_v44  ;;  %v919_v44 = vld [vmem:[#allocation7 + $0x298] sm:$0xff] }
  0xfa   :  { %748 = vmatprep.subr.mxu0 %v554_v45  ;;  %v856_v45 = vld [vmem:[#allocation7 + $0xa0] sm:$0xff] }
  0xfb   :  { %749 = vmatpush2.msra.mxu0 %v553_v46  ;;  %v918_v46 = vld [vmem:[#allocation7 + $0x290] sm:$0xff] }
  0xfc   :  { %1047 = vmatprep.subr.mxu0 %v867_v47  ;;  %v855_v47 = vld [vmem:[#allocation7 + $0x98] sm:$0xff] }
 0x15b   :  { %v335_v49 = vpop.f32.mrf.mxu0  ;;  %v406_v50 = vpop.f32.mrf.mxu1 }
 0x15c   :  { %v407_v53 = vadd.f32 %v406_v50, %v335_v49  ;;  %v854_v49 = vld [vmem:[#allocation7 + $0x90] sm:$0xff]  ;;  %v916_v50 = vld [vmem:[#allocation7 + $0x280] sm:$0xff] }
 0x15d   :  { %v337_v51 = vpop.f32.mrf.mxu0  ;;  %v408_v52 = vpop.f32.mrf.mxu1 }
 0x15e   :  { %v409_v55 = vadd.f32 %v408_v52, %v337_v51  ;;  %v853_v51 = vld [vmem:[#allocation7 + $0x88] sm:$0xff]  ;;  %v915_v52 = vld [vmem:[#allocation7 + $0x278] sm:$0xff] }
 0x17c   :  { %v514_v54 = vpop.f32.mrf.mxu0 }
 0x17d   :  { %v9717_v56 = vadd.f32 %v514_v54, %v407_v53  ;;  %v852_v53 = vld [vmem:[#allocation7 + $0x80] sm:$0xff]  ;;  %v914_v54 = vld [vmem:[#allocation7 + $0x270] sm:$0xff] }
 0x17e   :  { %v516_v59 = vpop.f32.mrf.mxu0 }
 0x17f   :  { %v589_v60 = vrot.slane %v9717_v56, 4  ;;  %v601_v57 = vmul.f32 %v9717_v56, %v9717_v56  ;;  %v9722_v58 = vadd.f32 %v516_v59, %v409_v55  ;;  %v851_v55 = vld [vmem:[#allocation7 + $0x78] sm:$0xff]  ;;  %v850_v59 = vld [vmem:[#allocation7 + $0x70] sm:$0xff] }
 0x181   :  { %v590_v61 = vadd.f32 %v589_v60, %v9717_v56  ;;  %v603_v62 = vrot.slane %v601_v57, 4  ;;  %v595_v63 = vrot.slane %v9722_v58, 4  ;;  %v602_v1 = vmul.f32 %v9722_v58, %v9722_v58  ;;  %v849_v60 = vld [vmem:[#allocation7 + $0x68] sm:$0xff] }
 0x183   :  { %v591_v2 = vrot.slane %v590_v61, 2  ;;  %v604_v3 = vadd.f32 %v603_v62, %v601_v57  ;;  %v596_v4 = vadd.f32 %v595_v63, %v9722_v58  ;;  %v609_v5 = vrot.slane %v602_v1, 4  ;;  %v848_v57 = vld [vmem:[#allocation7 + $0x60] sm:$0xff]  ;;  %v913_v62 = vld [vmem:[#allocation7 + $0x268] sm:$0xff]  ;;  %v846_v63 = vld [vmem:[#allocation7 + $0x50] sm:$0xff] }
 0x185   :  { %v597_v6 = vrot.slane %v596_v4, 2  ;;  %v592_v7 = vadd.f32 %v591_v2, %v590_v61  ;;  %v610_v8 = vadd.f32 %v609_v5, %v602_v1  ;;  %v605_v10 = vrot.slane %v604_v3, 2  ;;  %v847_v61 = vld [vmem:[#allocation7 + $0x58] sm:$0xff]  ;;  %v912_v1 = vld [vmem:[#allocation7 + $0x260] sm:$0xff]  ;;  %v845_v2 = vld [vmem:[#allocation7 + $0x48] sm:$0xff] }
 0x186   :  { %v910_v5 = vld [vmem:[#allocation7 + $0x250] sm:$0xff] }
 0x187   :  { %v598_v11 = vadd.f32 %v597_v6, %v596_v4  ;;  %v611_v12 = vrot.slane %v610_v8, 2  ;;  %v606_v13 = vadd.f32 %v605_v10, %v604_v3  ;;  %v593_v14 = vrot.slane %v592_v7, 1  ;;  %v911_v3 = vld [vmem:[#allocation7 + $0x258] sm:$0xff]  ;;  %v844_v4 = vld [vmem:[#allocation7 + $0x40] sm:$0xff] }
 0x188   :  { %v843_v6 = vld [vmem:[#allocation7 + $0x38] sm:$0xff]  ;;  %v908_v10 = vld [vmem:[#allocation7 + $0x240] sm:$0xff] }
 0x189   :  { %v599_v15 = vrot.slane %v598_v11, 1  ;;  %v612_v16 = vadd.f32 %v611_v12, %v610_v8  ;;  %v607_v17 = vrot.slane %v606_v13, 1  ;;  %v594_v20 = vadd.f32 %v593_v14, %v592_v7  ;;  %v909_v7 = vld [vmem:[#allocation7 + $0x248] sm:$0xff]  ;;  %v842_v8 = vld [vmem:[#allocation7 + $0x30] sm:$0xff]  ;;  %v907_v12 = vld [vmem:[#allocation7 + $0x238] sm:$0xff] }
 0x18a   :  { %v906_v14 = vld [vmem:[#allocation7 + $0x230] sm:$0xff] }
 0x18b   :  { %v600_v18 = vadd.f32 %v599_v15, %v598_v11  ;;  %v613_v19 = vrot.slane %v612_v16, 1  ;;  %v608_v24 = vadd.f32 %v607_v17, %v606_v13  ;;  %v841_v11 = vld [vmem:[#allocation7 + $0x28] sm:$0xff]  ;;  %v840_v13 = vld [vmem:[#allocation7 + $0x20] sm:$0xff]  ;;  %v839_v15 = vld [vmem:[#allocation7 + $0x18] sm:$0xff] }
 0x18c   :  { %v838_v17 = vld [vmem:[#allocation7 + $0x10] sm:$0xff] }
 0x18d   :  { %679 = vmatprep.mubr.f32.mxu1 %v600_v18  ;;  %v614_v22 = vadd.f32 %v613_v19, %v612_v16  ;;  %v905_v16 = vld [vmem:[#allocation7 + $0x228] sm:$0xff]  ;;  %v904_v18 = vld [vmem:[#allocation7 + $0x220] sm:$0xff] }
 0x18e   :  { %680 = vmatmul.mubr.f32.vlgmr.msra.gmra.mxu1 %v594_v20  ;;  %v837_v19 = vld [vmem:[#allocation7 + $0x8] sm:$0xff]  ;;  %v903_v20 = vld [vmem:[#allocation7 + $0x218] sm:$0xff] }
 0x18f   :  { %750 = vmatprep.mubr.f32.mxu0 %v614_v22  ;;  %977 = vmatpush1.msra.mxu1 %v930_v21  ;;  %v836_v21 = vld [vmem:[#allocation7] sm:$0xff]  ;;  %v902_v22 = vld [vmem:[#allocation7 + $0x210] sm:$0xff] }
 0x190   :  { %751 = vmatmul.mubr.f32.vlgmr.msra.gmra.mxu0 %v608_v24  ;;  %978 = vmatprep.subr.mxu1 %v929_v23  ;;  %v899_v23 = vld [vmem:[#allocation7 + $0x1f8] sm:$0xff]  ;;  %v901_v24 = vld [vmem:[#allocation7 + $0x208] sm:$0xff] }
 0x191   :  { %1048 = vmatpush1.msra.mxu0 %v866_v25  ;;  %979 = vmatpush1.msra.mxu1 %v928_v26  ;;  %v898_v25 = vld [vmem:[#allocation7 + $0x1f0] sm:$0xff]  ;;  %v900_v26 = vld [vmem:[#allocation7 + $0x200] sm:$0xff] }
 0x192   :  { %1049 = vmatprep.subr.mxu0 %v865_v27  ;;  %980 = vmatprep.subr.mxu1 %v927_v28  ;;  %v897_v27 = vld [vmem:[#allocation7 + $0x1e8] sm:$0xff]  ;;  %v963_v28 = vld [vmem:[#allocation7 + $0x3f8] sm:$0xff] }
 0x193   :  { %1050 = vmatpush1.msra.mxu0 %v864_v29  ;;  %981 = vmatpush1.msra.mxu1 %v926_v30  ;;  %v896_v29 = vld [vmem:[#allocation7 + $0x1e0] sm:$0xff]  ;;  %v962_v30 = vld [vmem:[#allocation7 + $0x3f0] sm:$0xff] }
 0x194   :  { %1051 = vmatprep.subr.mxu0 %v863_v31  ;;  %982 = vmatprep.subr.mxu1 %v925_v32  ;;  %v895_v31 = vld [vmem:[#allocation7 + $0x1d8] sm:$0xff]  ;;  %v961_v32 = vld [vmem:[#allocation7 + $0x3e8] sm:$0xff] }
 0x195   :  { %1052 = vmatpush1.msra.mxu0 %v862_v33  ;;  %983 = vmatpush1.msra.mxu1 %v924_v34  ;;  %v894_v33 = vld [vmem:[#allocation7 + $0x1d0] sm:$0xff]  ;;  %v960_v34 = vld [vmem:[#allocation7 + $0x3e0] sm:$0xff] }
 0x196   :  { %1053 = vmatprep.subr.mxu0 %v861_v35  ;;  %984 = vmatprep.subr.mxu1 %v923_v36  ;;  %v893_v35 = vld [vmem:[#allocation7 + $0x1c8] sm:$0xff]  ;;  %v959_v36 = vld [vmem:[#allocation7 + $0x3d8] sm:$0xff] }
 0x197   :  { %1054 = vmatpush1.msra.mxu0 %v860_v37  ;;  %985 = vmatpush1.msra.mxu1 %v922_v38  ;;  %v892_v37 = vld [vmem:[#allocation7 + $0x1c0] sm:$0xff]  ;;  %v958_v38 = vld [vmem:[#allocation7 + $0x3d0] sm:$0xff] }
 0x198   :  { %1055 = vmatprep.subr.mxu0 %v859_v39  ;;  %986 = vmatprep.subr.mxu1 %v921_v40  ;;  %v891_v39 = vld [vmem:[#allocation7 + $0x1b8] sm:$0xff]  ;;  %v957_v40 = vld [vmem:[#allocation7 + $0x3c8] sm:$0xff] }
 0x199   :  { %1056 = vmatpush1.msra.mxu0 %v858_v41  ;;  %987 = vmatpush1.msra.mxu1 %v920_v42  ;;  %v890_v41 = vld [vmem:[#allocation7 + $0x1b0] sm:$0xff]  ;;  %v956_v42 = vld [vmem:[#allocation7 + $0x3c0] sm:$0xff] }
 0x19a   :  { %1057 = vmatprep.subr.mxu0 %v857_v43  ;;  %988 = vmatprep.subr.mxu1 %v919_v44  ;;  %v889_v43 = vld [vmem:[#allocation7 + $0x1a8] sm:$0xff]  ;;  %v955_v44 = vld [vmem:[#allocation7 + $0x3b8] sm:$0xff] }
 0x19b   :  { %1058 = vmatpush1.msra.mxu0 %v856_v45  ;;  %989 = vmatpush1.msra.mxu1 %v918_v46  ;;  %v888_v45 = vld [vmem:[#allocation7 + $0x1a0] sm:$0xff]  ;;  %v954_v46 = vld [vmem:[#allocation7 + $0x3b0] sm:$0xff] }
 0x19c   :  { %1059 = vmatprep.subr.mxu0 %v855_v47  ;;  %990 = vmatprep.subr.mxu1 %v917_v48  ;;  %v887_v47 = vld [vmem:[#allocation7 + $0x198] sm:$0xff]  ;;  %v953_v48 = vld [vmem:[#allocation7 + $0x3a8] sm:$0xff] }
 0x19d   :  { %1060 = vmatpush1.msra.mxu0 %v854_v49  ;;  %991 = vmatpush1.msra.mxu1 %v916_v50  ;;  %v886_v49 = vld [vmem:[#allocation7 + $0x190] sm:$0xff]  ;;  %v952_v50 = vld [vmem:[#allocation7 + $0x3a0] sm:$0xff] }
 0x19e   :  { %1061 = vmatprep.subr.mxu0 %v853_v51  ;;  %992 = vmatprep.subr.mxu1 %v915_v52  ;;  %v885_v51 = vld [vmem:[#allocation7 + $0x188] sm:$0xff]  ;;  %v951_v52 = vld [vmem:[#allocation7 + $0x398] sm:$0xff] }
 0x19f   :  { %1062 = vmatpush1.msra.mxu0 %v852_v53  ;;  %993 = vmatpush1.msra.mxu1 %v914_v54  ;;  %v884_v53 = vld [vmem:[#allocation7 + $0x180] sm:$0xff]  ;;  %v950_v54 = vld [vmem:[#allocation7 + $0x390] sm:$0xff] }
 0x1a0   :  { %1063 = vmatprep.subr.mxu0 %v851_v55  ;;  %994 = vmatprep.subr.mxu1 %v913_v62  ;;  %v883_v55 = vld [vmem:[#allocation7 + $0x178] sm:$0xff] }
 0x1a1   :  { %1064 = vmatpush1.msra.mxu0 %v850_v59  ;;  %995 = vmatpush1.msra.mxu1 %v912_v1  ;;  %v949_v59 = vld [vmem:[#allocation7 + $0x388] sm:$0xff]  ;;  %v947_v62 = vld [vmem:[#allocation7 + $0x378] sm:$0xff]  ;;  %v946_v1 = vld [vmem:[#allocation7 + $0x370] sm:$0xff] }
 0x1a2   :  { %1065 = vmatprep.subr.mxu0 %v849_v60  ;;  %996 = vmatprep.subr.mxu1 %v911_v3  ;;  %v882_v60 = vld [vmem:[#allocation7 + $0x170] sm:$0xff]  ;;  %v945_v3 = vld [vmem:[#allocation7 + $0x368] sm:$0xff] }
 0x1a3   :  { %1066 = vmatpush1.msra.mxu0 %v848_v57  ;;  %997 = vmatpush1.msra.mxu1 %v910_v5  ;;  %v948_v57 = vld [vmem:[#allocation7 + $0x380] sm:$0xff] }
 0x1a4   :  { %1067 = vmatprep.subr.mxu0 %v847_v61  ;;  %998 = vmatprep.subr.mxu1 %v909_v7  ;;  %v881_v61 = vld [vmem:[#allocation7 + $0x168] sm:$0xff]  ;;  %v944_v5 = vld [vmem:[#allocation7 + $0x360] sm:$0xff]  ;;  %v943_v7 = vld [vmem:[#allocation7 + $0x358] sm:$0xff] }
 0x1a5   :  { %1068 = vmatpush1.msra.mxu0 %v846_v63  ;;  %999 = vmatpush1.msra.mxu1 %v908_v10  ;;  %v880_v63 = vld [vmem:[#allocation7 + $0x160] sm:$0xff]  ;;  %v942_v10 = vld [vmem:[#allocation7 + $0x350] sm:$0xff] }
 0x1a6   :  { %1069 = vmatprep.subr.mxu0 %v845_v2  ;;  %1000 = vmatprep.subr.mxu1 %v907_v12  ;;  %v879_v2 = vld [vmem:[#allocation7 + $0x158] sm:$0xff]  ;;  %v941_v12 = vld [vmem:[#allocation7 + $0x348] sm:$0xff] }
 0x1a7   :  { %1070 = vmatpush1.msra.mxu0 %v844_v4  ;;  %1001 = vmatpush1.msra.mxu1 %v906_v14  ;;  %v878_v4 = vld [vmem:[#allocation7 + $0x150] sm:$0xff]  ;;  %v940_v14 = vld [vmem:[#allocation7 + $0x340] sm:$0xff] }
 0x1a8   :  { %1071 = vmatprep.subr.mxu0 %v843_v6  ;;  %1002 = vmatprep.subr.mxu1 %v905_v16  ;;  %v877_v6 = vld [vmem:[#allocation7 + $0x148] sm:$0xff]  ;;  %v939_v16 = vld [vmem:[#allocation7 + $0x338] sm:$0xff] }
 0x1a9   :  { %1072 = vmatpush1.msra.mxu0 %v842_v8  ;;  %1003 = vmatpush1.msra.mxu1 %v904_v18  ;;  %v876_v8 = vld [vmem:[#allocation7 + $0x140] sm:$0xff]  ;;  %v938_v18 = vld [vmem:[#allocation7 + $0x330] sm:$0xff] }
 0x1aa   :  { %1073 = vmatprep.subr.mxu0 %v841_v11  ;;  %1004 = vmatprep.subr.mxu1 %v903_v20  ;;  %v875_v11 = vld [vmem:[#allocation7 + $0x138] sm:$0xff]  ;;  %v937_v20 = vld [vmem:[#allocation7 + $0x328] sm:$0xff] }
 0x1ab   :  { %1074 = vmatpush1.msra.mxu0 %v840_v13  ;;  %1005 = vmatpush1.msra.mxu1 %v902_v22  ;;  %v874_v13 = vld [vmem:[#allocation7 + $0x130] sm:$0xff]  ;;  %v936_v22 = vld [vmem:[#allocation7 + $0x320] sm:$0xff] }
 0x1ac   :  { %1075 = vmatprep.subr.mxu0 %v839_v15  ;;  %1006 = vmatprep.subr.mxu1 %v901_v24  ;;  %v873_v15 = vld [vmem:[#allocation7 + $0x128] sm:$0xff]  ;;  %v935_v24 = vld [vmem:[#allocation7 + $0x318] sm:$0xff] }
 0x1ad   :  { %1076 = vmatpush1.msra.mxu0 %v838_v17  ;;  %1007 = vmatpush1.msra.mxu1 %v900_v26  ;;  %v872_v17 = vld [vmem:[#allocation7 + $0x120] sm:$0xff]  ;;  %v934_v26 = vld [vmem:[#allocation7 + $0x310] sm:$0xff] }
 0x1ae   :  { %1077 = vmatprep.subr.mxu0 %v837_v19  ;;  %1008 = vmatprep.subr.mxu1 %v963_v28  ;;  %v871_v19 = vld [vmem:[#allocation7 + $0x118] sm:$0xff]  ;;  %v932_v28 = vld [vmem:[#allocation7 + $0x300] sm:$0xff] }
 0x1af   :  { %1078 = vmatpush1.msra.mxu0 %v836_v21  ;;  %1009 = vmatpush2.msra.mxu1 %v962_v30  ;;  %v870_v21 = vld [vmem:[#allocation7 + $0x110] sm:$0xff] }
 0x1b0   :  { %1079 = vmatprep.subr.mxu0 %v899_v23  ;;  %1010 = vmatprep.subr.mxu1 %v961_v32  ;;  %v869_v23 = vld [vmem:[#allocation7 + $0x108] sm:$0xff] }
 0x1b1   :  { %1080 = vmatpush2.msra.mxu0 %v898_v25  ;;  %1011 = vmatpush2.msra.mxu1 %v960_v34  ;;  %v868_v25 = vld [vmem:[#allocation7 + $0x100] sm:$0xff] }
 0x1b2   :  { %1081 = vmatprep.subr.mxu0 %v897_v27  ;;  %1012 = vmatprep.subr.mxu1 %v959_v36  ;;  %v933_v27 = vld [vmem:[#allocation7 + $0x308] sm:$0xff] }
 0x1b3   :  { %1082 = vmatpush2.msra.mxu0 %v896_v29  ;;  %1013 = vmatpush2.msra.mxu1 %v958_v38  ;;  %v1149_v29 = vld [vmem:[#allocation7 + $0x4f8] sm:$0xff] }
 0x1b4   :  { %1083 = vmatprep.subr.mxu0 %v895_v31  ;;  %1014 = vmatprep.subr.mxu1 %v957_v40  ;;  %v9524_v40 = vmov 1966171168  }
 0x1b5   :  { %1084 = vmatpush2.msra.mxu0 %v894_v33  ;;  %1015 = vmatpush2.msra.mxu1 %v956_v42  ;;  %v771_v42 = vlaneseq }
 0x1b6   :  { %1085 = vmatprep.subr.mxu0 %v893_v35  ;;  %1016 = vmatprep.subr.mxu1 %v955_v44 }
 0x1b7   :  { %1086 = vmatpush2.msra.mxu0 %v892_v37  ;;  %1017 = vmatpush2.msra.mxu1 %v954_v46  ;;  %v772_v44 = vshrl.u32 %v771_v42, 7  ;;  %v1134_v42 = vld [vmem:[#allocation7 + $0x480] sm:$0xff] }
 0x1b8   :  { %1087 = vmatprep.subr.mxu0 %v891_v39  ;;  %1018 = vmatprep.subr.mxu1 %v953_v48 }
 0x1b9   :  { %1088 = vmatpush2.msra.mxu0 %v890_v41  ;;  %1019 = vmatpush2.msra.mxu1 %v952_v50  ;;  %v769_v41 = vunpack.c.l.s4 %v9524_v40  ;;  %v9731_v48 = vsub.s32 0, %v772_v44  ;;  %v1136_v40 = vld [vmem:[#allocation7 + $0x490] sm:$0xff] }
 0x1ba   :  { %1089 = vmatprep.subr.mxu0 %v889_v43  ;;  %1020 = vmatprep.subr.mxu1 %v951_v52 }
 0x1bb   :  { %1090 = vmatpush2.msra.mxu0 %v888_v45  ;;  %1021 = vmatpush2.msra.mxu1 %v950_v54  ;;  %v770_v43 = vunpack.c.0.s8 %v769_v41  ;;  %11310 = vst [vmem:[#allocation28_spill] sm:$0xff] %v9731_v48  ;;  %v1135_v41 = vld [vmem:[#allocation7 + $0x488] sm:$0xff] }
 0x1bc   :  { %1091 = vmatprep.subr.mxu0 %v887_v47  ;;  %1022 = vmatprep.subr.mxu1 %v949_v59  ;;  %v9737_v59 = vsub.s32 1, %v772_v44 }
 0x1bd   :  { %1092 = vmatpush2.msra.mxu0 %v886_v49  ;;  %1023 = vmatpush2.msra.mxu1 %v948_v57  ;;  %v9729_v46 = vsub.s32 %v770_v43, %v772_v44  ;;  %v1133_v43 = vld [vmem:[#allocation7 + $0x478] sm:$0xff]  ;;  %v1132_v44 = vld [vmem:[#allocation7 + $0x470] sm:$0xff] }
 0x1be   :  { %1093 = vmatprep.subr.mxu0 %v885_v51  ;;  %1024 = vmatprep.subr.mxu1 %v947_v62  ;;  %v586_v51 = vld [vmem:[#allocation5 + $0x500] ss:$8 sm:$0x3]  ;;  %11311 = vst [vmem:[#allocation29_spill] sm:$0xff] %v9737_v59 }
 0x1bf   :  { %1094 = vmatpush2.msra.mxu0 %v884_v53  ;;  %1025 = vmatpush2.msra.mxu1 %v946_v1  ;;  %11309 = vst [vmem:[#allocation27_spill] sm:$0xff] %v9729_v46 }
 0x1c0   :  { %1095 = vmatprep.subr.mxu0 %v883_v55  ;;  %1026 = vmatprep.subr.mxu1 %v945_v3  ;;  %v588_v55 = vld [vmem:[#allocation5 + $0x501] ss:$8 sm:$0x3] }
 0x1c1   :  { %1096 = vmatpush2.msra.mxu0 %v882_v60  ;;  %1027 = vmatpush2.msra.mxu1 %v944_v5  ;;  %v9740_v57 = vrot.slane %v588_v55, %v9731_v48 }
 0x1c2   :  { %1097 = vmatprep.subr.mxu0 %v881_v61  ;;  %1028 = vmatprep.subr.mxu1 %v943_v7  ;;  %v9743_v61 = vrot.slane %v588_v55, %v9737_v59  ;;  %v1123_v55 = vld [vmem:[#allocation7 + $0x428] sm:$0xff] }
 0x1c3   :  { %1098 = vmatpush2.msra.mxu0 %v880_v63  ;;  %1029 = vmatpush2.msra.mxu1 %v942_v10  ;;  %11312 = vst [vmem:[#allocation30_spill] sm:$0xff] %v9740_v57 }
 0x1c4   :  { %1099 = vmatprep.subr.mxu0 %v879_v2  ;;  %1030 = vmatprep.subr.mxu1 %v941_v12  ;;  %11313 = vst [vmem:[#allocation31_spill] sm:$0xff] %v9743_v61 }
 0x1c5   :  { %1100 = vmatpush2.msra.mxu0 %v878_v4  ;;  %1031 = vmatpush2.msra.mxu1 %v940_v14 }
 0x1c6   :  { %1101 = vmatprep.subr.mxu0 %v877_v6  ;;  %1032 = vmatprep.subr.mxu1 %v939_v16 }
 0x1c7   :  { %1102 = vmatpush2.msra.mxu0 %v876_v8  ;;  %1033 = vmatpush2.msra.mxu1 %v938_v18 }
 0x1c8   :  { %1103 = vmatprep.subr.mxu0 %v875_v11  ;;  %1034 = vmatprep.subr.mxu1 %v937_v20 }
 0x1c9   :  { %1104 = vmatpush2.msra.mxu0 %v874_v13  ;;  %1035 = vmatpush2.msra.mxu1 %v936_v22 }
 0x1ca   :  { %1105 = vmatprep.subr.mxu0 %v873_v15  ;;  %1036 = vmatprep.subr.mxu1 %v935_v24 }
 0x1cb   :  { %1106 = vmatpush2.msra.mxu0 %v872_v17  ;;  %1037 = vmatpush2.msra.mxu1 %v934_v26  ;;  %v1148_v26 = vld [vmem:[#allocation7 + $0x4f0] sm:$0xff] }
 0x1cc   :  { %1107 = vmatprep.subr.mxu0 %v871_v19  ;;  %1038 = vmatprep.subr.mxu1 %v933_v27  ;;  %v1147_v27 = vld [vmem:[#allocation7 + $0x4e8] sm:$0xff] }
 0x1cd   :  { %1108 = vmatpush2.msra.mxu0 %v870_v21  ;;  %1039 = vmatpush2.msra.mxu1 %v932_v28 }
 0x1ce   :  { %1109 = vmatprep.subr.mxu0 %v869_v23  ;;  %1190 = vmatprep.subr.mxu1 %v1149_v29 }
 0x1cf   :  { %1110 = vmatpush2.msra.mxu0 %v868_v25 }
 0x24e   :  { %v681_v30 = vpop.f32.mrf.mxu1 }
 0x24f   :  { %v757_v31 = vmul.f32 %v681_v30, %v681_v30  ;;  %v787_v52 = vrot.slane %v681_v30, %v9731_v48  ;;  %v1146_v30 = vld [vmem:[#allocation7 + $0x4e0] sm:$0xff] }
 0x250   :  { %v683_v32 = vpop.f32.mrf.mxu1  ;;  %v752_v33 = vpop.f32.mrf.mxu0 }
 0x251   :  { %v758_v34 = vmul.f32 %v683_v32, %v683_v32  ;;  %v759_v35 = vsub.f32 %v752_v33, %v757_v31  ;;  %v791_v53 = vrot.slane %v683_v32, %v9731_v48  ;;  %v792_v62 = vsub.f32 %v9717_v56, %v787_v52  ;;  %v1145_v31 = vld [vmem:[#allocation7 + $0x4d8] sm:$0xff]  ;;  %v1144_v32 = vld [vmem:[#allocation7 + $0x4d0] sm:$0xff]  ;;  %v1143_v33 = vld [vmem:[#allocation7 + $0x4c8] sm:$0xff] }
 0x252   :  { %v754_v36 = vpop.f32.mrf.mxu0  ;;  %v1126_v52 = vld [vmem:[#allocation7 + $0x440] sm:$0xff] }
 0x253   :  { %v761_v37 = vadd.f32 1e-05, %v759_v35  ;;  %v760_v38 = vsub.f32 %v754_v36, %v758_v34  ;;  %v793_v63 = vsub.f32 %v9722_v58, %v791_v53  ;;  %v1142_v34 = vld [vmem:[#allocation7 + $0x4c0] sm:$0xff]  ;;  %v1141_v35 = vld [vmem:[#allocation7 + $0x4b8] sm:$0xff]  ;;  %v1140_v36 = vld [vmem:[#allocation7 + $0x4b0] sm:$0xff] }
 0x254   :  { %v1125_v53 = vld [vmem:[#allocation7 + $0x438] sm:$0xff] }
 0x255   :  { %v762_v39 = vadd.f32 1e-05, %v760_v38  ;;  %8536 = vrsqrt.f32 %v761_v37  ;;  %v1139_v37 = vld [vmem:[#allocation7 + $0x4a8] sm:$0xff]  ;;  %v1138_v38 = vld [vmem:[#allocation7 + $0x4a0] sm:$0xff] }
 0x257   :  { %8538 = vrsqrt.f32 %v762_v39  ;;  %v1137_v39 = vld [vmem:[#allocation7 + $0x498] sm:$0xff] }
 0x262   :  { %v8537_v45 = vpop.eup %8536 }
 0x264   :  { %v8539_v47 = vpop.eup %8538 }
 0x265   :  { %v767_v49 = vcombine.low %v8537_v45, %v8539_v47  ;;  %v1131_v45 = vld [vmem:[#allocation7 + $0x468] sm:$0xff]  ;;  %v1130_v47 = vld [vmem:[#allocation7 + $0x460] sm:$0xff] }
 0x267   :  { %v774_v50 = vrot.slane %v767_v49, %v9729_v46  ;;  %v1129_v49 = vld [vmem:[#allocation7 + $0x458] sm:$0xff] }
 0x269   :  { %v781_v54 = vrot.slane %v774_v50, %v9729_v46  ;;  %v1128_v50 = vld [vmem:[#allocation7 + $0x450] sm:$0xff] }
 0x26b   :  { %v783_v60 = vmul.f32 %v781_v54, %v586_v51  ;;  %v1127_v51 = vld [vmem:[#allocation7 + $0x448] sm:$0xff]  ;;  %v1124_v54 = vld [vmem:[#allocation7 + $0x430] sm:$0xff] }
 0x26d   :  { %v798_v1 = vrot.slane %v783_v60, %v9731_v48  ;;  %v802_v2 = vrot.slane %v783_v60, %v9737_v59  ;;  %v1122_v60 = vld [vmem:[#allocation7 + $0x420] sm:$0xff] }
 0x26f   :  { %v806_v3 = vmul.f32 %v802_v2, %v793_v63  ;;  %v805_v4 = vmul.f32 %v798_v1, %v792_v62  ;;  %v1121_v62 = vld [vmem:[#allocation7 + $0x418] sm:$0xff]  ;;  %v1120_v63 = vld [vmem:[#allocation7 + $0x410] sm:$0xff]  ;;  %v1119_v1 = vld [vmem:[#allocation7 + $0x408] sm:$0xff] }
 0x270   :  { %v1118_v2 = vld [vmem:[#allocation7 + $0x400] sm:$0xff] }
 0x271   :  { %v819_v5 = vadd.f32 %v9743_v61, %v806_v3  ;;  %v818_v6 = vadd.f32 %v9740_v57, %v805_v4  ;;  %v1181_v3 = vld [vmem:[#allocation7 + $0x5f8] sm:$0xff]  ;;  %v1180_v4 = vld [vmem:[#allocation7 + $0x5f0] sm:$0xff]  ;;  %v10357_v57 = vld [vmem:[#allocation5 + $0x438] sm:$0xff] }
 0x272   :  { %11324 = vst [vmem:[#allocation42_spill] sm:$0xff] %v10357_v57  ;;  %v10360_v61 = vld [vmem:[#allocation5 + $0x430] sm:$0xff] }
 0x273   :  { %vm821_vm4 = vcmp.ge.f32.partialorder %v819_v5, 0.0  ;;  %v823_v7 = vmul.f32 0.01, %v819_v5  ;;  %vm820_vm5 = vcmp.ge.f32.partialorder %v818_v6, 0.0  ;;  %v822_v8 = vmul.f32 0.01, %v818_v6 }
 0x274   :  { %11325 = vst [vmem:[#allocation43_spill] sm:$0xff] %v10360_v61 }
 0x275   :  { %v825_v10 = vsel %vm821_vm4, %v819_v5, %v823_v7  ;;  %v824_v11 = vsel %vm820_vm5, %v818_v6, %v822_v8  ;;  %v1179_v5 = vld [vmem:[#allocation7 + $0x5e8] sm:$0xff]  ;;  %v1178_v6 = vld [vmem:[#allocation7 + $0x5e0] sm:$0xff]  ;;  %v1177_v7 = vld [vmem:[#allocation7 + $0x5d8] sm:$0xff]  ;;  %vm2892_vm4 = vcmask 523264  }
 0x276   :  { %v829_v12 = vrot.slane %v825_v10, 7  ;;  %v828_v56 = vrot.slane %v824_v11, 7  ;;  %v1176_v8 = vld [vmem:[#allocation7 + $0x5d0] sm:$0xff]  ;;  %v1175_v10 = vld [vmem:[#allocation7 + $0x5c8] sm:$0xff]  ;;  %v1174_v11 = vld [vmem:[#allocation7 + $0x5c0] sm:$0xff] }
 0x278   :  { %6714 = vmatprep.mubr.msk.f32.mxu0 %vm9659_vm2, %v829_v12  ;;  %v833_v58 = vsel %vm195_vm0, 0.0, %v829_v12  ;;  %v835_v13 = vsel %vm195_vm0, %v829_v12, 0.0  ;;  %v832_v14 = vsel %vm195_vm0, 0.0, %v828_v56  ;;  %v834_v15 = vsel %vm195_vm0, %v828_v56, 0.0  ;;  %v1173_v12 = vld [vmem:[#allocation7 + $0x5b8] sm:$0xff] }
 0x279   :  { %6716 = vmatmul.mubr.msk.f32.vlgmr.msra.gmra.mxu0 %vm9659_vm2, %v828_v56  ;;  %v971_v16 = vrot.slane %v833_v58, 1  ;;  %v972_v17 = vrot.slane %v835_v13, 1  ;;  %v968_v18 = vrot.slane %v832_v14, 1  ;;  %v969_v19 = vrot.slane %v834_v15, 1  ;;  %v1172_v56 = vld [vmem:[#allocation7 + $0x5b0] sm:$0xff] }
 0x27a   :  { %v1185_v20 = vrot.slane %v833_v58, 2  ;;  %v1186_v21 = vrot.slane %v835_v13, 2  ;;  %v1182_v22 = vrot.slane %v832_v14, 2  ;;  %v1183_v23 = vrot.slane %v834_v15, 2  ;;  %v1171_v58 = vld [vmem:[#allocation7 + $0x5a8] sm:$0xff]  ;;  %v1170_v13 = vld [vmem:[#allocation7 + $0x5a0] sm:$0xff] }
 0x27b   :  { %v973_v24 = vsel %vm264_vm1, %v971_v16, %v972_v17  ;;  %v970_v25 = vsel %vm264_vm1, %v968_v18, %v969_v19  ;;  %v1169_v14 = vld [vmem:[#allocation7 + $0x598] sm:$0xff]  ;;  %v1168_v15 = vld [vmem:[#allocation7 + $0x590] sm:$0xff]  ;;  %v1167_v16 = vld [vmem:[#allocation7 + $0x588] sm:$0xff] }
 0x27c   :  { %1040 = vmatprep.mubr.f32.mxu1 %v973_v24  ;;  %v9762_v28 = vsel %vm443_vm3, %v1182_v22, %v1183_v23  ;;  %v1187_v29 = vsel %vm443_vm3, %v1185_v20, %v1186_v21  ;;  %v1166_v17 = vld [vmem:[#allocation7 + $0x580] sm:$0xff]  ;;  %v1165_v18 = vld [vmem:[#allocation7 + $0x578] sm:$0xff]  ;;  %v1164_v19 = vld [vmem:[#allocation7 + $0x570] sm:$0xff] }
 0x27d   :  { %1041 = vmatmul.mubr.f32.vlgmr.msra.gmra.mxu1 %v970_v25  ;;  %v1163_v20 = vld [vmem:[#allocation7 + $0x568] sm:$0xff]  ;;  %v1162_v21 = vld [vmem:[#allocation7 + $0x560] sm:$0xff]  ;;  %v1161_v22 = vld [vmem:[#allocation7 + $0x558] sm:$0xff] }
 0x27e   :  { %1191 = vmatpush1.msra.mxu1 %v1148_v26  ;;  %1254 = vmatprep.mubr.f32.mxu1 %v1187_v29  ;;  %v1160_v23 = vld [vmem:[#allocation7 + $0x550] sm:$0xff]  ;;  %v1159_v24 = vld [vmem:[#allocation7 + $0x548] sm:$0xff]  ;;  %v1158_v25 = vld [vmem:[#allocation7 + $0x540] sm:$0xff] }
 0x27f   :  { %1192 = vmatprep.subr.mxu1 %v1147_v27  ;;  %v1157_v26 = vld [vmem:[#allocation7 + $0x538] sm:$0xff]  ;;  %v1156_v27 = vld [vmem:[#allocation7 + $0x530] sm:$0xff]  ;;  %v1155_v29 = vld [vmem:[#allocation7 + $0x528] sm:$0xff] }
 0x280   :  { %1193 = vmatpush1.msra.mxu1 %v1146_v30  ;;  %v1154_v30 = vld [vmem:[#allocation7 + $0x520] sm:$0xff] }
 0x281   :  { %1194 = vmatprep.subr.mxu1 %v1145_v31  ;;  %v1153_v31 = vld [vmem:[#allocation7 + $0x518] sm:$0xff] }
 0x282   :  { %1195 = vmatpush1.msra.mxu1 %v1144_v32  ;;  %v1152_v32 = vld [vmem:[#allocation7 + $0x510] sm:$0xff] }
 0x283   :  { %1196 = vmatprep.subr.mxu1 %v1143_v33  ;;  %v1151_v33 = vld [vmem:[#allocation7 + $0x508] sm:$0xff] }
 0x284   :  { %1197 = vmatpush1.msra.mxu1 %v1142_v34  ;;  %v1150_v34 = vld [vmem:[#allocation7 + $0x500] sm:$0xff] }
 0x285   :  { %1198 = vmatprep.subr.mxu1 %v1141_v35  ;;  %v1294_v35 = vld [vmem:[#allocation7 + $0x6f8] sm:$0xff] }
 0x286   :  { %1199 = vmatpush1.msra.mxu1 %v1140_v36  ;;  %v1293_v36 = vld [vmem:[#allocation7 + $0x6f0] sm:$0xff]  ;;  %1357 = vmatprep.subr.mxu0 %v1294_v35 }
 0x287   :  { %1200 = vmatprep.subr.mxu1 %v1139_v37  ;;  %v1292_v37 = vld [vmem:[#allocation7 + $0x6e8] sm:$0xff]  ;;  %1358 = vmatpush1.msra.mxu0 %v1293_v36 }
 0x288   :  { %1201 = vmatpush1.msra.mxu1 %v1138_v38  ;;  %v1291_v38 = vld [vmem:[#allocation7 + $0x6e0] sm:$0xff]  ;;  %1359 = vmatprep.subr.mxu0 %v1292_v37 }
 0x289   :  { %1202 = vmatprep.subr.mxu1 %v1137_v39  ;;  %v1290_v39 = vld [vmem:[#allocation7 + $0x6d8] sm:$0xff]  ;;  %1360 = vmatpush1.msra.mxu0 %v1291_v38 }
 0x28a   :  { %1203 = vmatpush1.msra.mxu1 %v1136_v40  ;;  %v1289_v40 = vld [vmem:[#allocation7 + $0x6d0] sm:$0xff]  ;;  %1361 = vmatprep.subr.mxu0 %v1290_v39 }
 0x28b   :  { %1204 = vmatprep.subr.mxu1 %v1135_v41  ;;  %v1288_v41 = vld [vmem:[#allocation7 + $0x6c8] sm:$0xff]  ;;  %1362 = vmatpush1.msra.mxu0 %v1289_v40 }
 0x28c   :  { %1205 = vmatpush1.msra.mxu1 %v1134_v42  ;;  %v1287_v42 = vld [vmem:[#allocation7 + $0x6c0] sm:$0xff]  ;;  %1363 = vmatprep.subr.mxu0 %v1288_v41 }
 0x28d   :  { %1206 = vmatprep.subr.mxu1 %v1133_v43  ;;  %v1285_v43 = vld [vmem:[#allocation7 + $0x6b0] sm:$0xff]  ;;  %1364 = vmatpush1.msra.mxu0 %v1287_v42 }
 0x28e   :  { %1207 = vmatpush1.msra.mxu1 %v1132_v44  ;;  %v1284_v44 = vld [vmem:[#allocation7 + $0x6a8] sm:$0xff] }
 0x28f   :  { %1208 = vmatprep.subr.mxu1 %v1131_v45  ;;  %v1283_v45 = vld [vmem:[#allocation7 + $0x6a0] sm:$0xff] }
 0x290   :  { %1209 = vmatpush1.msra.mxu1 %v1130_v47  ;;  %v1282_v47 = vld [vmem:[#allocation7 + $0x698] sm:$0xff] }
 0x291   :  { %1210 = vmatprep.subr.mxu1 %v1129_v49  ;;  %v1281_v49 = vld [vmem:[#allocation7 + $0x690] sm:$0xff] }
 0x292   :  { %1211 = vmatpush1.msra.mxu1 %v1128_v50  ;;  %v1280_v50 = vld [vmem:[#allocation7 + $0x688] sm:$0xff] }
 0x293   :  { %1212 = vmatprep.subr.mxu1 %v1127_v51  ;;  %v1279_v51 = vld [vmem:[#allocation7 + $0x680] sm:$0xff] }
 0x294   :  { %1213 = vmatpush1.msra.mxu1 %v1126_v52  ;;  %v1278_v52 = vld [vmem:[#allocation7 + $0x678] sm:$0xff] }
 0x295   :  { %1214 = vmatprep.subr.mxu1 %v1125_v53  ;;  %v1277_v53 = vld [vmem:[#allocation7 + $0x670] sm:$0xff] }
 0x296   :  { %1215 = vmatpush1.msra.mxu1 %v1124_v54  ;;  %v1276_v54 = vld [vmem:[#allocation7 + $0x668] sm:$0xff] }
 0x297   :  { %1216 = vmatprep.subr.mxu1 %v1123_v55  ;;  %v1275_v55 = vld [vmem:[#allocation7 + $0x660] sm:$0xff] }
 0x298   :  { %1217 = vmatpush1.msra.mxu1 %v1122_v60  ;;  %v1274_v60 = vld [vmem:[#allocation7 + $0x658] sm:$0xff] }
 0x299   :  { %1218 = vmatprep.subr.mxu1 %v1121_v62  ;;  %v1273_v62 = vld [vmem:[#allocation7 + $0x650] sm:$0xff] }
 0x29a   :  { %1219 = vmatpush1.msra.mxu1 %v1120_v63  ;;  %v1272_v63 = vld [vmem:[#allocation7 + $0x648] sm:$0xff] }
 0x29b   :  { %1220 = vmatprep.subr.mxu1 %v1119_v1  ;;  %v1271_v1 = vld [vmem:[#allocation7 + $0x640] sm:$0xff] }
 0x29c   :  { %1221 = vmatpush1.msra.mxu1 %v1118_v2  ;;  %v1270_v2 = vld [vmem:[#allocation7 + $0x638] sm:$0xff] }
 0x29d   :  { %1222 = vmatprep.subr.mxu1 %v1181_v3  ;;  %v1269_v3 = vld [vmem:[#allocation7 + $0x630] sm:$0xff] }
 0x29e   :  { %1223 = vmatpush2.msra.mxu1 %v1180_v4  ;;  %v1268_v4 = vld [vmem:[#allocation7 + $0x628] sm:$0xff] }
 0x29f   :  { %1224 = vmatprep.subr.mxu1 %v1179_v5  ;;  %v1267_v5 = vld [vmem:[#allocation7 + $0x620] sm:$0xff] }
 0x2a0   :  { %1225 = vmatpush2.msra.mxu1 %v1178_v6  ;;  %v1266_v6 = vld [vmem:[#allocation7 + $0x618] sm:$0xff] }
 0x2a1   :  { %1226 = vmatprep.subr.mxu1 %v1177_v7  ;;  %v1265_v7 = vld [vmem:[#allocation7 + $0x610] sm:$0xff] }
 0x2a2   :  { %1227 = vmatpush2.msra.mxu1 %v1176_v8  ;;  %v1264_v8 = vld [vmem:[#allocation7 + $0x608] sm:$0xff] }
 0x2a3   :  { %1228 = vmatprep.subr.mxu1 %v1175_v10  ;;  %v1263_v10 = vld [vmem:[#allocation7 + $0x600] sm:$0xff] }
 0x2a4   :  { %1229 = vmatpush2.msra.mxu1 %v1174_v11  ;;  %v1326_v11 = vld [vmem:[#allocation7 + $0x7f8] sm:$0xff] }
 0x2a5   :  { %1230 = vmatprep.subr.mxu1 %v1173_v12  ;;  %v1325_v12 = vld [vmem:[#allocation7 + $0x7f0] sm:$0xff] }
 0x2a6   :  { %1231 = vmatpush2.msra.mxu1 %v1172_v56  ;;  %v1324_v56 = vld [vmem:[#allocation7 + $0x7e8] sm:$0xff] }
 0x2a7   :  { %1232 = vmatprep.subr.mxu1 %v1171_v58  ;;  %v1323_v58 = vld [vmem:[#allocation7 + $0x7e0] sm:$0xff] }
 0x2a8   :  { %1233 = vmatpush2.msra.mxu1 %v1170_v13  ;;  %v1322_v13 = vld [vmem:[#allocation7 + $0x7d8] sm:$0xff] }
 0x2a9   :  { %1234 = vmatprep.subr.mxu1 %v1169_v14  ;;  %v1321_v14 = vld [vmem:[#allocation7 + $0x7d0] sm:$0xff] }
 0x2aa   :  { %1235 = vmatpush2.msra.mxu1 %v1168_v15  ;;  %v1320_v15 = vld [vmem:[#allocation7 + $0x7c8] sm:$0xff] }
 0x2ab   :  { %1236 = vmatprep.subr.mxu1 %v1167_v16  ;;  %v1319_v16 = vld [vmem:[#allocation7 + $0x7c0] sm:$0xff] }
 0x2ac   :  { %1237 = vmatpush2.msra.mxu1 %v1166_v17  ;;  %v1318_v17 = vld [vmem:[#allocation7 + $0x7b8] sm:$0xff] }
 0x2ad   :  { %1238 = vmatprep.subr.mxu1 %v1165_v18  ;;  %v1317_v18 = vld [vmem:[#allocation7 + $0x7b0] sm:$0xff] }
 0x2ae   :  { %1239 = vmatpush2.msra.mxu1 %v1164_v19  ;;  %v1316_v19 = vld [vmem:[#allocation7 + $0x7a8] sm:$0xff] }
 0x2af   :  { %1240 = vmatprep.subr.mxu1 %v1163_v20  ;;  %v1315_v20 = vld [vmem:[#allocation7 + $0x7a0] sm:$0xff] }
 0x2b0   :  { %1241 = vmatpush2.msra.mxu1 %v1162_v21  ;;  %v1314_v21 = vld [vmem:[#allocation7 + $0x798] sm:$0xff] }
 0x2b1   :  { %1242 = vmatprep.subr.mxu1 %v1161_v22  ;;  %v1313_v22 = vld [vmem:[#allocation7 + $0x790] sm:$0xff] }
 0x2b2   :  { %1243 = vmatpush2.msra.mxu1 %v1160_v23  ;;  %v1312_v23 = vld [vmem:[#allocation7 + $0x788] sm:$0xff] }
 0x2b3   :  { %1244 = vmatprep.subr.mxu1 %v1159_v24  ;;  %v1311_v24 = vld [vmem:[#allocation7 + $0x780] sm:$0xff] }
 0x2b4   :  { %1245 = vmatpush2.msra.mxu1 %v1158_v25  ;;  %v1310_v25 = vld [vmem:[#allocation7 + $0x778] sm:$0xff] }
 0x2b5   :  { %1246 = vmatprep.subr.mxu1 %v1157_v26  ;;  %v1309_v26 = vld [vmem:[#allocation7 + $0x770] sm:$0xff] }
 0x2b6   :  { %1247 = vmatpush2.msra.mxu1 %v1156_v27  ;;  %v1308_v27 = vld [vmem:[#allocation7 + $0x768] sm:$0xff] }
 0x2b7   :  { %1248 = vmatprep.subr.mxu1 %v1155_v29  ;;  %v1307_v29 = vld [vmem:[#allocation7 + $0x760] sm:$0xff] }
 0x2b8   :  { %1249 = vmatpush2.msra.mxu1 %v1154_v30  ;;  %v1306_v30 = vld [vmem:[#allocation7 + $0x758] sm:$0xff] }
 0x2b9   :  { %1250 = vmatprep.subr.mxu1 %v1153_v31  ;;  %v1305_v31 = vld [vmem:[#allocation7 + $0x750] sm:$0xff] }
 0x2ba   :  { %1251 = vmatpush2.msra.mxu1 %v1152_v32  ;;  %v1304_v32 = vld [vmem:[#allocation7 + $0x748] sm:$0xff] }
 0x2bb   :  { %1252 = vmatprep.subr.mxu1 %v1151_v33  ;;  %v1303_v33 = vld [vmem:[#allocation7 + $0x740] sm:$0xff] }
 0x2bc   :  { %1253 = vmatpush2.msra.mxu1 %v1150_v34  ;;  %v1302_v34 = vld [vmem:[#allocation7 + $0x738] sm:$0xff] }
 0x2bd   :  { %1255 = vmatmul.mubr.f32.vlgmr.msra.gmra.mxu1 %v9762_v28  ;;  %1428 = vmatprep.subr.mxu1 %v1294_v35  ;;  %v1286_v28 = vld [vmem:[#allocation7 + $0x6b8] sm:$0xff]  ;;  %v1301_v35 = vld [vmem:[#allocation7 + $0x730] sm:$0xff] }
 0x2be   :  { %1429 = vmatpush1.msra.mxu1 %v1293_v36  ;;  %1365 = vmatprep.subr.mxu0 %v1286_v28  ;;  %v1300_v36 = vld [vmem:[#allocation7 + $0x728] sm:$0xff] }
 0x2bf   :  { %1430 = vmatprep.subr.mxu1 %v1292_v37  ;;  %1366 = vmatpush1.msra.mxu0 %v1285_v43  ;;  %v1299_v37 = vld [vmem:[#allocation7 + $0x720] sm:$0xff] }
 0x2c0   :  { %1431 = vmatpush1.msra.mxu1 %v1291_v38  ;;  %1367 = vmatprep.subr.mxu0 %v1284_v44  ;;  %v1298_v38 = vld [vmem:[#allocation7 + $0x718] sm:$0xff] }
 0x2c1   :  { %1432 = vmatprep.subr.mxu1 %v1290_v39  ;;  %1368 = vmatpush1.msra.mxu0 %v1283_v45  ;;  %v1297_v39 = vld [vmem:[#allocation7 + $0x710] sm:$0xff] }
 0x2c2   :  { %1433 = vmatpush1.msra.mxu1 %v1289_v40  ;;  %1369 = vmatprep.subr.mxu0 %v1282_v47  ;;  %v1296_v40 = vld [vmem:[#allocation7 + $0x708] sm:$0xff] }
 0x2c3   :  { %1434 = vmatprep.subr.mxu1 %v1288_v41  ;;  %1370 = vmatpush1.msra.mxu0 %v1281_v49  ;;  %v1295_v41 = vld [vmem:[#allocation7 + $0x700] sm:$0xff] }
 0x2c4   :  { %1435 = vmatpush1.msra.mxu1 %v1287_v42  ;;  %1371 = vmatprep.subr.mxu0 %v1280_v50 }
 0x2c5   :  { %1436 = vmatprep.subr.mxu1 %v1286_v28  ;;  %1372 = vmatpush1.msra.mxu0 %v1279_v51 }
 0x2c6   :  { %1437 = vmatpush1.msra.mxu1 %v1285_v43  ;;  %1373 = vmatprep.subr.mxu0 %v1278_v52 }
 0x2c7   :  { %1438 = vmatprep.subr.mxu1 %v1284_v44  ;;  %1374 = vmatpush1.msra.mxu0 %v1277_v53 }
 0x2c8   :  { %1439 = vmatpush1.msra.mxu1 %v1283_v45  ;;  %1375 = vmatprep.subr.mxu0 %v1276_v54 }
 0x2c9   :  { %1440 = vmatprep.subr.mxu1 %v1282_v47  ;;  %1376 = vmatpush1.msra.mxu0 %v1275_v55 }
 0x2ca   :  { %1441 = vmatpush1.msra.mxu1 %v1281_v49  ;;  %1377 = vmatprep.subr.mxu0 %v1274_v60 }
 0x2cb   :  { %1442 = vmatprep.subr.mxu1 %v1280_v50  ;;  %1378 = vmatpush1.msra.mxu0 %v1273_v62 }
 0x2cc   :  { %1443 = vmatpush1.msra.mxu1 %v1279_v51  ;;  %1379 = vmatprep.subr.mxu0 %v1272_v63 }
 0x2cd   :  { %1444 = vmatprep.subr.mxu1 %v1278_v52  ;;  %1380 = vmatpush1.msra.mxu0 %v1271_v1 }
 0x2ce   :  { %1445 = vmatpush1.msra.mxu1 %v1277_v53  ;;  %1381 = vmatprep.subr.mxu0 %v1270_v2 }
 0x2cf   :  { %1446 = vmatprep.subr.mxu1 %v1276_v54  ;;  %1382 = vmatpush1.msra.mxu0 %v1269_v3 }
 0x2d0   :  { %1447 = vmatpush1.msra.mxu1 %v1275_v55  ;;  %1383 = vmatprep.subr.mxu0 %v1268_v4 }
 0x2d1   :  { %1448 = vmatprep.subr.mxu1 %v1274_v60  ;;  %1384 = vmatpush1.msra.mxu0 %v1267_v5 }
 0x2d2   :  { %1449 = vmatpush1.msra.mxu1 %v1273_v62  ;;  %1385 = vmatprep.subr.mxu0 %v1266_v6 }
 0x2d3   :  { %1450 = vmatprep.subr.mxu1 %v1272_v63  ;;  %1386 = vmatpush1.msra.mxu0 %v1265_v7 }
 0x2d4   :  { %1451 = vmatpush1.msra.mxu1 %v1271_v1  ;;  %1387 = vmatprep.subr.mxu0 %v1264_v8 }
 0x2d5   :  { %1452 = vmatprep.subr.mxu1 %v1270_v2  ;;  %1388 = vmatpush1.msra.mxu0 %v1263_v10 }
 0x2d6   :  { %1453 = vmatpush1.msra.mxu1 %v1269_v3  ;;  %1389 = vmatprep.subr.mxu0 %v1326_v11 }
 0x2d7   :  { %1454 = vmatprep.subr.mxu1 %v1268_v4  ;;  %1390 = vmatpush2.msra.mxu0 %v1325_v12 }
 0x2d8   :  { %1455 = vmatpush1.msra.mxu1 %v1267_v5  ;;  %1391 = vmatprep.subr.mxu0 %v1324_v56 }
 0x2d9   :  { %1456 = vmatprep.subr.mxu1 %v1266_v6  ;;  %1392 = vmatpush2.msra.mxu0 %v1323_v58 }
 0x2da   :  { %1457 = vmatpush1.msra.mxu1 %v1265_v7  ;;  %1393 = vmatprep.subr.mxu0 %v1322_v13 }
 0x2db   :  { %1458 = vmatprep.subr.mxu1 %v1264_v8  ;;  %1394 = vmatpush2.msra.mxu0 %v1321_v14 }
 0x2dc   :  { %1459 = vmatpush1.msra.mxu1 %v1263_v10  ;;  %1395 = vmatprep.subr.mxu0 %v1320_v15 }
 0x2dd   :  { %1460 = vmatprep.subr.mxu1 %v1326_v11  ;;  %1396 = vmatpush2.msra.mxu0 %v1319_v16 }
 0x2de   :  { %1461 = vmatpush2.msra.mxu1 %v1325_v12  ;;  %1397 = vmatprep.subr.mxu0 %v1318_v17 }
 0x2df   :  { %1462 = vmatprep.subr.mxu1 %v1324_v56  ;;  %1398 = vmatpush2.msra.mxu0 %v1317_v18 }
 0x2e0   :  { %1463 = vmatpush2.msra.mxu1 %v1323_v58  ;;  %1399 = vmatprep.subr.mxu0 %v1316_v19 }
 0x2e1   :  { %1464 = vmatprep.subr.mxu1 %v1322_v13  ;;  %1400 = vmatpush2.msra.mxu0 %v1315_v20 }
 0x2e2   :  { %1465 = vmatpush2.msra.mxu1 %v1321_v14  ;;  %1401 = vmatprep.subr.mxu0 %v1314_v21 }
 0x2e3   :  { %1466 = vmatprep.subr.mxu1 %v1320_v15  ;;  %1402 = vmatpush2.msra.mxu0 %v1313_v22 }
 0x2e4   :  { %1467 = vmatpush2.msra.mxu1 %v1319_v16  ;;  %1403 = vmatprep.subr.mxu0 %v1312_v23 }
 0x2e5   :  { %1468 = vmatprep.subr.mxu1 %v1318_v17  ;;  %1404 = vmatpush2.msra.mxu0 %v1311_v24 }
 0x2e6   :  { %1469 = vmatpush2.msra.mxu1 %v1317_v18  ;;  %1405 = vmatprep.subr.mxu0 %v1310_v25 }
 0x2e7   :  { %1470 = vmatprep.subr.mxu1 %v1316_v19  ;;  %1406 = vmatpush2.msra.mxu0 %v1309_v26 }
 0x2e8   :  { %1471 = vmatpush2.msra.mxu1 %v1315_v20  ;;  %1407 = vmatprep.subr.mxu0 %v1308_v27  ;;  %v1663_v20 = vld [vmem:[#allocation8 + $0x1f8] sm:$0xff] }
 0x2e9   :  { %1472 = vmatprep.subr.mxu1 %v1314_v21  ;;  %1408 = vmatpush2.msra.mxu0 %v1307_v29  ;;  %v1647_v21 = vld [vmem:[#allocation8 + $0x178] sm:$0xff] }
 0x2ea   :  { %1473 = vmatpush2.msra.mxu1 %v1313_v22  ;;  %1409 = vmatprep.subr.mxu0 %v1306_v30  ;;  %v1845_v22 = vld [vmem:[#allocation8 + $0x2f8] sm:$0xff] }
 0x2eb   :  { %1474 = vmatprep.subr.mxu1 %v1312_v23  ;;  %1410 = vmatpush2.msra.mxu0 %v1305_v31  ;;  %v1662_v23 = vld [vmem:[#allocation8 + $0x1f0] sm:$0xff] }
 0x2ec   :  { %1475 = vmatpush2.msra.mxu1 %v1311_v24  ;;  %1411 = vmatprep.subr.mxu0 %v1304_v32  ;;  %v1829_v24 = vld [vmem:[#allocation8 + $0x278] sm:$0xff] }
 0x2ed   :  { %1476 = vmatprep.subr.mxu1 %v1310_v25  ;;  %1412 = vmatpush2.msra.mxu0 %v1303_v33  ;;  %v1646_v25 = vld [vmem:[#allocation8 + $0x170] sm:$0xff] }
 0x2ee   :  { %1477 = vmatpush2.msra.mxu1 %v1309_v26  ;;  %1413 = vmatprep.subr.mxu0 %v1302_v34  ;;  %v1844_v26 = vld [vmem:[#allocation8 + $0x2f0] sm:$0xff] }
 0x2ef   :  { %1478 = vmatprep.subr.mxu1 %v1308_v27  ;;  %1414 = vmatpush2.msra.mxu0 %v1301_v35  ;;  %v1661_v27 = vld [vmem:[#allocation8 + $0x1e8] sm:$0xff] }
 0x2f0   :  { %1479 = vmatpush2.msra.mxu1 %v1307_v29  ;;  %1415 = vmatprep.subr.mxu0 %v1300_v36  ;;  %v1828_v29 = vld [vmem:[#allocation8 + $0x270] sm:$0xff] }
 0x2f1   :  { %1480 = vmatprep.subr.mxu1 %v1306_v30  ;;  %1416 = vmatpush2.msra.mxu0 %v1299_v37  ;;  %v1645_v30 = vld [vmem:[#allocation8 + $0x168] sm:$0xff] }
 0x2f2   :  { %1481 = vmatpush2.msra.mxu1 %v1305_v31  ;;  %1417 = vmatprep.subr.mxu0 %v1298_v38  ;;  %v1843_v31 = vld [vmem:[#allocation8 + $0x2e8] sm:$0xff] }
 0x2f3   :  { %1482 = vmatprep.subr.mxu1 %v1304_v32  ;;  %1418 = vmatpush2.msra.mxu0 %v1297_v39  ;;  %v1660_v32 = vld [vmem:[#allocation8 + $0x1e0] sm:$0xff] }
 0x2f4   :  { %1483 = vmatpush2.msra.mxu1 %v1303_v33  ;;  %1419 = vmatprep.subr.mxu0 %v1296_v40  ;;  %v1827_v33 = vld [vmem:[#allocation8 + $0x268] sm:$0xff] }
 0x2f5   :  { %1484 = vmatprep.subr.mxu1 %v1302_v34  ;;  %1420 = vmatpush2.msra.mxu0 %v1295_v41  ;;  %v1644_v34 = vld [vmem:[#allocation8 + $0x160] sm:$0xff] }
 0x2f6   :  { %1485 = vmatpush2.msra.mxu1 %v1301_v35  ;;  %6754 = vmatprep.subr.mxu0 %v1663_v20  ;;  %v1842_v35 = vld [vmem:[#allocation8 + $0x2e0] sm:$0xff]  ;;  %v1649_v20 = vld [vmem:[#allocation8 + $0x188] sm:$0xff] }
 0x2f7   :  { %1486 = vmatprep.subr.mxu1 %v1300_v36  ;;  %v1659_v36 = vld [vmem:[#allocation8 + $0x1d8] sm:$0xff] }
 0x2f8   :  { %1487 = vmatpush2.msra.mxu1 %v1299_v37  ;;  %v1826_v37 = vld [vmem:[#allocation8 + $0x260] sm:$0xff] }
 0x2f9   :  { %1488 = vmatprep.subr.mxu1 %v1298_v38  ;;  %v1643_v38 = vld [vmem:[#allocation8 + $0x158] sm:$0xff] }
 0x2fa   :  { %1489 = vmatpush2.msra.mxu1 %v1297_v39  ;;  %v1841_v39 = vld [vmem:[#allocation8 + $0x2d8] sm:$0xff] }
 0x2fb   :  { %1490 = vmatprep.subr.mxu1 %v1296_v40  ;;  %v1658_v40 = vld [vmem:[#allocation8 + $0x1d0] sm:$0xff] }
 0x2fc   :  { %1491 = vmatpush2.msra.mxu1 %v1295_v41  ;;  %v1825_v41 = vld [vmem:[#allocation8 + $0x258] sm:$0xff] }
 0x2fd   :  { %6824 = vmatprep.subr.mxu1 %v1845_v22  ;;  %v1633_v22 = vld [vmem:[#allocation8 + $0x108] sm:$0xff] }
 0x339   :  { %v1113_v28 = vpop.f32.mrf.mxu0 }
 0x33b   :  { %v1115_v45 = vpop.f32.mrf.mxu0 }
 0x33d   :  { %v1042_v42 = vpop.f32.mrf.mxu1 }
 0x33e   :  { %v1114_v44 = vadd.f32 %v1113_v28, %v1042_v42  ;;  %v1642_v42 = vld [vmem:[#allocation8 + $0x150] sm:$0xff] }
 0x33f   :  { %v1044_v43 = vpop.f32.mrf.mxu1  ;;  %v1840_v28 = vld [vmem:[#allocation8 + $0x2d0] sm:$0xff] }
 0x340   :  { %v1116_v49 = vadd.f32 %v1115_v45, %v1044_v43  ;;  %v1657_v43 = vld [vmem:[#allocation8 + $0x1c8] sm:$0xff] }
 0x341   :  { %v1641_v45 = vld [vmem:[#allocation8 + $0x148] sm:$0xff] }
 0x37d   :  { %v1256_v47 = vpop.f32.mrf.mxu1 }
 0x37e   :  { %v9766_v50 = vadd.f32 %v1256_v47, %v1114_v44  ;;  %v1824_v44 = vld [vmem:[#allocation8 + $0x250] sm:$0xff]  ;;  %v1839_v47 = vld [vmem:[#allocation8 + $0x2c8] sm:$0xff] }
 0x37f   :  { %v1258_v51 = vpop.f32.mrf.mxu1 }
 0x380   :  { %v1331_v52 = vrot.slane %v9766_v50, 4  ;;  %v1343_v53 = vmul.f32 %v9766_v50, %v9766_v50  ;;  %v9771_v54 = vadd.f32 %v1258_v51, %v1116_v49  ;;  %v1656_v49 = vld [vmem:[#allocation8 + $0x1c0] sm:$0xff]  ;;  %v1823_v51 = vld [vmem:[#allocation8 + $0x248] sm:$0xff] }
 0x382   :  { %v1332_v55 = vadd.f32 %v1331_v52, %v9766_v50  ;;  %v1345_v60 = vrot.slane %v1343_v53, 4  ;;  %v1337_v62 = vrot.slane %v9771_v54, 4  ;;  %v1344_v63 = vmul.f32 %v9771_v54, %v9771_v54  ;;  %v1640_v52 = vld [vmem:[#allocation8 + $0x140] sm:$0xff] }
 0x384   :  { %v1333_v1 = vrot.slane %v1332_v55, 2  ;;  %v1346_v2 = vadd.f32 %v1345_v60, %v1343_v53  ;;  %v1338_v3 = vadd.f32 %v1337_v62, %v9771_v54  ;;  %v1351_v4 = vrot.slane %v1344_v63, 4  ;;  %v1838_v53 = vld [vmem:[#allocation8 + $0x2c0] sm:$0xff]  ;;  %v1639_v62 = vld [vmem:[#allocation8 + $0x138] sm:$0xff] }
 0x385   :  { %v1822_v60 = vld [vmem:[#allocation8 + $0x240] sm:$0xff] }
 0x386   :  { %v1339_v5 = vrot.slane %v1338_v3, 2  ;;  %v1334_v6 = vadd.f32 %v1333_v1, %v1332_v55  ;;  %v1352_v7 = vadd.f32 %v1351_v4, %v1344_v63  ;;  %v1347_v8 = vrot.slane %v1346_v2, 2  ;;  %v1655_v55 = vld [vmem:[#allocation8 + $0x1b8] sm:$0xff]  ;;  %v1654_v1 = vld [vmem:[#allocation8 + $0x1b0] sm:$0xff] }
 0x387   :  { %v1837_v63 = vld [vmem:[#allocation8 + $0x2b8] sm:$0xff]  ;;  %v1836_v4 = vld [vmem:[#allocation8 + $0x2b0] sm:$0xff] }
 0x388   :  { %v1340_v10 = vadd.f32 %v1339_v5, %v1338_v3  ;;  %v1353_v11 = vrot.slane %v1352_v7, 2  ;;  %v1348_v12 = vadd.f32 %v1347_v8, %v1346_v2  ;;  %v1335_v56 = vrot.slane %v1334_v6, 1  ;;  %v1821_v2 = vld [vmem:[#allocation8 + $0x238] sm:$0xff]  ;;  %v1638_v3 = vld [vmem:[#allocation8 + $0x130] sm:$0xff]  ;;  %v1653_v5 = vld [vmem:[#allocation8 + $0x1a8] sm:$0xff] }
 0x389   :  { %v1835_v8 = vld [vmem:[#allocation8 + $0x2a8] sm:$0xff] }
 0x38a   :  { %v1341_v58 = vrot.slane %v1340_v10, 1  ;;  %v1354_v13 = vadd.f32 %v1353_v11, %v1352_v7  ;;  %v1349_v14 = vrot.slane %v1348_v12, 1  ;;  %v1336_v17 = vadd.f32 %v1335_v56, %v1334_v6  ;;  %v1820_v6 = vld [vmem:[#allocation8 + $0x230] sm:$0xff]  ;;  %v1637_v7 = vld [vmem:[#allocation8 + $0x128] sm:$0xff]  ;;  %v1834_v56 = vld [vmem:[#allocation8 + $0x2a0] sm:$0xff] }
 0x38b   :  { %v1819_v11 = vld [vmem:[#allocation8 + $0x228] sm:$0xff] }
 0x38c   :  { %v1342_v15 = vadd.f32 %v1341_v58, %v1340_v10  ;;  %v1355_v16 = vrot.slane %v1354_v13, 1  ;;  %v1350_v19 = vadd.f32 %v1349_v14, %v1348_v12  ;;  %v1652_v10 = vld [vmem:[#allocation8 + $0x1a0] sm:$0xff]  ;;  %v1651_v58 = vld [vmem:[#allocation8 + $0x198] sm:$0xff] }
 0x38d   :  { %v1636_v12 = vld [vmem:[#allocation8 + $0x120] sm:$0xff]  ;;  %v1635_v14 = vld [vmem:[#allocation8 + $0x118] sm:$0xff] }
 0x38e   :  { %1421 = vmatprep.mubr.f32.mxu0 %v1342_v15  ;;  %v1356_v18 = vadd.f32 %v1355_v16, %v1354_v13  ;;  %v1818_v13 = vld [vmem:[#allocation8 + $0x220] sm:$0xff]  ;;  %v1833_v15 = vld [vmem:[#allocation8 + $0x298] sm:$0xff]  ;;  %v1650_v16 = vld [vmem:[#allocation8 + $0x190] sm:$0xff] }
 0x38f   :  { %1422 = vmatmul.mubr.f32.vlgmr.msra.gmra.mxu0 %v1336_v17  ;;  %v1817_v17 = vld [vmem:[#allocation8 + $0x218] sm:$0xff] }
 0x390   :  { %1492 = vmatprep.mubr.f32.mxu1 %v1356_v18  ;;  %6755 = vmatpush3.msra.mxu0 %v1647_v21  ;;  %v1634_v18 = vld [vmem:[#allocation8 + $0x110] sm:$0xff] }
 0x391   :  { %1493 = vmatmul.mubr.f32.vlgmr.msra.gmra.mxu1 %v1350_v19  ;;  %6756 = vmatprep.subr.mxu0 %v1662_v23  ;;  %v1832_v19 = vld [vmem:[#allocation8 + $0x290] sm:$0xff]  ;;  %v1831_v23 = vld [vmem:[#allocation8 + $0x288] sm:$0xff] }
 0x392   :  { %6825 = vmatpush3.msra.mxu1 %v1829_v24  ;;  %6757 = vmatpush3.msra.mxu0 %v1646_v25  ;;  %v1816_v21 = vld [vmem:[#allocation8 + $0x210] sm:$0xff]  ;;  %v1648_v24 = vld [vmem:[#allocation8 + $0x180] sm:$0xff]  ;;  %v1815_v25 = vld [vmem:[#allocation8 + $0x208] sm:$0xff] }
 0x393   :  { %6826 = vmatprep.subr.mxu1 %v1844_v26  ;;  %6758 = vmatprep.subr.mxu0 %v1661_v27  ;;  %v1632_v26 = vld [vmem:[#allocation8 + $0x100] sm:$0xff] }
 0x394   :  { %6827 = vmatpush3.msra.mxu1 %v1828_v29  ;;  %6759 = vmatpush3.msra.mxu0 %v1645_v30  ;;  %v1830_v27 = vld [vmem:[#allocation8 + $0x280] sm:$0xff]  ;;  %v1609_v29 = vld [vmem:[#allocation8 + $0xf8] sm:$0xff] }
 0x395   :  { %6828 = vmatprep.subr.mxu1 %v1843_v31  ;;  %6760 = vmatprep.subr.mxu0 %v1660_v32  ;;  %v1814_v30 = vld [vmem:[#allocation8 + $0x200] sm:$0xff] }
 0x396   :  { %6829 = vmatpush3.msra.mxu1 %v1827_v33  ;;  %6761 = vmatpush3.msra.mxu0 %v1644_v34 }
 0x397   :  { %6830 = vmatprep.subr.mxu1 %v1842_v35  ;;  %6762 = vmatprep.subr.mxu0 %v1659_v36 }
 0x398   :  { %6831 = vmatpush3.msra.mxu1 %v1826_v37  ;;  %6763 = vmatpush3.msra.mxu0 %v1643_v38 }
 0x399   :  { %6832 = vmatprep.subr.mxu1 %v1841_v39  ;;  %6764 = vmatprep.subr.mxu0 %v1658_v40 }
 0x39a   :  { %6833 = vmatpush3.msra.mxu1 %v1825_v41  ;;  %6765 = vmatpush3.msra.mxu0 %v1642_v42 }
 0x39b   :  { %6834 = vmatprep.subr.mxu1 %v1840_v28  ;;  %6766 = vmatprep.subr.mxu0 %v1657_v43 }
 0x39c   :  { %6835 = vmatpush3.msra.mxu1 %v1824_v44  ;;  %6767 = vmatpush3.msra.mxu0 %v1641_v45  ;;  %v1328_v44 = vld [vmem:[#allocation7 + $0x800] ss:$8 sm:$0x3] }
 0x39d   :  { %6836 = vmatprep.subr.mxu1 %v1839_v47  ;;  %6768 = vmatprep.subr.mxu0 %v1656_v49 }
 0x39e   :  { %6837 = vmatpush3.msra.mxu1 %v1823_v51  ;;  %6769 = vmatpush3.msra.mxu0 %v1640_v52  ;;  %v1330_v51 = vld [vmem:[#allocation7 + $0x801] ss:$8 sm:$0x3] }
 0x39f   :  { %6838 = vmatprep.subr.mxu1 %v1838_v53  ;;  %6770 = vmatprep.subr.mxu0 %v1655_v55  ;;  %v9784_v53 = vrot.slane %v1330_v51, %v9737_v59  ;;  %v9787_v55 = vrot.slane %v1330_v51, %v9731_v48  ;;  %v1588_v51 = vld [vmem:[#allocation8 + $0x50] sm:$0xff] }
 0x3a0   :  { %6839 = vmatpush3.msra.mxu1 %v1822_v60  ;;  %6771 = vmatpush3.msra.mxu0 %v1639_v62 }
 0x3a1   :  { %6840 = vmatprep.subr.mxu1 %v1837_v63  ;;  %6772 = vmatprep.subr.mxu0 %v1654_v1  ;;  %11314 = vst [vmem:[#allocation32_spill] sm:$0xff] %v9784_v53  ;;  %11315 = vst [vmem:[#allocation33_spill] sm:$0xff] %v9787_v55 }
 0x3a2   :  { %6841 = vmatpush3.msra.mxu1 %v1821_v2  ;;  %6773 = vmatpush3.msra.mxu0 %v1638_v3 }
 0x3a3   :  { %6842 = vmatprep.subr.mxu1 %v1836_v4  ;;  %6774 = vmatprep.subr.mxu0 %v1653_v5 }
 0x3a4   :  { %6843 = vmatpush3.msra.mxu1 %v1820_v6  ;;  %6775 = vmatpush3.msra.mxu0 %v1637_v7 }
 0x3a5   :  { %6844 = vmatprep.subr.mxu1 %v1835_v8  ;;  %6776 = vmatprep.subr.mxu0 %v1652_v10 }
 0x3a6   :  { %6845 = vmatpush3.msra.mxu1 %v1819_v11  ;;  %6777 = vmatpush3.msra.mxu0 %v1636_v12 }
 0x3a7   :  { %6846 = vmatprep.subr.mxu1 %v1834_v56  ;;  %6778 = vmatprep.subr.mxu0 %v1651_v58 }
 0x3a8   :  { %6847 = vmatpush3.msra.mxu1 %v1818_v13  ;;  %6779 = vmatpush3.msra.mxu0 %v1635_v14 }
 0x3a9   :  { %6848 = vmatprep.subr.mxu1 %v1833_v15  ;;  %6780 = vmatprep.subr.mxu0 %v1650_v16 }
 0x3aa   :  { %6849 = vmatpush3.msra.mxu1 %v1817_v17  ;;  %6781 = vmatpush3.msra.mxu0 %v1634_v18 }
 0x3ab   :  { %6850 = vmatprep.subr.mxu1 %v1832_v19  ;;  %6782 = vmatprep.subr.mxu0 %v1649_v20 }
 0x3ac   :  { %6851 = vmatpush3.msra.mxu1 %v1816_v21  ;;  %6783 = vmatpush3.msra.mxu0 %v1633_v22 }
 0x3ad   :  { %6852 = vmatprep.subr.mxu1 %v1831_v23  ;;  %6784 = vmatprep.subr.mxu0 %v1648_v24 }
 0x3ae   :  { %6853 = vmatpush3.msra.mxu1 %v1815_v25  ;;  %6785 = vmatpush3.msra.mxu0 %v1632_v26 }
 0x3af   :  { %6854 = vmatprep.subr.mxu1 %v1830_v27  ;;  %6789 = vmatprep.subr.mxu0 %v1609_v29 }
 0x3b0   :  { %6855 = vmatpush3.msra.mxu1 %v1814_v30 }
 0x3b1   :  { %7503 = vmatprep.subr.mxu1 %v11270_v0 }
 0x44f   :  { %v1423_v31 = vpop.f32.mrf.mxu0 }
 0x450   :  { %v1499_v32 = vmul.f32 %v1423_v31, %v1423_v31  ;;  %v1529_v45 = vrot.slane %v1423_v31, %v9731_v48 }
 0x451   :  { %v1425_v33 = vpop.f32.mrf.mxu0  ;;  %v1494_v34 = vpop.f32.mrf.mxu1 }
 0x452   :  { %v1500_v35 = vmul.f32 %v1425_v33, %v1425_v33  ;;  %v1501_v36 = vsub.f32 %v1494_v34, %v1499_v32  ;;  %v1533_v47 = vrot.slane %v1425_v33, %v9731_v48  ;;  %v1534_v60 = vsub.f32 %v9766_v50, %v1529_v45  ;;  %v1593_v33 = vld [vmem:[#allocation8 + $0x78] sm:$0xff] }
 0x453   :  { %v1496_v37 = vpop.f32.mrf.mxu1  ;;  %v1605_v45 = vld [vmem:[#allocation8 + $0xd8] sm:$0xff] }
 0x454   :  { %v1503_v38 = vadd.f32 1e-05, %v1501_v36  ;;  %v1502_v39 = vsub.f32 %v1496_v37, %v1500_v35  ;;  %v1535_v62 = vsub.f32 %v9771_v54, %v1533_v47  ;;  %v1608_v37 = vld [vmem:[#allocation8 + $0xf0] sm:$0xff]  ;;  %v1589_v47 = vld [vmem:[#allocation8 + $0x58] sm:$0xff] }
 0x456   :  { %v1504_v40 = vadd.f32 1e-05, %v1502_v39  ;;  %8540 = vrsqrt.f32 %v1503_v38 }
 0x458   :  { %8542 = vrsqrt.f32 %v1504_v40  ;;  %v1592_v40 = vld [vmem:[#allocation8 + $0x70] sm:$0xff] }
 0x463   :  { %v8541_v41 = vpop.eup %8540 }
 0x465   :  { %v8543_v42 = vpop.eup %8542 }
 0x466   :  { %v1509_v28 = vcombine.low %v8541_v41, %v8543_v42  ;;  %v1607_v42 = vld [vmem:[#allocation8 + $0xe8] sm:$0xff] }
 0x468   :  { %v1516_v43 = vrot.slane %v1509_v28, %v9729_v46  ;;  %v1591_v28 = vld [vmem:[#allocation8 + $0x68] sm:$0xff] }
 0x46a   :  { %v1523_v49 = vrot.slane %v1516_v43, %v9729_v46  ;;  %v1606_v43 = vld [vmem:[#allocation8 + $0xe0] sm:$0xff]  ;;  %v10369_v46 = vld [vmem:[#allocation5 + $0x418] sm:$0xff] }
 0x46b   :  { %11328 = vst [vmem:[#allocation46_spill] sm:$0xff] %v10369_v46 }
 0x46c   :  { %v1525_v52 = vmul.f32 %v1523_v49, %v1328_v44  ;;  %v1590_v44 = vld [vmem:[#allocation8 + $0x60] sm:$0xff]  ;;  %v1604_v49 = vld [vmem:[#allocation8 + $0xd0] sm:$0xff] }
 0x46e   :  { %v1540_v63 = vrot.slane %v1525_v52, %v9731_v48  ;;  %v1544_v1 = vrot.slane %v1525_v52, %v9737_v59  ;;  %v1603_v52 = vld [vmem:[#allocation8 + $0xc8] sm:$0xff] }
 0x46f   :  { %v10363_v59 = vld [vmem:[#allocation5 + $0x428] sm:$0xff] }
 0x470   :  { %v1548_v2 = vmul.f32 %v1544_v1, %v1535_v62  ;;  %v1547_v3 = vmul.f32 %v1540_v63, %v1534_v60  ;;  %v1587_v60 = vld [vmem:[#allocation8 + $0x48] sm:$0xff]  ;;  %v1602_v62 = vld [vmem:[#allocation8 + $0xc0] sm:$0xff]  ;;  %v1601_v1 = vld [vmem:[#allocation8 + $0xb8] sm:$0xff]  ;;  %11326 = vst [vmem:[#allocation44_spill] sm:$0xff] %v10363_v59 }
 0x471   :  { %v1586_v63 = vld [vmem:[#allocation8 + $0x40] sm:$0xff] }
 0x472   :  { %v1561_v4 = vadd.f32 %v9784_v53, %v1548_v2  ;;  %v1560_v5 = vadd.f32 %v9787_v55, %v1547_v3  ;;  %v1585_v2 = vld [vmem:[#allocation8 + $0x38] sm:$0xff]  ;;  %v1600_v3 = vld [vmem:[#allocation8 + $0xb0] sm:$0xff]  ;;  %v10351_v55 = vld [vmem:[#allocation5 + $0x448] sm:$0xff] }
 0x473   :  { %11322 = vst [vmem:[#allocation40_spill] sm:$0xff] %v10351_v55  ;;  %v10354_v53 = vld [vmem:[#allocation5 + $0x440] sm:$0xff] }
 0x474   :  { %vm1563_vm6 = vcmp.ge.f32.partialorder %v1561_v4, 0.0  ;;  %v1565_v6 = vmul.f32 0.01, %v1561_v4  ;;  %vm1562_vm7 = vcmp.ge.f32.partialorder %v1560_v5, 0.0  ;;  %v1564_v7 = vmul.f32 0.01, %v1560_v5 }
 0x475   :  { %11323 = vst [vmem:[#allocation41_spill] sm:$0xff] %v10354_v53 }
 0x476   :  { %v1567_v8 = vsel %vm1563_vm6, %v1561_v4, %v1565_v6  ;;  %v1566_v10 = vsel %vm1562_vm7, %v1560_v5, %v1564_v7  ;;  %v1584_v4 = vld [vmem:[#allocation8 + $0x30] sm:$0xff]  ;;  %v1599_v5 = vld [vmem:[#allocation8 + $0xa8] sm:$0xff]  ;;  %v1598_v7 = vld [vmem:[#allocation8 + $0xa0] sm:$0xff]  ;;  %vm3585_vm7 = vcmask 48128  }
 0x477   :  { %v1571_v11 = vrot.slane %v1567_v8, 7  ;;  %v1570_v50 = vrot.slane %v1566_v10, 7  ;;  %v1583_v6 = vld [vmem:[#allocation8 + $0x28] sm:$0xff]  ;;  %v1582_v8 = vld [vmem:[#allocation8 + $0x20] sm:$0xff]  ;;  %v1597_v10 = vld [vmem:[#allocation8 + $0x98] sm:$0xff] }
 0x479   :  { %v1575_v54 = vsel %vm195_vm0, 0.0, %v1571_v11  ;;  %v1577_v12 = vsel %vm195_vm0, %v1571_v11, 0.0  ;;  %v9798_v56 = vsel %vm195_vm0, 0.0, %v1570_v50  ;;  %v1576_v58 = vsel %vm195_vm0, %v1570_v50, 0.0  ;;  %v1581_v11 = vld [vmem:[#allocation8 + $0x18] sm:$0xff]  ;;  %v1596_v50 = vld [vmem:[#allocation8 + $0x90] sm:$0xff] }
 0x47a   :  { %v1613_v13 = vrot.slane %v1575_v54, 1  ;;  %v1617_v14 = vrot.slane %v1575_v54, 2  ;;  %v1621_v15 = vrot.slane %v1575_v54, 3  ;;  %v1665_v16 = vrot.slane %v1575_v54, 4 }
 0x47b   :  { %v1849_v17 = vrot.slane %v1577_v12, 5  ;;  %v1612_v18 = vrot.slane %v9798_v56, 1  ;;  %v9803_v19 = vrot.slane %v9798_v56, 2  ;;  %v9806_v20 = vrot.slane %v9798_v56, 3  ;;  %v1595_v12 = vld [vmem:[#allocation8 + $0x88] sm:$0xff] }
 0x47c   :  { %v1669_v21 = vsel %vm195_vm0, %v1613_v13, %v1617_v14  ;;  %v1853_v22 = vsel %vm195_vm0, %v1617_v14, %v1621_v15  ;;  %v1664_v23 = vrot.slane %v9798_v56, 4  ;;  %v1848_v24 = vrot.slane %v1576_v58, 5 }
 0x47d   :  { %v1671_v25 = vsel %vm1626_vm8, %v1669_v21, %v1621_v15  ;;  %v1855_v26 = vsel %vm1626_vm8, %v1853_v22, %v1665_v16  ;;  %v1668_v27 = vsel %vm195_vm0, %v1612_v18, %v9803_v19  ;;  %v1852_v29 = vsel %vm195_vm0, %v9803_v19, %v9806_v20  ;;  %v1944_v21 = vld [vmem:[#allocation8 + $0x378] sm:$0xff]  ;;  %v1939_v22 = vld [vmem:[#allocation8 + $0x350] sm:$0xff] }
 0x47e   :  { %v1673_v30 = vsel %vm1629_vm9, %v1671_v25, %v1665_v16  ;;  %v1857_v31 = vsel %vm1629_vm9, %v1855_v26, %v1849_v17  ;;  %v1670_v32 = vsel %vm1626_vm8, %v1668_v27, %v9806_v20  ;;  %v1854_v34 = vsel %vm1626_vm8, %v1852_v29, %v1664_v23  ;;  %v1936_v25 = vld [vmem:[#allocation8 + $0x338] sm:$0xff]  ;;  %v1935_v26 = vld [vmem:[#allocation8 + $0x330] sm:$0xff]  ;;  %v1934_v27 = vld [vmem:[#allocation8 + $0x328] sm:$0xff] }
 0x47f   :  { %1738 = vmatprep.mubr.f32.mxu0 %v1673_v30  ;;  %1922 = vmatprep.mubr.f32.mxu1 %v1857_v31  ;;  %v1672_v35 = vsel %vm1629_vm9, %v1670_v32, %v1664_v23  ;;  %v1856_v36 = vsel %vm1629_vm9, %v1854_v34, %v1848_v24  ;;  %v1625_v38 = vsel %vm195_vm0, %v1575_v54, %v1613_v13  ;;  %v1580_v54 = vld [vmem:[#allocation8 + $0x10] sm:$0xff]  ;;  %v1579_v13 = vld [vmem:[#allocation8 + $0x8] sm:$0xff]  ;;  %v1937_v24 = vld [vmem:[#allocation8 + $0x340] sm:$0xff] }
 0x480   :  { %1739 = vmatmul.mubr.f32.vlgmr.msra.gmra.mxu0 %v1672_v35  ;;  %1923 = vmatmul.mubr.f32.vlgmr.msra.gmra.mxu1 %v1856_v36  ;;  %v1628_v39 = vsel %vm1626_vm8, %v1625_v38, %v1617_v14  ;;  %v1624_v58 = vsel %vm195_vm0, %v9798_v56, %v1612_v18  ;;  %v1594_v14 = vld [vmem:[#allocation8 + $0x80] sm:$0xff]  ;;  %v1943_v56 = vld [vmem:[#allocation8 + $0x370] sm:$0xff]  ;;  %v1942_v18 = vld [vmem:[#allocation8 + $0x368] sm:$0xff] }
 0x481   :  { %6790 = vmatpush3.msra.mxu0 %v1593_v33  ;;  %v1631_v41 = vsel %vm1629_vm9, %v1628_v39, %v1621_v15  ;;  %v1578_v15 = vld [vmem:[#allocation8] sm:$0xff]  ;;  %v1627_v16 = vsel %vm1626_vm8, %v1624_v58, %v9803_v19  ;;  %7504 = vmatpush3.msra.mxu1 %v1944_v21  ;;  %v1938_v23 = vld [vmem:[#allocation8 + $0x348] sm:$0xff]  ;;  %v1932_v30 = vld [vmem:[#allocation8 + $0x318] sm:$0xff] }
 0x482   :  { %6791 = vmatprep.subr.mxu0 %v1608_v37  ;;  %1808 = vmatprep.mubr.f32.mxu0 %v1631_v41  ;;  %v1630_v17 = vsel %vm1629_vm9, %v1627_v16, %v9806_v20  ;;  %v1941_v19 = vld [vmem:[#allocation8 + $0x360] sm:$0xff]  ;;  %v1940_v20 = vld [vmem:[#allocation8 + $0x358] sm:$0xff]  ;;  %v1931_v31 = vld [vmem:[#allocation8 + $0x310] sm:$0xff] }
 0x483   :  { %6792 = vmatpush3.msra.mxu0 %v1592_v40  ;;  %7505 = vmatprep.subr.mxu1 %v11270_v0  ;;  %v1933_v29 = vld [vmem:[#allocation8 + $0x320] sm:$0xff]  ;;  %v1930_v32 = vld [vmem:[#allocation8 + $0x308] sm:$0xff]  ;;  %v2158_v16 = vld [vmem:[#allocation10 + $0xd0] sm:$0xff] }
 0x484   :  { %6793 = vmatprep.subr.mxu0 %v1607_v42  ;;  %7506 = vmatpush3.msra.mxu1 %v1943_v56  ;;  %v1929_v33 = vld [vmem:[#allocation8 + $0x300] sm:$0xff]  ;;  %v2160_v58 = vld [vmem:[#allocation10 + $0xe0] sm:$0xff] }
 0x485   :  { %6794 = vmatpush3.msra.mxu0 %v1591_v28  ;;  %7507 = vmatprep.subr.mxu1 %v11270_v0 }
 0x486   :  { %6795 = vmatprep.subr.mxu0 %v1606_v43  ;;  %7508 = vmatpush3.msra.mxu1 %v1942_v18 }
 0x487   :  { %6796 = vmatpush3.msra.mxu0 %v1590_v44  ;;  %7509 = vmatprep.subr.mxu1 %v11270_v0 }
 0x488   :  { %6797 = vmatprep.subr.mxu0 %v1605_v45  ;;  %7510 = vmatpush3.msra.mxu1 %v1941_v19 }
 0x489   :  { %6798 = vmatpush3.msra.mxu0 %v1589_v47  ;;  %7511 = vmatprep.subr.mxu1 %v11270_v0 }
 0x48a   :  { %6799 = vmatprep.subr.mxu0 %v1604_v49  ;;  %7512 = vmatpush3.msra.mxu1 %v1940_v20 }
 0x48b   :  { %6800 = vmatpush3.msra.mxu0 %v1588_v51  ;;  %7513 = vmatprep.subr.mxu1 %v11270_v0 }
 0x48c   :  { %6801 = vmatprep.subr.mxu0 %v1603_v52  ;;  %7514 = vmatpush3.msra.mxu1 %v1939_v22 }
 0x48d   :  { %6802 = vmatpush3.msra.mxu0 %v1587_v60  ;;  %7515 = vmatprep.subr.mxu1 %v11270_v0 }
 0x48e   :  { %6803 = vmatprep.subr.mxu0 %v1602_v62  ;;  %7516 = vmatpush3.msra.mxu1 %v1938_v23 }
 0x48f   :  { %6804 = vmatpush3.msra.mxu0 %v1586_v63  ;;  %7517 = vmatprep.subr.mxu1 %v11270_v0 }
 0x490   :  { %6805 = vmatprep.subr.mxu0 %v1601_v1  ;;  %7518 = vmatpush3.msra.mxu1 %v1937_v24 }
 0x491   :  { %6806 = vmatpush3.msra.mxu0 %v1585_v2  ;;  %7519 = vmatprep.subr.mxu1 %v11270_v0 }
 0x492   :  { %6807 = vmatprep.subr.mxu0 %v1600_v3  ;;  %7520 = vmatpush3.msra.mxu1 %v1936_v25 }
 0x493   :  { %6808 = vmatpush3.msra.mxu0 %v1584_v4  ;;  %7521 = vmatprep.subr.mxu1 %v11270_v0 }
 0x494   :  { %6809 = vmatprep.subr.mxu0 %v1599_v5  ;;  %7522 = vmatpush3.msra.mxu1 %v1935_v26 }
 0x495   :  { %6810 = vmatpush3.msra.mxu0 %v1583_v6  ;;  %7523 = vmatprep.subr.mxu1 %v11270_v0 }
 0x496   :  { %6811 = vmatprep.subr.mxu0 %v1598_v7  ;;  %7524 = vmatpush3.msra.mxu1 %v1934_v27  ;;  %v2147_v7 = vld [vmem:[#allocation10 + $0x78] sm:$0xff] }
 0x497   :  { %6812 = vmatpush3.msra.mxu0 %v1582_v8  ;;  %7525 = vmatprep.subr.mxu1 %v11270_v0  ;;  %v2163_v8 = vld [vmem:[#allocation10 + $0xf8] sm:$0xff] }
 0x498   :  { %6813 = vmatprep.subr.mxu0 %v1597_v10  ;;  %7526 = vmatpush3.msra.mxu1 %v1933_v29  ;;  %v2146_v10 = vld [vmem:[#allocation10 + $0x70] sm:$0xff] }
 0x499   :  { %6814 = vmatpush3.msra.mxu0 %v1581_v11  ;;  %7527 = vmatprep.subr.mxu1 %v11270_v0  ;;  %v2162_v11 = vld [vmem:[#allocation10 + $0xf0] sm:$0xff] }
 0x49a   :  { %6815 = vmatprep.subr.mxu0 %v1596_v50  ;;  %7528 = vmatpush3.msra.mxu1 %v1932_v30  ;;  %v2145_v50 = vld [vmem:[#allocation10 + $0x68] sm:$0xff] }
 0x49b   :  { %6816 = vmatpush3.msra.mxu0 %v1580_v54  ;;  %7529 = vmatprep.subr.mxu1 %v11270_v0  ;;  %v2161_v54 = vld [vmem:[#allocation10 + $0xe8] sm:$0xff] }
 0x49c   :  { %6817 = vmatprep.subr.mxu0 %v1595_v12  ;;  %7530 = vmatpush3.msra.mxu1 %v1931_v31  ;;  %v2144_v12 = vld [vmem:[#allocation10 + $0x60] sm:$0xff] }
 0x49d   :  { %6818 = vmatpush3.msra.mxu0 %v1579_v13  ;;  %7531 = vmatprep.subr.mxu1 %v11270_v0  ;;  %v2143_v13 = vld [vmem:[#allocation10 + $0x58] sm:$0xff] }
 0x49e   :  { %6819 = vmatprep.subr.mxu0 %v1594_v14  ;;  %7532 = vmatpush3.msra.mxu1 %v1930_v32  ;;  %v2159_v14 = vld [vmem:[#allocation10 + $0xd8] sm:$0xff] }
 0x49f   :  { %6820 = vmatpush3.msra.mxu0 %v1578_v15  ;;  %7533 = vmatprep.subr.mxu1 %v11270_v0  ;;  %v2142_v15 = vld [vmem:[#allocation10 + $0x50] sm:$0xff] }
 0x4a0   :  { %1809 = vmatmul.mubr.f32.vlgmr.msra.gmra.mxu0 %v1630_v17  ;;  %7468 = vmatprep.subr.mxu0 %v11270_v0  ;;  %v2141_v17 = vld [vmem:[#allocation10 + $0x48] sm:$0xff] }
 0x4a1   :  { %7469 = vmatpush3.msra.mxu0 %v1944_v21  ;;  %7500 = vmatprep.mubr.msk.f32.mxu0 %vm9525_vm10, %v11270_v0  ;;  %v2157_v21 = vld [vmem:[#allocation10 + $0xc8] sm:$0xff] }
 0x4a2   :  { %7470 = vmatprep.subr.mxu0 %v11270_v0  ;;  %7534 = vmatpush3.msra.mxu1 %v1929_v33 }
 0x4a3   :  { %7471 = vmatpush3.msra.mxu0 %v1943_v56  ;;  %7535 = vmatprep.mubr.msk.f32.mxu1 %vm9525_vm10, %v11270_v0  ;;  %v2140_v56 = vld [vmem:[#allocation10 + $0x40] sm:$0xff] }
 0x4a4   :  { %7472 = vmatprep.subr.mxu0 %v11270_v0  ;;  %7573 = vmatprep.subr.mxu1 %v11270_v0 }
 0x4a5   :  { %7473 = vmatpush3.msra.mxu0 %v1942_v18  ;;  %v2156_v18 = vld [vmem:[#allocation10 + $0xc0] sm:$0xff] }
 0x4a6   :  { %7474 = vmatprep.subr.mxu0 %v11270_v0 }
 0x4a7   :  { %7475 = vmatpush3.msra.mxu0 %v1941_v19  ;;  %v2139_v19 = vld [vmem:[#allocation10 + $0x38] sm:$0xff] }
 0x4a8   :  { %7476 = vmatprep.subr.mxu0 %v11270_v0 }
 0x4a9   :  { %7477 = vmatpush3.msra.mxu0 %v1940_v20  ;;  %v2155_v20 = vld [vmem:[#allocation10 + $0xb8] sm:$0xff] }
 0x4aa   :  { %7478 = vmatprep.subr.mxu0 %v11270_v0 }
 0x4ab   :  { %7479 = vmatpush3.msra.mxu0 %v1939_v22  ;;  %v2138_v22 = vld [vmem:[#allocation10 + $0x30] sm:$0xff] }
 0x4ac   :  { %7480 = vmatprep.subr.mxu0 %v11270_v0 }
 0x4ad   :  { %7481 = vmatpush3.msra.mxu0 %v1938_v23  ;;  %v2154_v23 = vld [vmem:[#allocation10 + $0xb0] sm:$0xff] }
 0x4ae   :  { %7482 = vmatprep.subr.mxu0 %v11270_v0 }
 0x4af   :  { %7483 = vmatpush3.msra.mxu0 %v1937_v24  ;;  %v2137_v24 = vld [vmem:[#allocation10 + $0x28] sm:$0xff] }
 0x4b0   :  { %7484 = vmatprep.subr.mxu0 %v11270_v0 }
 0x4b1   :  { %7485 = vmatpush3.msra.mxu0 %v1936_v25  ;;  %v2153_v25 = vld [vmem:[#allocation10 + $0xa8] sm:$0xff] }
 0x4b2   :  { %7486 = vmatprep.subr.mxu0 %v11270_v0 }
 0x4b3   :  { %7487 = vmatpush3.msra.mxu0 %v1935_v26  ;;  %v2136_v26 = vld [vmem:[#allocation10 + $0x20] sm:$0xff] }
 0x4b4   :  { %7488 = vmatprep.subr.mxu0 %v11270_v0 }
 0x4b5   :  { %7489 = vmatpush3.msra.mxu0 %v1934_v27  ;;  %v2152_v27 = vld [vmem:[#allocation10 + $0xa0] sm:$0xff] }
 0x4b6   :  { %7490 = vmatprep.subr.mxu0 %v11270_v0 }
 0x4b7   :  { %7491 = vmatpush3.msra.mxu0 %v1933_v29  ;;  %v2135_v29 = vld [vmem:[#allocation10 + $0x18] sm:$0xff] }
 0x4b8   :  { %7492 = vmatprep.subr.mxu0 %v11270_v0 }
 0x4b9   :  { %7493 = vmatpush3.msra.mxu0 %v1932_v30  ;;  %v2151_v30 = vld [vmem:[#allocation10 + $0x98] sm:$0xff] }
 0x4ba   :  { %7494 = vmatprep.subr.mxu0 %v11270_v0 }
 0x4bb   :  { %7495 = vmatpush3.msra.mxu0 %v1931_v31  ;;  %v2134_v31 = vld [vmem:[#allocation10 + $0x10] sm:$0xff] }
 0x4bc   :  { %7496 = vmatprep.subr.mxu0 %v11270_v0 }
 0x4bd   :  { %7497 = vmatpush3.msra.mxu0 %v1930_v32  ;;  %v2150_v32 = vld [vmem:[#allocation10 + $0x90] sm:$0xff] }
 0x4be   :  { %7498 = vmatprep.subr.mxu0 %v11270_v0 }
 0x4bf   :  { %7499 = vmatpush3.msra.mxu0 %v1929_v33  ;;  %v2133_v33 = vld [vmem:[#allocation10 + $0x8] sm:$0xff] }
 0x4c0   :  { %7538 = vmatprep.subr.mxu0 %v11270_v0 }
 0x540   :  { %v6786_v34 = vpop.f32.mrf.mxu0  ;;  %v6856_v35 = vpop.f32.mrf.mxu1 }
 0x542   :  { %v6787_v36 = vpop.f32.mrf.mxu0  ;;  %v6857_v38 = vpop.f32.mrf.mxu1 }
 0x543   :  { %v6788_v40 = vadd.f32 %v6787_v36, %v6786_v34  ;;  %v6858_v42 = vadd.f32 %v6857_v38, %v6856_v35  ;;  %v2149_v34 = vld [vmem:[#allocation10 + $0x88] sm:$0xff]  ;;  %v2132_v35 = vld [vmem:[#allocation10] sm:$0xff] }
 0x544   :  { %v2148_v36 = vld [vmem:[#allocation10 + $0x80] sm:$0xff] }
 0x560   :  { %v6821_v37 = vpop.f32.mrf.mxu0 }
 0x562   :  { %v6822_v39 = vpop.f32.mrf.mxu0 }
 0x563   :  { %v6823_v41 = vadd.f32 %v6822_v39, %v6821_v37 }
 0x565   :  { %v1811_v28 = vadd.f32 %v6823_v41, %v6788_v40 }
 0x567   :  { %v9875_v43 = vadd.f32 %v6858_v42, %v1811_v28 }
 0x569   :  { %v1948_v44 = vsel %vm1947_vm11, %v9875_v43, 0.0  ;;  %v1955_v45 = vmul.f32 %v9875_v43, %v9875_v43 }
 0x56a   :  { %v1949_v47 = vrot.slane %v1948_v44, 4 }
 0x56b   :  { %v1956_v49 = vsel %vm1947_vm11, %v1955_v45, 0.0 }
 0x56c   :  { %v1950_v51 = vadd.f32 %v1949_v47, %v1948_v44  ;;  %v1957_v52 = vrot.slane %v1956_v49, 4  ;;  %v1945_v44 = vld [vmem:[#allocation8 + $0x380] sm:$0x1] }
 0x56e   :  { %v1951_v60 = vrot.slane %v1950_v51, 2  ;;  %v1958_v62 = vadd.f32 %v1957_v52, %v1956_v49 }
 0x570   :  { %v1952_v63 = vadd.f32 %v1951_v60, %v1950_v51  ;;  %v1959_v1 = vrot.slane %v1958_v62, 2  ;;  %v6717_v60 = vld [vmem:[#allocation8 + $0x381] ss:$0 sm:$0xff] }
 0x572   :  { %v1953_v2 = vrot.slane %v1952_v63, 1  ;;  %v1960_v3 = vadd.f32 %v1959_v1, %v1958_v62 }
 0x574   :  { %v1954_v4 = vadd.f32 %v1953_v2, %v1952_v63  ;;  %v1961_v5 = vrot.slane %v1960_v3, 1 }
 0x576   :  { %7501 = vmatmul.mubr.f32.vlgmr.msra.gmra.mxu0 %v1954_v4  ;;  %v1962_v6 = vadd.f32 %v1961_v5, %v1960_v3 }
 0x577   :  { %7570 = vmatprep.mubr.msk.f32.mxu0 %vm9525_vm10, %v11270_v0  ;;  %7539 = vmatpush3.msra.mxu0 %v2163_v8  ;;  %v2320_v8 = vld [vmem:[#allocation10 + $0x168] sm:$0xff] }
 0x578   :  { %7536 = vmatmul.mubr.f32.vlgmr.msra.gmra.mxu1 %v1962_v6  ;;  %7540 = vmatprep.subr.mxu0 %v11270_v0 }
 0x579   :  { %7605 = vmatprep.mubr.msk.f32.mxu1 %vm9525_vm10, %v11270_v0  ;;  %7574 = vmatpush3.msra.mxu1 %v2147_v7  ;;  %v2322_v7 = vld [vmem:[#allocation10 + $0x178] sm:$0xff] }
 0x57a   :  { %7575 = vmatprep.subr.mxu1 %v11270_v0  ;;  %7541 = vmatpush3.msra.mxu0 %v2162_v11  ;;  %v2318_v11 = vld [vmem:[#allocation10 + $0x158] sm:$0xff] }
 0x57b   :  { %7576 = vmatpush3.msra.mxu1 %v2146_v10  ;;  %7542 = vmatprep.subr.mxu0 %v11270_v0  ;;  %v2319_v10 = vld [vmem:[#allocation10 + $0x160] sm:$0xff] }
 0x57c   :  { %7577 = vmatprep.subr.mxu1 %v11270_v0  ;;  %7543 = vmatpush3.msra.mxu0 %v2161_v54  ;;  %v2316_v54 = vld [vmem:[#allocation10 + $0x148] sm:$0xff] }
 0x57d   :  { %7578 = vmatpush3.msra.mxu1 %v2145_v50  ;;  %7544 = vmatprep.subr.mxu0 %v11270_v0  ;;  %v2317_v50 = vld [vmem:[#allocation10 + $0x150] sm:$0xff] }
 0x57e   :  { %7579 = vmatprep.subr.mxu1 %v11270_v0  ;;  %7545 = vmatpush3.msra.mxu0 %v2160_v58  ;;  %v2314_v58 = vld [vmem:[#allocation10 + $0x138] sm:$0xff] }
 0x57f   :  { %7580 = vmatpush3.msra.mxu1 %v2144_v12  ;;  %7546 = vmatprep.subr.mxu0 %v11270_v0  ;;  %v2315_v12 = vld [vmem:[#allocation10 + $0x140] sm:$0xff] }
 0x580   :  { %7581 = vmatprep.subr.mxu1 %v11270_v0  ;;  %7547 = vmatpush3.msra.mxu0 %v2159_v14  ;;  %v2312_v14 = vld [vmem:[#allocation10 + $0x128] sm:$0xff] }
 0x581   :  { %7582 = vmatpush3.msra.mxu1 %v2143_v13  ;;  %7548 = vmatprep.subr.mxu0 %v11270_v0  ;;  %v2313_v13 = vld [vmem:[#allocation10 + $0x130] sm:$0xff] }
 0x582   :  { %7583 = vmatprep.subr.mxu1 %v11270_v0  ;;  %7549 = vmatpush3.msra.mxu0 %v2158_v16  ;;  %v2310_v16 = vld [vmem:[#allocation10 + $0x118] sm:$0xff] }
 0x583   :  { %7584 = vmatpush3.msra.mxu1 %v2142_v15  ;;  %7550 = vmatprep.subr.mxu0 %v11270_v0  ;;  %v2311_v15 = vld [vmem:[#allocation10 + $0x120] sm:$0xff] }
 0x584   :  { %7585 = vmatprep.subr.mxu1 %v11270_v0  ;;  %7551 = vmatpush3.msra.mxu0 %v2157_v21  ;;  %v2308_v21 = vld [vmem:[#allocation10 + $0x108] sm:$0xff] }
 0x585   :  { %7586 = vmatpush3.msra.mxu1 %v2141_v17  ;;  %7552 = vmatprep.subr.mxu0 %v11270_v0  ;;  %v2309_v17 = vld [vmem:[#allocation10 + $0x110] sm:$0xff] }
 0x586   :  { %7587 = vmatprep.subr.mxu1 %v11270_v0  ;;  %7553 = vmatpush3.msra.mxu0 %v2156_v18 }
 0x587   :  { %7588 = vmatpush3.msra.mxu1 %v2140_v56  ;;  %7554 = vmatprep.subr.mxu0 %v11270_v0  ;;  %v2307_v56 = vld [vmem:[#allocation10 + $0x100] sm:$0xff] }
 0x588   :  { %7589 = vmatprep.subr.mxu1 %v11270_v0  ;;  %7555 = vmatpush3.msra.mxu0 %v2155_v20  ;;  %v2410_v20 = vld [vmem:[#allocation10 + $0x1f0] sm:$0xff] }
 0x589   :  { %7590 = vmatpush3.msra.mxu1 %v2139_v19  ;;  %7556 = vmatprep.subr.mxu0 %v11270_v0  ;;  %v2411_v19 = vld [vmem:[#allocation10 + $0x1f8] sm:$0xff] }
 0x58a   :  { %7591 = vmatprep.subr.mxu1 %v11270_v0  ;;  %7557 = vmatpush3.msra.mxu0 %v2154_v23  ;;  %v2408_v23 = vld [vmem:[#allocation10 + $0x1e0] sm:$0xff] }
 0x58b   :  { %7592 = vmatpush3.msra.mxu1 %v2138_v22  ;;  %7558 = vmatprep.subr.mxu0 %v11270_v0  ;;  %v2409_v22 = vld [vmem:[#allocation10 + $0x1e8] sm:$0xff] }
 0x58c   :  { %7593 = vmatprep.subr.mxu1 %v11270_v0  ;;  %7559 = vmatpush3.msra.mxu0 %v2153_v25  ;;  %v2406_v25 = vld [vmem:[#allocation10 + $0x1d0] sm:$0xff] }
 0x58d   :  { %7594 = vmatpush3.msra.mxu1 %v2137_v24  ;;  %7560 = vmatprep.subr.mxu0 %v11270_v0  ;;  %v2407_v24 = vld [vmem:[#allocation10 + $0x1d8] sm:$0xff] }
 0x58e   :  { %7595 = vmatprep.subr.mxu1 %v11270_v0  ;;  %7561 = vmatpush3.msra.mxu0 %v2152_v27  ;;  %v2404_v27 = vld [vmem:[#allocation10 + $0x1c0] sm:$0xff] }
 0x58f   :  { %7596 = vmatpush3.msra.mxu1 %v2136_v26  ;;  %7562 = vmatprep.subr.mxu0 %v11270_v0  ;;  %v2405_v26 = vld [vmem:[#allocation10 + $0x1c8] sm:$0xff] }
 0x590   :  { %7597 = vmatprep.subr.mxu1 %v11270_v0  ;;  %7563 = vmatpush3.msra.mxu0 %v2151_v30  ;;  %v2402_v30 = vld [vmem:[#allocation10 + $0x1b0] sm:$0xff] }
 0x591   :  { %7598 = vmatpush3.msra.mxu1 %v2135_v29  ;;  %7564 = vmatprep.subr.mxu0 %v11270_v0  ;;  %v2403_v29 = vld [vmem:[#allocation10 + $0x1b8] sm:$0xff] }
 0x592   :  { %7599 = vmatprep.subr.mxu1 %v11270_v0  ;;  %7565 = vmatpush3.msra.mxu0 %v2150_v32  ;;  %v2400_v32 = vld [vmem:[#allocation10 + $0x1a0] sm:$0xff] }
 0x593   :  { %7600 = vmatpush3.msra.mxu1 %v2134_v31  ;;  %7566 = vmatprep.subr.mxu0 %v11270_v0  ;;  %v2401_v31 = vld [vmem:[#allocation10 + $0x1a8] sm:$0xff] }
 0x594   :  { %7601 = vmatprep.subr.mxu1 %v11270_v0  ;;  %7567 = vmatpush3.msra.mxu0 %v2149_v34  ;;  %v2398_v34 = vld [vmem:[#allocation10 + $0x190] sm:$0xff] }
 0x595   :  { %7602 = vmatpush3.msra.mxu1 %v2133_v33  ;;  %7568 = vmatprep.subr.mxu0 %v11270_v0  ;;  %v2399_v33 = vld [vmem:[#allocation10 + $0x198] sm:$0xff] }
 0x596   :  { %7603 = vmatprep.subr.mxu1 %v11270_v0  ;;  %7569 = vmatpush3.msra.mxu0 %v2148_v36  ;;  %v2396_v36 = vld [vmem:[#allocation10 + $0x180] sm:$0xff] }
 0x597   :  { %7604 = vmatpush3.msra.mxu1 %v2132_v35  ;;  %7608 = vmatprep.subr.mxu0 %v11270_v0  ;;  %v2397_v35 = vld [vmem:[#allocation10 + $0x188] sm:$0xff] }
 0x598   :  { %7643 = vmatprep.subr.mxu1 %v11270_v0 }
 0x636   :  { %v2029_v37 = vpop.f32.mrf.mxu0 }
 0x637   :  { %v2103_v38 = vmul.f32 %v2029_v37, %v2029_v37  ;;  %v2111_v45 = vrot.slane %v2029_v37, %v9731_v48 }
 0x638   :  { %v7502_v39 = vpop.f32.mrf.mxu0  ;;  %v2099_v40 = vpop.f32.mrf.mxu1 }
 0x639   :  { %v2104_v41 = vsub.f32 %v2099_v40, %v2103_v38  ;;  %v2112_v51 = vsub.f32 %v9875_v43, %v2111_v45  ;;  %v2321_v43 = vld [vmem:[#allocation10 + $0x170] sm:$0xff] }
 0x63a   :  { %v7537_v42 = vpop.f32.mrf.mxu1 }
 0x63b   :  { %v2105_v28 = vadd.f32 1e-05, %v2104_v41 }
 0x63d   :  { %8544 = vrsqrt.f32 %v2105_v28 }
 0x64a   :  { %v8545_v47 = vpop.eup %8544 }
 0x64b   :  { %v2107_v49 = vmul.f32 %v8545_v47, %v1945_v44 }
 0x64d   :  { %v2116_v52 = vrot.slane %v2107_v49, %v9731_v48 }
 0x64f   :  { %v2117_v62 = vmul.f32 %v2116_v52, %v2112_v51 }
 0x651   :  { %v2122_v63 = vadd.f32 %v6717_v60, %v2117_v62 }
 0x653   :  { %vm2123_vm12 = vcmp.ge.f32.partialorder %v2122_v63, 0.0  ;;  %v2124_v1 = vmul.f32 0.01, %v2122_v63 }
 0x655   :  { %v2125_v2 = vsel %vm2123_vm12, %v2122_v63, %v2124_v1  ;;  %vm3662_vm12 = vcmask 130048  }
 0x656   :  { %v2127_v3 = vrot.slane %v2125_v2, 7 }
 0x658   :  { %v2129_v4 = vsel %vm195_vm0, 0.0, %v2127_v3 }
 0x659   :  { %v2131_v5 = vsel %vm2130_vm13, %v2129_v4, 0.0  ;;  %7606 = vmatmul.mubr.msk.f32.vlgmr.msra.gmra.mxu1 %vm2130_vm13, %v2129_v4 }
 0x65a   :  { %v2165_v6 = vrot.slane %v2131_v5, 1  ;;  %7675 = vmatprep.mubr.msk.f32.mxu1 %vm9525_vm10, %v11270_v0  ;;  %v2323_v18 = vrot.slane %v2131_v5, 2  ;;  %7644 = vmatpush3.msra.mxu1 %v2411_v19 }
 0x65b   :  { %7645 = vmatprep.subr.mxu1 %v11270_v0 }
 0x65c   :  { %7571 = vmatmul.mubr.f32.vlgmr.msra.gmra.mxu0 %v2165_v6  ;;  %7646 = vmatpush3.msra.mxu1 %v2410_v20 }
 0x65d   :  { %7609 = vmatpush3.msra.mxu0 %v2322_v7  ;;  %7640 = vmatprep.mubr.msk.f32.mxu0 %vm9525_vm10, %v11270_v0 }
 0x65e   :  { %7610 = vmatprep.subr.mxu0 %v11270_v0  ;;  %7647 = vmatprep.subr.mxu1 %v11270_v0 }
 0x65f   :  { %7611 = vmatpush3.msra.mxu0 %v2321_v43  ;;  %7648 = vmatpush3.msra.mxu1 %v2409_v22  ;;  %v2632_v43 = vld [vmem:[#allocation11 + $0xf8] sm:$0xff] }
 0x660   :  { %7612 = vmatprep.subr.mxu0 %v11270_v0  ;;  %7649 = vmatprep.subr.mxu1 %v11270_v0 }
 0x661   :  { %7613 = vmatpush3.msra.mxu0 %v2320_v8  ;;  %7650 = vmatpush3.msra.mxu1 %v2408_v23  ;;  %v2612_v8 = vld [vmem:[#allocation11 + $0x78] sm:$0xff] }
 0x662   :  { %7614 = vmatprep.subr.mxu0 %v11270_v0  ;;  %7651 = vmatprep.subr.mxu1 %v11270_v0 }
 0x663   :  { %7615 = vmatpush3.msra.mxu0 %v2319_v10  ;;  %7652 = vmatpush3.msra.mxu1 %v2407_v24  ;;  %v2631_v10 = vld [vmem:[#allocation11 + $0xf0] sm:$0xff] }
 0x664   :  { %7616 = vmatprep.subr.mxu0 %v11270_v0  ;;  %7653 = vmatprep.subr.mxu1 %v11270_v0 }
 0x665   :  { %7617 = vmatpush3.msra.mxu0 %v2318_v11  ;;  %7654 = vmatpush3.msra.mxu1 %v2406_v25  ;;  %v2611_v11 = vld [vmem:[#allocation11 + $0x70] sm:$0xff] }
 0x666   :  { %7618 = vmatprep.subr.mxu0 %v11270_v0  ;;  %7655 = vmatprep.subr.mxu1 %v11270_v0 }
 0x667   :  { %7619 = vmatpush3.msra.mxu0 %v2317_v50  ;;  %7656 = vmatpush3.msra.mxu1 %v2405_v26  ;;  %v2630_v50 = vld [vmem:[#allocation11 + $0xe8] sm:$0xff] }
 0x668   :  { %7620 = vmatprep.subr.mxu0 %v11270_v0  ;;  %7657 = vmatprep.subr.mxu1 %v11270_v0 }
 0x669   :  { %7621 = vmatpush3.msra.mxu0 %v2316_v54  ;;  %7658 = vmatpush3.msra.mxu1 %v2404_v27  ;;  %v2610_v54 = vld [vmem:[#allocation11 + $0x68] sm:$0xff] }
 0x66a   :  { %7622 = vmatprep.subr.mxu0 %v11270_v0  ;;  %7659 = vmatprep.subr.mxu1 %v11270_v0 }
 0x66b   :  { %7623 = vmatpush3.msra.mxu0 %v2315_v12  ;;  %7660 = vmatpush3.msra.mxu1 %v2403_v29  ;;  %v2629_v12 = vld [vmem:[#allocation11 + $0xe0] sm:$0xff] }
 0x66c   :  { %7624 = vmatprep.subr.mxu0 %v11270_v0  ;;  %7661 = vmatprep.subr.mxu1 %v11270_v0 }
 0x66d   :  { %7625 = vmatpush3.msra.mxu0 %v2314_v58  ;;  %7662 = vmatpush3.msra.mxu1 %v2402_v30  ;;  %v2609_v58 = vld [vmem:[#allocation11 + $0x60] sm:$0xff] }
 0x66e   :  { %7626 = vmatprep.subr.mxu0 %v11270_v0  ;;  %7663 = vmatprep.subr.mxu1 %v11270_v0 }
 0x66f   :  { %7627 = vmatpush3.msra.mxu0 %v2313_v13  ;;  %7664 = vmatpush3.msra.mxu1 %v2401_v31  ;;  %v2628_v13 = vld [vmem:[#allocation11 + $0xd8] sm:$0xff] }
 0x670   :  { %7628 = vmatprep.subr.mxu0 %v11270_v0  ;;  %7665 = vmatprep.subr.mxu1 %v11270_v0 }
 0x671   :  { %7629 = vmatpush3.msra.mxu0 %v2312_v14  ;;  %7666 = vmatpush3.msra.mxu1 %v2400_v32  ;;  %v2608_v14 = vld [vmem:[#allocation11 + $0x58] sm:$0xff] }
 0x672   :  { %7630 = vmatprep.subr.mxu0 %v11270_v0  ;;  %7667 = vmatprep.subr.mxu1 %v11270_v0 }
 0x673   :  { %7631 = vmatpush3.msra.mxu0 %v2311_v15  ;;  %7668 = vmatpush3.msra.mxu1 %v2399_v33  ;;  %v2627_v15 = vld [vmem:[#allocation11 + $0xd0] sm:$0xff] }
 0x674   :  { %7632 = vmatprep.subr.mxu0 %v11270_v0  ;;  %7669 = vmatprep.subr.mxu1 %v11270_v0 }
 0x675   :  { %7633 = vmatpush3.msra.mxu0 %v2310_v16  ;;  %7670 = vmatpush3.msra.mxu1 %v2398_v34  ;;  %v2607_v16 = vld [vmem:[#allocation11 + $0x50] sm:$0xff] }
 0x676   :  { %7634 = vmatprep.subr.mxu0 %v11270_v0  ;;  %7671 = vmatprep.subr.mxu1 %v11270_v0 }
 0x677   :  { %7635 = vmatpush3.msra.mxu0 %v2309_v17  ;;  %7672 = vmatpush3.msra.mxu1 %v2397_v35  ;;  %v2626_v17 = vld [vmem:[#allocation11 + $0xc8] sm:$0xff] }
 0x678   :  { %7636 = vmatprep.subr.mxu0 %v11270_v0  ;;  %7673 = vmatprep.subr.mxu1 %v11270_v0 }
 0x679   :  { %7637 = vmatpush3.msra.mxu0 %v2308_v21  ;;  %7674 = vmatpush3.msra.mxu1 %v2396_v36  ;;  %v2606_v21 = vld [vmem:[#allocation11 + $0x48] sm:$0xff] }
 0x67a   :  { %7638 = vmatprep.subr.mxu0 %v11270_v0  ;;  %7713 = vmatprep.subr.mxu1 %v11270_v0 }
 0x67b   :  { %7639 = vmatpush3.msra.mxu0 %v2307_v56  ;;  %v2625_v56 = vld [vmem:[#allocation11 + $0xc0] sm:$0xff] }
 0x67c   :  { %7641 = vmatmul.mubr.f32.vlgmr.msra.gmra.mxu0 %v2323_v18  ;;  %7678 = vmatprep.subr.mxu0 %v11270_v0  ;;  %v2605_v18 = vld [vmem:[#allocation11 + $0x40] sm:$0xff] }
 0x67d   :  { %7710 = vmatprep.mubr.msk.f32.mxu0 %vm9525_vm10, %v11270_v0  ;;  %7679 = vmatpush3.msra.mxu0 %v2411_v19  ;;  %v2624_v19 = vld [vmem:[#allocation11 + $0xb8] sm:$0xff] }
 0x67e   :  { %7680 = vmatprep.subr.mxu0 %v11270_v0 }
 0x67f   :  { %7681 = vmatpush3.msra.mxu0 %v2410_v20  ;;  %v2604_v20 = vld [vmem:[#allocation11 + $0x38] sm:$0xff] }
 0x680   :  { %7682 = vmatprep.subr.mxu0 %v11270_v0 }
 0x681   :  { %7683 = vmatpush3.msra.mxu0 %v2409_v22  ;;  %v2623_v22 = vld [vmem:[#allocation11 + $0xb0] sm:$0xff] }
 0x682   :  { %7684 = vmatprep.subr.mxu0 %v11270_v0 }
 0x683   :  { %7685 = vmatpush3.msra.mxu0 %v2408_v23  ;;  %v2603_v23 = vld [vmem:[#allocation11 + $0x30] sm:$0xff] }
 0x684   :  { %7686 = vmatprep.subr.mxu0 %v11270_v0 }
 0x685   :  { %7687 = vmatpush3.msra.mxu0 %v2407_v24  ;;  %v2622_v24 = vld [vmem:[#allocation11 + $0xa8] sm:$0xff] }
 0x686   :  { %7688 = vmatprep.subr.mxu0 %v11270_v0 }
 0x687   :  { %7689 = vmatpush3.msra.mxu0 %v2406_v25  ;;  %v2602_v25 = vld [vmem:[#allocation11 + $0x28] sm:$0xff] }
 0x688   :  { %7690 = vmatprep.subr.mxu0 %v11270_v0 }
 0x689   :  { %7691 = vmatpush3.msra.mxu0 %v2405_v26  ;;  %v2621_v26 = vld [vmem:[#allocation11 + $0xa0] sm:$0xff] }
 0x68a   :  { %7692 = vmatprep.subr.mxu0 %v11270_v0 }
 0x68b   :  { %7693 = vmatpush3.msra.mxu0 %v2404_v27  ;;  %v2601_v27 = vld [vmem:[#allocation11 + $0x20] sm:$0xff] }
 0x68c   :  { %7694 = vmatprep.subr.mxu0 %v11270_v0 }
 0x68d   :  { %7695 = vmatpush3.msra.mxu0 %v2403_v29  ;;  %v2620_v29 = vld [vmem:[#allocation11 + $0x98] sm:$0xff] }
 0x68e   :  { %7696 = vmatprep.subr.mxu0 %v11270_v0 }
 0x68f   :  { %7697 = vmatpush3.msra.mxu0 %v2402_v30  ;;  %v2600_v30 = vld [vmem:[#allocation11 + $0x18] sm:$0xff] }
 0x690   :  { %7698 = vmatprep.subr.mxu0 %v11270_v0 }
 0x691   :  { %7699 = vmatpush3.msra.mxu0 %v2401_v31  ;;  %v2619_v31 = vld [vmem:[#allocation11 + $0x90] sm:$0xff] }
 0x692   :  { %7700 = vmatprep.subr.mxu0 %v11270_v0 }
 0x693   :  { %7701 = vmatpush3.msra.mxu0 %v2400_v32  ;;  %v2599_v32 = vld [vmem:[#allocation11 + $0x10] sm:$0xff] }
 0x694   :  { %7702 = vmatprep.subr.mxu0 %v11270_v0 }
 0x695   :  { %7703 = vmatpush3.msra.mxu0 %v2399_v33  ;;  %v2618_v33 = vld [vmem:[#allocation11 + $0x88] sm:$0xff] }
 0x696   :  { %7704 = vmatprep.subr.mxu0 %v11270_v0 }
 0x697   :  { %7705 = vmatpush3.msra.mxu0 %v2398_v34  ;;  %v2598_v34 = vld [vmem:[#allocation11 + $0x8] sm:$0xff] }
 0x698   :  { %7706 = vmatprep.subr.mxu0 %v11270_v0 }
 0x699   :  { %7707 = vmatpush3.msra.mxu0 %v2397_v35  ;;  %v2617_v35 = vld [vmem:[#allocation11 + $0x80] sm:$0xff] }
 0x69a   :  { %7708 = vmatprep.subr.mxu0 %v11270_v0 }
 0x69b   :  { %7709 = vmatpush3.msra.mxu0 %v2396_v36  ;;  %v2597_v36 = vld [vmem:[#allocation11] sm:$0xff] }
 0x69c   :  { %7748 = vmatprep.subr.mxu0 %v11270_v0 }
 0x719   :  { %v2303_v37 = vpop.f32.mrf.mxu1 }
 0x71b   :  { %v7607_v38 = vpop.f32.mrf.mxu1 }
 0x71c   :  { %v2233_v39 = vpop.f32.mrf.mxu0 }
 0x71d   :  { %v2304_v41 = vadd.f32 %v2303_v37, %v2233_v39 }
 0x71e   :  { %v7572_v40 = vpop.f32.mrf.mxu0 }
 0x73c   :  { %v2391_v42 = vpop.f32.mrf.mxu0 }
 0x73d   :  { %v9978_v28 = vadd.f32 %v2391_v42, %v2304_v41 }
 0x73e   :  { %v7642_v44 = vpop.f32.mrf.mxu0 }
 0x73f   :  { %v2414_v45 = vsel %vm1947_vm11, %v9978_v28, 0.0  ;;  %v2421_v47 = vmul.f32 %v9978_v28, %v9978_v28 }
 0x740   :  { %v2415_v49 = vrot.slane %v2414_v45, 4 }
 0x741   :  { %v2422_v51 = vsel %vm1947_vm11, %v2421_v47, 0.0 }
 0x742   :  { %v2416_v52 = vadd.f32 %v2415_v49, %v2414_v45  ;;  %v2423_v60 = vrot.slane %v2422_v51, 4  ;;  %v2412_v45 = vld [vmem:[#allocation10 + $0x200] sm:$0x1] }
 0x744   :  { %v2417_v62 = vrot.slane %v2416_v52, 2  ;;  %v2424_v63 = vadd.f32 %v2423_v60, %v2422_v51 }
 0x746   :  { %v2418_v1 = vadd.f32 %v2417_v62, %v2416_v52  ;;  %v2425_v2 = vrot.slane %v2424_v63, 2  ;;  %v6719_v62 = vld [vmem:[#allocation10 + $0x201] ss:$0 sm:$0xff] }
 0x748   :  { %v2419_v3 = vrot.slane %v2418_v1, 1  ;;  %v2426_v4 = vadd.f32 %v2425_v2, %v2424_v63 }
 0x74a   :  { %v2420_v5 = vadd.f32 %v2419_v3, %v2418_v1  ;;  %v2427_v6 = vrot.slane %v2426_v4, 1 }
 0x74c   :  { %7676 = vmatmul.mubr.f32.vlgmr.msra.gmra.mxu1 %v2420_v5  ;;  %v2428_v7 = vadd.f32 %v2427_v6, %v2426_v4 }
 0x74d   :  { %7745 = vmatprep.mubr.msk.f32.mxu1 %vm9525_vm10, %v11270_v0  ;;  %7714 = vmatpush3.msra.mxu1 %v2632_v43 }
 0x74e   :  { %7711 = vmatmul.mubr.f32.vlgmr.msra.gmra.mxu0 %v2428_v7  ;;  %7715 = vmatprep.subr.mxu1 %v11270_v0 }
 0x74f   :  { %7780 = vmatprep.mubr.msk.f32.mxu0 %vm9525_vm10, %v11270_v0  ;;  %7749 = vmatpush3.msra.mxu0 %v2612_v8  ;;  %v2791_v8 = vld [vmem:[#allocation11 + $0x178] sm:$0xff] }
 0x750   :  { %7716 = vmatpush3.msra.mxu1 %v2631_v10  ;;  %7750 = vmatprep.subr.mxu0 %v11270_v0 }
 0x751   :  { %7717 = vmatprep.subr.mxu1 %v11270_v0  ;;  %7751 = vmatpush3.msra.mxu0 %v2611_v11  ;;  %v2790_v11 = vld [vmem:[#allocation11 + $0x170] sm:$0xff] }
 0x752   :  { %7718 = vmatpush3.msra.mxu1 %v2630_v50  ;;  %7752 = vmatprep.subr.mxu0 %v11270_v0  ;;  %v2789_v50 = vld [vmem:[#allocation11 + $0x168] sm:$0xff] }
 0x753   :  { %7719 = vmatprep.subr.mxu1 %v11270_v0  ;;  %7753 = vmatpush3.msra.mxu0 %v2610_v54  ;;  %v2788_v54 = vld [vmem:[#allocation11 + $0x160] sm:$0xff] }
 0x754   :  { %7720 = vmatpush3.msra.mxu1 %v2629_v12  ;;  %7754 = vmatprep.subr.mxu0 %v11270_v0  ;;  %v2787_v12 = vld [vmem:[#allocation11 + $0x158] sm:$0xff] }
 0x755   :  { %7721 = vmatprep.subr.mxu1 %v11270_v0  ;;  %7755 = vmatpush3.msra.mxu0 %v2609_v58  ;;  %v2786_v58 = vld [vmem:[#allocation11 + $0x150] sm:$0xff] }
 0x756   :  { %7722 = vmatpush3.msra.mxu1 %v2628_v13  ;;  %7756 = vmatprep.subr.mxu0 %v11270_v0  ;;  %v2785_v13 = vld [vmem:[#allocation11 + $0x148] sm:$0xff] }
 0x757   :  { %7723 = vmatprep.subr.mxu1 %v11270_v0  ;;  %7757 = vmatpush3.msra.mxu0 %v2608_v14  ;;  %v2784_v14 = vld [vmem:[#allocation11 + $0x140] sm:$0xff] }
 0x758   :  { %7724 = vmatpush3.msra.mxu1 %v2627_v15  ;;  %7758 = vmatprep.subr.mxu0 %v11270_v0  ;;  %v2783_v15 = vld [vmem:[#allocation11 + $0x138] sm:$0xff] }
 0x759   :  { %7725 = vmatprep.subr.mxu1 %v11270_v0  ;;  %7759 = vmatpush3.msra.mxu0 %v2607_v16  ;;  %v2782_v16 = vld [vmem:[#allocation11 + $0x130] sm:$0xff] }
 0x75a   :  { %7726 = vmatpush3.msra.mxu1 %v2626_v17  ;;  %7760 = vmatprep.subr.mxu0 %v11270_v0  ;;  %v2781_v17 = vld [vmem:[#allocation11 + $0x128] sm:$0xff] }
 0x75b   :  { %7727 = vmatprep.subr.mxu1 %v11270_v0  ;;  %7761 = vmatpush3.msra.mxu0 %v2606_v21  ;;  %v2780_v21 = vld [vmem:[#allocation11 + $0x120] sm:$0xff] }
 0x75c   :  { %7728 = vmatpush3.msra.mxu1 %v2625_v56  ;;  %7762 = vmatprep.subr.mxu0 %v11270_v0  ;;  %v2779_v56 = vld [vmem:[#allocation11 + $0x118] sm:$0xff] }
 0x75d   :  { %7729 = vmatprep.subr.mxu1 %v11270_v0  ;;  %7763 = vmatpush3.msra.mxu0 %v2605_v18  ;;  %v2778_v18 = vld [vmem:[#allocation11 + $0x110] sm:$0xff] }
 0x75e   :  { %7730 = vmatpush3.msra.mxu1 %v2624_v19  ;;  %7764 = vmatprep.subr.mxu0 %v11270_v0  ;;  %v2777_v19 = vld [vmem:[#allocation11 + $0x108] sm:$0xff] }
 0x75f   :  { %7731 = vmatprep.subr.mxu1 %v11270_v0  ;;  %7765 = vmatpush3.msra.mxu0 %v2604_v20 }
 0x760   :  { %7732 = vmatpush3.msra.mxu1 %v2623_v22  ;;  %7766 = vmatprep.subr.mxu0 %v11270_v0  ;;  %v2776_v22 = vld [vmem:[#allocation11 + $0x100] sm:$0xff] }
 0x761   :  { %7733 = vmatprep.subr.mxu1 %v11270_v0  ;;  %7767 = vmatpush3.msra.mxu0 %v2603_v23 }
 0x762   :  { %7734 = vmatpush3.msra.mxu1 %v2622_v24  ;;  %7768 = vmatprep.subr.mxu0 %v11270_v0  ;;  %v2873_v24 = vld [vmem:[#allocation11 + $0x1b8] sm:$0xff] }
 0x763   :  { %7735 = vmatprep.subr.mxu1 %v11270_v0  ;;  %7769 = vmatpush3.msra.mxu0 %v2602_v25  ;;  %v2872_v25 = vld [vmem:[#allocation11 + $0x1b0] sm:$0xff] }
 0x764   :  { %7736 = vmatpush3.msra.mxu1 %v2621_v26  ;;  %7770 = vmatprep.subr.mxu0 %v11270_v0  ;;  %v2871_v26 = vld [vmem:[#allocation11 + $0x1a8] sm:$0xff] }
 0x765   :  { %7737 = vmatprep.subr.mxu1 %v11270_v0  ;;  %7771 = vmatpush3.msra.mxu0 %v2601_v27  ;;  %v2870_v27 = vld [vmem:[#allocation11 + $0x1a0] sm:$0xff] }
 0x766   :  { %7738 = vmatpush3.msra.mxu1 %v2620_v29  ;;  %7772 = vmatprep.subr.mxu0 %v11270_v0  ;;  %v2869_v29 = vld [vmem:[#allocation11 + $0x198] sm:$0xff] }
 0x767   :  { %7739 = vmatprep.subr.mxu1 %v11270_v0  ;;  %7773 = vmatpush3.msra.mxu0 %v2600_v30  ;;  %v2868_v30 = vld [vmem:[#allocation11 + $0x190] sm:$0xff] }
 0x768   :  { %7740 = vmatpush3.msra.mxu1 %v2619_v31  ;;  %7774 = vmatprep.subr.mxu0 %v11270_v0  ;;  %v2867_v31 = vld [vmem:[#allocation11 + $0x188] sm:$0xff] }
 0x769   :  { %7741 = vmatprep.subr.mxu1 %v11270_v0  ;;  %7775 = vmatpush3.msra.mxu0 %v2599_v32  ;;  %v2866_v32 = vld [vmem:[#allocation11 + $0x180] sm:$0xff] }
 0x76a   :  { %7742 = vmatpush3.msra.mxu1 %v2618_v33  ;;  %7776 = vmatprep.subr.mxu0 %v11270_v0 }
 0x76b   :  { %7743 = vmatprep.subr.mxu1 %v11270_v0  ;;  %7777 = vmatpush3.msra.mxu0 %v2598_v34 }
 0x76c   :  { %7744 = vmatpush3.msra.mxu1 %v2617_v35  ;;  %7778 = vmatprep.subr.mxu0 %v11270_v0 }
 0x76d   :  { %7779 = vmatpush3.msra.mxu0 %v2597_v36  ;;  %7783 = vmatprep.subr.mxu1 %v11270_v0 }
 0x76e   :  { %7818 = vmatprep.subr.mxu0 %v11270_v0 }
 0x80c   :  { %v2495_v37 = vpop.f32.mrf.mxu1 }
 0x80d   :  { %v2569_v38 = vmul.f32 %v2495_v37, %v2495_v37  ;;  %v2577_v47 = vrot.slane %v2495_v37, %v9731_v48 }
 0x80e   :  { %v7677_v39 = vpop.f32.mrf.mxu1  ;;  %v2565_v40 = vpop.f32.mrf.mxu0 }
 0x80f   :  { %v2570_v41 = vsub.f32 %v2565_v40, %v2569_v38  ;;  %v2578_v52 = vsub.f32 %v9978_v28, %v2577_v47 }
 0x810   :  { %v7712_v42 = vpop.f32.mrf.mxu0 }
 0x811   :  { %v2571_v44 = vadd.f32 1e-05, %v2570_v41 }
 0x813   :  { %8546 = vrsqrt.f32 %v2571_v44 }
 0x820   :  { %v8547_v49 = vpop.eup %8546 }
 0x821   :  { %v2573_v51 = vmul.f32 %v8547_v49, %v2412_v45 }
 0x823   :  { %v2582_v60 = vrot.slane %v2573_v51, %v9731_v48 }
 0x825   :  { %v2583_v63 = vmul.f32 %v2582_v60, %v2578_v52 }
 0x827   :  { %v2588_v1 = vadd.f32 %v6719_v62, %v2583_v63 }
 0x829   :  { %vm2589_vm14 = vcmp.ge.f32.partialorder %v2588_v1, 0.0  ;;  %v2590_v2 = vmul.f32 0.01, %v2588_v1 }
 0x82b   :  { %v2591_v3 = vsel %vm2589_vm14, %v2588_v1, %v2590_v2  ;;  %vm3738_vm14 = vcmask 261120  }
 0x82c   :  { %v2593_v4 = vrot.slane %v2591_v3, 7 }
 0x82e   :  { %v2595_v5 = vsel %vm195_vm0, 0.0, %v2593_v4 }
 0x82f   :  { %v2596_v6 = vsel %vm2130_vm13, %v2595_v5, 0.0  ;;  %v3074_v5 = vld [vmem:[#allocation13 + $0x38] sm:$0xff] }
 0x830   :  { %v2614_v7 = vrot.slane %v2596_v6, 1  ;;  %v2633_v43 = vrot.slane %v2596_v6, 2  ;;  %v2792_v20 = vrot.slane %v2596_v6, 3 }
 0x832   :  { %v2635_v10 = vsel %vm195_vm0, %v2614_v7, %v2633_v43  ;;  %v2616_v28 = vsel %vm195_vm0, %v2596_v6, %v2614_v7  ;;  %v2794_v23 = vsel %vm195_vm0, %v2633_v43, %v2792_v20  ;;  %v3082_v6 = vld [vmem:[#allocation13 + $0x78] sm:$0xff]  ;;  %v3073_v7 = vld [vmem:[#allocation13 + $0x30] sm:$0xff] }
 0x833   :  { %7746 = vmatmul.mubr.f32.vlgmr.msra.gmra.mxu1 %v2635_v10  ;;  %7781 = vmatmul.mubr.f32.vlgmr.msra.gmra.mxu0 %v2616_v28  ;;  %v3081_v43 = vld [vmem:[#allocation13 + $0x70] sm:$0xff]  ;;  %v3080_v10 = vld [vmem:[#allocation13 + $0x68] sm:$0xff]  ;;  %v3071_v28 = vld [vmem:[#allocation13 + $0x20] sm:$0xff] }
 0x834   :  { %7784 = vmatpush3.msra.mxu1 %v2791_v8  ;;  %7815 = vmatprep.mubr.msk.f32.mxu1 %vm9525_vm10, %v11270_v0  ;;  %v3072_v8 = vld [vmem:[#allocation13 + $0x28] sm:$0xff] }
 0x835   :  { %7785 = vmatprep.subr.mxu1 %v11270_v0  ;;  %7834 = vmatprep.mubr.msk.f32.mxu0 %vm9525_vm10, %v11270_v0 }
 0x836   :  { %7786 = vmatpush3.msra.mxu1 %v2790_v11  ;;  %7819 = vmatpush3.msra.mxu0 %v2873_v24  ;;  %v3079_v11 = vld [vmem:[#allocation13 + $0x60] sm:$0xff] }
 0x837   :  { %7787 = vmatprep.subr.mxu1 %v11270_v0  ;;  %7820 = vmatprep.subr.mxu0 %v11270_v0 }
 0x838   :  { %7788 = vmatpush3.msra.mxu1 %v2789_v50  ;;  %7821 = vmatpush3.msra.mxu0 %v2872_v25  ;;  %v3070_v50 = vld [vmem:[#allocation13 + $0x18] sm:$0xff] }
 0x839   :  { %7789 = vmatprep.subr.mxu1 %v11270_v0  ;;  %7822 = vmatprep.subr.mxu0 %v11270_v0 }
 0x83a   :  { %7790 = vmatpush3.msra.mxu1 %v2788_v54  ;;  %7823 = vmatpush3.msra.mxu0 %v2871_v26  ;;  %v3078_v54 = vld [vmem:[#allocation13 + $0x58] sm:$0xff] }
 0x83b   :  { %7791 = vmatprep.subr.mxu1 %v11270_v0  ;;  %7824 = vmatprep.subr.mxu0 %v11270_v0 }
 0x83c   :  { %7792 = vmatpush3.msra.mxu1 %v2787_v12  ;;  %7825 = vmatpush3.msra.mxu0 %v2870_v27  ;;  %v3069_v12 = vld [vmem:[#allocation13 + $0x10] sm:$0xff] }
 0x83d   :  { %7793 = vmatprep.subr.mxu1 %v11270_v0  ;;  %7826 = vmatprep.subr.mxu0 %v11270_v0 }
 0x83e   :  { %7794 = vmatpush3.msra.mxu1 %v2786_v58  ;;  %7827 = vmatpush3.msra.mxu0 %v2869_v29  ;;  %v3077_v58 = vld [vmem:[#allocation13 + $0x50] sm:$0xff] }
 0x83f   :  { %7795 = vmatprep.subr.mxu1 %v11270_v0  ;;  %7828 = vmatprep.subr.mxu0 %v11270_v0 }
 0x840   :  { %7796 = vmatpush3.msra.mxu1 %v2785_v13  ;;  %7829 = vmatpush3.msra.mxu0 %v2868_v30  ;;  %v3068_v13 = vld [vmem:[#allocation13 + $0x8] sm:$0xff] }
 0x841   :  { %7797 = vmatprep.subr.mxu1 %v11270_v0  ;;  %7830 = vmatprep.subr.mxu0 %v11270_v0 }
 0x842   :  { %7798 = vmatpush3.msra.mxu1 %v2784_v14  ;;  %7831 = vmatpush3.msra.mxu0 %v2867_v31  ;;  %v3076_v14 = vld [vmem:[#allocation13 + $0x48] sm:$0xff] }
 0x843   :  { %7799 = vmatprep.subr.mxu1 %v11270_v0  ;;  %7832 = vmatprep.subr.mxu0 %v11270_v0 }
 0x844   :  { %7800 = vmatpush3.msra.mxu1 %v2783_v15  ;;  %7833 = vmatpush3.msra.mxu0 %v2866_v32  ;;  %v3067_v15 = vld [vmem:[#allocation13] sm:$0xff] }
 0x845   :  { %7801 = vmatprep.subr.mxu1 %v11270_v0  ;;  %7856 = vmatprep.subr.mxu0 %v11270_v0 }
 0x846   :  { %7802 = vmatpush3.msra.mxu1 %v2782_v16  ;;  %v3075_v16 = vld [vmem:[#allocation13 + $0x40] sm:$0xff] }
 0x847   :  { %7803 = vmatprep.subr.mxu1 %v11270_v0 }
 0x848   :  { %7804 = vmatpush3.msra.mxu1 %v2781_v17 }
 0x849   :  { %7805 = vmatprep.subr.mxu1 %v11270_v0 }
 0x84a   :  { %7806 = vmatpush3.msra.mxu1 %v2780_v21 }
 0x84b   :  { %7807 = vmatprep.subr.mxu1 %v11270_v0 }
 0x84c   :  { %7808 = vmatpush3.msra.mxu1 %v2779_v56 }
 0x84d   :  { %7809 = vmatprep.subr.mxu1 %v11270_v0 }
 0x84e   :  { %7810 = vmatpush3.msra.mxu1 %v2778_v18 }
 0x84f   :  { %7811 = vmatprep.subr.mxu1 %v11270_v0 }
 0x850   :  { %7812 = vmatpush3.msra.mxu1 %v2777_v19 }
 0x851   :  { %7813 = vmatprep.subr.mxu1 %v11270_v0 }
 0x852   :  { %7814 = vmatpush3.msra.mxu1 %v2776_v22 }
 0x853   :  { %7816 = vmatmul.mubr.f32.vlgmr.msra.gmra.mxu1 %v2794_v23  ;;  %7837 = vmatprep.subr.mxu1 %v11270_v0  ;;  %v2874_v23 = vld [vmem:[#allocation11 + $0x1c0] sm:$0x1] }
 0x854   :  { %7853 = vmatprep.mubr.msk.f32.mxu1 %vm9525_vm10, %v11270_v0  ;;  %7838 = vmatpush3.msra.mxu1 %v2873_v24 }
 0x855   :  { %7839 = vmatprep.subr.mxu1 %v11270_v0 }
 0x856   :  { %7840 = vmatpush3.msra.mxu1 %v2872_v25 }
 0x857   :  { %7841 = vmatprep.subr.mxu1 %v11270_v0 }
 0x858   :  { %7842 = vmatpush3.msra.mxu1 %v2871_v26 }
 0x859   :  { %7843 = vmatprep.subr.mxu1 %v11270_v0 }
 0x85a   :  { %7844 = vmatpush3.msra.mxu1 %v2870_v27 }
 0x85b   :  { %7845 = vmatprep.subr.mxu1 %v11270_v0 }
 0x85c   :  { %7846 = vmatpush3.msra.mxu1 %v2869_v29 }
 0x85d   :  { %7847 = vmatprep.subr.mxu1 %v11270_v0 }
 0x85e   :  { %7848 = vmatpush3.msra.mxu1 %v2868_v30  ;;  %v6722_v30 = vld [vmem:[#allocation11 + $0x1c1] ss:$0 sm:$0xff] }
 0x85f   :  { %7849 = vmatprep.subr.mxu1 %v11270_v0 }
 0x860   :  { %7850 = vmatpush3.msra.mxu1 %v2867_v31 }
 0x861   :  { %7851 = vmatprep.subr.mxu1 %v11270_v0 }
 0x862   :  { %7852 = vmatpush3.msra.mxu1 %v2866_v32 }
 0x863   :  { %7875 = vmatprep.subr.mxu1 %v11270_v0 }
 0x8f3   :  { %v2702_v33 = vpop.f32.mrf.mxu1  ;;  %v2772_v34 = vpop.f32.mrf.mxu0 }
 0x8f4   :  { %v2773_v37 = vadd.f32 %v2772_v34, %v2702_v33 }
 0x8f5   :  { %v7747_v35 = vpop.f32.mrf.mxu1  ;;  %v7782_v36 = vpop.f32.mrf.mxu0 }
 0x913   :  { %v2861_v38 = vpop.f32.mrf.mxu1 }
 0x914   :  { %v10067_v39 = vadd.f32 %v2861_v38, %v2773_v37 }
 0x915   :  { %v7817_v40 = vpop.f32.mrf.mxu1 }
 0x916   :  { %v2877_v41 = vsel %vm2876_vm15, %v10067_v39, 0.0  ;;  %v2884_v42 = vmul.f32 %v10067_v39, %v10067_v39  ;;  %v3236_v40 = vld [vmem:[#allocation13 + $0xb8] sm:$0xff] }
 0x917   :  { %v2878_v44 = vrot.slane %v2877_v41, 4 }
 0x918   :  { %v2885_v45 = vsel %vm2876_vm15, %v2884_v42, 0.0  ;;  %v3233_v42 = vld [vmem:[#allocation13 + $0xa0] sm:$0xff] }
 0x919   :  { %v2879_v47 = vadd.f32 %v2878_v44, %v2877_v41  ;;  %v2886_v49 = vrot.slane %v2885_v45, 4  ;;  %v3234_v41 = vld [vmem:[#allocation13 + $0xa8] sm:$0xff]  ;;  %v3232_v44 = vld [vmem:[#allocation13 + $0x98] sm:$0xff] }
 0x91b   :  { %v2880_v51 = vrot.slane %v2879_v47, 2  ;;  %v2887_v52 = vadd.f32 %v2886_v49, %v2885_v45  ;;  %v3231_v45 = vld [vmem:[#allocation13 + $0x90] sm:$0xff]  ;;  %v3229_v49 = vld [vmem:[#allocation13 + $0x80] sm:$0xff] }
 0x91d   :  { %v2881_v60 = vadd.f32 %v2880_v51, %v2879_v47  ;;  %v2888_v62 = vrot.slane %v2887_v52, 2  ;;  %v3230_v47 = vld [vmem:[#allocation13 + $0x88] sm:$0xff] }
 0x91f   :  { %v2882_v63 = vrot.slane %v2881_v60, 1  ;;  %v2889_v1 = vadd.f32 %v2888_v62, %v2887_v52  ;;  %v3318_v52 = vld [vmem:[#allocation13 + $0xf8] sm:$0xff]  ;;  %v3316_v62 = vld [vmem:[#allocation13 + $0xe8] sm:$0xff] }
 0x921   :  { %v2883_v2 = vadd.f32 %v2882_v63, %v2881_v60  ;;  %v2890_v3 = vrot.slane %v2889_v1, 1  ;;  %v3317_v60 = vld [vmem:[#allocation13 + $0xf0] sm:$0xff]  ;;  %v3315_v63 = vld [vmem:[#allocation13 + $0xe0] sm:$0xff] }
 0x923   :  { %7835 = vmatmul.mubr.msk.f32.vlgmr.msra.gmra.mxu0 %vm2892_vm4, %v2883_v2  ;;  %v2891_v4 = vadd.f32 %v2890_v3, %v2889_v1  ;;  %v3314_v1 = vld [vmem:[#allocation13 + $0xd8] sm:$0xff]  ;;  %v3313_v2 = vld [vmem:[#allocation13 + $0xd0] sm:$0xff]  ;;  %v3312_v3 = vld [vmem:[#allocation13 + $0xc8] sm:$0xff] }
 0x924   :  { %7872 = vmatprep.mubr.msk.f32.mxu0 %vm9525_vm10, %v11270_v0  ;;  %7857 = vmatpush3.msra.mxu0 %v3082_v6 }
 0x925   :  { %7854 = vmatmul.mubr.msk.f32.vlgmr.msra.gmra.mxu1 %vm2892_vm4, %v2891_v4  ;;  %7858 = vmatprep.subr.mxu0 %v11270_v0  ;;  %v3311_v4 = vld [vmem:[#allocation13 + $0xc0] sm:$0xff] }
 0x926   :  { %7891 = vmatprep.mubr.msk.f32.mxu1 %vm9525_vm10, %v11270_v0  ;;  %7876 = vmatpush3.msra.mxu1 %v3074_v5 }
 0x927   :  { %7877 = vmatprep.subr.mxu1 %v11270_v0  ;;  %7859 = vmatpush3.msra.mxu0 %v3081_v43 }
 0x928   :  { %7878 = vmatpush3.msra.mxu1 %v3073_v7  ;;  %7860 = vmatprep.subr.mxu0 %v11270_v0 }
 0x929   :  { %7879 = vmatprep.subr.mxu1 %v11270_v0  ;;  %7861 = vmatpush3.msra.mxu0 %v3080_v10 }
 0x92a   :  { %7880 = vmatpush3.msra.mxu1 %v3072_v8  ;;  %7862 = vmatprep.subr.mxu0 %v11270_v0 }
 0x92b   :  { %7881 = vmatprep.subr.mxu1 %v11270_v0  ;;  %7863 = vmatpush3.msra.mxu0 %v3079_v11 }
 0x92c   :  { %7882 = vmatpush3.msra.mxu1 %v3071_v28  ;;  %7864 = vmatprep.subr.mxu0 %v11270_v0 }
 0x92d   :  { %7883 = vmatprep.subr.mxu1 %v11270_v0  ;;  %7865 = vmatpush3.msra.mxu0 %v3078_v54 }
 0x92e   :  { %7884 = vmatpush3.msra.mxu1 %v3070_v50  ;;  %7866 = vmatprep.subr.mxu0 %v11270_v0 }
 0x92f   :  { %7885 = vmatprep.subr.mxu1 %v11270_v0  ;;  %7867 = vmatpush3.msra.mxu0 %v3077_v58 }
 0x930   :  { %7886 = vmatpush3.msra.mxu1 %v3069_v12  ;;  %7868 = vmatprep.subr.mxu0 %v11270_v0 }
 0x931   :  { %7887 = vmatprep.subr.mxu1 %v11270_v0  ;;  %7869 = vmatpush3.msra.mxu0 %v3076_v14 }
 0x932   :  { %7888 = vmatpush3.msra.mxu1 %v3068_v13  ;;  %7870 = vmatprep.subr.mxu0 %v11270_v0 }
 0x933   :  { %7889 = vmatprep.subr.mxu1 %v11270_v0  ;;  %7871 = vmatpush3.msra.mxu0 %v3075_v16 }
 0x934   :  { %7890 = vmatpush3.msra.mxu1 %v3067_v15  ;;  %7894 = vmatprep.subr.mxu0 %v11270_v0 }
 0x935   :  { %7913 = vmatprep.subr.mxu1 %v11270_v0 }
 0x9e3   :  { %v2962_v17 = vpop.f32.mrf.mxu0 }
 0x9e4   :  { %v3039_v21 = vmul.f32 %v2962_v17, %v2962_v17  ;;  %v3047_v24 = vrot.slane %v2962_v17, %v9731_v48 }
 0x9e5   :  { %v7836_v56 = vpop.f32.mrf.mxu0  ;;  %v3035_v18 = vpop.f32.mrf.mxu1 }
 0x9e6   :  { %v3040_v19 = vsub.f32 %v3035_v18, %v3039_v21  ;;  %v3048_v27 = vsub.f32 %v10067_v39, %v3047_v24  ;;  %v3235_v39 = vld [vmem:[#allocation13 + $0xb0] sm:$0xff]  ;;  %v180_v24 = vld [vmem:[#allocation17 + $0x30] sm:$0xff] }
 0x9e7   :  { %v7855_v20 = vpop.f32.mrf.mxu1 }
 0x9e8   :  { %v3041_v22 = vadd.f32 1e-05, %v3040_v19 }
 0x9ea   :  { %8548 = vrsqrt.f32 %v3041_v22 }
 0x9f7   :  { %v8549_v25 = vpop.eup %8548 }
 0x9f8   :  { %v3043_v26 = vmul.f32 %v8549_v25, %v2874_v23  ;;  %v181_v23 = vld [vmem:[#allocation17 + $0x38] sm:$0xff]  ;;  %v179_v25 = vld [vmem:[#allocation17 + $0x28] sm:$0xff] }
 0x9fa   :  { %v3052_v29 = vrot.slane %v3043_v26, %v9731_v48  ;;  %v178_v26 = vld [vmem:[#allocation17 + $0x20] sm:$0xff] }
 0x9fc   :  { %v3053_v31 = vmul.f32 %v3052_v29, %v3048_v27  ;;  %v177_v27 = vld [vmem:[#allocation17 + $0x18] sm:$0xff]  ;;  %v176_v29 = vld [vmem:[#allocation17 + $0x10] sm:$0xff] }
 0x9fe   :  { %v3058_v32 = vadd.f32 %v6722_v30, %v3053_v31  ;;  %v175_v30 = vld [vmem:[#allocation17 + $0x8] sm:$0xff]  ;;  %v174_v31 = vld [vmem:[#allocation17] sm:$0xff] }
 0xa00   :  { %vm3059_vm5 = vcmp.ge.f32.partialorder %v3058_v32, 0.0  ;;  %v3060_v33 = vmul.f32 0.01, %v3058_v32 }
 0xa02   :  { %v3061_v34 = vsel %vm3059_vm5, %v3058_v32, %v3060_v33 }
 0xa03   :  { %v3063_v35 = vrot.slane %v3061_v34, 7 }
 0xa05   :  { %v3065_v36 = vsel %vm195_vm0, 0.0, %v3063_v35 }
 0xa06   :  { %v3066_v37 = vsel %vm1629_vm9, %v3065_v36, 0.0 }
 0xa07   :  { %v3084_v38 = vrot.slane %v3066_v37, 1  ;;  %7892 = vmatmul.mubr.msk.f32.vlgmr.msra.gmra.mxu1 %vm2892_vm4, %v3066_v37  ;;  %v3237_v51 = vrot.slane %v3066_v37, 2 }
 0xa08   :  { %7929 = vmatprep.mubr.msk.f32.mxu1 %vm9525_vm10, %v11270_v0  ;;  %7914 = vmatpush3.msra.mxu1 %v3318_v52 }
 0xa09   :  { %7873 = vmatmul.mubr.msk.f32.vlgmr.msra.gmra.mxu0 %vm2892_vm4, %v3084_v38  ;;  %7915 = vmatprep.subr.mxu1 %v11270_v0 }
 0xa0a   :  { %7895 = vmatpush3.msra.mxu0 %v3236_v40  ;;  %7910 = vmatprep.mubr.msk.f32.mxu0 %vm9525_vm10, %v11270_v0  ;;  %v3319_v40 = vld [vmem:[#allocation13 + $0x100] sm:$0x1] }
 0xa0b   :  { %7896 = vmatprep.subr.mxu0 %v11270_v0  ;;  %7916 = vmatpush3.msra.mxu1 %v3317_v60 }
 0xa0c   :  { %7897 = vmatpush3.msra.mxu0 %v3235_v39  ;;  %7917 = vmatprep.subr.mxu1 %v11270_v0 }
 0xa0d   :  { %7898 = vmatprep.subr.mxu0 %v11270_v0  ;;  %7918 = vmatpush3.msra.mxu1 %v3316_v62 }
 0xa0e   :  { %7899 = vmatpush3.msra.mxu0 %v3234_v41  ;;  %7919 = vmatprep.subr.mxu1 %v11270_v0 }
 0xa0f   :  { %7900 = vmatprep.subr.mxu0 %v11270_v0  ;;  %7920 = vmatpush3.msra.mxu1 %v3315_v63 }
 0xa10   :  { %7901 = vmatpush3.msra.mxu0 %v3233_v42  ;;  %7921 = vmatprep.subr.mxu1 %v11270_v0 }
 0xa11   :  { %7902 = vmatprep.subr.mxu0 %v11270_v0  ;;  %7922 = vmatpush3.msra.mxu1 %v3314_v1 }
 0xa12   :  { %7903 = vmatpush3.msra.mxu0 %v3232_v44  ;;  %7923 = vmatprep.subr.mxu1 %v11270_v0 }
 0xa13   :  { %7904 = vmatprep.subr.mxu0 %v11270_v0  ;;  %7924 = vmatpush3.msra.mxu1 %v3313_v2 }
 0xa14   :  { %7905 = vmatpush3.msra.mxu0 %v3231_v45  ;;  %7925 = vmatprep.subr.mxu1 %v11270_v0 }
 0xa15   :  { %7906 = vmatprep.subr.mxu0 %v11270_v0  ;;  %7926 = vmatpush3.msra.mxu1 %v3312_v3 }
 0xa16   :  { %7907 = vmatpush3.msra.mxu0 %v3230_v47  ;;  %7927 = vmatprep.subr.mxu1 %v11270_v0  ;;  %v6728_v47 = vld [vmem:[#allocation13 + $0x101] ss:$0 sm:$0xff] }
 0xa17   :  { %7908 = vmatprep.subr.mxu0 %v11270_v0  ;;  %7928 = vmatpush3.msra.mxu1 %v3311_v4 }
 0xa18   :  { %7909 = vmatpush3.msra.mxu0 %v3229_v49  ;;  %7951 = vmatprep.subr.mxu1 %v11270_v0 }
 0xa19   :  { %7911 = vmatmul.mubr.msk.f32.vlgmr.msra.gmra.mxu0 %vm2892_vm4, %v3237_v51  ;;  %7932 = vmatprep.subr.mxu0 %v11270_v0 }
 0xa1a   :  { %7948 = vmatprep.mubr.msk.f32.mxu0 %vm9525_vm10, %v11270_v0  ;;  %7933 = vmatpush3.msra.mxu0 %v3318_v52 }
 0xa1b   :  { %7934 = vmatprep.subr.mxu0 %v11270_v0 }
 0xa1c   :  { %7935 = vmatpush3.msra.mxu0 %v3317_v60 }
 0xa1d   :  { %7936 = vmatprep.subr.mxu0 %v11270_v0 }
 0xa1e   :  { %7937 = vmatpush3.msra.mxu0 %v3316_v62 }
 0xa1f   :  { %7938 = vmatprep.subr.mxu0 %v11270_v0 }
 0xa20   :  { %7939 = vmatpush3.msra.mxu0 %v3315_v63 }
 0xa21   :  { %7940 = vmatprep.subr.mxu0 %v11270_v0 }
 0xa22   :  { %7941 = vmatpush3.msra.mxu0 %v3314_v1 }
 0xa23   :  { %7942 = vmatprep.subr.mxu0 %v11270_v0 }
 0xa24   :  { %7943 = vmatpush3.msra.mxu0 %v3313_v2 }
 0xa25   :  { %7944 = vmatprep.subr.mxu0 %v11270_v0 }
 0xa26   :  { %7945 = vmatpush3.msra.mxu0 %v3312_v3 }
 0xa27   :  { %7946 = vmatprep.subr.mxu0 %v11270_v0 }
 0xa28   :  { %7947 = vmatpush3.msra.mxu0 %v3311_v4 }
 0xa29   :  { %7982 = vmatprep.subr.mxu0 %v11270_v0 }
 0xac7   :  { %v3225_v5 = vpop.f32.mrf.mxu1 }
 0xac9   :  { %v3153_v6 = vpop.f32.mrf.mxu0  ;;  %v7893_v7 = vpop.f32.mrf.mxu1 }
 0xaca   :  { %v3226_v8 = vadd.f32 %v3225_v5, %v3153_v6  ;;  %v184_v6 = vld [vmem:[#allocation14 + $0x10] sm:$0x3f]  ;;  %v173_v7 = vld [vmem:[#allocation2] sm:$0x3] }
 0xacb   :  { %v7874_v43 = vpop.f32.mrf.mxu0 }
 0xacc   :  { %v183_v43 = vld [vmem:[#allocation14 + $0x8] sm:$0xff] }
 0xad9   :  { %v3306_v10 = vpop.f32.mrf.mxu0 }
 0xada   :  { %v3310_v28 = vadd.f32 %v3306_v10, %v3226_v8  ;;  %v182_v8 = vld [vmem:[#allocation14] sm:$0xff]  ;;  %v8568_v10 = vld [vmem:[#allocation5 + $0x1f8] sm:$0xff] }
 0xadb   :  { %v7912_v11 = vpop.f32.mrf.mxu0 }
 0xadc   :  { %v3321_v50 = vsel %vm2876_vm15, %v3310_v28, 0.0  ;;  %v3328_v54 = vmul.f32 %v3310_v28, %v3310_v28 }
 0xadd   :  { %v3322_v12 = vrot.slane %v3321_v50, 4 }
 0xade   :  { %v3329_v58 = vsel %vm2876_vm15, %v3328_v54, 0.0  ;;  %v8569_v54 = vld [vmem:[#allocation5 + $0x1f0] sm:$0xff] }
 0xadf   :  { %v3323_v13 = vadd.f32 %v3322_v12, %v3321_v50  ;;  %v3330_v14 = vrot.slane %v3329_v58, 4  ;;  %v8570_v12 = vld [vmem:[#allocation5 + $0x1e8] sm:$0xff] }
 0xae1   :  { %v3324_v15 = vrot.slane %v3323_v13, 2  ;;  %v3331_v16 = vadd.f32 %v3330_v14, %v3329_v58  ;;  %v8571_v58 = vld [vmem:[#allocation5 + $0x1e0] sm:$0xff]  ;;  %v8572_v14 = vld [vmem:[#allocation5 + $0x1d8] sm:$0xff] }
 0xae3   :  { %v3325_v17 = vadd.f32 %v3324_v15, %v3323_v13  ;;  %v3332_v21 = vrot.slane %v3331_v16, 2  ;;  %v8573_v15 = vld [vmem:[#allocation5 + $0x1d0] sm:$0xff] }
 0xae5   :  { %v3326_v56 = vrot.slane %v3325_v17, 1  ;;  %v3333_v18 = vadd.f32 %v3332_v21, %v3331_v16  ;;  %v8575_v21 = vld [vmem:[#allocation5 + $0x1c0] sm:$0xff] }
 0xae7   :  { %v3327_v19 = vadd.f32 %v3326_v56, %v3325_v17  ;;  %v3334_v20 = vrot.slane %v3333_v18, 1  ;;  %v8574_v17 = vld [vmem:[#allocation5 + $0x1c8] sm:$0xff]  ;;  %v8576_v56 = vld [vmem:[#allocation5 + $0x1b8] sm:$0xff] }
 0xae9   :  { %7930 = vmatmul.mubr.msk.f32.vlgmr.msra.gmra.mxu1 %vm2892_vm4, %v3327_v19  ;;  %v3335_v22 = vadd.f32 %v3334_v20, %v3333_v18  ;;  %v8577_v18 = vld [vmem:[#allocation5 + $0x1b0] sm:$0xff]  ;;  %v8578_v19 = vld [vmem:[#allocation5 + $0x1a8] sm:$0xff]  ;;  %v8579_v20 = vld [vmem:[#allocation5 + $0x1a0] sm:$0xff] }
 0xaea   :  { %7967 = vmatprep.mubr.msk.f32.mxu1 %vm9525_vm10, %v11270_v0  ;;  %7952 = vmatpush3.msra.mxu1 %v181_v23  ;;  %v8581_v23 = vld [vmem:[#allocation5 + $0x190] sm:$0xff] }
 0xaeb   :  { %7949 = vmatmul.mubr.msk.f32.vlgmr.msra.gmra.mxu0 %vm2892_vm4, %v3335_v22  ;;  %7953 = vmatprep.subr.mxu1 %v11270_v0  ;;  %v8580_v22 = vld [vmem:[#allocation5 + $0x198] sm:$0xff] }
 0xaec   :  { %7990 = vmatprep.mubr.msk.f32.mxu0 %vm9525_vm10, %v11270_v0  ;;  %7954 = vmatpush3.msra.mxu1 %v180_v24  ;;  %v8582_v24 = vld [vmem:[#allocation5 + $0x188] sm:$0xff] }
 0xaed   :  { %7955 = vmatprep.subr.mxu1 %v11270_v0 }
 0xaee   :  { %7956 = vmatpush3.msra.mxu1 %v179_v25  ;;  %v8583_v25 = vld [vmem:[#allocation5 + $0x180] sm:$0xff] }
 0xaef   :  { %7957 = vmatprep.subr.mxu1 %v11270_v0 }
 0xaf0   :  { %7958 = vmatpush3.msra.mxu1 %v178_v26  ;;  %v8584_v26 = vld [vmem:[#allocation5 + $0x178] sm:$0xff] }
 0xaf1   :  { %7959 = vmatprep.subr.mxu1 %v11270_v0 }
 0xaf2   :  { %7960 = vmatpush3.msra.mxu1 %v177_v27  ;;  %v8585_v27 = vld [vmem:[#allocation5 + $0x170] sm:$0xff] }
 0xaf3   :  { %7961 = vmatprep.subr.mxu1 %v11270_v0 }
 0xaf4   :  { %7962 = vmatpush3.msra.mxu1 %v176_v29  ;;  %v8586_v29 = vld [vmem:[#allocation5 + $0x168] sm:$0xff] }
 0xaf5   :  { %7963 = vmatprep.subr.mxu1 %v11270_v0 }
 0xaf6   :  { %7964 = vmatpush3.msra.mxu1 %v175_v30  ;;  %v8587_v30 = vld [vmem:[#allocation5 + $0x160] sm:$0xff] }
 0xaf7   :  { %7965 = vmatprep.subr.mxu1 %v11270_v0 }
 0xaf8   :  { %7966 = vmatpush3.msra.mxu1 %v174_v31  ;;  %v8588_v31 = vld [vmem:[#allocation5 + $0x158] sm:$0xff] }
 0xaf9   :  { %7970 = vmatprep.subr.mxu1 %v11270_v0 }
 0xba9   :  { %v3405_v32 = vpop.f32.mrf.mxu1 }
 0xbaa   :  { %v3482_v33 = vmul.f32 %v3405_v32, %v3405_v32  ;;  %v3490_v39 = vrot.slane %v3405_v32, %v9731_v48  ;;  %v8589_v32 = vld [vmem:[#allocation5 + $0x150] sm:$0xff] }
 0xbab   :  { %v7931_v34 = vpop.f32.mrf.mxu1  ;;  %v3478_v35 = vpop.f32.mrf.mxu0 }
 0xbac   :  { %v3483_v36 = vsub.f32 %v3478_v35, %v3482_v33  ;;  %v3491_v44 = vsub.f32 %v3310_v28, %v3490_v39  ;;  %v189_v28 = vld [vmem:[#allocation16 + $0x18] sm:$0xff]  ;;  %v8590_v33 = vld [vmem:[#allocation5 + $0x148] sm:$0xff]  ;;  %v8591_v34 = vld [vmem:[#allocation5 + $0x140] sm:$0xff] }
 0xbad   :  { %v7950_v37 = vpop.f32.mrf.mxu0  ;;  %7983 = vmatpush3.msra.mxu0 %v189_v28  ;;  %v8592_v35 = vld [vmem:[#allocation5 + $0x138] sm:$0xff]  ;;  %v8597_v39 = vld [vmem:[#allocation5 + $0x110] sm:$0xff] }
 0xbae   :  { %v3484_v38 = vadd.f32 1e-05, %v3483_v36  ;;  %7984 = vmatprep.subr.mxu0 %v11270_v0  ;;  %v8593_v36 = vld [vmem:[#allocation5 + $0x130] sm:$0xff]  ;;  %v8594_v37 = vld [vmem:[#allocation5 + $0x128] sm:$0xff]  ;;  %v8609_v28 = vld [vmem:[#allocation5 + $0x2b8] sm:$0xff] }
 0xbb0   :  { %8550 = vrsqrt.f32 %v3484_v38  ;;  %v8595_v38 = vld [vmem:[#allocation5 + $0x120] sm:$0xff] }
 0xbbd   :  { %v8551_v41 = vpop.eup %8550 }
 0xbbe   :  { %v3486_v42 = vmul.f32 %v8551_v41, %v3319_v40  ;;  %v8596_v40 = vld [vmem:[#allocation5 + $0x118] sm:$0xff]  ;;  %v8598_v41 = vld [vmem:[#allocation5 + $0x108] sm:$0xff] }
 0xbc0   :  { %v3495_v45 = vrot.slane %v3486_v42, %v9731_v48  ;;  %v8599_v42 = vld [vmem:[#allocation5 + $0x100] sm:$0xff] }
 0xbc1   :  { %v10366_v48 = vld [vmem:[#allocation5 + $0x420] sm:$0xff] }
 0xbc2   :  { %v3496_v49 = vmul.f32 %v3495_v45, %v3491_v44  ;;  %v8600_v44 = vld [vmem:[#allocation5 + $0x2f8] sm:$0xff]  ;;  %v188_v45 = vld [vmem:[#allocation16 + $0x10] sm:$0xff]  ;;  %11327 = vst [vmem:[#allocation45_spill] sm:$0xff] %v10366_v48 }
 0xbc3   :  { %7985 = vmatpush3.msra.mxu0 %v188_v45  ;;  %v10216_v45 = vld [vmem:[#allocation5 + $0x3b0] sm:$0xff] }
 0xbc4   :  { %v3501_v51 = vadd.f32 %v6728_v47, %v3496_v49  ;;  %v6734_v47 = vld [vmem:[%s11258_s0 + $0x8] sm:$0xff]  ;;  %7986 = vmatprep.subr.mxu0 %v11270_v0  ;;  %s9526_s0 = smov [#allocation19]  }
 0xbc5   :  { %v10170_v49 = vrot.slane %v6734_v47, 7  ;;  %v10219_v47 = vld [vmem:[#allocation5 + $0x3a8] sm:$0xff]  ;;  %s6697_s26 = sshll.u32 %s9526_s0, 4  ;;  %s6698_s26 = int_to_ptr.vmem [resolvable:$true] %s6697_s26 }
 0xbc6   :  { %vm3502_vm6 = vcmp.ge.f32.partialorder %v3501_v51, 0.0  ;;  %v3503_v52 = vmul.f32 0.01, %v3501_v51  ;;  %s9475_s29 = scalar_lea.vmem %s6698_s26, 32  ;;  %p9480_p9 = scmp.lt.s32.totalorder %s6698_s26, %s6698_s26 }
 0xbc7   :  { %p9476_p8 = scmp.ne.s32.totalorder %s6698_s26, %s9475_s29  ;;  %p9481_p10 = scmp.lt.s32.totalorder %s9475_s29, %s9475_s29 }
 0xbc8   :  { %v3504_v60 = vsel %vm3502_vm6, %v3501_v51, %v3503_v52  ;;  %v187_v51 = vld [vmem:[#allocation16 + $0x8] sm:$0xff]  ;;  %v10175_v52 = vsel %vm195_vm0, 0.0, %v10170_v49 }
 0xbc9   :  { %v3505_v62 = vsel %vm2876_vm15, %v3504_v60, 0.0  ;;  %7987 = vmatpush3.msra.mxu0 %v187_v51  ;;  %v10179_v60 = vsel %vm195_vm0, %v10170_v49, 0.0  ;;  %v10222_v51 = vld [vmem:[#allocation5 + $0x3a0] sm:$0xff]  ;;  %p9482_p11 = por %p9481_p10, %p9480_p9 }
 0xbca   :  { %v3506_v63 = vrot.slane %v3505_v62, 4  ;;  %7988 = vmatprep.subr.mxu0 %v11270_v0 }
 0xbcb   :  { %p9483_p12 = pnand %p9482_p11, %p9476_p8 }
 0xbcc   :  { %v3507_v1 = vadd.f32 %v3506_v63, %v3505_v62  ;;  %v186_v62 = vld [vmem:[#allocation16] sm:$0xff]  ;;  %v3821_v63 = vrot.slane %v10175_v52, 1 }
 0xbcd   :  { %7989 = vmatpush3.msra.mxu0 %v186_v62  ;;  %v10231_v62 = vld [vmem:[#allocation5 + $0x388] sm:$0xff] }
 0xbce   :  { %v3508_v2 = vrot.slane %v3507_v1, 2 }
 0xbd0   :  { %v3509_v3 = vadd.f32 %v3508_v2, %v3507_v1  ;;  %v3822_v1 = vrot.slane %v10179_v60, 1  ;;  %v8601_v2 = vld [vmem:[#allocation5 + $0xf8] sm:$0xff] }
 0xbd1   :  { %3896 = vmatprep.subr.mxu0 %v8601_v2  ;;  %v10240_v2 = vld [vmem:[#allocation5 + $0x370] sm:$0xff] }
 0xbd2   :  { %v3510_v4 = vrot.slane %v3509_v3, 1 }
 0xbd4   :  { %v3511_v5 = vadd.f32 %v3510_v4, %v3509_v3  ;;  %v3823_v3 = vsel %vm264_vm1, %v3821_v63, %v3822_v1  ;;  %v8602_v4 = vld [vmem:[#allocation5 + $0x2f0] sm:$0xff]  ;;  %v10234_v63 = vld [vmem:[#allocation5 + $0x380] sm:$0xff]  ;;  %v10237_v1 = vld [vmem:[#allocation5 + $0x378] sm:$0xff] }
 0xbd6   :  { %7968 = vmatmul.mubr.msk.f32.vlgmr.msra.gmra.mxu1 %vm2892_vm4, %v3511_v5  ;;  %v8603_v5 = vld [vmem:[#allocation5 + $0x2e8] sm:$0xff] }
 0xbd7   :  { %7971 = vmatpush3.msk.msra.mxu1 %vm443_vm3, %v184_v6  ;;  %7972 = vmatprep.mubr.msk.f32.mxu1 %vm9525_vm10, %v11270_v0  ;;  %v8604_v6 = vld [vmem:[#allocation5 + $0x2e0] sm:$0xff] }
 0xbd8   :  { %7975 = vmatprep.subr.mxu1 %v11270_v0 }
 0xbda   :  { %7973 = vmatmul.mubr.msk.f32.vlgmr.msra.gmra.mxu1 %vm3585_vm7, %v173_v7  ;;  %v8605_v7 = vld [vmem:[#allocation5 + $0x2d8] sm:$0xff] }
 0xbdb   :  { %7976 = vmatpush3.msra.mxu1 %v183_v43  ;;  %7979 = vmatprep.mubr.msk.f32.mxu1 %vm9525_vm10, %v11270_v0  ;;  %v8606_v43 = vld [vmem:[#allocation5 + $0x2d0] sm:$0xff] }
 0xbdc   :  { %7977 = vmatprep.subr.mxu1 %v11270_v0 }
 0xbdd   :  { %7978 = vmatpush3.msra.mxu1 %v182_v8  ;;  %v8607_v8 = vld [vmem:[#allocation5 + $0x2c8] sm:$0xff] }
 0xbde   :  { %3825 = vmatprep.subr.mxu1 %v8568_v10  ;;  %v8608_v10 = vld [vmem:[#allocation5 + $0x2c0] sm:$0xff] }
 0xc96   :  { %v3581_v11 = vpop.f32.mrf.mxu1 }
 0xc97   :  { %7980 = vmatmul.mubr.msk.f32.vlgmr.msra.gmra.mxu1 %vm3662_vm12, %v3581_v11  ;;  %v8610_v11 = vld [vmem:[#allocation5 + $0x2b0] sm:$0xff] }
 0xc98   :  { %v7969_v50 = vpop.f32.mrf.mxu1  ;;  %3826 = vmatpush1.msra.mxu1 %v8569_v54  ;;  %3889 = vmatprep.mubr.f32.mxu1 %v11270_v0  ;;  %v8612_v54 = vld [vmem:[#allocation5 + $0x2a0] sm:$0xff] }
 0xc99   :  { %3827 = vmatprep.subr.mxu1 %v8570_v12  ;;  %v8611_v50 = vld [vmem:[#allocation5 + $0x2a8] sm:$0xff]  ;;  %v8613_v12 = vld [vmem:[#allocation5 + $0x298] sm:$0xff] }
 0xc9a   :  { %3828 = vmatpush1.msra.mxu1 %v8571_v58  ;;  %v10165_v13 = vpop.f32.mrf.mxu1  ;;  %v8614_v58 = vld [vmem:[#allocation5 + $0x290] sm:$0xff] }
 0xc9b   :  { %3829 = vmatprep.subr.mxu1 %v8572_v14  ;;  %v8615_v14 = vld [vmem:[#allocation5 + $0x288] sm:$0xff] }
 0xc9c   :  { %3830 = vmatpush1.msra.mxu1 %v8573_v15  ;;  %v7974_v16 = vpop.f32.mrf.mxu1  ;;  %v8616_v15 = vld [vmem:[#allocation5 + $0x280] sm:$0xff] }
 0xc9d   :  { %3831 = vmatprep.subr.mxu1 %v8574_v17  ;;  %v8617_v16 = vld [vmem:[#allocation5 + $0x278] sm:$0xff]  ;;  %v8618_v17 = vld [vmem:[#allocation5 + $0x270] sm:$0xff] }
 0xc9e   :  { %3832 = vmatpush1.msra.mxu1 %v8575_v21  ;;  %v8619_v21 = vld [vmem:[#allocation5 + $0x268] sm:$0xff] }
 0xc9f   :  { %3833 = vmatprep.subr.mxu1 %v8576_v56  ;;  %v8620_v56 = vld [vmem:[#allocation5 + $0x260] sm:$0xff] }
 0xca0   :  { %3834 = vmatpush1.msra.mxu1 %v8577_v18  ;;  %v8621_v18 = vld [vmem:[#allocation5 + $0x258] sm:$0xff] }
 0xca1   :  { %3835 = vmatprep.subr.mxu1 %v8578_v19  ;;  %v8622_v19 = vld [vmem:[#allocation5 + $0x250] sm:$0xff] }
 0xca2   :  { %3836 = vmatpush1.msra.mxu1 %v8579_v20  ;;  %v8623_v20 = vld [vmem:[#allocation5 + $0x248] sm:$0xff] }
 0xca3   :  { %3837 = vmatprep.subr.mxu1 %v8580_v22  ;;  %v8624_v22 = vld [vmem:[#allocation5 + $0x240] sm:$0xff] }
 0xca4   :  { %3838 = vmatpush1.msra.mxu1 %v8581_v23  ;;  %v8625_v23 = vld [vmem:[#allocation5 + $0x238] sm:$0xff] }
 0xca5   :  { %3839 = vmatprep.subr.mxu1 %v8582_v24  ;;  %v8626_v24 = vld [vmem:[#allocation5 + $0x230] sm:$0xff] }
 0xca6   :  { %3840 = vmatpush1.msra.mxu1 %v8583_v25  ;;  %v8627_v25 = vld [vmem:[#allocation5 + $0x228] sm:$0xff] }
 0xca7   :  { %3841 = vmatprep.subr.mxu1 %v8584_v26  ;;  %v8628_v26 = vld [vmem:[#allocation5 + $0x220] sm:$0xff] }
 0xca8   :  { %3842 = vmatpush1.msra.mxu1 %v8585_v27  ;;  %v8629_v27 = vld [vmem:[#allocation5 + $0x218] sm:$0xff] }
 0xca9   :  { %3843 = vmatprep.subr.mxu1 %v8586_v29  ;;  %v8630_v29 = vld [vmem:[#allocation5 + $0x210] sm:$0xff] }
 0xcaa   :  { %3844 = vmatpush1.msra.mxu1 %v8587_v30  ;;  %v3967_v30 = vrot.slane %v10175_v52, 2  ;;  %v10225_v52 = vld [vmem:[#allocation5 + $0x398] sm:$0xff] }
 0xcab   :  { %3845 = vmatprep.subr.mxu1 %v8588_v31  ;;  %v3968_v31 = vrot.slane %v10179_v60, 2  ;;  %v10228_v60 = vld [vmem:[#allocation5 + $0x390] sm:$0xff] }
 0xcac   :  { %3846 = vmatpush1.msra.mxu1 %v8589_v32  ;;  %v8631_v32 = vld [vmem:[#allocation5 + $0x208] sm:$0xff] }
 0xcad   :  { %3847 = vmatprep.subr.mxu1 %v8590_v33  ;;  %v8632_v33 = vld [vmem:[#allocation5 + $0x200] sm:$0xff] }
 0xcae   :  { %3848 = vmatpush1.msra.mxu1 %v8591_v34  ;;  %v3969_v34 = vsel %vm443_vm3, %v3967_v30, %v3968_v31  ;;  %v10333_v30 = vld [vmem:[#allocation5 + $0x478] sm:$0xff]  ;;  %v10336_v31 = vld [vmem:[#allocation5 + $0x470] sm:$0xff] }
 0xcaf   :  { %3849 = vmatprep.subr.mxu1 %v8592_v35  ;;  %v10189_v35 = vld [vmem:[#allocation5 + $0x3f8] sm:$0xff]  ;;  %11316 = vst [vmem:[#allocation34_spill] sm:$0xff] %v10333_v30  ;;  %11317 = vst [vmem:[#allocation35_spill] sm:$0xff] %v10336_v31 }
 0xcb0   :  { %3850 = vmatpush1.msra.mxu1 %v8593_v36  ;;  %v10192_v36 = vld [vmem:[#allocation5 + $0x3f0] sm:$0xff] }
 0xcb1   :  { %3851 = vmatprep.subr.mxu1 %v8594_v37  ;;  %v10195_v37 = vld [vmem:[#allocation5 + $0x3e8] sm:$0xff] }
 0xcb2   :  { %3852 = vmatpush1.msra.mxu1 %v8595_v38  ;;  %v10198_v38 = vld [vmem:[#allocation5 + $0x3e0] sm:$0xff] }
 0xcb3   :  { %3853 = vmatprep.subr.mxu1 %v8596_v40  ;;  %v10201_v40 = vld [vmem:[#allocation5 + $0x3d8] sm:$0xff] }
 0xcb4   :  { %3854 = vmatpush1.msra.mxu1 %v8597_v39  ;;  %v10204_v39 = vld [vmem:[#allocation5 + $0x3d0] sm:$0xff] }
 0xcb5   :  { %3855 = vmatprep.subr.mxu1 %v8598_v41  ;;  %v10207_v41 = vld [vmem:[#allocation5 + $0x3c8] sm:$0xff] }
 0xcb6   :  { %3856 = vmatpush1.msra.mxu1 %v8599_v42  ;;  %v10210_v42 = vld [vmem:[#allocation5 + $0x3c0] sm:$0xff] }
 0xcb7   :  { %3971 = vmatprep.subr.mxu1 %v8600_v44  ;;  %3890 = vmatmul.mubr.f32.vlgmr.msra.gmra.mxu1 %v3823_v3  ;;  %v10213_v44 = vld [vmem:[#allocation5 + $0x3b8] sm:$0xff]  ;;  %v10243_v3 = vld [vmem:[#allocation5 + $0x368] sm:$0xff] }
 0xcb8   :  { %3972 = vmatpush1.msra.mxu1 %v8602_v4  ;;  %4035 = vmatprep.mubr.f32.mxu1 %v11270_v0  ;;  %v10246_v4 = vld [vmem:[#allocation5 + $0x360] sm:$0xff]  ;;  %v10348_v0 = vld [vmem:[#allocation5 + $0x450] sm:$0xff] }
 0xcb9   :  { %3973 = vmatprep.subr.mxu1 %v8603_v5  ;;  %v10249_v5 = vld [vmem:[#allocation5 + $0x358] sm:$0xff]  ;;  %11321 = vst [vmem:[#allocation39_spill] sm:$0xff] %v10348_v0 }
 0xcba   :  { %3974 = vmatpush1.msra.mxu1 %v8604_v6  ;;  %v10252_v6 = vld [vmem:[#allocation5 + $0x350] sm:$0xff] }
 0xcbb   :  { %3975 = vmatprep.subr.mxu1 %v8605_v7  ;;  %v10255_v7 = vld [vmem:[#allocation5 + $0x348] sm:$0xff] }
 0xcbc   :  { %3976 = vmatpush1.msra.mxu1 %v8606_v43  ;;  %v10258_v43 = vld [vmem:[#allocation5 + $0x340] sm:$0xff] }
 0xcbd   :  { %3977 = vmatprep.subr.mxu1 %v8607_v8  ;;  %v10261_v8 = vld [vmem:[#allocation5 + $0x338] sm:$0xff] }
 0xcbe   :  { %3978 = vmatpush1.msra.mxu1 %v8608_v10  ;;  %v10264_v10 = vld [vmem:[#allocation5 + $0x330] sm:$0xff] }
 0xcbf   :  { %3979 = vmatprep.subr.mxu1 %v8609_v28  ;;  %v10267_v28 = vld [vmem:[#allocation5 + $0x328] sm:$0xff] }
 0xcc0   :  { %3980 = vmatpush1.msra.mxu1 %v8610_v11  ;;  %v10270_v11 = vld [vmem:[#allocation5 + $0x320] sm:$0xff] }
 0xcc1   :  { %3981 = vmatprep.subr.mxu1 %v8611_v50  ;;  %v10273_v50 = vld [vmem:[#allocation5 + $0x318] sm:$0xff] }
 0xcc2   :  { %3982 = vmatpush1.msra.mxu1 %v8612_v54  ;;  %v10276_v54 = vld [vmem:[#allocation5 + $0x310] sm:$0xff] }
 0xcc3   :  { %3983 = vmatprep.subr.mxu1 %v8613_v12  ;;  %v10279_v12 = vld [vmem:[#allocation5 + $0x308] sm:$0xff] }
 0xcc4   :  { %3984 = vmatpush1.msra.mxu1 %v8614_v58  ;;  %v10282_v58 = vld [vmem:[#allocation5 + $0x300] sm:$0xff] }
 0xcc5   :  { %3985 = vmatprep.subr.mxu1 %v8615_v14  ;;  %v10285_v14 = vld [vmem:[#allocation5 + $0x4f8] sm:$0xff] }
 0xcc6   :  { %3986 = vmatpush1.msra.mxu1 %v8616_v15  ;;  %v10288_v15 = vld [vmem:[#allocation5 + $0x4f0] sm:$0xff] }
 0xcc7   :  { %3987 = vmatprep.subr.mxu1 %v8617_v16  ;;  %v10291_v16 = vld [vmem:[#allocation5 + $0x4e8] sm:$0xff] }
 0xcc8   :  { %3988 = vmatpush1.msra.mxu1 %v8618_v17  ;;  %v10294_v17 = vld [vmem:[#allocation5 + $0x4e0] sm:$0xff] }
 0xcc9   :  { %3989 = vmatprep.subr.mxu1 %v8619_v21  ;;  %v10297_v21 = vld [vmem:[#allocation5 + $0x4d8] sm:$0xff] }
 0xcca   :  { %3990 = vmatpush1.msra.mxu1 %v8620_v56  ;;  %v10300_v56 = vld [vmem:[#allocation5 + $0x4d0] sm:$0xff] }
 0xccb   :  { %3991 = vmatprep.subr.mxu1 %v8621_v18  ;;  %v10303_v18 = vld [vmem:[#allocation5 + $0x4c8] sm:$0xff] }
 0xccc   :  { %3992 = vmatpush1.msra.mxu1 %v8622_v19  ;;  %v10306_v19 = vld [vmem:[#allocation5 + $0x4c0] sm:$0xff] }
 0xccd   :  { %3993 = vmatprep.subr.mxu1 %v8623_v20  ;;  %v10309_v20 = vld [vmem:[#allocation5 + $0x4b8] sm:$0xff] }
 0xcce   :  { %3994 = vmatpush1.msra.mxu1 %v8624_v22  ;;  %v10312_v22 = vld [vmem:[#allocation5 + $0x4b0] sm:$0xff] }
 0xccf   :  { %3995 = vmatprep.subr.mxu1 %v8625_v23  ;;  %v10315_v23 = vld [vmem:[#allocation5 + $0x4a8] sm:$0xff] }
 0xcd0   :  { %3996 = vmatpush1.msra.mxu1 %v8626_v24  ;;  %v10318_v24 = vld [vmem:[#allocation5 + $0x4a0] sm:$0xff] }
 0xcd1   :  { %3997 = vmatprep.subr.mxu1 %v8627_v25  ;;  %v10321_v25 = vld [vmem:[#allocation5 + $0x498] sm:$0xff] }
 0xcd2   :  { %3998 = vmatpush1.msra.mxu1 %v8628_v26  ;;  %v10324_v26 = vld [vmem:[#allocation5 + $0x490] sm:$0xff] }
 0xcd3   :  { %3999 = vmatprep.subr.mxu1 %v8629_v27  ;;  %v10327_v27 = vld [vmem:[#allocation5 + $0x488] sm:$0xff] }
 0xcd4   :  { %4000 = vmatpush1.msra.mxu1 %v8630_v29  ;;  %v10330_v29 = vld [vmem:[#allocation5 + $0x480] sm:$0xff] }
 0xcd5   :  { %4001 = vmatprep.subr.mxu1 %v8631_v32  ;;  %v10339_v32 = vld [vmem:[#allocation5 + $0x468] sm:$0xff] }
 0xcd6   :  { %4002 = vmatpush1.msra.mxu1 %v8632_v33  ;;  %11318 = vst [vmem:[#allocation36_spill] sm:$0xff] %v10339_v32  ;;  %v10342_v33 = vld [vmem:[#allocation5 + $0x460] sm:$0xff] }
 0xcd7   :  { %4036 = vmatmul.mubr.f32.vlgmr.msra.gmra.mxu1 %v3969_v34  ;;  %4141 = vmatprep.subr.mxu1 %v10189_v35  ;;  %11319 = vst [vmem:[#allocation37_spill] sm:$0xff] %v10342_v33  ;;  %v10345_v34 = vld [vmem:[#allocation5 + $0x458] sm:$0xff] }
 0xcd8   :  { %4142 = vmatpush1.msra.mxu1 %v10192_v36  ;;  %11320 = vst [vmem:[#allocation38_spill] sm:$0xff] %v10345_v34 }
 0xcd9   :  { %4143 = vmatprep.subr.mxu1 %v10195_v37 }
 0xcda   :  { %4144 = vmatpush1.msra.mxu1 %v10198_v38 }
 0xcdb   :  { %4145 = vmatprep.subr.mxu1 %v10201_v40 }
 0xcdc   :  { %4146 = vmatpush1.msra.mxu1 %v10204_v39 }
 0xcdd   :  { %4147 = vmatprep.subr.mxu1 %v10207_v41 }
 0xcde   :  { %4148 = vmatpush1.msra.mxu1 %v10210_v42 }
 0xcdf   :  { %4149 = vmatprep.subr.mxu1 %v10213_v44 }
 0xce0   :  { %4150 = vmatpush1.msra.mxu1 %v10216_v45 }
 0xce1   :  { %4151 = vmatprep.subr.mxu1 %v10219_v47 }
 0xce2   :  { %4152 = vmatpush1.msra.mxu1 %v10222_v51 }
 0xce3   :  { %4153 = vmatprep.subr.mxu1 %v10225_v52 }
 0xce4   :  { %4154 = vmatpush1.msra.mxu1 %v10228_v60 }
 0xce5   :  { %4155 = vmatprep.subr.mxu1 %v10231_v62 }
 0xce6   :  { %4156 = vmatpush1.msra.mxu1 %v10234_v63 }
 0xce7   :  { %4157 = vmatprep.subr.mxu1 %v10237_v1 }
 0xce8   :  { %4158 = vmatpush1.msra.mxu1 %v10240_v2 }
 0xce9   :  { %4159 = vmatprep.subr.mxu1 %v10243_v3 }
 0xcea   :  { %4160 = vmatpush1.msra.mxu1 %v10246_v4 }
 0xceb   :  { %4161 = vmatprep.subr.mxu1 %v10249_v5 }
 0xcec   :  { %4162 = vmatpush1.msra.mxu1 %v10252_v6 }
 0xced   :  { %4163 = vmatprep.subr.mxu1 %v10255_v7 }
 0xcee   :  { %4164 = vmatpush1.msra.mxu1 %v10258_v43 }
 0xcef   :  { %4165 = vmatprep.subr.mxu1 %v10261_v8 }
 0xcf0   :  { %4166 = vmatpush1.msra.mxu1 %v10264_v10 }
 0xcf1   :  { %4167 = vmatprep.subr.mxu1 %v10267_v28 }
 0xcf2   :  { %4168 = vmatpush1.msra.mxu1 %v10270_v11 }
 0xcf3   :  { %4169 = vmatprep.subr.mxu1 %v10273_v50 }
 0xcf4   :  { %4170 = vmatpush1.msra.mxu1 %v10276_v54 }
 0xcf5   :  { %4171 = vmatprep.subr.mxu1 %v10279_v12 }
 0xcf6   :  { %4172 = vmatpush1.msra.mxu1 %v10282_v58 }
 0xcf7   :  { %4173 = vmatprep.subr.mxu1 %v10285_v14 }
 0xcf8   :  { %4174 = vmatpush2.msra.mxu1 %v10288_v15 }
 0xcf9   :  { %4175 = vmatprep.subr.mxu1 %v10291_v16 }
 0xcfa   :  { %4176 = vmatpush2.msra.mxu1 %v10294_v17 }
 0xcfb   :  { %4177 = vmatprep.subr.mxu1 %v10297_v21 }
 0xcfc   :  { %4178 = vmatpush2.msra.mxu1 %v10300_v56 }
 0xcfd   :  { %4179 = vmatprep.subr.mxu1 %v10303_v18 }
 0xcfe   :  { %4180 = vmatpush2.msra.mxu1 %v10306_v19 }
 0xcff   :  { %4181 = vmatprep.subr.mxu1 %v10309_v20 }
 0xd00   :  { %4182 = vmatpush2.msra.mxu1 %v10312_v22 }
 0xd01   :  { %4183 = vmatprep.subr.mxu1 %v10315_v23 }
 0xd02   :  { %4184 = vmatpush2.msra.mxu1 %v10318_v24 }
 0xd03   :  { %4185 = vmatprep.subr.mxu1 %v10321_v25 }
 0xd04   :  { %4186 = vmatpush2.msra.mxu1 %v10324_v26 }
 0xd05   :  { %4187 = vmatprep.subr.mxu1 %v10327_v27 }
 0xd06   :  { %4188 = vmatpush2.msra.mxu1 %v10330_v29 }
 0xd07   :  { %4189 = vmatprep.subr.mxu1 %v10333_v30  ;;  %v8703_v30 = vld [vmem:[#allocation5 + $0xc8] sm:$0xff] }
 0xd08   :  { %4190 = vmatpush2.msra.mxu1 %v10336_v31  ;;  %v8700_v31 = vld [vmem:[#allocation5 + $0xe0] sm:$0xff] }
 0xd09   :  { %4191 = vmatprep.subr.mxu1 %v10339_v32  ;;  %v11332_v32 = vmov 0.0  }
 0xd0a   :  { %4192 = vmatpush2.msra.mxu1 %v10342_v33 }
 0xd0b   :  { %4193 = vmatprep.subr.mxu1 %v10345_v34 }
 0xd0c   :  { %4194 = vmatpush2.msra.mxu1 %v10348_v0 }
 0xd0d   :  { %4195 = vmatprep.subr.mxu1 %v10351_v55  ;;  %v185_v55 = vld [vmem:[#allocation14 + $0x16] sm:$0x1] }
 0xd0e   :  { %4196 = vmatpush2.msra.mxu1 %v10354_v53  ;;  %v10372_v53 = vld [vmem:[#allocation5 + $0x410] sm:$0xff] }
 0xd0f   :  { %4197 = vmatprep.subr.mxu1 %v10357_v57  ;;  %11329 = vst [vmem:[#allocation47_spill] sm:$0xff] %v10372_v53  ;;  %v10375_v57 = vld [vmem:[#allocation5 + $0x408] sm:$0xff] }
 0xd10   :  { %4198 = vmatpush2.msra.mxu1 %v10360_v61  ;;  %11330 = vst [vmem:[#allocation48_spill] sm:$0xff] %v10375_v57  ;;  %v10378_v61 = vld [vmem:[#allocation5 + $0x400] sm:$0xff] }
 0xd11   :  { %4199 = vmatprep.subr.mxu1 %v10363_v59  ;;  %11331 = vst [vmem:[#allocation49_spill] sm:$0xff] %v10378_v61  ;;  %v8697_v59 = vld [vmem:[#allocation7 + $0xf8] sm:$0xff] }
 0xd12   :  { %4200 = vmatpush2.msra.mxu1 %v10366_v48 }
 0xd13   :  { %4201 = vmatprep.subr.mxu1 %v10369_v46 }
 0xd14   :  { %4202 = vmatpush2.msra.mxu1 %v10372_v53  ;;  %v8698_v53 = vld [vmem:[#allocation5 + $0xf0] sm:$0xff] }
 0xd15   :  { %4203 = vmatprep.subr.mxu1 %v10375_v57  ;;  %v8699_v57 = vld [vmem:[#allocation5 + $0xe8] sm:$0xff] }
 0xd16   :  { %4204 = vmatpush2.msra.mxu1 %v10378_v61  ;;  %v8701_v61 = vld [vmem:[#allocation5 + $0xd8] sm:$0xff] }
 0xd17   :  { %4363 = vmatprep.subr.mxu1 %v8697_v59  ;;  %v8702_v59 = vld [vmem:[#allocation5 + $0xd0] sm:$0xff] }
 0xd57   :  { %v3732_v48 = vpop.f32.mrf.mxu1 }
 0xd58   :  { %v3733_v0 = vadd.f32 %v3732_v48, %v10165_v13  ;;  %v8704_v48 = vld [vmem:[#allocation5 + $0xc0] sm:$0xff]  ;;  %v8709_v13 = vld [vmem:[#allocation5 + $0x98] sm:$0xff] }
 0xd59   :  { %v7981_v34 = vpop.f32.mrf.mxu1 }
 0xd5a   :  { %v3736_v46 = vadd.f32 %v3733_v0, %v185_v55  ;;  %v8705_v0 = vld [vmem:[#allocation5 + $0xb8] sm:$0xff]  ;;  %v8707_v55 = vld [vmem:[#allocation5 + $0xa8] sm:$0xff] }
 0xd5b   :  { %v8715_v34 = vld [vmem:[#allocation5 + $0x68] sm:$0xff] }
 0xd5c   :  { %v3737_v33 = vmax.f32 %v3736_v46, 0.0  ;;  %v8706_v46 = vld [vmem:[#allocation5 + $0xb0] sm:$0xff] }
 0xd5e   :  { %7991 = vmatmul.mubr.msk.f32.vlgmr.msra.gmra.mxu0 %vm3738_vm14, %v3737_v33  ;;  %v8713_v33 = vld [vmem:[#allocation5 + $0x78] sm:$0xff] }
 0xd5f   :  { %3897 = vmatpush1.msra.mxu0 %v8698_v53  ;;  %3960 = vmatprep.mubr.f32.mxu0 %v11332_v32  ;;  %v8708_v53 = vld [vmem:[#allocation5 + $0xa0] sm:$0xff]  ;;  %v10663_v32 = vld [vmem:[#allocation7 + $0x728] sm:$0xff] }
 0xd60   :  { %3898 = vmatprep.subr.mxu0 %v8699_v57  ;;  %v8710_v57 = vld [vmem:[#allocation5 + $0x90] sm:$0xff] }
 0xd61   :  { %3899 = vmatpush1.msra.mxu0 %v8700_v31  ;;  %v8711_v31 = vld [vmem:[#allocation5 + $0x88] sm:$0xff] }
 0xd62   :  { %3900 = vmatprep.subr.mxu0 %v8701_v61  ;;  %v8712_v61 = vld [vmem:[#allocation5 + $0x80] sm:$0xff] }
 0xd63   :  { %3901 = vmatpush1.msra.mxu0 %v8702_v59  ;;  %v8716_v59 = vld [vmem:[#allocation5 + $0x60] sm:$0xff] }
 0xd64   :  { %3902 = vmatprep.subr.mxu0 %v8703_v30  ;;  %v8714_v30 = vld [vmem:[#allocation5 + $0x70] sm:$0xff] }
 0xd65   :  { %3903 = vmatpush1.msra.mxu0 %v8704_v48  ;;  %v8717_v48 = vld [vmem:[#allocation5 + $0x58] sm:$0xff] }
 0xd66   :  { %3904 = vmatprep.subr.mxu0 %v8705_v0  ;;  %v8718_v0 = vld [vmem:[#allocation5 + $0x50] sm:$0xff] }
 0xd67   :  { %3905 = vmatpush1.msra.mxu0 %v8706_v46  ;;  %v8719_v46 = vld [vmem:[#allocation5 + $0x48] sm:$0xff] }
 0xd68   :  { %3906 = vmatprep.subr.mxu0 %v8707_v55  ;;  %v8720_v55 = vld [vmem:[#allocation5 + $0x40] sm:$0xff] }
 0xd69   :  { %3907 = vmatpush1.msra.mxu0 %v8708_v53  ;;  %v8721_v53 = vld [vmem:[#allocation5 + $0x38] sm:$0xff] }
 0xd6a   :  { %3908 = vmatprep.subr.mxu0 %v8709_v13  ;;  %v8722_v13 = vld [vmem:[#allocation5 + $0x30] sm:$0xff] }
 0xd6b   :  { %3909 = vmatpush1.msra.mxu0 %v8710_v57  ;;  %v8723_v57 = vld [vmem:[#allocation5 + $0x28] sm:$0xff] }
 0xd6c   :  { %3910 = vmatprep.subr.mxu0 %v8711_v31  ;;  %v8724_v31 = vld [vmem:[#allocation5 + $0x20] sm:$0xff] }
 0xd6d   :  { %3911 = vmatpush1.msra.mxu0 %v8712_v61  ;;  %v8725_v61 = vld [vmem:[#allocation5 + $0x18] sm:$0xff] }
 0xd6e   :  { %3912 = vmatprep.subr.mxu0 %v8713_v33  ;;  %v8726_v33 = vld [vmem:[#allocation5 + $0x10] sm:$0xff] }
 0xd6f   :  { %3913 = vmatpush1.msra.mxu0 %v8714_v30  ;;  %v8727_v30 = vld [vmem:[#allocation5 + $0x8] sm:$0xff] }
 0xd70   :  { %3914 = vmatprep.subr.mxu0 %v8715_v34  ;;  %v8728_v34 = vld [vmem:[#allocation5] sm:$0xff] }
 0xd71   :  { %3915 = vmatpush1.msra.mxu0 %v8716_v59 }
 0xd72   :  { %3916 = vmatprep.subr.mxu0 %v8717_v48 }
 0xd73   :  { %3917 = vmatpush1.msra.mxu0 %v8718_v0 }
 0xd74   :  { %3918 = vmatprep.subr.mxu0 %v8719_v46 }
 0xd75   :  { %3919 = vmatpush1.msra.mxu0 %v8720_v55 }
 0xd76   :  { %3920 = vmatprep.subr.mxu0 %v8721_v53 }
 0xd77   :  { %3921 = vmatpush1.msra.mxu0 %v8722_v13  ;;  %v8730_v13 = vld [vmem:[#allocation7 + $0x2f0] sm:$0xff] }
 0xd78   :  { %3922 = vmatprep.subr.mxu0 %v8723_v57  ;;  %v8731_v57 = vld [vmem:[#allocation7 + $0x2e8] sm:$0xff] }
 0xd79   :  { %3923 = vmatpush1.msra.mxu0 %v8724_v31  ;;  %v8732_v31 = vld [vmem:[#allocation7 + $0xf0] sm:$0xff] }
 0xd7a   :  { %3924 = vmatprep.subr.mxu0 %v8725_v61  ;;  %v8733_v61 = vld [vmem:[#allocation7 + $0x2e0] sm:$0xff] }
 0xd7b   :  { %3925 = vmatpush1.msra.mxu0 %v8726_v33  ;;  %v8734_v33 = vld [vmem:[#allocation7 + $0xe8] sm:$0xff] }
 0xd7c   :  { %3926 = vmatprep.subr.mxu0 %v8727_v30  ;;  %v8735_v30 = vld [vmem:[#allocation7 + $0x2d8] sm:$0xff] }
 0xd7d   :  { %3927 = vmatpush1.msra.mxu0 %v8728_v34  ;;  %v8736_v34 = vld [vmem:[#allocation7 + $0xe0] sm:$0xff] }
 0xd7e   :  { %6736 = vmatmul.mubr.msk.f32.vlgmr.msra.gmra.mxu0 %vm9659_vm2, %v10170_v49  ;;  %4070 = vmatprep.subr.mxu0 %v10189_v35  ;;  %v11333_v49 = vld [vmem:[#allocation34_spill] sm:$0xff]  ;;  %v11334_v35 = vld [vmem:[#allocation35_spill] sm:$0xff] }
 0xd7f   :  { %4071 = vmatpush1.msra.mxu0 %v10192_v36  ;;  %v11335_v36 = vld [vmem:[#allocation36_spill] sm:$0xff] }
 0xd80   :  { %4072 = vmatprep.subr.mxu0 %v10195_v37  ;;  %v11336_v37 = vld [vmem:[#allocation37_spill] sm:$0xff] }
 0xd81   :  { %4073 = vmatpush1.msra.mxu0 %v10198_v38  ;;  %v11337_v38 = vld [vmem:[#allocation38_spill] sm:$0xff] }
 0xd82   :  { %4074 = vmatprep.subr.mxu0 %v10201_v40  ;;  %v11338_v40 = vld [vmem:[#allocation39_spill] sm:$0xff] }
 0xd83   :  { %4075 = vmatpush1.msra.mxu0 %v10204_v39  ;;  %v11339_v39 = vld [vmem:[#allocation40_spill] sm:$0xff]  ;;  %11359 = vst [vmem:[#allocation39_spill] sm:$0xff] %v10663_v32 }
 0xd84   :  { %4076 = vmatprep.subr.mxu0 %v10207_v41  ;;  %v11340_v41 = vld [vmem:[#allocation41_spill] sm:$0xff] }
 0xd85   :  { %4077 = vmatpush1.msra.mxu0 %v10210_v42  ;;  %v11341_v42 = vld [vmem:[#allocation42_spill] sm:$0xff] }
 0xd86   :  { %4078 = vmatprep.subr.mxu0 %v10213_v44  ;;  %v11342_v44 = vld [vmem:[#allocation43_spill] sm:$0xff] }
 0xd87   :  { %4079 = vmatpush1.msra.mxu0 %v10216_v45  ;;  %v11343_v45 = vld [vmem:[#allocation44_spill] sm:$0xff] }
 0xd88   :  { %4080 = vmatprep.subr.mxu0 %v10219_v47  ;;  %v11344_v47 = vld [vmem:[#allocation45_spill] sm:$0xff] }
 0xd89   :  { %4081 = vmatpush1.msra.mxu0 %v10222_v51  ;;  %v11345_v51 = vld [vmem:[#allocation46_spill] sm:$0xff] }
 0xd8a   :  { %4082 = vmatprep.subr.mxu0 %v10225_v52  ;;  %v11346_v52 = vld [vmem:[#allocation47_spill] sm:$0xff] }
 0xd8b   :  { %4083 = vmatpush1.msra.mxu0 %v10228_v60  ;;  %v11347_v60 = vld [vmem:[#allocation48_spill] sm:$0xff] }
 0xd8c   :  { %4084 = vmatprep.subr.mxu0 %v10231_v62  ;;  %v11348_v62 = vld [vmem:[#allocation49_spill] sm:$0xff] }
 0xd8d   :  { %4085 = vmatpush1.msra.mxu0 %v10234_v63  ;;  %v8729_v63 = vld [vmem:[#allocation7 + $0x2f8] sm:$0xff] }
 0xd8e   :  { %4086 = vmatprep.subr.mxu0 %v10237_v1 }
 0xd8f   :  { %4087 = vmatpush1.msra.mxu0 %v10240_v2 }
 0xd90   :  { %4088 = vmatprep.subr.mxu0 %v10243_v3  ;;  %v3891_v3 = vpop.f32.mrf.mxu1 }
 0xd91   :  { %4089 = vmatpush1.msra.mxu0 %v10246_v4 }
 0xd92   :  { %4090 = vmatprep.subr.mxu0 %v10249_v5  ;;  %v3893_v4 = vpop.f32.mrf.mxu1 }
 0xd93   :  { %4091 = vmatpush1.msra.mxu0 %v10252_v6 }
 0xd94   :  { %4092 = vmatprep.subr.mxu0 %v10255_v7 }
 0xd95   :  { %4093 = vmatpush1.msra.mxu0 %v10258_v43 }
 0xd96   :  { %4094 = vmatprep.subr.mxu0 %v10261_v8 }
 0xd97   :  { %4095 = vmatpush1.msra.mxu0 %v10264_v10  ;;  %v4037_v6 = vpop.f32.mrf.mxu1 }
 0xd98   :  { %4096 = vmatprep.subr.mxu0 %v10267_v28 }
 0xd99   :  { %4097 = vmatpush1.msra.mxu0 %v10270_v11  ;;  %v4039_v28 = vpop.f32.mrf.mxu1 }
 0xd9a   :  { %4098 = vmatprep.subr.mxu0 %v10273_v50 }
 0xd9b   :  { %4099 = vmatpush1.msra.mxu0 %v10276_v54 }
 0xd9c   :  { %4100 = vmatprep.subr.mxu0 %v10279_v12 }
 0xd9d   :  { %4101 = vmatpush1.msra.mxu0 %v10282_v58 }
 0xd9e   :  { %4102 = vmatprep.subr.mxu0 %v10285_v14 }
 0xd9f   :  { %4103 = vmatpush2.msra.mxu0 %v10288_v15 }
 0xda0   :  { %4104 = vmatprep.subr.mxu0 %v10291_v16 }
 0xda1   :  { %4105 = vmatpush2.msra.mxu0 %v10294_v17 }
 0xda2   :  { %4106 = vmatprep.subr.mxu0 %v10297_v21 }
 0xda3   :  { %4107 = vmatpush2.msra.mxu0 %v10300_v56 }
 0xda4   :  { %4108 = vmatprep.subr.mxu0 %v10303_v18 }
 0xda5   :  { %4109 = vmatpush2.msra.mxu0 %v10306_v19 }
 0xda6   :  { %4110 = vmatprep.subr.mxu0 %v10309_v20 }
 0xda7   :  { %4111 = vmatpush2.msra.mxu0 %v10312_v22 }
 0xda8   :  { %4112 = vmatprep.subr.mxu0 %v10315_v23 }
 0xda9   :  { %4113 = vmatpush2.msra.mxu0 %v10318_v24 }
 0xdaa   :  { %4114 = vmatprep.subr.mxu0 %v10321_v25 }
 0xdab   :  { %4115 = vmatpush2.msra.mxu0 %v10324_v26 }
 0xdac   :  { %4116 = vmatprep.subr.mxu0 %v10327_v27 }
 0xdad   :  { %4117 = vmatpush2.msra.mxu0 %v10330_v29 }
 0xdae   :  { %4118 = vmatprep.subr.mxu0 %v11333_v49  ;;  %v8737_v49 = vld [vmem:[#allocation7 + $0x2d0] sm:$0xff] }
 0xdaf   :  { %4119 = vmatpush2.msra.mxu0 %v11334_v35  ;;  %v8738_v35 = vld [vmem:[#allocation7 + $0xd8] sm:$0xff] }
 0xdb0   :  { %4120 = vmatprep.subr.mxu0 %v11335_v36  ;;  %v8739_v36 = vld [vmem:[#allocation7 + $0x2c8] sm:$0xff] }
 0xdb1   :  { %4121 = vmatpush2.msra.mxu0 %v11336_v37  ;;  %v8740_v37 = vld [vmem:[#allocation7 + $0xd0] sm:$0xff] }
 0xdb2   :  { %4122 = vmatprep.subr.mxu0 %v11337_v38  ;;  %v8741_v38 = vld [vmem:[#allocation7 + $0x2c0] sm:$0xff] }
 0xdb3   :  { %4123 = vmatpush2.msra.mxu0 %v11338_v40  ;;  %v8742_v40 = vld [vmem:[#allocation7 + $0xc8] sm:$0xff] }
 0xdb4   :  { %4124 = vmatprep.subr.mxu0 %v11339_v39  ;;  %v8743_v39 = vld [vmem:[#allocation7 + $0x2b8] sm:$0xff] }
 0xdb5   :  { %4125 = vmatpush2.msra.mxu0 %v11340_v41  ;;  %v8744_v41 = vld [vmem:[#allocation7 + $0xc0] sm:$0xff] }
 0xdb6   :  { %4126 = vmatprep.subr.mxu0 %v11341_v42  ;;  %v8745_v42 = vld [vmem:[#allocation7 + $0x2b0] sm:$0xff] }
 0xdb7   :  { %4127 = vmatpush2.msra.mxu0 %v11342_v44  ;;  %v8746_v44 = vld [vmem:[#allocation7 + $0xb8] sm:$0xff] }
 0xdb8   :  { %4128 = vmatprep.subr.mxu0 %v11343_v45  ;;  %v8747_v45 = vld [vmem:[#allocation7 + $0x2a8] sm:$0xff] }
 0xdb9   :  { %4129 = vmatpush2.msra.mxu0 %v11344_v47  ;;  %v8748_v47 = vld [vmem:[#allocation7 + $0xb0] sm:$0xff] }
 0xdba   :  { %4130 = vmatprep.subr.mxu0 %v11345_v51  ;;  %v8749_v51 = vld [vmem:[#allocation7 + $0x2a0] sm:$0xff] }
 0xdbb   :  { %4131 = vmatpush2.msra.mxu0 %v11346_v52  ;;  %v8750_v52 = vld [vmem:[#allocation7 + $0xa8] sm:$0xff] }
 0xdbc   :  { %4132 = vmatprep.subr.mxu0 %v11347_v60  ;;  %v8751_v60 = vld [vmem:[#allocation7 + $0x298] sm:$0xff] }
 0xdbd   :  { %4133 = vmatpush2.msra.mxu0 %v11348_v62  ;;  %v8752_v62 = vld [vmem:[#allocation7 + $0xa0] sm:$0xff] }
 0xdbe   :  { %4292 = vmatprep.subr.mxu0 %v8729_v63  ;;  %v8753_v63 = vld [vmem:[#allocation7 + $0x290] sm:$0xff] }
 0xe1e   :  { %v10451_v1 = vpop.f32.mrf.mxu0 }
 0xe1f   :  { %11349 = vst [vmem:[#allocation34_spill] sm:$0xff] %v10451_v1  ;;  %v10651_v1 = vld [vmem:[#allocation7 + $0x748] sm:$0xff] }
 0xe20   :  { %v7992_v2 = vpop.f32.mrf.mxu0  ;;  %11355 = vst [vmem:[#allocation35_spill] sm:$0xff] %v10651_v1 }
 0xe21   :  { %v8754_v2 = vld [vmem:[#allocation7 + $0x98] sm:$0xff] }
 0xe3e   :  { %v3962_v5 = vpop.f32.mrf.mxu0 }
 0xe3f   :  { %v3963_v7 = vadd.f32 %v3962_v5, %v3891_v3  ;;  %v8755_v3 = vld [vmem:[#allocation7 + $0x288] sm:$0xff]  ;;  %v8757_v5 = vld [vmem:[#allocation7 + $0x280] sm:$0xff] }
 0xe40   :  { %v3964_v43 = vpop.f32.mrf.mxu0 }
 0xe41   :  { %v10453_v8 = vadd.f32 %v4037_v6, %v3963_v7  ;;  %v3965_v10 = vadd.f32 %v3964_v43, %v3893_v4  ;;  %v8756_v4 = vld [vmem:[#allocation7 + $0x90] sm:$0xff]  ;;  %v8758_v6 = vld [vmem:[#allocation7 + $0x88] sm:$0xff]  ;;  %v8759_v7 = vld [vmem:[#allocation7 + $0x278] sm:$0xff] }
 0xe42   :  { %v8760_v43 = vld [vmem:[#allocation7 + $0x80] sm:$0xff] }
 0xe43   :  { %v4044_v11 = vrot.slane %v10453_v8, 4  ;;  %v4056_v50 = vmul.f32 %v10453_v8, %v10453_v8  ;;  %v10458_v54 = vadd.f32 %v4039_v28, %v3965_v10  ;;  %v8761_v10 = vld [vmem:[#allocation7 + $0x270] sm:$0xff]  ;;  %v8762_v28 = vld [vmem:[#allocation7 + $0x78] sm:$0xff] }
 0xe45   :  { %v4045_v12 = vadd.f32 %v4044_v11, %v10453_v8  ;;  %v4058_v58 = vrot.slane %v4056_v50, 4  ;;  %v4050_v14 = vrot.slane %v10458_v54, 4  ;;  %v4057_v15 = vmul.f32 %v10458_v54, %v10458_v54  ;;  %v8763_v11 = vld [vmem:[#allocation7 + $0x268] sm:$0xff] }
 0xe47   :  { %v4046_v16 = vrot.slane %v4045_v12, 2  ;;  %v4059_v17 = vadd.f32 %v4058_v58, %v4056_v50  ;;  %v4051_v21 = vadd.f32 %v4050_v14, %v10458_v54  ;;  %v4064_v56 = vrot.slane %v4057_v15, 4  ;;  %v8764_v50 = vld [vmem:[#allocation7 + $0x70] sm:$0xff]  ;;  %v8766_v58 = vld [vmem:[#allocation7 + $0x68] sm:$0xff]  ;;  %v8767_v14 = vld [vmem:[#allocation7 + $0x258] sm:$0xff] }
 0xe49   :  { %v4052_v18 = vrot.slane %v4051_v21, 2  ;;  %v4047_v19 = vadd.f32 %v4046_v16, %v4045_v12  ;;  %v4065_v20 = vadd.f32 %v4064_v56, %v4057_v15  ;;  %v4060_v22 = vrot.slane %v4059_v17, 2  ;;  %v8765_v12 = vld [vmem:[#allocation7 + $0x260] sm:$0xff]  ;;  %v8769_v16 = vld [vmem:[#allocation7 + $0x250] sm:$0xff] }
 0xe4a   :  { %v8768_v15 = vld [vmem:[#allocation7 + $0x60] sm:$0xff]  ;;  %v8772_v56 = vld [vmem:[#allocation7 + $0x50] sm:$0xff] }
 0xe4b   :  { %v4053_v23 = vadd.f32 %v4052_v18, %v4051_v21  ;;  %v4066_v24 = vrot.slane %v4065_v20, 2  ;;  %v4061_v25 = vadd.f32 %v4060_v22, %v4059_v17  ;;  %v4048_v26 = vrot.slane %v4047_v19, 1  ;;  %v8770_v17 = vld [vmem:[#allocation7 + $0x58] sm:$0xff]  ;;  %v8771_v21 = vld [vmem:[#allocation7 + $0x248] sm:$0xff]  ;;  %v8773_v18 = vld [vmem:[#allocation7 + $0x240] sm:$0xff] }
 0xe4c   :  { %v8776_v22 = vld [vmem:[#allocation7 + $0x40] sm:$0xff] }
 0xe4d   :  { %v4054_v27 = vrot.slane %v4053_v23, 1  ;;  %v4067_v29 = vadd.f32 %v4066_v24, %v4065_v20  ;;  %v4062_v59 = vrot.slane %v4061_v25, 1  ;;  %v4049_v46 = vadd.f32 %v4048_v26, %v4047_v19  ;;  %v8774_v19 = vld [vmem:[#allocation7 + $0x48] sm:$0xff]  ;;  %v8775_v20 = vld [vmem:[#allocation7 + $0x238] sm:$0xff]  ;;  %v8780_v26 = vld [vmem:[#allocation7 + $0x30] sm:$0xff] }
 0xe4e   :  { %v8778_v24 = vld [vmem:[#allocation7 + $0x38] sm:$0xff] }
 0xe4f   :  { %v4055_v48 = vadd.f32 %v4054_v27, %v4053_v23  ;;  %v4068_v0 = vrot.slane %v4067_v29, 1  ;;  %v4063_v53 = vadd.f32 %v4062_v59, %v4061_v25  ;;  %v8777_v23 = vld [vmem:[#allocation7 + $0x230] sm:$0xff]  ;;  %v8779_v25 = vld [vmem:[#allocation7 + $0x228] sm:$0xff]  ;;  %v8781_v27 = vld [vmem:[#allocation7 + $0x220] sm:$0xff] }
 0xe50   :  { %v8783_v59 = vld [vmem:[#allocation7 + $0x218] sm:$0xff] }
 0xe51   :  { %4134 = vmatprep.mubr.f32.mxu0 %v4055_v48  ;;  %v4069_v55 = vadd.f32 %v4068_v0, %v4067_v29  ;;  %v8782_v29 = vld [vmem:[#allocation7 + $0x28] sm:$0xff]  ;;  %v8784_v48 = vld [vmem:[#allocation7 + $0x20] sm:$0xff]  ;;  %v8785_v0 = vld [vmem:[#allocation7 + $0x210] sm:$0xff] }
 0xe52   :  { %4135 = vmatmul.mubr.f32.vlgmr.msra.gmra.mxu0 %v4049_v46  ;;  %v8786_v46 = vld [vmem:[#allocation7 + $0x18] sm:$0xff] }
 0xe53   :  { %4205 = vmatprep.mubr.f32.mxu1 %v4069_v55  ;;  %4293 = vmatpush1.msra.mxu0 %v8730_v13  ;;  %v8787_v55 = vld [vmem:[#allocation7 + $0x208] sm:$0xff]  ;;  %v8789_v13 = vld [vmem:[#allocation7 + $0x200] sm:$0xff] }
 0xe54   :  { %4206 = vmatmul.mubr.f32.vlgmr.msra.gmra.mxu1 %v4063_v53  ;;  %4294 = vmatprep.subr.mxu0 %v8731_v57  ;;  %v8788_v53 = vld [vmem:[#allocation7 + $0x10] sm:$0xff]  ;;  %v8790_v57 = vld [vmem:[#allocation7 + $0x8] sm:$0xff] }
 0xe55   :  { %4364 = vmatpush1.msra.mxu1 %v8732_v31  ;;  %4295 = vmatpush1.msra.mxu0 %v8733_v61  ;;  %v8791_v31 = vld [vmem:[#allocation7 + $0x3f8] sm:$0xff]  ;;  %v8792_v61 = vld [vmem:[#allocation7] sm:$0xff] }
 0xe56   :  { %4365 = vmatprep.subr.mxu1 %v8734_v33  ;;  %4296 = vmatprep.subr.mxu0 %v8735_v30  ;;  %v8793_v33 = vld [vmem:[#allocation7 + $0x3f0] sm:$0xff]  ;;  %v8794_v30 = vld [vmem:[#allocation7 + $0x1f8] sm:$0xff] }
 0xe57   :  { %4366 = vmatpush1.msra.mxu1 %v8736_v34  ;;  %4297 = vmatpush1.msra.mxu0 %v8737_v49  ;;  %v8795_v34 = vld [vmem:[#allocation7 + $0x3e8] sm:$0xff]  ;;  %v8796_v49 = vld [vmem:[#allocation7 + $0x1f0] sm:$0xff] }
 0xe58   :  { %4367 = vmatprep.subr.mxu1 %v8738_v35  ;;  %4298 = vmatprep.subr.mxu0 %v8739_v36  ;;  %v8797_v35 = vld [vmem:[#allocation7 + $0x3e0] sm:$0xff]  ;;  %v8798_v36 = vld [vmem:[#allocation7 + $0x1e8] sm:$0xff] }
 0xe59   :  { %4368 = vmatpush1.msra.mxu1 %v8740_v37  ;;  %4299 = vmatpush1.msra.mxu0 %v8741_v38  ;;  %v8799_v37 = vld [vmem:[#allocation7 + $0x3d8] sm:$0xff]  ;;  %v8800_v38 = vld [vmem:[#allocation7 + $0x1e0] sm:$0xff] }
 0xe5a   :  { %4369 = vmatprep.subr.mxu1 %v8742_v40  ;;  %4300 = vmatprep.subr.mxu0 %v8743_v39  ;;  %v8801_v40 = vld [vmem:[#allocation7 + $0x3d0] sm:$0xff]  ;;  %v8802_v39 = vld [vmem:[#allocation7 + $0x1d8] sm:$0xff] }
 0xe5b   :  { %4370 = vmatpush1.msra.mxu1 %v8744_v41  ;;  %4301 = vmatpush1.msra.mxu0 %v8745_v42  ;;  %v8803_v41 = vld [vmem:[#allocation7 + $0x3c8] sm:$0xff]  ;;  %v8804_v42 = vld [vmem:[#allocation7 + $0x1d0] sm:$0xff] }
 0xe5c   :  { %4371 = vmatprep.subr.mxu1 %v8746_v44  ;;  %4302 = vmatprep.subr.mxu0 %v8747_v45  ;;  %v8805_v44 = vld [vmem:[#allocation7 + $0x3c0] sm:$0xff]  ;;  %v8806_v45 = vld [vmem:[#allocation7 + $0x1c8] sm:$0xff] }
 0xe5d   :  { %4372 = vmatpush1.msra.mxu1 %v8748_v47  ;;  %4303 = vmatpush1.msra.mxu0 %v8749_v51  ;;  %v8807_v47 = vld [vmem:[#allocation7 + $0x3b8] sm:$0xff]  ;;  %v8808_v51 = vld [vmem:[#allocation7 + $0x1c0] sm:$0xff] }
 0xe5e   :  { %4373 = vmatprep.subr.mxu1 %v8750_v52  ;;  %4304 = vmatprep.subr.mxu0 %v8751_v60  ;;  %v8809_v52 = vld [vmem:[#allocation7 + $0x3b0] sm:$0xff]  ;;  %v8810_v60 = vld [vmem:[#allocation7 + $0x1b8] sm:$0xff] }
 0xe5f   :  { %4374 = vmatpush1.msra.mxu1 %v8752_v62  ;;  %4305 = vmatpush1.msra.mxu0 %v8753_v63  ;;  %v8811_v62 = vld [vmem:[#allocation7 + $0x3a8] sm:$0xff]  ;;  %v8812_v63 = vld [vmem:[#allocation7 + $0x1b0] sm:$0xff] }
 0xe60   :  { %4375 = vmatprep.subr.mxu1 %v8754_v2  ;;  %4306 = vmatprep.subr.mxu0 %v8755_v3  ;;  %v8813_v2 = vld [vmem:[#allocation7 + $0x3a0] sm:$0xff]  ;;  %v8814_v3 = vld [vmem:[#allocation7 + $0x1a8] sm:$0xff] }
 0xe61   :  { %4376 = vmatpush1.msra.mxu1 %v8756_v4  ;;  %4307 = vmatpush1.msra.mxu0 %v8757_v5  ;;  %v8815_v4 = vld [vmem:[#allocation7 + $0x398] sm:$0xff]  ;;  %v8816_v5 = vld [vmem:[#allocation7 + $0x1a0] sm:$0xff] }
 0xe62   :  { %4377 = vmatprep.subr.mxu1 %v8758_v6  ;;  %4308 = vmatprep.subr.mxu0 %v8759_v7  ;;  %v8817_v6 = vld [vmem:[#allocation7 + $0x390] sm:$0xff]  ;;  %v8818_v7 = vld [vmem:[#allocation7 + $0x198] sm:$0xff] }
 0xe63   :  { %4378 = vmatpush1.msra.mxu1 %v8760_v43  ;;  %4309 = vmatpush1.msra.mxu0 %v8761_v10  ;;  %v8819_v43 = vld [vmem:[#allocation7 + $0x388] sm:$0xff]  ;;  %v8820_v10 = vld [vmem:[#allocation7 + $0x190] sm:$0xff] }
 0xe64   :  { %4379 = vmatprep.subr.mxu1 %v8762_v28  ;;  %4310 = vmatprep.subr.mxu0 %v8763_v11  ;;  %v8821_v28 = vld [vmem:[#allocation7 + $0x380] sm:$0xff]  ;;  %v8822_v11 = vld [vmem:[#allocation7 + $0x188] sm:$0xff] }
 0xe65   :  { %4380 = vmatpush1.msra.mxu1 %v8764_v50  ;;  %4311 = vmatpush1.msra.mxu0 %v8765_v12  ;;  %v8823_v50 = vld [vmem:[#allocation7 + $0x378] sm:$0xff]  ;;  %v8824_v12 = vld [vmem:[#allocation7 + $0x180] sm:$0xff] }
 0xe66   :  { %4381 = vmatprep.subr.mxu1 %v8766_v58  ;;  %4312 = vmatprep.subr.mxu0 %v8767_v14  ;;  %v8825_v58 = vld [vmem:[#allocation7 + $0x370] sm:$0xff]  ;;  %v8826_v14 = vld [vmem:[#allocation7 + $0x178] sm:$0xff] }
 0xe67   :  { %4382 = vmatpush1.msra.mxu1 %v8768_v15  ;;  %4313 = vmatpush1.msra.mxu0 %v8769_v16  ;;  %v8827_v15 = vld [vmem:[#allocation7 + $0x368] sm:$0xff]  ;;  %v8828_v16 = vld [vmem:[#allocation7 + $0x170] sm:$0xff] }
 0xe68   :  { %4383 = vmatprep.subr.mxu1 %v8770_v17  ;;  %4314 = vmatprep.subr.mxu0 %v8771_v21  ;;  %v8829_v17 = vld [vmem:[#allocation7 + $0x360] sm:$0xff]  ;;  %v8830_v21 = vld [vmem:[#allocation7 + $0x168] sm:$0xff] }
 0xe69   :  { %4384 = vmatpush1.msra.mxu1 %v8772_v56  ;;  %4315 = vmatpush1.msra.mxu0 %v8773_v18  ;;  %v8831_v56 = vld [vmem:[#allocation7 + $0x358] sm:$0xff]  ;;  %v8832_v18 = vld [vmem:[#allocation7 + $0x160] sm:$0xff] }
 0xe6a   :  { %4385 = vmatprep.subr.mxu1 %v8774_v19  ;;  %4316 = vmatprep.subr.mxu0 %v8775_v20  ;;  %v8833_v19 = vld [vmem:[#allocation7 + $0x350] sm:$0xff]  ;;  %v8834_v20 = vld [vmem:[#allocation7 + $0x158] sm:$0xff] }
 0xe6b   :  { %4386 = vmatpush1.msra.mxu1 %v8776_v22  ;;  %4317 = vmatpush1.msra.mxu0 %v8777_v23  ;;  %v8835_v22 = vld [vmem:[#allocation7 + $0x348] sm:$0xff]  ;;  %v8836_v23 = vld [vmem:[#allocation7 + $0x150] sm:$0xff] }
 0xe6c   :  { %4387 = vmatprep.subr.mxu1 %v8778_v24  ;;  %4318 = vmatprep.subr.mxu0 %v8779_v25  ;;  %v8837_v24 = vld [vmem:[#allocation7 + $0x340] sm:$0xff]  ;;  %v8838_v25 = vld [vmem:[#allocation7 + $0x148] sm:$0xff] }
 0xe6d   :  { %4388 = vmatpush1.msra.mxu1 %v8780_v26  ;;  %4319 = vmatpush1.msra.mxu0 %v8781_v27  ;;  %v8839_v26 = vld [vmem:[#allocation7 + $0x338] sm:$0xff]  ;;  %v8840_v27 = vld [vmem:[#allocation7 + $0x140] sm:$0xff] }
 0xe6e   :  { %4389 = vmatprep.subr.mxu1 %v8782_v29  ;;  %4320 = vmatprep.subr.mxu0 %v8783_v59  ;;  %v8841_v29 = vld [vmem:[#allocation7 + $0x330] sm:$0xff]  ;;  %v8842_v59 = vld [vmem:[#allocation7 + $0x138] sm:$0xff] }
 0xe6f   :  { %4390 = vmatpush1.msra.mxu1 %v8784_v48  ;;  %4321 = vmatpush1.msra.mxu0 %v8785_v0  ;;  %v8843_v48 = vld [vmem:[#allocation7 + $0x328] sm:$0xff]  ;;  %v8844_v0 = vld [vmem:[#allocation7 + $0x130] sm:$0xff] }
 0xe70   :  { %4391 = vmatprep.subr.mxu1 %v8786_v46  ;;  %4322 = vmatprep.subr.mxu0 %v8787_v55  ;;  %v8845_v46 = vld [vmem:[#allocation7 + $0x320] sm:$0xff]  ;;  %v8846_v55 = vld [vmem:[#allocation7 + $0x128] sm:$0xff] }
 0xe71   :  { %4392 = vmatpush1.msra.mxu1 %v8788_v53  ;;  %4323 = vmatpush1.msra.mxu0 %v8789_v13  ;;  %v8847_v53 = vld [vmem:[#allocation7 + $0x318] sm:$0xff]  ;;  %v8848_v13 = vld [vmem:[#allocation7 + $0x120] sm:$0xff] }
 0xe72   :  { %4393 = vmatprep.subr.mxu1 %v8790_v57  ;;  %4324 = vmatprep.subr.mxu0 %v8791_v31  ;;  %v8849_v57 = vld [vmem:[#allocation7 + $0x310] sm:$0xff]  ;;  %v8850_v31 = vld [vmem:[#allocation7 + $0x118] sm:$0xff] }
 0xe73   :  { %4394 = vmatpush1.msra.mxu1 %v8792_v61  ;;  %4325 = vmatpush2.msra.mxu0 %v8793_v33  ;;  %v8851_v61 = vld [vmem:[#allocation7 + $0x308] sm:$0xff]  ;;  %v8852_v33 = vld [vmem:[#allocation7 + $0x110] sm:$0xff] }
 0xe74   :  { %4395 = vmatprep.subr.mxu1 %v8794_v30  ;;  %4326 = vmatprep.subr.mxu0 %v8795_v34  ;;  %v8853_v30 = vld [vmem:[#allocation7 + $0x300] sm:$0xff]  ;;  %v8854_v34 = vld [vmem:[#allocation7 + $0x108] sm:$0xff] }
 0xe75   :  { %4396 = vmatpush2.msra.mxu1 %v8796_v49  ;;  %4327 = vmatpush2.msra.mxu0 %v8797_v35  ;;  %v8855_v49 = vld [vmem:[#allocation7 + $0x4f8] sm:$0xff]  ;;  %v8856_v35 = vld [vmem:[#allocation7 + $0x100] sm:$0xff] }
 0xe76   :  { %4397 = vmatprep.subr.mxu1 %v8798_v36  ;;  %4328 = vmatprep.subr.mxu0 %v8799_v37  ;;  %v10465_v36 = vld [vmem:[#allocation7 + $0x6f8] sm:$0xff] }
 0xe77   :  { %4398 = vmatpush2.msra.mxu1 %v8800_v38  ;;  %4329 = vmatpush2.msra.mxu0 %v8801_v40 }
 0xe78   :  { %4399 = vmatprep.subr.mxu1 %v8802_v39  ;;  %4330 = vmatprep.subr.mxu0 %v8803_v41 }
 0xe79   :  { %4400 = vmatpush2.msra.mxu1 %v8804_v42  ;;  %4331 = vmatpush2.msra.mxu0 %v8805_v44 }
 0xe7a   :  { %4401 = vmatprep.subr.mxu1 %v8806_v45  ;;  %4332 = vmatprep.subr.mxu0 %v8807_v47 }
 0xe7b   :  { %4402 = vmatpush2.msra.mxu1 %v8808_v51  ;;  %4333 = vmatpush2.msra.mxu0 %v8809_v52 }
 0xe7c   :  { %4403 = vmatprep.subr.mxu1 %v8810_v60  ;;  %4334 = vmatprep.subr.mxu0 %v8811_v62 }
 0xe7d   :  { %4404 = vmatpush2.msra.mxu1 %v8812_v63  ;;  %4335 = vmatpush2.msra.mxu0 %v8813_v2  ;;  %v11350_v63 = vld [vmem:[#allocation27_spill] sm:$0xff] }
 0xe7e   :  { %4405 = vmatprep.subr.mxu1 %v8814_v3  ;;  %4336 = vmatprep.subr.mxu0 %v8815_v4  ;;  %v11351_v3 = vld [vmem:[#allocation28_spill] sm:$0xff] }
 0xe7f   :  { %4406 = vmatpush2.msra.mxu1 %v8816_v5  ;;  %4337 = vmatpush2.msra.mxu0 %v8817_v6 }
 0xe80   :  { %4407 = vmatprep.subr.mxu1 %v8818_v7  ;;  %4338 = vmatprep.subr.mxu0 %v8819_v43  ;;  %v8858_v7 = vld [vmem:[#allocation5 + $0x500] ss:$8 sm:$0x3] }
 0xe81   :  { %4408 = vmatpush2.msra.mxu1 %v8820_v10  ;;  %4339 = vmatpush2.msra.mxu0 %v8821_v28 }
 0xe82   :  { %4409 = vmatprep.subr.mxu1 %v8822_v11  ;;  %4340 = vmatprep.subr.mxu0 %v8823_v50  ;;  %v11352_v50 = vld [vmem:[#allocation29_spill] sm:$0xff] }
 0xe83   :  { %4410 = vmatpush2.msra.mxu1 %v8824_v12  ;;  %4341 = vmatpush2.msra.mxu0 %v8825_v58 }
 0xe84   :  { %4411 = vmatprep.subr.mxu1 %v8826_v14  ;;  %4342 = vmatprep.subr.mxu0 %v8827_v15  ;;  %v11353_v15 = vld [vmem:[#allocation31_spill] sm:$0xff] }
 0xe85   :  { %4412 = vmatpush2.msra.mxu1 %v8828_v16  ;;  %4343 = vmatpush2.msra.mxu0 %v8829_v17  ;;  %v11354_v17 = vld [vmem:[#allocation30_spill] sm:$0xff] }
 0xe86   :  { %4413 = vmatprep.subr.mxu1 %v8830_v21  ;;  %4344 = vmatprep.subr.mxu0 %v8831_v56 }
 0xe87   :  { %4414 = vmatpush2.msra.mxu1 %v8832_v18  ;;  %4345 = vmatpush2.msra.mxu0 %v8833_v19 }
 0xe88   :  { %4415 = vmatprep.subr.mxu1 %v8834_v20  ;;  %4346 = vmatprep.subr.mxu0 %v8835_v22 }
 0xe89   :  { %4416 = vmatpush2.msra.mxu1 %v8836_v23  ;;  %4347 = vmatpush2.msra.mxu0 %v8837_v24 }
 0xe8a   :  { %4417 = vmatprep.subr.mxu1 %v8838_v25  ;;  %4348 = vmatprep.subr.mxu0 %v8839_v26 }
 0xe8b   :  { %4418 = vmatpush2.msra.mxu1 %v8840_v27  ;;  %4349 = vmatpush2.msra.mxu0 %v8841_v29 }
 0xe8c   :  { %4419 = vmatprep.subr.mxu1 %v8842_v59  ;;  %4350 = vmatprep.subr.mxu0 %v8843_v48 }
 0xe8d   :  { %4420 = vmatpush2.msra.mxu1 %v8844_v0  ;;  %4351 = vmatpush2.msra.mxu0 %v8845_v46 }
 0xe8e   :  { %4421 = vmatprep.subr.mxu1 %v8846_v55  ;;  %4352 = vmatprep.subr.mxu0 %v8847_v53  ;;  %v10486_v53 = vld [vmem:[#allocation7 + $0x6f0] sm:$0xff] }
 0xe8f   :  { %4422 = vmatpush2.msra.mxu1 %v8848_v13  ;;  %4353 = vmatpush2.msra.mxu0 %v8849_v57 }
 0xe90   :  { %4423 = vmatprep.subr.mxu1 %v8850_v31  ;;  %4354 = vmatprep.subr.mxu0 %v8851_v61  ;;  %v10491_v31 = vld [vmem:[#allocation7 + $0x6e8] sm:$0xff]  ;;  %v10497_v61 = vld [vmem:[#allocation7 + $0x6e0] sm:$0xff] }
 0xe91   :  { %4424 = vmatpush2.msra.mxu1 %v8852_v33  ;;  %4355 = vmatpush2.msra.mxu0 %v8853_v30  ;;  %v10501_v30 = vld [vmem:[#allocation7 + $0x6d8] sm:$0xff] }
 0xe92   :  { %4425 = vmatprep.subr.mxu1 %v8854_v34  ;;  %4442 = vmatprep.subr.mxu0 %v8855_v49  ;;  %v8863_v34 = vld [vmem:[#allocation7 + $0x4f0] sm:$0xff]  ;;  %v8864_v49 = vld [vmem:[#allocation7 + $0x4e8] sm:$0xff] }
 0xe93   :  { %4426 = vmatpush2.msra.mxu1 %v8856_v35  ;;  %v10504_v35 = vld [vmem:[#allocation7 + $0x6d0] sm:$0xff] }
 0xe94   :  { %4541 = vmatprep.subr.mxu1 %v10465_v36 }
 0xf12   :  { %v4136_v37 = vpop.f32.mrf.mxu0 }
 0xf13   :  { %v4212_v38 = vmul.f32 %v4136_v37, %v4136_v37  ;;  %v4242_v4 = vrot.slane %v4136_v37, %v11351_v3  ;;  %v8866_v37 = vld [vmem:[#allocation7 + $0x4e0] sm:$0xff] }
 0xf14   :  { %v4138_v40 = vpop.f32.mrf.mxu0  ;;  %v4207_v39 = vpop.f32.mrf.mxu1 }
 0xf15   :  { %v4213_v41 = vmul.f32 %v4138_v40, %v4138_v40  ;;  %v4214_v42 = vsub.f32 %v4207_v39, %v4212_v38  ;;  %v4246_v5 = vrot.slane %v4138_v40, %v11351_v3  ;;  %v4247_v10 = vsub.f32 %v10453_v8, %v4242_v4  ;;  %v10507_v38 = vld [vmem:[#allocation7 + $0x6c8] sm:$0xff]  ;;  %v8868_v40 = vld [vmem:[#allocation7 + $0x4d8] sm:$0xff]  ;;  %v10510_v39 = vld [vmem:[#allocation7 + $0x6c0] sm:$0xff] }
 0xf16   :  { %v4209_v44 = vpop.f32.mrf.mxu1  ;;  %v8880_v4 = vld [vmem:[#allocation7 + $0x4a8] sm:$0xff] }
 0xf17   :  { %v4216_v45 = vadd.f32 1e-05, %v4214_v42  ;;  %v4215_v47 = vsub.f32 %v4209_v44, %v4213_v41  ;;  %v4248_v28 = vsub.f32 %v10458_v54, %v4246_v5  ;;  %v8870_v41 = vld [vmem:[#allocation7 + $0x4d0] sm:$0xff]  ;;  %v10513_v42 = vld [vmem:[#allocation7 + $0x6b8] sm:$0xff]  ;;  %v8872_v44 = vld [vmem:[#allocation7 + $0x4c8] sm:$0xff] }
 0xf18   :  { %v10528_v5 = vld [vmem:[#allocation7 + $0x690] sm:$0xff] }
 0xf19   :  { %v4217_v51 = vadd.f32 1e-05, %v4215_v47  ;;  %8552 = vrsqrt.f32 %v4216_v45  ;;  %v10516_v45 = vld [vmem:[#allocation7 + $0x6b0] sm:$0xff]  ;;  %v8874_v47 = vld [vmem:[#allocation7 + $0x4c0] sm:$0xff] }
 0xf1b   :  { %8554 = vrsqrt.f32 %v4217_v51  ;;  %v10519_v51 = vld [vmem:[#allocation7 + $0x6a8] sm:$0xff] }
 0xf26   :  { %v8553_v52 = vpop.eup %8552 }
 0xf28   :  { %v8555_v60 = vpop.eup %8554 }
 0xf29   :  { %v4222_v62 = vcombine.low %v8553_v52, %v8555_v60  ;;  %v8876_v52 = vld [vmem:[#allocation7 + $0x4b8] sm:$0xff]  ;;  %v10522_v60 = vld [vmem:[#allocation7 + $0x6a0] sm:$0xff] }
 0xf2b   :  { %v4229_v2 = vrot.slane %v4222_v62, %v11350_v63  ;;  %v8878_v62 = vld [vmem:[#allocation7 + $0x4b0] sm:$0xff] }
 0xf2d   :  { %v4236_v6 = vrot.slane %v4229_v2, %v11350_v63  ;;  %v10525_v2 = vld [vmem:[#allocation7 + $0x698] sm:$0xff]  ;;  %v10660_v63 = vld [vmem:[#allocation7 + $0x730] sm:$0xff] }
 0xf2e   :  { %11358 = vst [vmem:[#allocation38_spill] sm:$0xff] %v10660_v63 }
 0xf2f   :  { %v4238_v43 = vmul.f32 %v8858_v7, %v4236_v6  ;;  %v8882_v6 = vld [vmem:[#allocation7 + $0x4a0] sm:$0xff]  ;;  %v10531_v7 = vld [vmem:[#allocation7 + $0x688] sm:$0xff] }
 0xf31   :  { %v4253_v11 = vrot.slane %v4238_v43, %v11351_v3  ;;  %v4257_v12 = vrot.slane %v4238_v43, %v11352_v50  ;;  %v8884_v43 = vld [vmem:[#allocation7 + $0x498] sm:$0xff]  ;;  %v10654_v50 = vld [vmem:[#allocation7 + $0x740] sm:$0xff] }
 0xf32   :  { %11356 = vst [vmem:[#allocation36_spill] sm:$0xff] %v10654_v50  ;;  %v10657_v3 = vld [vmem:[#allocation7 + $0x738] sm:$0xff] }
 0xf33   :  { %v4261_v58 = vmul.f32 %v4257_v12, %v4248_v28  ;;  %v4260_v14 = vmul.f32 %v4253_v11, %v4247_v10  ;;  %v10534_v10 = vld [vmem:[#allocation7 + $0x680] sm:$0xff]  ;;  %v8886_v28 = vld [vmem:[#allocation7 + $0x490] sm:$0xff]  ;;  %v10537_v11 = vld [vmem:[#allocation7 + $0x678] sm:$0xff]  ;;  %11357 = vst [vmem:[#allocation37_spill] sm:$0xff] %v10657_v3 }
 0xf34   :  { %v8888_v12 = vld [vmem:[#allocation7 + $0x488] sm:$0xff] }
 0xf35   :  { %v4263_v16 = vadd.f32 %v4261_v58, %v11353_v15  ;;  %v4262_v21 = vadd.f32 %v4260_v14, %v11354_v17  ;;  %v10540_v58 = vld [vmem:[#allocation7 + $0x670] sm:$0xff]  ;;  %v8890_v14 = vld [vmem:[#allocation7 + $0x480] sm:$0xff]  ;;  %v10543_v15 = vld [vmem:[#allocation7 + $0x668] sm:$0xff] }
 0xf36   :  { %v10546_v17 = vld [vmem:[#allocation7 + $0x660] sm:$0xff] }
 0xf37   :  { %vm4265_vm5 = vcmp.ge.f32.partialorder %v4263_v16, 0.0  ;;  %v4267_v56 = vmul.f32 0.01, %v4263_v16  ;;  %vm4264_vm6 = vcmp.ge.f32.partialorder %v4262_v21, 0.0  ;;  %v4266_v18 = vmul.f32 0.01, %v4262_v21 }
 0xf39   :  { %v4269_v19 = vsel %vm4265_vm5, %v4263_v16, %v4267_v56  ;;  %v4268_v20 = vsel %vm4264_vm6, %v4262_v21, %v4266_v18  ;;  %v8892_v16 = vld [vmem:[#allocation7 + $0x478] sm:$0xff]  ;;  %v8894_v21 = vld [vmem:[#allocation7 + $0x470] sm:$0xff]  ;;  %v8896_v18 = vld [vmem:[#allocation7 + $0x468] sm:$0xff] }
 0xf3a   :  { %v4273_v22 = vrot.slane %v4269_v19, 7  ;;  %v4272_v8 = vrot.slane %v4268_v20, 7  ;;  %v10549_v56 = vld [vmem:[#allocation7 + $0x658] sm:$0xff]  ;;  %v10552_v19 = vld [vmem:[#allocation7 + $0x650] sm:$0xff]  ;;  %v8898_v20 = vld [vmem:[#allocation7 + $0x460] sm:$0xff] }
 0xf3c   :  { %6738 = vmatprep.mubr.msk.f32.mxu1 %vm9659_vm2, %v4273_v22  ;;  %v4277_v54 = vsel %vm195_vm0, 0.0, %v4273_v22  ;;  %v4279_v23 = vsel %vm195_vm0, %v4273_v22, 0.0  ;;  %v4276_v24 = vsel %vm195_vm0, 0.0, %v4272_v8  ;;  %v4278_v25 = vsel %vm195_vm0, %v4272_v8, 0.0  ;;  %v10555_v22 = vld [vmem:[#allocation7 + $0x648] sm:$0xff] }
 0xf3d   :  { %6740 = vmatmul.mubr.msk.f32.vlgmr.msra.gmra.mxu1 %vm9659_vm2, %v4272_v8  ;;  %v4287_v26 = vrot.slane %v4277_v54, 1  ;;  %v4288_v27 = vrot.slane %v4279_v23, 1  ;;  %v4284_v29 = vrot.slane %v4276_v24, 1  ;;  %v4285_v59 = vrot.slane %v4278_v25, 1  ;;  %v8900_v8 = vld [vmem:[#allocation7 + $0x458] sm:$0xff] }
 0xf3e   :  { %v4437_v48 = vrot.slane %v4277_v54, 2  ;;  %v4438_v0 = vrot.slane %v4279_v23, 2  ;;  %v4434_v46 = vrot.slane %v4276_v24, 2  ;;  %v4435_v55 = vrot.slane %v4278_v25, 2  ;;  %4542 = vmatpush1.msra.mxu1 %v10486_v53  ;;  %v10558_v54 = vld [vmem:[#allocation7 + $0x640] sm:$0xff]  ;;  %v8902_v23 = vld [vmem:[#allocation7 + $0x450] sm:$0xff] }
 0xf3f   :  { %v4289_v13 = vsel %vm264_vm1, %v4287_v26, %v4288_v27  ;;  %v4286_v57 = vsel %vm264_vm1, %v4284_v29, %v4285_v59  ;;  %4543 = vmatprep.subr.mxu1 %v10491_v31  ;;  %v10561_v24 = vld [vmem:[#allocation7 + $0x638] sm:$0xff]  ;;  %v8904_v25 = vld [vmem:[#allocation7 + $0x448] sm:$0xff]  ;;  %v10564_v26 = vld [vmem:[#allocation7 + $0x630] sm:$0xff] }
 0xf40   :  { %4356 = vmatprep.mubr.f32.mxu0 %v4289_v13  ;;  %v10495_v9 = vsel %vm443_vm3, %v4434_v46, %v4435_v55  ;;  %4544 = vmatpush1.msra.mxu1 %v10497_v61  ;;  %v4439_v33 = vsel %vm443_vm3, %v4437_v48, %v4438_v0  ;;  %v8906_v27 = vld [vmem:[#allocation7 + $0x440] sm:$0xff]  ;;  %v10567_v29 = vld [vmem:[#allocation7 + $0x628] sm:$0xff]  ;;  %v8908_v59 = vld [vmem:[#allocation7 + $0x438] sm:$0xff] }
 0xf41   :  { %4357 = vmatmul.mubr.f32.vlgmr.msra.gmra.mxu0 %v4286_v57  ;;  %4545 = vmatprep.subr.mxu1 %v10501_v30  ;;  %v10570_v48 = vld [vmem:[#allocation7 + $0x620] sm:$0xff]  ;;  %v8910_v0 = vld [vmem:[#allocation7 + $0x430] sm:$0xff]  ;;  %v10573_v46 = vld [vmem:[#allocation7 + $0x618] sm:$0xff] }
 0xf42   :  { %4443 = vmatpush1.msra.mxu0 %v8863_v34  ;;  %4506 = vmatprep.mubr.f32.mxu0 %v4439_v33  ;;  %v8912_v55 = vld [vmem:[#allocation7 + $0x428] sm:$0xff]  ;;  %v10576_v13 = vld [vmem:[#allocation7 + $0x610] sm:$0xff]  ;;  %v8914_v57 = vld [vmem:[#allocation7 + $0x420] sm:$0xff] }
 0xf43   :  { %4444 = vmatprep.subr.mxu0 %v8864_v49  ;;  %4546 = vmatpush1.msra.mxu1 %v10504_v35  ;;  %v10579_v33 = vld [vmem:[#allocation7 + $0x608] sm:$0xff]  ;;  %v8916_v34 = vld [vmem:[#allocation7 + $0x418] sm:$0xff]  ;;  %v10582_v49 = vld [vmem:[#allocation7 + $0x600] sm:$0xff] }
 0xf44   :  { %4445 = vmatpush1.msra.mxu0 %v8866_v37  ;;  %4547 = vmatprep.subr.mxu1 %v10507_v38  ;;  %v8918_v37 = vld [vmem:[#allocation7 + $0x410] sm:$0xff] }
 0xf45   :  { %4446 = vmatprep.subr.mxu0 %v8868_v40  ;;  %4548 = vmatpush1.msra.mxu1 %v10510_v39  ;;  %v10585_v40 = vld [vmem:[#allocation7 + $0x7f8] sm:$0xff] }
 0xf46   :  { %4447 = vmatpush1.msra.mxu0 %v8870_v41  ;;  %4549 = vmatprep.subr.mxu1 %v10513_v42  ;;  %v8920_v41 = vld [vmem:[#allocation7 + $0x408] sm:$0xff] }
 0xf47   :  { %4448 = vmatprep.subr.mxu0 %v8872_v44  ;;  %4550 = vmatpush1.msra.mxu1 %v10516_v45  ;;  %v10588_v44 = vld [vmem:[#allocation7 + $0x7f0] sm:$0xff] }
 0xf48   :  { %4449 = vmatpush1.msra.mxu0 %v8874_v47  ;;  %4551 = vmatprep.subr.mxu1 %v10519_v51  ;;  %v8922_v47 = vld [vmem:[#allocation7 + $0x400] sm:$0xff] }
 0xf49   :  { %4450 = vmatprep.subr.mxu0 %v8876_v52  ;;  %4552 = vmatpush1.msra.mxu1 %v10522_v60  ;;  %v10591_v52 = vld [vmem:[#allocation7 + $0x7e8] sm:$0xff] }
 0xf4a   :  { %4451 = vmatpush1.msra.mxu0 %v8878_v62  ;;  %4553 = vmatprep.subr.mxu1 %v10525_v2  ;;  %v8924_v62 = vld [vmem:[#allocation7 + $0x5f8] sm:$0xff] }
 0xf4b   :  { %4452 = vmatprep.subr.mxu0 %v8880_v4  ;;  %4554 = vmatpush1.msra.mxu1 %v10528_v5  ;;  %v10594_v4 = vld [vmem:[#allocation7 + $0x7e0] sm:$0xff] }
 0xf4c   :  { %4453 = vmatpush1.msra.mxu0 %v8882_v6  ;;  %4555 = vmatprep.subr.mxu1 %v10531_v7  ;;  %v8926_v6 = vld [vmem:[#allocation7 + $0x5f0] sm:$0xff] }
 0xf4d   :  { %4454 = vmatprep.subr.mxu0 %v8884_v43  ;;  %4556 = vmatpush1.msra.mxu1 %v10534_v10  ;;  %v10597_v43 = vld [vmem:[#allocation7 + $0x7d8] sm:$0xff] }
 0xf4e   :  { %4455 = vmatpush1.msra.mxu0 %v8886_v28  ;;  %4557 = vmatprep.subr.mxu1 %v10537_v11  ;;  %v8928_v28 = vld [vmem:[#allocation7 + $0x5e8] sm:$0xff] }
 0xf4f   :  { %4456 = vmatprep.subr.mxu0 %v8888_v12  ;;  %4558 = vmatpush1.msra.mxu1 %v10540_v58  ;;  %v10600_v12 = vld [vmem:[#allocation7 + $0x7d0] sm:$0xff] }
 0xf50   :  { %4457 = vmatpush1.msra.mxu0 %v8890_v14  ;;  %4559 = vmatprep.subr.mxu1 %v10543_v15  ;;  %v8930_v14 = vld [vmem:[#allocation7 + $0x5e0] sm:$0xff] }
 0xf51   :  { %4458 = vmatprep.subr.mxu0 %v8892_v16  ;;  %4560 = vmatpush1.msra.mxu1 %v10546_v17  ;;  %v10603_v16 = vld [vmem:[#allocation7 + $0x7c8] sm:$0xff] }
 0xf52   :  { %4459 = vmatpush1.msra.mxu0 %v8894_v21  ;;  %4561 = vmatprep.subr.mxu1 %v10549_v56  ;;  %v8932_v21 = vld [vmem:[#allocation7 + $0x5d8] sm:$0xff] }
 0xf53   :  { %4460 = vmatprep.subr.mxu0 %v8896_v18  ;;  %4562 = vmatpush1.msra.mxu1 %v10552_v19  ;;  %v10606_v18 = vld [vmem:[#allocation7 + $0x7c0] sm:$0xff] }
 0xf54   :  { %4461 = vmatpush1.msra.mxu0 %v8898_v20  ;;  %4563 = vmatprep.subr.mxu1 %v10555_v22  ;;  %v8934_v20 = vld [vmem:[#allocation7 + $0x5d0] sm:$0xff] }
 0xf55   :  { %4462 = vmatprep.subr.mxu0 %v8900_v8  ;;  %4564 = vmatpush1.msra.mxu1 %v10558_v54  ;;  %v10609_v8 = vld [vmem:[#allocation7 + $0x7b8] sm:$0xff] }
 0xf56   :  { %4463 = vmatpush1.msra.mxu0 %v8902_v23  ;;  %4565 = vmatprep.subr.mxu1 %v10561_v24  ;;  %v8936_v23 = vld [vmem:[#allocation7 + $0x5c8] sm:$0xff] }
 0xf57   :  { %4464 = vmatprep.subr.mxu0 %v8904_v25  ;;  %4566 = vmatpush1.msra.mxu1 %v10564_v26  ;;  %v10612_v25 = vld [vmem:[#allocation7 + $0x7b0] sm:$0xff] }
 0xf58   :  { %4465 = vmatpush1.msra.mxu0 %v8906_v27  ;;  %4567 = vmatprep.subr.mxu1 %v10567_v29  ;;  %v8938_v27 = vld [vmem:[#allocation7 + $0x5c0] sm:$0xff] }
 0xf59   :  { %4466 = vmatprep.subr.mxu0 %v8908_v59  ;;  %4568 = vmatpush1.msra.mxu1 %v10570_v48  ;;  %v10615_v59 = vld [vmem:[#allocation7 + $0x7a8] sm:$0xff] }
 0xf5a   :  { %4467 = vmatpush1.msra.mxu0 %v8910_v0  ;;  %4569 = vmatprep.subr.mxu1 %v10573_v46  ;;  %v8940_v0 = vld [vmem:[#allocation7 + $0x5b8] sm:$0xff] }
 0xf5b   :  { %4468 = vmatprep.subr.mxu0 %v8912_v55  ;;  %4570 = vmatpush1.msra.mxu1 %v10576_v13  ;;  %v10618_v55 = vld [vmem:[#allocation7 + $0x7a0] sm:$0xff] }
 0xf5c   :  { %4469 = vmatpush1.msra.mxu0 %v8914_v57  ;;  %4571 = vmatprep.subr.mxu1 %v10579_v33  ;;  %v8942_v57 = vld [vmem:[#allocation7 + $0x5b0] sm:$0xff] }
 0xf5d   :  { %4470 = vmatprep.subr.mxu0 %v8916_v34  ;;  %4572 = vmatpush1.msra.mxu1 %v10582_v49  ;;  %v10621_v34 = vld [vmem:[#allocation7 + $0x798] sm:$0xff] }
 0xf5e   :  { %4471 = vmatpush1.msra.mxu0 %v8918_v37  ;;  %4573 = vmatprep.subr.mxu1 %v10585_v40  ;;  %v8944_v37 = vld [vmem:[#allocation7 + $0x5a8] sm:$0xff] }
 0xf5f   :  { %4472 = vmatprep.subr.mxu0 %v8920_v41  ;;  %4574 = vmatpush2.msra.mxu1 %v10588_v44  ;;  %v10624_v41 = vld [vmem:[#allocation7 + $0x790] sm:$0xff] }
 0xf60   :  { %4473 = vmatpush1.msra.mxu0 %v8922_v47  ;;  %4575 = vmatprep.subr.mxu1 %v10591_v52  ;;  %v8946_v47 = vld [vmem:[#allocation7 + $0x5a0] sm:$0xff] }
 0xf61   :  { %4474 = vmatprep.subr.mxu0 %v8924_v62  ;;  %4576 = vmatpush2.msra.mxu1 %v10594_v4  ;;  %v10627_v62 = vld [vmem:[#allocation7 + $0x788] sm:$0xff] }
 0xf62   :  { %4475 = vmatpush2.msra.mxu0 %v8926_v6  ;;  %4577 = vmatprep.subr.mxu1 %v10597_v43  ;;  %v8948_v6 = vld [vmem:[#allocation7 + $0x598] sm:$0xff] }
 0xf63   :  { %4476 = vmatprep.subr.mxu0 %v8928_v28  ;;  %4578 = vmatpush2.msra.mxu1 %v10600_v12  ;;  %v10630_v28 = vld [vmem:[#allocation7 + $0x780] sm:$0xff] }
 0xf64   :  { %4477 = vmatpush2.msra.mxu0 %v8930_v14  ;;  %4579 = vmatprep.subr.mxu1 %v10603_v16  ;;  %v8950_v14 = vld [vmem:[#allocation7 + $0x590] sm:$0xff] }
 0xf65   :  { %4478 = vmatprep.subr.mxu0 %v8932_v21  ;;  %4580 = vmatpush2.msra.mxu1 %v10606_v18  ;;  %v10633_v21 = vld [vmem:[#allocation7 + $0x778] sm:$0xff] }
 0xf66   :  { %4479 = vmatpush2.msra.mxu0 %v8934_v20  ;;  %4581 = vmatprep.subr.mxu1 %v10609_v8  ;;  %v8952_v20 = vld [vmem:[#allocation7 + $0x588] sm:$0xff] }
 0xf67   :  { %4480 = vmatprep.subr.mxu0 %v8936_v23  ;;  %4582 = vmatpush2.msra.mxu1 %v10612_v25  ;;  %v10636_v23 = vld [vmem:[#allocation7 + $0x770] sm:$0xff] }
 0xf68   :  { %4481 = vmatpush2.msra.mxu0 %v8938_v27  ;;  %4583 = vmatprep.subr.mxu1 %v10615_v59  ;;  %v8954_v27 = vld [vmem:[#allocation7 + $0x580] sm:$0xff] }
 0xf69   :  { %4482 = vmatprep.subr.mxu0 %v8940_v0  ;;  %4584 = vmatpush2.msra.mxu1 %v10618_v55  ;;  %v10639_v0 = vld [vmem:[#allocation7 + $0x768] sm:$0xff] }
 0xf6a   :  { %4483 = vmatpush2.msra.mxu0 %v8942_v57  ;;  %4585 = vmatprep.subr.mxu1 %v10621_v34  ;;  %v8956_v57 = vld [vmem:[#allocation7 + $0x578] sm:$0xff] }
 0xf6b   :  { %4484 = vmatprep.subr.mxu0 %v8944_v37  ;;  %4586 = vmatpush2.msra.mxu1 %v10624_v41  ;;  %v10642_v37 = vld [vmem:[#allocation7 + $0x760] sm:$0xff] }
 0xf6c   :  { %4485 = vmatpush2.msra.mxu0 %v8946_v47  ;;  %4587 = vmatprep.subr.mxu1 %v10627_v62  ;;  %v8958_v47 = vld [vmem:[#allocation7 + $0x570] sm:$0xff] }
 0xf6d   :  { %4486 = vmatprep.subr.mxu0 %v8948_v6  ;;  %4588 = vmatpush2.msra.mxu1 %v10630_v28  ;;  %v10645_v6 = vld [vmem:[#allocation7 + $0x758] sm:$0xff] }
 0xf6e   :  { %4487 = vmatpush2.msra.mxu0 %v8950_v14  ;;  %4589 = vmatprep.subr.mxu1 %v10633_v21  ;;  %v8960_v14 = vld [vmem:[#allocation7 + $0x568] sm:$0xff] }
 0xf6f   :  { %4488 = vmatprep.subr.mxu0 %v8952_v20  ;;  %4590 = vmatpush2.msra.mxu1 %v10636_v23  ;;  %v10648_v20 = vld [vmem:[#allocation7 + $0x750] sm:$0xff] }
 0xf70   :  { %4489 = vmatpush2.msra.mxu0 %v8954_v27  ;;  %4591 = vmatprep.subr.mxu1 %v10639_v0  ;;  %v8962_v27 = vld [vmem:[#allocation7 + $0x560] sm:$0xff] }
 0xf71   :  { %4490 = vmatprep.subr.mxu0 %v8956_v57  ;;  %4592 = vmatpush2.msra.mxu1 %v10642_v37  ;;  %v8964_v57 = vld [vmem:[#allocation7 + $0x558] sm:$0xff] }
 0xf72   :  { %4491 = vmatpush2.msra.mxu0 %v8958_v47  ;;  %4593 = vmatprep.subr.mxu1 %v10645_v6  ;;  %v8966_v47 = vld [vmem:[#allocation7 + $0x550] sm:$0xff] }
 0xf73   :  { %4492 = vmatprep.subr.mxu0 %v8960_v14  ;;  %4594 = vmatpush2.msra.mxu1 %v10648_v20  ;;  %v8968_v14 = vld [vmem:[#allocation7 + $0x548] sm:$0xff] }
 0xf74   :  { %4493 = vmatpush2.msra.mxu0 %v8962_v27  ;;  %4595 = vmatprep.subr.mxu1 %v10651_v1  ;;  %v8970_v27 = vld [vmem:[#allocation7 + $0x540] sm:$0xff] }
 0xf75   :  { %4494 = vmatprep.subr.mxu0 %v8964_v57  ;;  %4596 = vmatpush2.msra.mxu1 %v10654_v50  ;;  %v8972_v57 = vld [vmem:[#allocation7 + $0x538] sm:$0xff]  ;;  %v10666_v50 = vld [vmem:[#allocation7 + $0x720] sm:$0xff] }
 0xf76   :  { %4495 = vmatpush2.msra.mxu0 %v8966_v47  ;;  %4597 = vmatprep.subr.mxu1 %v10657_v3  ;;  %11360 = vst [vmem:[#allocation40_spill] sm:$0xff] %v10666_v50  ;;  %v8974_v47 = vld [vmem:[#allocation7 + $0x530] sm:$0xff]  ;;  %v10669_v3 = vld [vmem:[#allocation7 + $0x718] sm:$0xff]  ;;  %v8985_v1 = vld [vmem:[#allocation7 + $0x500] sm:$0xff] }
 0xf77   :  { %4496 = vmatprep.subr.mxu0 %v8968_v14  ;;  %4598 = vmatpush2.msra.mxu1 %v10660_v63  ;;  %11361 = vst [vmem:[#allocation41_spill] sm:$0xff] %v10669_v3  ;;  %v8976_v14 = vld [vmem:[#allocation7 + $0x528] sm:$0xff]  ;;  %v10672_v63 = vld [vmem:[#allocation7 + $0x710] sm:$0xff] }
 0xf78   :  { %4497 = vmatpush2.msra.mxu0 %v8970_v27  ;;  %4599 = vmatprep.subr.mxu1 %v10663_v32  ;;  %v8978_v27 = vld [vmem:[#allocation7 + $0x520] sm:$0xff]  ;;  %v10675_v32 = vld [vmem:[#allocation7 + $0x708] sm:$0xff] }
 0xf79   :  { %4498 = vmatprep.subr.mxu0 %v8972_v57  ;;  %4600 = vmatpush2.msra.mxu1 %v10666_v50  ;;  %v8980_v57 = vld [vmem:[#allocation7 + $0x518] sm:$0xff]  ;;  %v10678_v50 = vld [vmem:[#allocation7 + $0x700] sm:$0xff] }
 0xf7a   :  { %4499 = vmatpush2.msra.mxu0 %v8974_v47  ;;  %4601 = vmatprep.subr.mxu1 %v10669_v3  ;;  %v8982_v47 = vld [vmem:[#allocation7 + $0x510] sm:$0xff]  ;;  %v8983_v3 = vld [vmem:[#allocation8 + $0x1f8] sm:$0xff] }
 0xf7b   :  { %4500 = vmatprep.subr.mxu0 %v8976_v14  ;;  %4602 = vmatpush2.msra.mxu1 %v10672_v63  ;;  %v8984_v14 = vld [vmem:[#allocation7 + $0x508] sm:$0xff] }
 0xf7c   :  { %4501 = vmatpush2.msra.mxu0 %v8978_v27  ;;  %4603 = vmatprep.subr.mxu1 %v10675_v32  ;;  %v9003_v27 = vld [vmem:[#allocation8 + $0x2d8] sm:$0xff] }
 0xf7d   :  { %4502 = vmatprep.subr.mxu0 %v8980_v57  ;;  %4604 = vmatpush2.msra.mxu1 %v10678_v50  ;;  %v9004_v57 = vld [vmem:[#allocation8 + $0x1d0] sm:$0xff] }
 0xf7e   :  { %4503 = vmatpush2.msra.mxu0 %v8982_v47  ;;  %7111 = vmatprep.subr.mxu1 %v8983_v3  ;;  %v11364_v3 = vld [vmem:[#allocation37_spill] sm:$0xff] }
 0xf7f   :  { %4504 = vmatprep.subr.mxu0 %v8984_v14  ;;  %v9005_v47 = vld [vmem:[#allocation8 + $0x258] sm:$0xff]  ;;  %v9006_v14 = vld [vmem:[#allocation8 + $0x150] sm:$0xff] }
 0xf80   :  { %4505 = vmatpush2.msra.mxu0 %v8985_v1  ;;  %v11362_v1 = vld [vmem:[#allocation35_spill] sm:$0xff] }
 0xf81   :  { %4507 = vmatmul.mubr.f32.vlgmr.msra.gmra.mxu0 %v10495_v9  ;;  %4612 = vmatprep.subr.mxu0 %v10465_v36  ;;  %v11363_v36 = vld [vmem:[#allocation36_spill] sm:$0xff] }
 0xf82   :  { %4613 = vmatpush1.msra.mxu0 %v10486_v53  ;;  %v11365_v53 = vld [vmem:[#allocation38_spill] sm:$0xff]  ;;  %v11367_v9 = vld [vmem:[#allocation40_spill] sm:$0xff] }
 0xf83   :  { %4614 = vmatprep.subr.mxu0 %v10491_v31  ;;  %v11366_v31 = vld [vmem:[#allocation39_spill] sm:$0xff] }
 0xf84   :  { %4615 = vmatpush1.msra.mxu0 %v10497_v61  ;;  %v11368_v61 = vld [vmem:[#allocation41_spill] sm:$0xff] }
 0xf85   :  { %4616 = vmatprep.subr.mxu0 %v10501_v30  ;;  %v8986_v30 = vld [vmem:[#allocation8 + $0x2f8] sm:$0xff] }
 0xf86   :  { %4617 = vmatpush1.msra.mxu0 %v10504_v35 }
 0xf87   :  { %4618 = vmatprep.subr.mxu0 %v10507_v38 }
 0xf88   :  { %4619 = vmatpush1.msra.mxu0 %v10510_v39 }
 0xf89   :  { %4620 = vmatprep.subr.mxu0 %v10513_v42 }
 0xf8a   :  { %4621 = vmatpush1.msra.mxu0 %v10516_v45 }
 0xf8b   :  { %4622 = vmatprep.subr.mxu0 %v10519_v51 }
 0xf8c   :  { %4623 = vmatpush1.msra.mxu0 %v10522_v60 }
 0xf8d   :  { %4624 = vmatprep.subr.mxu0 %v10525_v2 }
 0xf8e   :  { %4625 = vmatpush1.msra.mxu0 %v10528_v5 }
 0xf8f   :  { %4626 = vmatprep.subr.mxu0 %v10531_v7 }
 0xf90   :  { %4627 = vmatpush1.msra.mxu0 %v10534_v10 }
 0xf91   :  { %4628 = vmatprep.subr.mxu0 %v10537_v11 }
 0xf92   :  { %4629 = vmatpush1.msra.mxu0 %v10540_v58 }
 0xf93   :  { %4630 = vmatprep.subr.mxu0 %v10543_v15 }
 0xf94   :  { %4631 = vmatpush1.msra.mxu0 %v10546_v17 }
 0xf95   :  { %4632 = vmatprep.subr.mxu0 %v10549_v56 }
 0xf96   :  { %4633 = vmatpush1.msra.mxu0 %v10552_v19 }
 0xf97   :  { %4634 = vmatprep.subr.mxu0 %v10555_v22 }
 0xf98   :  { %4635 = vmatpush1.msra.mxu0 %v10558_v54 }
 0xf99   :  { %4636 = vmatprep.subr.mxu0 %v10561_v24 }
 0xf9a   :  { %4637 = vmatpush1.msra.mxu0 %v10564_v26 }
 0xf9b   :  { %4638 = vmatprep.subr.mxu0 %v10567_v29 }
 0xf9c   :  { %4639 = vmatpush1.msra.mxu0 %v10570_v48 }
 0xf9d   :  { %4640 = vmatprep.subr.mxu0 %v10573_v46 }
 0xf9e   :  { %4641 = vmatpush1.msra.mxu0 %v10576_v13 }
 0xf9f   :  { %4642 = vmatprep.subr.mxu0 %v10579_v33 }
 0xfa0   :  { %4643 = vmatpush1.msra.mxu0 %v10582_v49 }
 0xfa1   :  { %4644 = vmatprep.subr.mxu0 %v10585_v40 }
 0xfa2   :  { %4645 = vmatpush2.msra.mxu0 %v10588_v44 }
 0xfa3   :  { %4646 = vmatprep.subr.mxu0 %v10591_v52 }
 0xfa4   :  { %4647 = vmatpush2.msra.mxu0 %v10594_v4 }
 0xfa5   :  { %4648 = vmatprep.subr.mxu0 %v10597_v43 }
 0xfa6   :  { %4649 = vmatpush2.msra.mxu0 %v10600_v12 }
 0xfa7   :  { %4650 = vmatprep.subr.mxu0 %v10603_v16  ;;  %v8987_v16 = vld [vmem:[#allocation8 + $0x178] sm:$0xff] }
 0xfa8   :  { %4651 = vmatpush2.msra.mxu0 %v10606_v18  ;;  %v8988_v18 = vld [vmem:[#allocation8 + $0x1f0] sm:$0xff] }
 0xfa9   :  { %4652 = vmatprep.subr.mxu0 %v10609_v8  ;;  %v8989_v8 = vld [vmem:[#allocation8 + $0x278] sm:$0xff] }
 0xfaa   :  { %4653 = vmatpush2.msra.mxu0 %v10612_v25  ;;  %v8990_v25 = vld [vmem:[#allocation8 + $0x170] sm:$0xff] }
 0xfab   :  { %4654 = vmatprep.subr.mxu0 %v10615_v59  ;;  %v8991_v59 = vld [vmem:[#allocation8 + $0x2f0] sm:$0xff] }
 0xfac   :  { %4655 = vmatpush2.msra.mxu0 %v10618_v55  ;;  %v8992_v55 = vld [vmem:[#allocation8 + $0x1e8] sm:$0xff] }
 0xfad   :  { %4656 = vmatprep.subr.mxu0 %v10621_v34  ;;  %v8993_v34 = vld [vmem:[#allocation8 + $0x270] sm:$0xff] }
 0xfae   :  { %4657 = vmatpush2.msra.mxu0 %v10624_v41  ;;  %v8994_v41 = vld [vmem:[#allocation8 + $0x168] sm:$0xff] }
 0xfaf   :  { %4658 = vmatprep.subr.mxu0 %v10627_v62  ;;  %v8995_v62 = vld [vmem:[#allocation8 + $0x2e8] sm:$0xff] }
 0xfb0   :  { %4659 = vmatpush2.msra.mxu0 %v10630_v28  ;;  %v8996_v28 = vld [vmem:[#allocation8 + $0x1e0] sm:$0xff] }
 0xfb1   :  { %4660 = vmatprep.subr.mxu0 %v10633_v21  ;;  %v8997_v21 = vld [vmem:[#allocation8 + $0x268] sm:$0xff] }
 0xfb2   :  { %4661 = vmatpush2.msra.mxu0 %v10636_v23  ;;  %v8998_v23 = vld [vmem:[#allocation8 + $0x160] sm:$0xff] }
 0xfb3   :  { %4662 = vmatprep.subr.mxu0 %v10639_v0  ;;  %v8999_v0 = vld [vmem:[#allocation8 + $0x2e0] sm:$0xff] }
 0xfb4   :  { %4663 = vmatpush2.msra.mxu0 %v10642_v37  ;;  %v9000_v37 = vld [vmem:[#allocation8 + $0x1d8] sm:$0xff] }
 0xfb5   :  { %4664 = vmatprep.subr.mxu0 %v10645_v6  ;;  %v9001_v6 = vld [vmem:[#allocation8 + $0x260] sm:$0xff] }
 0xfb6   :  { %4665 = vmatpush2.msra.mxu0 %v10648_v20  ;;  %v9002_v20 = vld [vmem:[#allocation8 + $0x158] sm:$0xff] }
 0xfb7   :  { %4666 = vmatprep.subr.mxu0 %v11362_v1  ;;  %v9007_v1 = vld [vmem:[#allocation8 + $0x2d0] sm:$0xff] }
 0xfb8   :  { %4667 = vmatpush2.msra.mxu0 %v11363_v36  ;;  %v9008_v36 = vld [vmem:[#allocation8 + $0x1c8] sm:$0xff] }
 0xfb9   :  { %4668 = vmatprep.subr.mxu0 %v11364_v3  ;;  %v9009_v3 = vld [vmem:[#allocation8 + $0x250] sm:$0xff] }
 0xfba   :  { %4669 = vmatpush2.msra.mxu0 %v11365_v53  ;;  %v9010_v53 = vld [vmem:[#allocation8 + $0x148] sm:$0xff] }
 0xfbb   :  { %4670 = vmatprep.subr.mxu0 %v11366_v31  ;;  %v9011_v31 = vld [vmem:[#allocation8 + $0x2c8] sm:$0xff] }
 0xfbc   :  { %4671 = vmatpush2.msra.mxu0 %v11367_v9  ;;  %v9012_v9 = vld [vmem:[#allocation8 + $0x1c0] sm:$0xff] }
 0xfbd   :  { %4672 = vmatprep.subr.mxu0 %v11368_v61  ;;  %v9013_v61 = vld [vmem:[#allocation8 + $0x248] sm:$0xff] }
 0xfbe   :  { %4673 = vmatpush2.msra.mxu0 %v10672_v63 }
 0xfbf   :  { %4674 = vmatprep.subr.mxu0 %v10675_v32 }
 0xfc0   :  { %4675 = vmatpush2.msra.mxu0 %v10678_v50 }
 0xfc1   :  { %7181 = vmatprep.subr.mxu0 %v8986_v30  ;;  %v9014_v30 = vld [vmem:[#allocation8 + $0x140] sm:$0xff] }
 0xffd   :  { %v4429_v38 = vpop.f32.mrf.mxu1 }
 0xfff   :  { %v4431_v45 = vpop.f32.mrf.mxu1 }
0x1001   :  { %v4358_v35 = vpop.f32.mrf.mxu0 }
0x1002   :  { %v4430_v42 = vadd.f32 %v4429_v38, %v4358_v35  ;;  %v9015_v35 = vld [vmem:[#allocation8 + $0x2c0] sm:$0xff]  ;;  %v9016_v38 = vld [vmem:[#allocation8 + $0x1b8] sm:$0xff] }
0x1003   :  { %v4360_v39 = vpop.f32.mrf.mxu0 }
0x1004   :  { %v4432_v60 = vadd.f32 %v4431_v45, %v4360_v39  ;;  %v9017_v39 = vld [vmem:[#allocation8 + $0x240] sm:$0xff]  ;;  %v9019_v45 = vld [vmem:[#allocation8 + $0x2b8] sm:$0xff] }
0x1041   :  { %v4508_v51 = vpop.f32.mrf.mxu0 }
0x1042   :  { %v10746_v2 = vadd.f32 %v4508_v51, %v4430_v42  ;;  %v9018_v42 = vld [vmem:[#allocation8 + $0x138] sm:$0xff]  ;;  %v9020_v51 = vld [vmem:[#allocation8 + $0x1b0] sm:$0xff] }
0x1043   :  { %v4510_v5 = vpop.f32.mrf.mxu0 }
0x1044   :  { %v4515_v7 = vrot.slane %v10746_v2, 4  ;;  %v4527_v63 = vmul.f32 %v10746_v2, %v10746_v2  ;;  %v10751_v32 = vadd.f32 %v4510_v5, %v4432_v60  ;;  %v9021_v60 = vld [vmem:[#allocation8 + $0x238] sm:$0xff]  ;;  %v9022_v5 = vld [vmem:[#allocation8 + $0x130] sm:$0xff] }
0x1046   :  { %v4516_v50 = vadd.f32 %v4515_v7, %v10746_v2  ;;  %v4529_v10 = vrot.slane %v4527_v63, 4  ;;  %v4521_v11 = vrot.slane %v10751_v32, 4  ;;  %v4528_v58 = vmul.f32 %v10751_v32, %v10751_v32  ;;  %v9023_v7 = vld [vmem:[#allocation8 + $0x2b0] sm:$0xff] }
0x1048   :  { %v4517_v15 = vrot.slane %v4516_v50, 2  ;;  %v4530_v17 = vadd.f32 %v4529_v10, %v4527_v63  ;;  %v4522_v56 = vadd.f32 %v4521_v11, %v10751_v32  ;;  %v4535_v19 = vrot.slane %v4528_v58, 4  ;;  %v9024_v63 = vld [vmem:[#allocation8 + $0x1a8] sm:$0xff] }
0x1049   :  { %v9026_v10 = vld [vmem:[#allocation8 + $0x128] sm:$0xff] }
0x104a   :  { %v4523_v22 = vrot.slane %v4522_v56, 2  ;;  %v4518_v54 = vadd.f32 %v4517_v15, %v4516_v50  ;;  %v4536_v24 = vadd.f32 %v4535_v19, %v4528_v58  ;;  %v4531_v26 = vrot.slane %v4530_v17, 2  ;;  %v9025_v50 = vld [vmem:[#allocation8 + $0x230] sm:$0xff]  ;;  %v9027_v11 = vld [vmem:[#allocation8 + $0x2a8] sm:$0xff]  ;;  %v9028_v58 = vld [vmem:[#allocation8 + $0x1a0] sm:$0xff] }
0x104b   :  { %v9029_v15 = vld [vmem:[#allocation8 + $0x228] sm:$0xff]  ;;  %v9032_v19 = vld [vmem:[#allocation8 + $0x198] sm:$0xff] }
0x104c   :  { %v4524_v29 = vadd.f32 %v4523_v22, %v4522_v56  ;;  %v4537_v48 = vrot.slane %v4536_v24, 2  ;;  %v4532_v46 = vadd.f32 %v4531_v26, %v4530_v17  ;;  %v4519_v13 = vrot.slane %v4518_v54, 1  ;;  %v9030_v17 = vld [vmem:[#allocation8 + $0x120] sm:$0xff]  ;;  %v9036_v26 = vld [vmem:[#allocation8 + $0x190] sm:$0xff] }
0x104d   :  { %v9031_v56 = vld [vmem:[#allocation8 + $0x2a0] sm:$0xff] }
0x104e   :  { %v4525_v33 = vrot.slane %v4524_v29, 1  ;;  %v4538_v49 = vadd.f32 %v4537_v48, %v4536_v24  ;;  %v4533_v40 = vrot.slane %v4532_v46, 1  ;;  %v4520_v4 = vadd.f32 %v4519_v13, %v4518_v54  ;;  %v9033_v22 = vld [vmem:[#allocation8 + $0x220] sm:$0xff]  ;;  %v9034_v54 = vld [vmem:[#allocation8 + $0x118] sm:$0xff]  ;;  %v9038_v48 = vld [vmem:[#allocation8 + $0x110] sm:$0xff] }
0x104f   :  { %v9035_v24 = vld [vmem:[#allocation8 + $0x298] sm:$0xff]  ;;  %v9040_v13 = vld [vmem:[#allocation8 + $0x188] sm:$0xff] }
0x1050   :  { %v4526_v44 = vadd.f32 %v4525_v33, %v4524_v29  ;;  %v4539_v52 = vrot.slane %v4538_v49, 1  ;;  %v4534_v12 = vadd.f32 %v4533_v40, %v4532_v46  ;;  %v9037_v29 = vld [vmem:[#allocation8 + $0x218] sm:$0xff]  ;;  %v9039_v46 = vld [vmem:[#allocation8 + $0x290] sm:$0xff]  ;;  %v9043_v40 = vld [vmem:[#allocation8 + $0x288] sm:$0xff] }
0x1051   :  { %v9041_v33 = vld [vmem:[#allocation8 + $0x210] sm:$0xff] }
0x1052   :  { %4605 = vmatprep.mubr.f32.mxu1 %v4526_v44  ;;  %v4540_v43 = vadd.f32 %v4539_v52, %v4538_v49  ;;  %v9042_v49 = vld [vmem:[#allocation8 + $0x108] sm:$0xff]  ;;  %v9044_v44 = vld [vmem:[#allocation8 + $0x180] sm:$0xff] }
0x1053   :  { %4606 = vmatmul.mubr.f32.vlgmr.msra.gmra.mxu1 %v4520_v4  ;;  %v9045_v52 = vld [vmem:[#allocation8 + $0x208] sm:$0xff]  ;;  %v9046_v4 = vld [vmem:[#allocation8 + $0x100] sm:$0xff] }
0x1054   :  { %4676 = vmatprep.mubr.f32.mxu0 %v4540_v43  ;;  %7112 = vmatpush3.msra.mxu1 %v8987_v16  ;;  %v9047_v43 = vld [vmem:[#allocation8 + $0x280] sm:$0xff] }
0x1055   :  { %4677 = vmatmul.mubr.f32.vlgmr.msra.gmra.mxu0 %v4534_v12  ;;  %7113 = vmatprep.subr.mxu1 %v8988_v18  ;;  %v9048_v12 = vld [vmem:[#allocation8 + $0xf8] sm:$0xff]  ;;  %v9049_v16 = vld [vmem:[#allocation8 + $0x200] sm:$0xff]  ;;  %v11369_v18 = vmov 0.0  }
0x1056   :  { %7182 = vmatpush3.msra.mxu0 %v8989_v8  ;;  %7114 = vmatpush3.msra.mxu1 %v8990_v25 }
0x1057   :  { %7183 = vmatprep.subr.mxu0 %v8991_v59  ;;  %7115 = vmatprep.subr.mxu1 %v8992_v55 }
0x1058   :  { %7184 = vmatpush3.msra.mxu0 %v8993_v34  ;;  %7116 = vmatpush3.msra.mxu1 %v8994_v41 }
0x1059   :  { %7185 = vmatprep.subr.mxu0 %v8995_v62  ;;  %7117 = vmatprep.subr.mxu1 %v8996_v28 }
0x105a   :  { %7186 = vmatpush3.msra.mxu0 %v8997_v21  ;;  %7118 = vmatpush3.msra.mxu1 %v8998_v23 }
0x105b   :  { %7187 = vmatprep.subr.mxu0 %v8999_v0  ;;  %7119 = vmatprep.subr.mxu1 %v9000_v37 }
0x105c   :  { %7188 = vmatpush3.msra.mxu0 %v9001_v6  ;;  %7120 = vmatpush3.msra.mxu1 %v9002_v20  ;;  %v11370_v20 = vld [vmem:[#allocation27_spill] sm:$0xff] }
0x105d   :  { %7189 = vmatprep.subr.mxu0 %v9003_v27  ;;  %7121 = vmatprep.subr.mxu1 %v9004_v57  ;;  %v11371_v57 = vld [vmem:[#allocation28_spill] sm:$0xff] }
0x105e   :  { %7190 = vmatpush3.msra.mxu0 %v9005_v47  ;;  %7122 = vmatpush3.msra.mxu1 %v9006_v14 }
0x105f   :  { %7191 = vmatprep.subr.mxu0 %v9007_v1  ;;  %7123 = vmatprep.subr.mxu1 %v9008_v36  ;;  %v9050_v36 = vld [vmem:[#allocation7 + $0x800] ss:$8 sm:$0x3] }
0x1060   :  { %7192 = vmatpush3.msra.mxu0 %v9009_v3  ;;  %7124 = vmatpush3.msra.mxu1 %v9010_v53 }
0x1061   :  { %7193 = vmatprep.subr.mxu0 %v9011_v31  ;;  %7125 = vmatprep.subr.mxu1 %v9012_v9 }
0x1062   :  { %7194 = vmatpush3.msra.mxu0 %v9013_v61  ;;  %7126 = vmatpush3.msra.mxu1 %v9014_v30  ;;  %v11372_v61 = vld [vmem:[#allocation29_spill] sm:$0xff] }
0x1063   :  { %7195 = vmatprep.subr.mxu0 %v9015_v35  ;;  %7127 = vmatprep.subr.mxu1 %v9016_v38 }
0x1064   :  { %7196 = vmatpush3.msra.mxu0 %v9017_v39  ;;  %7128 = vmatpush3.msra.mxu1 %v9018_v42  ;;  %v11373_v39 = vld [vmem:[#allocation32_spill] sm:$0xff] }
0x1065   :  { %7197 = vmatprep.subr.mxu0 %v9019_v45  ;;  %7129 = vmatprep.subr.mxu1 %v9020_v51  ;;  %v11374_v45 = vld [vmem:[#allocation33_spill] sm:$0xff] }
0x1066   :  { %7198 = vmatpush3.msra.mxu0 %v9021_v60  ;;  %7130 = vmatpush3.msra.mxu1 %v9022_v5 }
0x1067   :  { %7199 = vmatprep.subr.mxu0 %v9023_v7  ;;  %7131 = vmatprep.subr.mxu1 %v9024_v63 }
0x1068   :  { %7200 = vmatpush3.msra.mxu0 %v9025_v50  ;;  %7132 = vmatpush3.msra.mxu1 %v9026_v10 }
0x1069   :  { %7201 = vmatprep.subr.mxu0 %v9027_v11  ;;  %7133 = vmatprep.subr.mxu1 %v9028_v58 }
0x106a   :  { %7202 = vmatpush3.msra.mxu0 %v9029_v15  ;;  %7134 = vmatpush3.msra.mxu1 %v9030_v17 }
0x106b   :  { %7203 = vmatprep.subr.mxu0 %v9031_v56  ;;  %7135 = vmatprep.subr.mxu1 %v9032_v19 }
0x106c   :  { %7204 = vmatpush3.msra.mxu0 %v9033_v22  ;;  %7136 = vmatpush3.msra.mxu1 %v9034_v54 }
0x106d   :  { %7205 = vmatprep.subr.mxu0 %v9035_v24  ;;  %7137 = vmatprep.subr.mxu1 %v9036_v26 }
0x106e   :  { %7206 = vmatpush3.msra.mxu0 %v9037_v29  ;;  %7138 = vmatpush3.msra.mxu1 %v9038_v48 }
0x106f   :  { %7207 = vmatprep.subr.mxu0 %v9039_v46  ;;  %7139 = vmatprep.subr.mxu1 %v9040_v13 }
0x1070   :  { %7208 = vmatpush3.msra.mxu0 %v9041_v33  ;;  %7140 = vmatpush3.msra.mxu1 %v9042_v49 }
0x1071   :  { %7209 = vmatprep.subr.mxu0 %v9043_v40  ;;  %7141 = vmatprep.subr.mxu1 %v9044_v44 }
0x1072   :  { %7210 = vmatpush3.msra.mxu0 %v9045_v52  ;;  %7142 = vmatpush3.msra.mxu1 %v9046_v4 }
0x1073   :  { %7211 = vmatprep.subr.mxu0 %v9047_v43  ;;  %7146 = vmatprep.subr.mxu1 %v9048_v12 }
0x1074   :  { %7212 = vmatpush3.msra.mxu0 %v9049_v16 }
0x1075   :  { %8028 = vmatprep.subr.mxu0 %v11369_v18 }
0x1113   :  { %v4607_v8 = vpop.f32.mrf.mxu1 }
0x1114   :  { %v4683_v25 = vmul.f32 %v4607_v8, %v4607_v8  ;;  %v4713_v47 = vrot.slane %v4607_v8, %v11371_v57 }
0x1115   :  { %v4609_v59 = vpop.f32.mrf.mxu1  ;;  %v4678_v55 = vpop.f32.mrf.mxu0 }
0x1116   :  { %v4684_v34 = vmul.f32 %v4609_v59, %v4609_v59  ;;  %v4685_v41 = vsub.f32 %v4678_v55, %v4683_v25  ;;  %v4717_v14 = vrot.slane %v4609_v59, %v11371_v57  ;;  %v4718_v53 = vsub.f32 %v10746_v2, %v4713_v47  ;;  %v9051_v55 = vld [vmem:[#allocation8 + $0x78] sm:$0xff]  ;;  %v10816_v47 = vld [vmem:[#allocation8 + $0x360] sm:$0xff] }
0x1117   :  { %v4680_v62 = vpop.f32.mrf.mxu0 }
0x1118   :  { %v4687_v28 = vadd.f32 1e-05, %v4685_v41  ;;  %v4686_v21 = vsub.f32 %v4680_v62, %v4684_v34  ;;  %v4719_v31 = vsub.f32 %v10751_v32, %v4717_v14  ;;  %v10804_v41 = vld [vmem:[#allocation8 + $0x378] sm:$0xff]  ;;  %v9053_v62 = vld [vmem:[#allocation8 + $0xf0] sm:$0xff] }
0x1119   :  { %v9063_v14 = vld [vmem:[#allocation8 + $0x58] sm:$0xff] }
0x111a   :  { %v4688_v23 = vadd.f32 1e-05, %v4686_v21  ;;  %8556 = vrsqrt.f32 %v4687_v28  ;;  %v9054_v28 = vld [vmem:[#allocation8 + $0x70] sm:$0xff]  ;;  %v9055_v21 = vld [vmem:[#allocation8 + $0xe8] sm:$0xff] }
0x111c   :  { %8558 = vrsqrt.f32 %v4688_v23  ;;  %v10808_v23 = vld [vmem:[#allocation8 + $0x370] sm:$0xff] }
0x1127   :  { %v8557_v0 = vpop.eup %8556 }
0x1129   :  { %v8559_v37 = vpop.eup %8558 }
0x112a   :  { %v4693_v6 = vcombine.low %v8557_v0, %v8559_v37  ;;  %v9057_v0 = vld [vmem:[#allocation8 + $0x68] sm:$0xff]  ;;  %v9058_v37 = vld [vmem:[#allocation8 + $0xe0] sm:$0xff] }
0x112c   :  { %v4700_v27 = vrot.slane %v4693_v6, %v11370_v20  ;;  %v10812_v6 = vld [vmem:[#allocation8 + $0x368] sm:$0xff] }
0x112e   :  { %v4707_v1 = vrot.slane %v4700_v27, %v11370_v20  ;;  %v9060_v20 = vld [vmem:[#allocation8 + $0x60] sm:$0xff]  ;;  %v9061_v27 = vld [vmem:[#allocation8 + $0xd8] sm:$0xff] }
0x1130   :  { %v4709_v3 = vmul.f32 %v9050_v36, %v4707_v1  ;;  %v9064_v1 = vld [vmem:[#allocation8 + $0xd0] sm:$0xff]  ;;  %v10820_v36 = vld [vmem:[#allocation8 + $0x358] sm:$0xff] }
0x1132   :  { %v4724_v9 = vrot.slane %v4709_v3, %v11371_v57  ;;  %v4728_v30 = vrot.slane %v4709_v3, %v11372_v61  ;;  %v9066_v3 = vld [vmem:[#allocation8 + $0x50] sm:$0xff]  ;;  %v9070_v61 = vld [vmem:[#allocation8 + $0xc0] sm:$0xff] }
0x1134   :  { %v4732_v35 = vmul.f32 %v4728_v30, %v4719_v31  ;;  %v4731_v38 = vmul.f32 %v4724_v9, %v4718_v53  ;;  %v9067_v53 = vld [vmem:[#allocation8 + $0xc8] sm:$0xff]  ;;  %v10824_v31 = vld [vmem:[#allocation8 + $0x350] sm:$0xff] }
0x1135   :  { %v9069_v9 = vld [vmem:[#allocation8 + $0x48] sm:$0xff] }
0x1136   :  { %v4734_v42 = vadd.f32 %v4732_v35, %v11373_v39  ;;  %v4733_v51 = vadd.f32 %v4731_v38, %v11374_v45  ;;  %v10828_v30 = vld [vmem:[#allocation8 + $0x348] sm:$0xff]  ;;  %v9072_v35 = vld [vmem:[#allocation8 + $0x40] sm:$0xff]  ;;  %v9073_v38 = vld [vmem:[#allocation8 + $0xb8] sm:$0xff] }
0x1137   :  { %v10832_v39 = vld [vmem:[#allocation8 + $0x340] sm:$0xff]  ;;  %v9076_v45 = vld [vmem:[#allocation8 + $0xb0] sm:$0xff] }
0x1138   :  { %vm4736_vm1 = vcmp.ge.f32.partialorder %v4734_v42, 0.0  ;;  %v4738_v60 = vmul.f32 0.01, %v4734_v42  ;;  %vm4735_vm2 = vcmp.ge.f32.partialorder %v4733_v51, 0.0  ;;  %v4737_v5 = vmul.f32 0.01, %v4733_v51 }
0x113a   :  { %v4740_v7 = vsel %vm4736_vm1, %v4734_v42, %v4738_v60  ;;  %v4739_v63 = vsel %vm4735_vm2, %v4733_v51, %v4737_v5  ;;  %v9075_v42 = vld [vmem:[#allocation8 + $0x38] sm:$0xff]  ;;  %v9078_v60 = vld [vmem:[#allocation8 + $0x30] sm:$0xff]  ;;  %v9079_v5 = vld [vmem:[#allocation8 + $0xa8] sm:$0xff] }
0x113b   :  { %v4744_v50 = vrot.slane %v4740_v7, 7  ;;  %v4743_v2 = vrot.slane %v4739_v63, 7  ;;  %v10836_v51 = vld [vmem:[#allocation8 + $0x338] sm:$0xff]  ;;  %v10840_v7 = vld [vmem:[#allocation8 + $0x330] sm:$0xff]  ;;  %v9081_v63 = vld [vmem:[#allocation8 + $0x28] sm:$0xff] }
0x113d   :  { %v4748_v32 = vsel %vm195_vm0, 0.0, %v4744_v50  ;;  %v4750_v10 = vsel %vm195_vm0, %v4744_v50, 0.0  ;;  %v10772_v11 = vsel %vm195_vm0, 0.0, %v4743_v2  ;;  %v4749_v58 = vsel %vm195_vm0, %v4743_v2, 0.0  ;;  %v9082_v50 = vld [vmem:[#allocation8 + $0xa0] sm:$0xff]  ;;  %v9083_v2 = vld [vmem:[#allocation8 + $0x328] sm:$0xff] }
0x113e   :  { %v4754_v15 = vrot.slane %v4748_v32, 1  ;;  %v4758_v17 = vrot.slane %v4748_v32, 2  ;;  %v4762_v56 = vrot.slane %v4748_v32, 3  ;;  %v4772_v19 = vrot.slane %v4748_v32, 4 }
0x113f   :  { %v4924_v22 = vrot.slane %v4750_v10, 5  ;;  %v4753_v54 = vrot.slane %v10772_v11, 1  ;;  %v10777_v24 = vrot.slane %v10772_v11, 2  ;;  %v10780_v26 = vrot.slane %v10772_v11, 3  ;;  %v9085_v10 = vld [vmem:[#allocation8 + $0x98] sm:$0xff] }
0x1140   :  { %v4776_v29 = vsel %vm195_vm0, %v4754_v15, %v4758_v17  ;;  %v4928_v48 = vsel %vm195_vm0, %v4758_v17, %v4762_v56  ;;  %v4771_v46 = vrot.slane %v10772_v11, 4  ;;  %v4923_v13 = vrot.slane %v4749_v58, 5  ;;  %v9086_v58 = vld [vmem:[#allocation8 + $0x320] sm:$0xff] }
0x1141   :  { %v4778_v33 = vsel %vm1626_vm8, %v4776_v29, %v4762_v56  ;;  %v4930_v49 = vsel %vm1626_vm8, %v4928_v48, %v4772_v19  ;;  %v4775_v40 = vsel %vm195_vm0, %v4753_v54, %v10777_v24  ;;  %v4927_v44 = vsel %vm195_vm0, %v10777_v24, %v10780_v26  ;;  %v9091_v29 = vld [vmem:[#allocation8 + $0x88] sm:$0xff] }
0x1142   :  { %v4780_v52 = vsel %vm1629_vm9, %v4778_v33, %v4772_v19  ;;  %v4932_v4 = vsel %vm1629_vm9, %v4930_v49, %v4924_v22  ;;  %v4777_v43 = vsel %vm1626_vm8, %v4775_v40, %v10780_v26  ;;  %v4929_v12 = vsel %vm1626_vm8, %v4927_v44, %v4771_v46  ;;  %v9089_v19 = vld [vmem:[#allocation8 + $0x318] sm:$0xff]  ;;  %v9090_v22 = vld [vmem:[#allocation8 + $0x10] sm:$0xff]  ;;  %v9096_v33 = vld [vmem:[#allocation8] sm:$0xff] }
0x1143   :  { %4845 = vmatprep.mubr.f32.mxu1 %v4780_v52  ;;  %4997 = vmatprep.mubr.f32.mxu0 %v4932_v4  ;;  %v4779_v16 = vsel %vm1629_vm9, %v4777_v43, %v4771_v46  ;;  %v4931_v8 = vsel %vm1629_vm9, %v4929_v12, %v4923_v13  ;;  %v4766_v25 = vsel %vm195_vm0, %v4748_v32, %v4754_v15  ;;  %v9084_v32 = vld [vmem:[#allocation8 + $0x20] sm:$0xff]  ;;  %v9087_v15 = vld [vmem:[#allocation8 + $0x18] sm:$0xff]  ;;  %v9092_v46 = vld [vmem:[#allocation8 + $0x310] sm:$0xff] }
0x1144   :  { %4846 = vmatmul.mubr.f32.vlgmr.msra.gmra.mxu1 %v4779_v16  ;;  %4998 = vmatmul.mubr.f32.vlgmr.msra.gmra.mxu0 %v4931_v8  ;;  %v4768_v59 = vsel %vm1626_vm8, %v4766_v25, %v4758_v17  ;;  %v4765_v17 = vsel %vm195_vm0, %v10772_v11, %v4753_v54  ;;  %v9093_v13 = vld [vmem:[#allocation8 + $0x8] sm:$0xff]  ;;  %v9094_v11 = vld [vmem:[#allocation8 + $0x80] sm:$0xff] }
0x1145   :  { %7147 = vmatpush3.msra.mxu1 %v9051_v55  ;;  %v4770_v34 = vsel %vm1629_vm9, %v4768_v59, %v4762_v56  ;;  %8029 = vmatpush3.msra.mxu0 %v10804_v41  ;;  %v9088_v56 = vld [vmem:[#allocation8 + $0x90] sm:$0xff]  ;;  %v4767_v48 = vsel %vm1626_vm8, %v4765_v17, %v10777_v24  ;;  %v9095_v54 = vld [vmem:[#allocation8 + $0x308] sm:$0xff]  ;;  %v9097_v24 = vld [vmem:[#allocation8 + $0x300] sm:$0xff] }
0x1146   :  { %7148 = vmatprep.subr.mxu1 %v9053_v62  ;;  %4915 = vmatprep.mubr.f32.mxu1 %v4770_v34  ;;  %v4769_v49 = vsel %vm1629_vm9, %v4767_v48, %v10780_v26  ;;  %v9121_v17 = vld [vmem:[#allocation10 + $0x20] sm:$0xff]  ;;  %v9126_v48 = vld [vmem:[#allocation10 + $0x88] sm:$0xff] }
0x1147   :  { %7149 = vmatpush3.msra.mxu1 %v9054_v28  ;;  %8030 = vmatprep.subr.mxu0 %v11369_v18 }
0x1148   :  { %7150 = vmatprep.subr.mxu1 %v9055_v21  ;;  %8031 = vmatpush3.msra.mxu0 %v10808_v23 }
0x1149   :  { %7151 = vmatpush3.msra.mxu1 %v9057_v0  ;;  %8032 = vmatprep.subr.mxu0 %v11369_v18 }
0x114a   :  { %7152 = vmatprep.subr.mxu1 %v9058_v37  ;;  %8033 = vmatpush3.msra.mxu0 %v10812_v6 }
0x114b   :  { %7153 = vmatpush3.msra.mxu1 %v9060_v20  ;;  %8034 = vmatprep.subr.mxu0 %v11369_v18 }
0x114c   :  { %7154 = vmatprep.subr.mxu1 %v9061_v27  ;;  %8035 = vmatpush3.msra.mxu0 %v10816_v47 }
0x114d   :  { %7155 = vmatpush3.msra.mxu1 %v9063_v14  ;;  %8036 = vmatprep.subr.mxu0 %v11369_v18 }
0x114e   :  { %7156 = vmatprep.subr.mxu1 %v9064_v1  ;;  %8037 = vmatpush3.msra.mxu0 %v10820_v36 }
0x114f   :  { %7157 = vmatpush3.msra.mxu1 %v9066_v3  ;;  %8038 = vmatprep.subr.mxu0 %v11369_v18  ;;  %v9099_v3 = vld [vmem:[#allocation10 + $0x78] sm:$0xff] }
0x1150   :  { %7158 = vmatprep.subr.mxu1 %v9067_v53  ;;  %8039 = vmatpush3.msra.mxu0 %v10824_v31  ;;  %v9100_v53 = vld [vmem:[#allocation10 + $0xf0] sm:$0xff] }
0x1151   :  { %7159 = vmatpush3.msra.mxu1 %v9069_v9  ;;  %8040 = vmatprep.subr.mxu0 %v11369_v18  ;;  %v9102_v9 = vld [vmem:[#allocation10 + $0xe8] sm:$0xff] }
0x1152   :  { %7160 = vmatprep.subr.mxu1 %v9070_v61  ;;  %8041 = vmatpush3.msra.mxu0 %v10828_v30  ;;  %v9103_v61 = vld [vmem:[#allocation10 + $0x68] sm:$0xff] }
0x1153   :  { %7161 = vmatpush3.msra.mxu1 %v9072_v35  ;;  %8042 = vmatprep.subr.mxu0 %v11369_v18  ;;  %v9105_v35 = vld [vmem:[#allocation10 + $0x60] sm:$0xff] }
0x1154   :  { %7162 = vmatprep.subr.mxu1 %v9073_v38  ;;  %8043 = vmatpush3.msra.mxu0 %v10832_v39  ;;  %v9106_v38 = vld [vmem:[#allocation10 + $0xd8] sm:$0xff] }
0x1155   :  { %7163 = vmatpush3.msra.mxu1 %v9075_v42  ;;  %8044 = vmatprep.subr.mxu0 %v11369_v18  ;;  %v9108_v42 = vld [vmem:[#allocation10 + $0xd0] sm:$0xff] }
0x1156   :  { %7164 = vmatprep.subr.mxu1 %v9076_v45  ;;  %8045 = vmatpush3.msra.mxu0 %v10836_v51  ;;  %v9109_v45 = vld [vmem:[#allocation10 + $0x50] sm:$0xff] }
0x1157   :  { %7165 = vmatpush3.msra.mxu1 %v9078_v60  ;;  %8046 = vmatprep.subr.mxu0 %v11369_v18  ;;  %v9111_v60 = vld [vmem:[#allocation10 + $0x48] sm:$0xff] }
0x1158   :  { %7166 = vmatprep.subr.mxu1 %v9079_v5  ;;  %8047 = vmatpush3.msra.mxu0 %v10840_v7  ;;  %v9112_v5 = vld [vmem:[#allocation10 + $0xc0] sm:$0xff] }
0x1159   :  { %7167 = vmatpush3.msra.mxu1 %v9081_v63  ;;  %8048 = vmatprep.subr.mxu0 %v11369_v18  ;;  %v9114_v63 = vld [vmem:[#allocation10 + $0xb8] sm:$0xff] }
0x115a   :  { %7168 = vmatprep.subr.mxu1 %v9082_v50  ;;  %8049 = vmatpush3.msra.mxu0 %v9083_v2  ;;  %v9115_v50 = vld [vmem:[#allocation10 + $0x38] sm:$0xff] }
0x115b   :  { %7169 = vmatpush3.msra.mxu1 %v9084_v32  ;;  %8050 = vmatprep.subr.mxu0 %v11369_v18  ;;  %v9117_v32 = vld [vmem:[#allocation10 + $0x30] sm:$0xff] }
0x115c   :  { %7170 = vmatprep.subr.mxu1 %v9085_v10  ;;  %8051 = vmatpush3.msra.mxu0 %v9086_v58  ;;  %v9118_v10 = vld [vmem:[#allocation10 + $0xa8] sm:$0xff] }
0x115d   :  { %7171 = vmatpush3.msra.mxu1 %v9087_v15  ;;  %8052 = vmatprep.subr.mxu0 %v11369_v18  ;;  %v9120_v15 = vld [vmem:[#allocation10 + $0xa0] sm:$0xff] }
0x115e   :  { %7172 = vmatprep.subr.mxu1 %v9088_v56  ;;  %8053 = vmatpush3.msra.mxu0 %v9089_v19  ;;  %v9122_v56 = vld [vmem:[#allocation10 + $0x98] sm:$0xff] }
0x115f   :  { %7173 = vmatpush3.msra.mxu1 %v9090_v22  ;;  %8054 = vmatprep.subr.mxu0 %v11369_v18  ;;  %v9124_v22 = vld [vmem:[#allocation10 + $0x90] sm:$0xff] }
0x1160   :  { %7174 = vmatprep.subr.mxu1 %v9091_v29  ;;  %8055 = vmatpush3.msra.mxu0 %v9092_v46  ;;  %v9125_v29 = vld [vmem:[#allocation10 + $0x10] sm:$0xff] }
0x1161   :  { %7175 = vmatpush3.msra.mxu1 %v9093_v13  ;;  %8056 = vmatprep.subr.mxu0 %v11369_v18  ;;  %v9128_v13 = vld [vmem:[#allocation10 + $0x80] sm:$0xff] }
0x1162   :  { %7176 = vmatprep.subr.mxu1 %v9094_v11  ;;  %8057 = vmatpush3.msra.mxu0 %v9095_v54  ;;  %v9129_v11 = vld [vmem:[#allocation10] sm:$0xff] }
0x1163   :  { %7177 = vmatpush3.msra.mxu1 %v9096_v33  ;;  %8058 = vmatprep.subr.mxu0 %v11369_v18 }
0x1164   :  { %4916 = vmatmul.mubr.f32.vlgmr.msra.gmra.mxu1 %v4769_v49  ;;  %7993 = vmatprep.subr.mxu1 %v11369_v18 }
0x1165   :  { %7994 = vmatpush3.msra.mxu1 %v10804_v41  ;;  %8025 = vmatprep.mubr.msk.f32.mxu1 %vm9525_vm10, %v11369_v18 }
0x1166   :  { %7995 = vmatprep.subr.mxu1 %v11369_v18  ;;  %8059 = vmatpush3.msra.mxu0 %v9097_v24 }
0x1167   :  { %7996 = vmatpush3.msra.mxu1 %v10808_v23  ;;  %8060 = vmatprep.mubr.msk.f32.mxu0 %vm9525_vm10, %v11369_v18 }
0x1168   :  { %7997 = vmatprep.subr.mxu1 %v11369_v18  ;;  %8098 = vmatprep.subr.mxu0 %v11369_v18 }
0x1169   :  { %7998 = vmatpush3.msra.mxu1 %v10812_v6 }
0x116a   :  { %7999 = vmatprep.subr.mxu1 %v11369_v18 }
0x116b   :  { %8000 = vmatpush3.msra.mxu1 %v10816_v47 }
0x116c   :  { %8001 = vmatprep.subr.mxu1 %v11369_v18 }
0x116d   :  { %8002 = vmatpush3.msra.mxu1 %v10820_v36  ;;  %v9098_v36 = vld [vmem:[#allocation10 + $0xf8] sm:$0xff] }
0x116e   :  { %8003 = vmatprep.subr.mxu1 %v11369_v18 }
0x116f   :  { %8004 = vmatpush3.msra.mxu1 %v10824_v31  ;;  %v9101_v31 = vld [vmem:[#allocation10 + $0x70] sm:$0xff] }
0x1170   :  { %8005 = vmatprep.subr.mxu1 %v11369_v18 }
0x1171   :  { %8006 = vmatpush3.msra.mxu1 %v10828_v30  ;;  %v9104_v30 = vld [vmem:[#allocation10 + $0xe0] sm:$0xff] }
0x1172   :  { %8007 = vmatprep.subr.mxu1 %v11369_v18 }
0x1173   :  { %8008 = vmatpush3.msra.mxu1 %v10832_v39  ;;  %v9107_v39 = vld [vmem:[#allocation10 + $0x58] sm:$0xff] }
0x1174   :  { %8009 = vmatprep.subr.mxu1 %v11369_v18 }
0x1175   :  { %8010 = vmatpush3.msra.mxu1 %v10836_v51  ;;  %v9110_v51 = vld [vmem:[#allocation10 + $0xc8] sm:$0xff] }
0x1176   :  { %8011 = vmatprep.subr.mxu1 %v11369_v18 }
0x1177   :  { %8012 = vmatpush3.msra.mxu1 %v10840_v7  ;;  %v9113_v7 = vld [vmem:[#allocation10 + $0x40] sm:$0xff] }
0x1178   :  { %8013 = vmatprep.subr.mxu1 %v11369_v18 }
0x1179   :  { %8014 = vmatpush3.msra.mxu1 %v9083_v2  ;;  %v9116_v2 = vld [vmem:[#allocation10 + $0xb0] sm:$0xff] }
0x117a   :  { %8015 = vmatprep.subr.mxu1 %v11369_v18 }
0x117b   :  { %8016 = vmatpush3.msra.mxu1 %v9086_v58  ;;  %v9119_v58 = vld [vmem:[#allocation10 + $0x28] sm:$0xff] }
0x117c   :  { %8017 = vmatprep.subr.mxu1 %v11369_v18 }
0x117d   :  { %8018 = vmatpush3.msra.mxu1 %v9089_v19  ;;  %v9123_v19 = vld [vmem:[#allocation10 + $0x18] sm:$0xff] }
0x117e   :  { %8019 = vmatprep.subr.mxu1 %v11369_v18 }
0x117f   :  { %8020 = vmatpush3.msra.mxu1 %v9092_v46  ;;  %v9127_v46 = vld [vmem:[#allocation10 + $0x8] sm:$0xff] }
0x1180   :  { %8021 = vmatprep.subr.mxu1 %v11369_v18 }
0x1181   :  { %8022 = vmatpush3.msra.mxu1 %v9095_v54 }
0x1182   :  { %8023 = vmatprep.subr.mxu1 %v11369_v18 }
0x1183   :  { %8024 = vmatpush3.msra.mxu1 %v9097_v24 }
0x1184   :  { %8063 = vmatprep.subr.mxu1 %v11369_v18 }
0x1204   :  { %v7143_v26 = vpop.f32.mrf.mxu1  ;;  %v7213_v40 = vpop.f32.mrf.mxu0 }
0x1206   :  { %v7144_v44 = vpop.f32.mrf.mxu1  ;;  %v7214_v4 = vpop.f32.mrf.mxu0 }
0x1207   :  { %v7145_v12 = vadd.f32 %v7144_v44, %v7143_v26  ;;  %v7215_v8 = vadd.f32 %v7214_v4, %v7213_v40 }
0x1224   :  { %v7178_v52 = vpop.f32.mrf.mxu1 }
0x1226   :  { %v7179_v43 = vpop.f32.mrf.mxu1 }
0x1227   :  { %v7180_v16 = vadd.f32 %v7179_v43, %v7178_v52  ;;  %v9130_v43 = vld [vmem:[#allocation8 + $0x380] sm:$0x1] }
0x1229   :  { %v4918_v25 = vadd.f32 %v7180_v16, %v7145_v12 }
0x122b   :  { %v10889_v59 = vadd.f32 %v7215_v8, %v4918_v25 }
0x122d   :  { %v5004_v55 = vsel %vm1947_vm11, %v10889_v59, 0.0  ;;  %v5011_v34 = vmul.f32 %v10889_v59, %v10889_v59 }
0x122e   :  { %v5005_v41 = vrot.slane %v5004_v55, 4 }
0x122f   :  { %v5012_v62 = vsel %vm1947_vm11, %v5011_v34, 0.0 }
0x1230   :  { %v5006_v28 = vadd.f32 %v5005_v41, %v5004_v55  ;;  %v5013_v21 = vrot.slane %v5012_v62, 4  ;;  %v9131_v55 = vld [vmem:[#allocation8 + $0x381] ss:$0 sm:$0xff] }
0x1232   :  { %v5007_v23 = vrot.slane %v5006_v28, 2  ;;  %v5014_v0 = vadd.f32 %v5013_v21, %v5012_v62 }
0x1234   :  { %v5008_v37 = vadd.f32 %v5007_v23, %v5006_v28  ;;  %v5015_v6 = vrot.slane %v5014_v0, 2 }
0x1236   :  { %v5009_v20 = vrot.slane %v5008_v37, 1  ;;  %v5016_v27 = vadd.f32 %v5015_v6, %v5014_v0  ;;  %v9134_v6 = vld [vmem:[#allocation10 + $0x178] sm:$0xff] }
0x1238   :  { %v5010_v47 = vadd.f32 %v5009_v20, %v5008_v37  ;;  %v5017_v14 = vrot.slane %v5016_v27, 1  ;;  %v10941_v37 = vld [vmem:[#allocation10 + $0x1f8] sm:$0xff]  ;;  %v9135_v20 = vld [vmem:[#allocation10 + $0x170] sm:$0xff] }
0x123a   :  { %8026 = vmatmul.mubr.f32.vlgmr.msra.gmra.mxu1 %v5010_v47  ;;  %v5018_v1 = vadd.f32 %v5017_v14, %v5016_v27  ;;  %v10954_v27 = vld [vmem:[#allocation10 + $0x1e8] sm:$0xff]  ;;  %v10959_v14 = vld [vmem:[#allocation10 + $0x1e0] sm:$0xff] }
0x123b   :  { %8064 = vmatpush3.msra.mxu1 %v9098_v36  ;;  %8095 = vmatprep.mubr.msk.f32.mxu1 %vm9525_vm10, %v11369_v18  ;;  %v9137_v47 = vld [vmem:[#allocation10 + $0x168] sm:$0xff]  ;;  %v10964_v36 = vld [vmem:[#allocation10 + $0x1d8] sm:$0xff] }
0x123c   :  { %8061 = vmatmul.mubr.f32.vlgmr.msra.gmra.mxu0 %v5018_v1  ;;  %8065 = vmatprep.subr.mxu1 %v11369_v18  ;;  %v9139_v1 = vld [vmem:[#allocation10 + $0x160] sm:$0xff] }
0x123d   :  { %8099 = vmatpush3.msra.mxu0 %v9099_v3  ;;  %8066 = vmatpush3.msra.mxu1 %v9100_v53  ;;  %v9141_v3 = vld [vmem:[#allocation10 + $0x158] sm:$0xff]  ;;  %v10969_v53 = vld [vmem:[#allocation10 + $0x1d0] sm:$0xff] }
0x123e   :  { %8100 = vmatprep.subr.mxu0 %v11369_v18  ;;  %8067 = vmatprep.subr.mxu1 %v11369_v18 }
0x123f   :  { %8101 = vmatpush3.msra.mxu0 %v9101_v31  ;;  %8068 = vmatpush3.msra.mxu1 %v9102_v9  ;;  %v9143_v31 = vld [vmem:[#allocation10 + $0x150] sm:$0xff]  ;;  %v10974_v9 = vld [vmem:[#allocation10 + $0x1c8] sm:$0xff] }
0x1240   :  { %8102 = vmatprep.subr.mxu0 %v11369_v18  ;;  %8069 = vmatprep.subr.mxu1 %v11369_v18 }
0x1241   :  { %8103 = vmatpush3.msra.mxu0 %v9103_v61  ;;  %8070 = vmatpush3.msra.mxu1 %v9104_v30  ;;  %v9145_v61 = vld [vmem:[#allocation10 + $0x148] sm:$0xff]  ;;  %v10979_v30 = vld [vmem:[#allocation10 + $0x1c0] sm:$0xff] }
0x1242   :  { %8104 = vmatprep.subr.mxu0 %v11369_v18  ;;  %8071 = vmatprep.subr.mxu1 %v11369_v18 }
0x1243   :  { %8105 = vmatpush3.msra.mxu0 %v9105_v35  ;;  %8072 = vmatpush3.msra.mxu1 %v9106_v38  ;;  %v9147_v35 = vld [vmem:[#allocation10 + $0x140] sm:$0xff]  ;;  %v10984_v38 = vld [vmem:[#allocation10 + $0x1b8] sm:$0xff] }
0x1244   :  { %8106 = vmatprep.subr.mxu0 %v11369_v18  ;;  %8073 = vmatprep.subr.mxu1 %v11369_v18 }
0x1245   :  { %8107 = vmatpush3.msra.mxu0 %v9107_v39  ;;  %8074 = vmatpush3.msra.mxu1 %v9108_v42  ;;  %v9149_v39 = vld [vmem:[#allocation10 + $0x138] sm:$0xff]  ;;  %v10989_v42 = vld [vmem:[#allocation10 + $0x1b0] sm:$0xff] }
0x1246   :  { %8108 = vmatprep.subr.mxu0 %v11369_v18  ;;  %8075 = vmatprep.subr.mxu1 %v11369_v18 }
0x1247   :  { %8109 = vmatpush3.msra.mxu0 %v9109_v45  ;;  %8076 = vmatpush3.msra.mxu1 %v9110_v51  ;;  %v9151_v45 = vld [vmem:[#allocation10 + $0x130] sm:$0xff]  ;;  %v9152_v51 = vld [vmem:[#allocation10 + $0x1a8] sm:$0xff] }
0x1248   :  { %8110 = vmatprep.subr.mxu0 %v11369_v18  ;;  %8077 = vmatprep.subr.mxu1 %v11369_v18 }
0x1249   :  { %8111 = vmatpush3.msra.mxu0 %v9111_v60  ;;  %8078 = vmatpush3.msra.mxu1 %v9112_v5  ;;  %v9153_v60 = vld [vmem:[#allocation10 + $0x128] sm:$0xff]  ;;  %v9154_v5 = vld [vmem:[#allocation10 + $0x1a0] sm:$0xff] }
0x124a   :  { %8112 = vmatprep.subr.mxu0 %v11369_v18  ;;  %8079 = vmatprep.subr.mxu1 %v11369_v18 }
0x124b   :  { %8113 = vmatpush3.msra.mxu0 %v9113_v7  ;;  %8080 = vmatpush3.msra.mxu1 %v9114_v63  ;;  %v9155_v7 = vld [vmem:[#allocation10 + $0x120] sm:$0xff]  ;;  %v9156_v63 = vld [vmem:[#allocation10 + $0x198] sm:$0xff] }
0x124c   :  { %8114 = vmatprep.subr.mxu0 %v11369_v18  ;;  %8081 = vmatprep.subr.mxu1 %v11369_v18 }
0x124d   :  { %8115 = vmatpush3.msra.mxu0 %v9115_v50  ;;  %8082 = vmatpush3.msra.mxu1 %v9116_v2  ;;  %v9157_v50 = vld [vmem:[#allocation10 + $0x118] sm:$0xff]  ;;  %v9158_v2 = vld [vmem:[#allocation10 + $0x190] sm:$0xff] }
0x124e   :  { %8116 = vmatprep.subr.mxu0 %v11369_v18  ;;  %8083 = vmatprep.subr.mxu1 %v11369_v18 }
0x124f   :  { %8117 = vmatpush3.msra.mxu0 %v9117_v32  ;;  %8084 = vmatpush3.msra.mxu1 %v9118_v10  ;;  %v9159_v32 = vld [vmem:[#allocation10 + $0x110] sm:$0xff]  ;;  %v9160_v10 = vld [vmem:[#allocation10 + $0x188] sm:$0xff] }
0x1250   :  { %8118 = vmatprep.subr.mxu0 %v11369_v18  ;;  %8085 = vmatprep.subr.mxu1 %v11369_v18 }
0x1251   :  { %8119 = vmatpush3.msra.mxu0 %v9119_v58  ;;  %8086 = vmatpush3.msra.mxu1 %v9120_v15  ;;  %v9161_v58 = vld [vmem:[#allocation10 + $0x108] sm:$0xff]  ;;  %v9162_v15 = vld [vmem:[#allocation10 + $0x180] sm:$0xff] }
0x1252   :  { %8120 = vmatprep.subr.mxu0 %v11369_v18  ;;  %8087 = vmatprep.subr.mxu1 %v11369_v18 }
0x1253   :  { %8121 = vmatpush3.msra.mxu0 %v9121_v17  ;;  %8088 = vmatpush3.msra.mxu1 %v9122_v56  ;;  %v9163_v56 = vld [vmem:[#allocation10 + $0x100] sm:$0xff] }
0x1254   :  { %8122 = vmatprep.subr.mxu0 %v11369_v18  ;;  %8089 = vmatprep.subr.mxu1 %v11369_v18 }
0x1255   :  { %8123 = vmatpush3.msra.mxu0 %v9123_v19  ;;  %8090 = vmatpush3.msra.mxu1 %v9124_v22 }
0x1256   :  { %8124 = vmatprep.subr.mxu0 %v11369_v18  ;;  %8091 = vmatprep.subr.mxu1 %v11369_v18 }
0x1257   :  { %8125 = vmatpush3.msra.mxu0 %v9125_v29  ;;  %8092 = vmatpush3.msra.mxu1 %v9126_v48 }
0x1258   :  { %8126 = vmatprep.subr.mxu0 %v11369_v18  ;;  %8130 = vmatprep.mubr.msk.f32.mxu0 %vm9525_vm10, %v11369_v18 }
0x1259   :  { %8127 = vmatpush3.msra.mxu0 %v9127_v46  ;;  %8093 = vmatprep.subr.mxu1 %v11369_v18 }
0x125a   :  { %8128 = vmatprep.subr.mxu0 %v11369_v18  ;;  %8094 = vmatpush3.msra.mxu1 %v9128_v13 }
0x125b   :  { %8129 = vmatpush3.msra.mxu0 %v9129_v11  ;;  %8133 = vmatprep.subr.mxu1 %v11369_v18 }
0x125c   :  { %8168 = vmatprep.subr.mxu0 %v11369_v18 }
0x12fa   :  { %v5085_v54 = vpop.f32.mrf.mxu1 }
0x12fb   :  { %v5159_v33 = vmul.f32 %v5085_v54, %v5085_v54  ;;  %v5167_v52 = vrot.slane %v5085_v54, %v11371_v57 }
0x12fc   :  { %v8027_v49 = vpop.f32.mrf.mxu1  ;;  %v5155_v24 = vpop.f32.mrf.mxu0 }
0x12fd   :  { %v5160_v26 = vsub.f32 %v5155_v24, %v5159_v33  ;;  %v5168_v16 = vsub.f32 %v10889_v59, %v5167_v52  ;;  %v10947_v59 = vld [vmem:[#allocation10 + $0x1f0] sm:$0xff] }
0x12fe   :  { %v8062_v40 = vpop.f32.mrf.mxu0 }
0x12ff   :  { %v5161_v44 = vadd.f32 1e-05, %v5160_v26 }
0x1301   :  { %8560 = vrsqrt.f32 %v5161_v44 }
0x130e   :  { %v8561_v4 = vpop.eup %8560 }
0x130f   :  { %v5163_v12 = vmul.f32 %v9130_v43, %v8561_v4 }
0x1311   :  { %v5172_v8 = vrot.slane %v5163_v12, %v11371_v57 }
0x1313   :  { %v5173_v25 = vmul.f32 %v5172_v8, %v5168_v16 }
0x1315   :  { %v5174_v34 = vadd.f32 %v9131_v55, %v5173_v25 }
0x1317   :  { %vm5175_vm8 = vcmp.ge.f32.partialorder %v5174_v34, 0.0  ;;  %v5176_v41 = vmul.f32 0.01, %v5174_v34 }
0x1319   :  { %v5177_v62 = vsel %vm5175_vm8, %v5174_v34, %v5176_v41  ;;  %v9164_v41 = vld [vmem:[#allocation11 + $0xf8] sm:$0xff] }
0x131a   :  { %v5179_v28 = vrot.slane %v5177_v62, 7  ;;  %v9165_v62 = vld [vmem:[#allocation11 + $0x78] sm:$0xff] }
0x131c   :  { %v5181_v21 = vsel %vm195_vm0, 0.0, %v5179_v28  ;;  %v9166_v28 = vld [vmem:[#allocation11 + $0xf0] sm:$0xff] }
0x131d   :  { %v10937_v23 = vsel %vm2130_vm13, %v5181_v21, 0.0  ;;  %8131 = vmatmul.mubr.msk.f32.vlgmr.msra.gmra.mxu0 %vm2130_vm13, %v5181_v21  ;;  %v9167_v21 = vld [vmem:[#allocation11 + $0x70] sm:$0xff] }
0x131e   :  { %v5184_v0 = vrot.slane %v10937_v23, 1  ;;  %8169 = vmatpush3.msra.mxu0 %v10941_v37  ;;  %8200 = vmatprep.mubr.msk.f32.mxu0 %vm9525_vm10, %v11369_v18  ;;  %v5326_v17 = vrot.slane %v10937_v23, 2  ;;  %v9168_v23 = vld [vmem:[#allocation11 + $0xe8] sm:$0xff] }
0x131f   :  { %8170 = vmatprep.subr.mxu0 %v11369_v18 }
0x1320   :  { %8096 = vmatmul.mubr.f32.vlgmr.msra.gmra.mxu1 %v5184_v0  ;;  %8171 = vmatpush3.msra.mxu0 %v10947_v59  ;;  %v9169_v0 = vld [vmem:[#allocation11 + $0x68] sm:$0xff] }
0x1321   :  { %8134 = vmatpush3.msra.mxu1 %v9134_v6  ;;  %8165 = vmatprep.mubr.msk.f32.mxu1 %vm9525_vm10, %v11369_v18  ;;  %v9172_v6 = vld [vmem:[#allocation11 + $0xd8] sm:$0xff] }
0x1322   :  { %8135 = vmatprep.subr.mxu1 %v11369_v18  ;;  %8172 = vmatprep.subr.mxu0 %v11369_v18 }
0x1323   :  { %8136 = vmatpush3.msra.mxu1 %v9135_v20  ;;  %8173 = vmatpush3.msra.mxu0 %v10954_v27  ;;  %v9173_v20 = vld [vmem:[#allocation11 + $0x58] sm:$0xff] }
0x1324   :  { %8137 = vmatprep.subr.mxu1 %v11369_v18  ;;  %8174 = vmatprep.subr.mxu0 %v11369_v18 }
0x1325   :  { %8138 = vmatpush3.msra.mxu1 %v9137_v47  ;;  %8175 = vmatpush3.msra.mxu0 %v10959_v14  ;;  %v9175_v47 = vld [vmem:[#allocation11 + $0x50] sm:$0xff] }
0x1326   :  { %8139 = vmatprep.subr.mxu1 %v11369_v18  ;;  %8176 = vmatprep.subr.mxu0 %v11369_v18 }
0x1327   :  { %8140 = vmatpush3.msra.mxu1 %v9139_v1  ;;  %8177 = vmatpush3.msra.mxu0 %v10964_v36  ;;  %v9177_v1 = vld [vmem:[#allocation11 + $0x48] sm:$0xff] }
0x1328   :  { %8141 = vmatprep.subr.mxu1 %v11369_v18  ;;  %8178 = vmatprep.subr.mxu0 %v11369_v18 }
0x1329   :  { %8142 = vmatpush3.msra.mxu1 %v9141_v3  ;;  %8179 = vmatpush3.msra.mxu0 %v10969_v53  ;;  %v9179_v3 = vld [vmem:[#allocation11 + $0x40] sm:$0xff] }
0x132a   :  { %8143 = vmatprep.subr.mxu1 %v11369_v18  ;;  %8180 = vmatprep.subr.mxu0 %v11369_v18 }
0x132b   :  { %8144 = vmatpush3.msra.mxu1 %v9143_v31  ;;  %8181 = vmatpush3.msra.mxu0 %v10974_v9  ;;  %v9181_v31 = vld [vmem:[#allocation11 + $0x38] sm:$0xff] }
0x132c   :  { %8145 = vmatprep.subr.mxu1 %v11369_v18  ;;  %8182 = vmatprep.subr.mxu0 %v11369_v18 }
0x132d   :  { %8146 = vmatpush3.msra.mxu1 %v9145_v61  ;;  %8183 = vmatpush3.msra.mxu0 %v10979_v30  ;;  %v9183_v61 = vld [vmem:[#allocation11 + $0x30] sm:$0xff] }
0x132e   :  { %8147 = vmatprep.subr.mxu1 %v11369_v18  ;;  %8184 = vmatprep.subr.mxu0 %v11369_v18 }
0x132f   :  { %8148 = vmatpush3.msra.mxu1 %v9147_v35  ;;  %8185 = vmatpush3.msra.mxu0 %v10984_v38  ;;  %v9185_v35 = vld [vmem:[#allocation11 + $0x28] sm:$0xff] }
0x1330   :  { %8149 = vmatprep.subr.mxu1 %v11369_v18  ;;  %8186 = vmatprep.subr.mxu0 %v11369_v18 }
0x1331   :  { %8150 = vmatpush3.msra.mxu1 %v9149_v39  ;;  %8187 = vmatpush3.msra.mxu0 %v10989_v42  ;;  %v9187_v39 = vld [vmem:[#allocation11 + $0x20] sm:$0xff] }
0x1332   :  { %8151 = vmatprep.subr.mxu1 %v11369_v18  ;;  %8188 = vmatprep.subr.mxu0 %v11369_v18 }
0x1333   :  { %8152 = vmatpush3.msra.mxu1 %v9151_v45  ;;  %8189 = vmatpush3.msra.mxu0 %v9152_v51  ;;  %v9189_v45 = vld [vmem:[#allocation11 + $0x18] sm:$0xff] }
0x1334   :  { %8153 = vmatprep.subr.mxu1 %v11369_v18  ;;  %8190 = vmatprep.subr.mxu0 %v11369_v18 }
0x1335   :  { %8154 = vmatpush3.msra.mxu1 %v9153_v60  ;;  %8191 = vmatpush3.msra.mxu0 %v9154_v5  ;;  %v9191_v60 = vld [vmem:[#allocation11 + $0x10] sm:$0xff] }
0x1336   :  { %8155 = vmatprep.subr.mxu1 %v11369_v18  ;;  %8192 = vmatprep.subr.mxu0 %v11369_v18 }
0x1337   :  { %8156 = vmatpush3.msra.mxu1 %v9155_v7  ;;  %8193 = vmatpush3.msra.mxu0 %v9156_v63  ;;  %v9193_v7 = vld [vmem:[#allocation11 + $0x8] sm:$0xff] }
0x1338   :  { %8157 = vmatprep.subr.mxu1 %v11369_v18  ;;  %8194 = vmatprep.subr.mxu0 %v11369_v18 }
0x1339   :  { %8158 = vmatpush3.msra.mxu1 %v9157_v50  ;;  %8195 = vmatpush3.msra.mxu0 %v9158_v2  ;;  %v9195_v50 = vld [vmem:[#allocation11] sm:$0xff] }
0x133a   :  { %8159 = vmatprep.subr.mxu1 %v11369_v18  ;;  %8196 = vmatprep.subr.mxu0 %v11369_v18 }
0x133b   :  { %8160 = vmatpush3.msra.mxu1 %v9159_v32  ;;  %8197 = vmatpush3.msra.mxu0 %v9160_v10 }
0x133c   :  { %8161 = vmatprep.subr.mxu1 %v11369_v18  ;;  %8198 = vmatprep.subr.mxu0 %v11369_v18 }
0x133d   :  { %8162 = vmatpush3.msra.mxu1 %v9161_v58  ;;  %8199 = vmatpush3.msra.mxu0 %v9162_v15 }
0x133e   :  { %8163 = vmatprep.subr.mxu1 %v11369_v18  ;;  %8238 = vmatprep.subr.mxu0 %v11369_v18 }
0x133f   :  { %8164 = vmatpush3.msra.mxu1 %v9163_v56 }
0x1340   :  { %8166 = vmatmul.mubr.f32.vlgmr.msra.gmra.mxu1 %v5326_v17  ;;  %8203 = vmatprep.subr.mxu1 %v11369_v18 }
0x1341   :  { %8204 = vmatpush3.msra.mxu1 %v10941_v37  ;;  %8235 = vmatprep.mubr.msk.f32.mxu1 %vm9525_vm10, %v11369_v18  ;;  %v9170_v37 = vld [vmem:[#allocation11 + $0xe0] sm:$0xff] }
0x1342   :  { %8205 = vmatprep.subr.mxu1 %v11369_v18 }
0x1343   :  { %8206 = vmatpush3.msra.mxu1 %v10947_v59  ;;  %v9171_v59 = vld [vmem:[#allocation11 + $0x60] sm:$0xff] }
0x1344   :  { %8207 = vmatprep.subr.mxu1 %v11369_v18 }
0x1345   :  { %8208 = vmatpush3.msra.mxu1 %v10954_v27  ;;  %v9174_v27 = vld [vmem:[#allocation11 + $0xd0] sm:$0xff] }
0x1346   :  { %8209 = vmatprep.subr.mxu1 %v11369_v18 }
0x1347   :  { %8210 = vmatpush3.msra.mxu1 %v10959_v14  ;;  %v9176_v14 = vld [vmem:[#allocation11 + $0xc8] sm:$0xff] }
0x1348   :  { %8211 = vmatprep.subr.mxu1 %v11369_v18 }
0x1349   :  { %8212 = vmatpush3.msra.mxu1 %v10964_v36  ;;  %v9178_v36 = vld [vmem:[#allocation11 + $0xc0] sm:$0xff] }
0x134a   :  { %8213 = vmatprep.subr.mxu1 %v11369_v18 }
0x134b   :  { %8214 = vmatpush3.msra.mxu1 %v10969_v53  ;;  %v9180_v53 = vld [vmem:[#allocation11 + $0xb8] sm:$0xff] }
0x134c   :  { %8215 = vmatprep.subr.mxu1 %v11369_v18 }
0x134d   :  { %8216 = vmatpush3.msra.mxu1 %v10974_v9  ;;  %v9182_v9 = vld [vmem:[#allocation11 + $0xb0] sm:$0xff] }
0x134e   :  { %8217 = vmatprep.subr.mxu1 %v11369_v18 }
0x134f   :  { %8218 = vmatpush3.msra.mxu1 %v10979_v30  ;;  %v9184_v30 = vld [vmem:[#allocation11 + $0xa8] sm:$0xff] }
0x1350   :  { %8219 = vmatprep.subr.mxu1 %v11369_v18 }
0x1351   :  { %8220 = vmatpush3.msra.mxu1 %v10984_v38  ;;  %v9186_v38 = vld [vmem:[#allocation11 + $0xa0] sm:$0xff] }
0x1352   :  { %8221 = vmatprep.subr.mxu1 %v11369_v18 }
0x1353   :  { %8222 = vmatpush3.msra.mxu1 %v10989_v42  ;;  %v9188_v42 = vld [vmem:[#allocation11 + $0x98] sm:$0xff] }
0x1354   :  { %8223 = vmatprep.subr.mxu1 %v11369_v18 }
0x1355   :  { %8224 = vmatpush3.msra.mxu1 %v9152_v51  ;;  %v9190_v51 = vld [vmem:[#allocation11 + $0x90] sm:$0xff] }
0x1356   :  { %8225 = vmatprep.subr.mxu1 %v11369_v18 }
0x1357   :  { %8226 = vmatpush3.msra.mxu1 %v9154_v5  ;;  %v9192_v5 = vld [vmem:[#allocation11 + $0x88] sm:$0xff] }
0x1358   :  { %8227 = vmatprep.subr.mxu1 %v11369_v18 }
0x1359   :  { %8228 = vmatpush3.msra.mxu1 %v9156_v63  ;;  %v9194_v63 = vld [vmem:[#allocation11 + $0x80] sm:$0xff] }
0x135a   :  { %8229 = vmatprep.subr.mxu1 %v11369_v18 }
0x135b   :  { %8230 = vmatpush3.msra.mxu1 %v9158_v2 }
0x135c   :  { %8231 = vmatprep.subr.mxu1 %v11369_v18 }
0x135d   :  { %8232 = vmatpush3.msra.mxu1 %v9160_v10 }
0x135e   :  { %8233 = vmatprep.subr.mxu1 %v11369_v18 }
0x135f   :  { %8234 = vmatpush3.msra.mxu1 %v9162_v15 }
0x1360   :  { %8273 = vmatprep.subr.mxu1 %v11369_v18 }
0x13dd   :  { %v5322_v19 = vpop.f32.mrf.mxu0 }
0x13df   :  { %v8132_v22 = vpop.f32.mrf.mxu0 }
0x13e0   :  { %v5252_v29 = vpop.f32.mrf.mxu1 }
0x13e1   :  { %v5323_v46 = vadd.f32 %v5322_v19, %v5252_v29  ;;  %v9196_v29 = vld [vmem:[#allocation10 + $0x200] sm:$0x1] }
0x13e2   :  { %v8097_v48 = vpop.f32.mrf.mxu1 }
0x1400   :  { %v5394_v13 = vpop.f32.mrf.mxu1 }
0x1401   :  { %v11036_v11 = vadd.f32 %v5394_v13, %v5323_v46 }
0x1402   :  { %v8167_v54 = vpop.f32.mrf.mxu1 }
0x1403   :  { %v5399_v33 = vsel %vm1947_vm11, %v11036_v11, 0.0  ;;  %v5406_v49 = vmul.f32 %v11036_v11, %v11036_v11 }
0x1404   :  { %v5400_v24 = vrot.slane %v5399_v33, 4 }
0x1405   :  { %v5407_v26 = vsel %vm1947_vm11, %v5406_v49, 0.0 }
0x1406   :  { %v5401_v40 = vadd.f32 %v5400_v24, %v5399_v33  ;;  %v5408_v44 = vrot.slane %v5407_v26, 4  ;;  %v9197_v33 = vld [vmem:[#allocation10 + $0x201] ss:$0 sm:$0xff] }
0x1408   :  { %v5402_v52 = vrot.slane %v5401_v40, 2  ;;  %v5409_v4 = vadd.f32 %v5408_v44, %v5407_v26 }
0x140a   :  { %v5403_v43 = vadd.f32 %v5402_v52, %v5401_v40  ;;  %v5410_v12 = vrot.slane %v5409_v4, 2 }
0x140c   :  { %v5404_v16 = vrot.slane %v5403_v43, 1  ;;  %v5411_v8 = vadd.f32 %v5410_v12, %v5409_v4 }
0x140e   :  { %v5405_v25 = vadd.f32 %v5404_v16, %v5403_v43  ;;  %v5412_v55 = vrot.slane %v5411_v8, 1  ;;  %v9198_v16 = vld [vmem:[#allocation11 + $0x178] sm:$0xff] }
0x1410   :  { %8201 = vmatmul.mubr.f32.vlgmr.msra.gmra.mxu0 %v5405_v25  ;;  %v5413_v34 = vadd.f32 %v5412_v55, %v5411_v8  ;;  %v11096_v8 = vld [vmem:[#allocation11 + $0x1b8] sm:$0xff]  ;;  %v9200_v25 = vld [vmem:[#allocation11 + $0x170] sm:$0xff] }
0x1411   :  { %8239 = vmatpush3.msra.mxu0 %v9164_v41  ;;  %8270 = vmatprep.mubr.msk.f32.mxu0 %vm9525_vm10, %v11369_v18  ;;  %v11101_v55 = vld [vmem:[#allocation11 + $0x1b0] sm:$0xff]  ;;  %v11106_v41 = vld [vmem:[#allocation11 + $0x1a8] sm:$0xff] }
0x1412   :  { %8236 = vmatmul.mubr.f32.vlgmr.msra.gmra.mxu1 %v5413_v34  ;;  %8240 = vmatprep.subr.mxu0 %v11369_v18  ;;  %v9202_v34 = vld [vmem:[#allocation11 + $0x168] sm:$0xff] }
0x1413   :  { %8274 = vmatpush3.msra.mxu1 %v9165_v62  ;;  %8241 = vmatpush3.msra.mxu0 %v9166_v28  ;;  %v9204_v62 = vld [vmem:[#allocation11 + $0x160] sm:$0xff] }
0x1414   :  { %8275 = vmatprep.subr.mxu1 %v11369_v18  ;;  %8242 = vmatprep.subr.mxu0 %v11369_v18  ;;  %v9205_v28 = vld [vmem:[#allocation11 + $0x1a0] sm:$0xff] }
0x1415   :  { %8276 = vmatpush3.msra.mxu1 %v9167_v21  ;;  %8243 = vmatpush3.msra.mxu0 %v9168_v23  ;;  %v9206_v21 = vld [vmem:[#allocation11 + $0x158] sm:$0xff] }
0x1416   :  { %8277 = vmatprep.subr.mxu1 %v11369_v18  ;;  %8244 = vmatprep.subr.mxu0 %v11369_v18  ;;  %v9207_v23 = vld [vmem:[#allocation11 + $0x198] sm:$0xff] }
0x1417   :  { %8278 = vmatpush3.msra.mxu1 %v9169_v0  ;;  %8245 = vmatpush3.msra.mxu0 %v9170_v37  ;;  %v9208_v0 = vld [vmem:[#allocation11 + $0x150] sm:$0xff] }
0x1418   :  { %8279 = vmatprep.subr.mxu1 %v11369_v18  ;;  %8246 = vmatprep.subr.mxu0 %v11369_v18  ;;  %v9209_v37 = vld [vmem:[#allocation11 + $0x190] sm:$0xff] }
0x1419   :  { %8280 = vmatpush3.msra.mxu1 %v9171_v59  ;;  %8247 = vmatpush3.msra.mxu0 %v9172_v6  ;;  %v9210_v59 = vld [vmem:[#allocation11 + $0x148] sm:$0xff] }
0x141a   :  { %8281 = vmatprep.subr.mxu1 %v11369_v18  ;;  %8248 = vmatprep.subr.mxu0 %v11369_v18  ;;  %v9211_v6 = vld [vmem:[#allocation11 + $0x188] sm:$0xff] }
0x141b   :  { %8282 = vmatpush3.msra.mxu1 %v9173_v20  ;;  %8249 = vmatpush3.msra.mxu0 %v9174_v27  ;;  %v9212_v20 = vld [vmem:[#allocation11 + $0x140] sm:$0xff] }
0x141c   :  { %8283 = vmatprep.subr.mxu1 %v11369_v18  ;;  %8250 = vmatprep.subr.mxu0 %v11369_v18  ;;  %v9213_v27 = vld [vmem:[#allocation11 + $0x180] sm:$0xff] }
0x141d   :  { %8284 = vmatpush3.msra.mxu1 %v9175_v47  ;;  %8251 = vmatpush3.msra.mxu0 %v9176_v14  ;;  %v9214_v47 = vld [vmem:[#allocation11 + $0x138] sm:$0xff]  ;;  %v9215_v14 = vld [vmem:[#allocation11 + $0x130] sm:$0xff] }
0x141e   :  { %8285 = vmatprep.subr.mxu1 %v11369_v18  ;;  %8252 = vmatprep.subr.mxu0 %v11369_v18 }
0x141f   :  { %8286 = vmatpush3.msra.mxu1 %v9177_v1  ;;  %8253 = vmatpush3.msra.mxu0 %v9178_v36  ;;  %v9216_v1 = vld [vmem:[#allocation11 + $0x128] sm:$0xff]  ;;  %v9217_v36 = vld [vmem:[#allocation11 + $0x120] sm:$0xff] }
0x1420   :  { %8287 = vmatprep.subr.mxu1 %v11369_v18  ;;  %8254 = vmatprep.subr.mxu0 %v11369_v18 }
0x1421   :  { %8288 = vmatpush3.msra.mxu1 %v9179_v3  ;;  %8255 = vmatpush3.msra.mxu0 %v9180_v53  ;;  %v9218_v3 = vld [vmem:[#allocation11 + $0x118] sm:$0xff]  ;;  %v9219_v53 = vld [vmem:[#allocation11 + $0x110] sm:$0xff] }
0x1422   :  { %8289 = vmatprep.subr.mxu1 %v11369_v18  ;;  %8256 = vmatprep.subr.mxu0 %v11369_v18 }
0x1423   :  { %8290 = vmatpush3.msra.mxu1 %v9181_v31  ;;  %8257 = vmatpush3.msra.mxu0 %v9182_v9  ;;  %v9220_v9 = vld [vmem:[#allocation11 + $0x108] sm:$0xff] }
0x1424   :  { %8291 = vmatprep.subr.mxu1 %v11369_v18  ;;  %8258 = vmatprep.subr.mxu0 %v11369_v18 }
0x1425   :  { %8292 = vmatpush3.msra.mxu1 %v9183_v61  ;;  %8259 = vmatpush3.msra.mxu0 %v9184_v30  ;;  %v9221_v61 = vld [vmem:[#allocation11 + $0x100] sm:$0xff] }
0x1426   :  { %8293 = vmatprep.subr.mxu1 %v11369_v18  ;;  %8260 = vmatprep.subr.mxu0 %v11369_v18 }
0x1427   :  { %8294 = vmatpush3.msra.mxu1 %v9185_v35  ;;  %8261 = vmatpush3.msra.mxu0 %v9186_v38 }
0x1428   :  { %8295 = vmatprep.subr.mxu1 %v11369_v18  ;;  %8262 = vmatprep.subr.mxu0 %v11369_v18 }
0x1429   :  { %8296 = vmatpush3.msra.mxu1 %v9187_v39  ;;  %8263 = vmatpush3.msra.mxu0 %v9188_v42 }
0x142a   :  { %8297 = vmatprep.subr.mxu1 %v11369_v18  ;;  %8264 = vmatprep.subr.mxu0 %v11369_v18 }
0x142b   :  { %8298 = vmatpush3.msra.mxu1 %v9189_v45  ;;  %8265 = vmatpush3.msra.mxu0 %v9190_v51 }
0x142c   :  { %8299 = vmatprep.subr.mxu1 %v11369_v18  ;;  %8266 = vmatprep.subr.mxu0 %v11369_v18 }
0x142d   :  { %8300 = vmatpush3.msra.mxu1 %v9191_v60  ;;  %8267 = vmatpush3.msra.mxu0 %v9192_v5 }
0x142e   :  { %8301 = vmatprep.subr.mxu1 %v11369_v18  ;;  %8268 = vmatprep.subr.mxu0 %v11369_v18 }
0x142f   :  { %8302 = vmatpush3.msra.mxu1 %v9193_v7  ;;  %8269 = vmatpush3.msra.mxu0 %v9194_v63 }
0x1430   :  { %8303 = vmatprep.subr.mxu1 %v11369_v18  ;;  %8305 = vmatprep.mubr.msk.f32.mxu1 %vm9525_vm10, %v11369_v18 }
0x1431   :  { %8304 = vmatpush3.msra.mxu1 %v9195_v50  ;;  %8308 = vmatprep.subr.mxu0 %v11369_v18 }
0x1432   :  { %8343 = vmatprep.subr.mxu1 %v11369_v18 }
0x14d0   :  { %v5480_v2 = vpop.f32.mrf.mxu0 }
0x14d1   :  { %v5554_v32 = vmul.f32 %v5480_v2, %v5480_v2  ;;  %v5562_v19 = vrot.slane %v5480_v2, %v11371_v57 }
0x14d2   :  { %v8202_v10 = vpop.f32.mrf.mxu0  ;;  %v5550_v58 = vpop.f32.mrf.mxu1 }
0x14d3   :  { %v5555_v15 = vsub.f32 %v5550_v58, %v5554_v32  ;;  %v5563_v46 = vsub.f32 %v11036_v11, %v5562_v19 }
0x14d4   :  { %v8237_v17 = vpop.f32.mrf.mxu1 }
0x14d5   :  { %v5556_v56 = vadd.f32 1e-05, %v5555_v15 }
0x14d7   :  { %8562 = vrsqrt.f32 %v5556_v56 }
0x14e4   :  { %v8563_v22 = vpop.eup %8562 }
0x14e5   :  { %v5558_v48 = vmul.f32 %v9196_v29, %v8563_v22 }
0x14e7   :  { %v5567_v13 = vrot.slane %v5558_v48, %v11371_v57 }
0x14e9   :  { %v5568_v54 = vmul.f32 %v5567_v13, %v5563_v46  ;;  %v9222_v13 = vld [vmem:[#allocation13 + $0x78] sm:$0xff] }
0x14eb   :  { %v5569_v49 = vadd.f32 %v9197_v33, %v5568_v54  ;;  %v9223_v54 = vld [vmem:[#allocation13 + $0x38] sm:$0xff]  ;;  %v9224_v33 = vld [vmem:[#allocation13 + $0x70] sm:$0xff] }
0x14ed   :  { %vm5570_vm11 = vcmp.ge.f32.partialorder %v5569_v49, 0.0  ;;  %v5571_v24 = vmul.f32 0.01, %v5569_v49 }
0x14ef   :  { %v5572_v26 = vsel %vm5570_vm11, %v5569_v49, %v5571_v24  ;;  %v9225_v49 = vld [vmem:[#allocation13 + $0x30] sm:$0xff]  ;;  %v9226_v24 = vld [vmem:[#allocation13 + $0x68] sm:$0xff] }
0x14f0   :  { %v5574_v40 = vrot.slane %v5572_v26, 7  ;;  %v9227_v26 = vld [vmem:[#allocation13 + $0x28] sm:$0xff] }
0x14f2   :  { %v5576_v44 = vsel %vm195_vm0, 0.0, %v5574_v40  ;;  %v9228_v40 = vld [vmem:[#allocation13 + $0x60] sm:$0xff] }
0x14f3   :  { %v11084_v52 = vsel %vm2130_vm13, %v5576_v44, 0.0  ;;  %v9229_v44 = vld [vmem:[#allocation13 + $0x20] sm:$0xff] }
0x14f4   :  { %v5579_v4 = vrot.slane %v11084_v52, 1  ;;  %v5582_v43 = vrot.slane %v11084_v52, 2  ;;  %v5725_v31 = vrot.slane %v11084_v52, 3 }
0x14f6   :  { %v5584_v11 = vsel %vm195_vm0, %v5579_v4, %v5582_v43  ;;  %v5581_v12 = vsel %vm195_vm0, %v11084_v52, %v5579_v4  ;;  %v5727_v30 = vsel %vm195_vm0, %v5582_v43, %v5725_v31  ;;  %v9230_v52 = vld [vmem:[#allocation13 + $0x58] sm:$0xff]  ;;  %v9232_v43 = vld [vmem:[#allocation13 + $0x50] sm:$0xff] }
0x14f7   :  { %8271 = vmatmul.mubr.f32.vlgmr.msra.gmra.mxu0 %v5584_v11  ;;  %8306 = vmatmul.mubr.f32.vlgmr.msra.gmra.mxu1 %v5581_v12  ;;  %v9231_v4 = vld [vmem:[#allocation13 + $0x18] sm:$0xff]  ;;  %v9233_v11 = vld [vmem:[#allocation13 + $0x10] sm:$0xff]  ;;  %v9234_v12 = vld [vmem:[#allocation13 + $0x48] sm:$0xff] }
0x14f8   :  { %8309 = vmatpush3.msra.mxu0 %v9198_v16  ;;  %8340 = vmatprep.mubr.msk.f32.mxu0 %vm9525_vm10, %v11369_v18  ;;  %v9235_v16 = vld [vmem:[#allocation13 + $0x8] sm:$0xff] }
0x14f9   :  { %8310 = vmatprep.subr.mxu0 %v11369_v18  ;;  %8344 = vmatpush3.msra.mxu1 %v11096_v8 }
0x14fa   :  { %8311 = vmatpush3.msra.mxu0 %v9200_v25  ;;  %8345 = vmatprep.subr.mxu1 %v11369_v18  ;;  %v9237_v25 = vld [vmem:[#allocation13] sm:$0xff] }
0x14fb   :  { %8312 = vmatprep.subr.mxu0 %v11369_v18  ;;  %8346 = vmatpush3.msra.mxu1 %v11101_v55 }
0x14fc   :  { %8313 = vmatpush3.msra.mxu0 %v9202_v34  ;;  %8347 = vmatprep.subr.mxu1 %v11369_v18 }
0x14fd   :  { %8314 = vmatprep.subr.mxu0 %v11369_v18  ;;  %8348 = vmatpush3.msra.mxu1 %v11106_v41 }
0x14fe   :  { %8315 = vmatpush3.msra.mxu0 %v9204_v62  ;;  %8349 = vmatprep.subr.mxu1 %v11369_v18 }
0x14ff   :  { %8316 = vmatprep.subr.mxu0 %v11369_v18  ;;  %8350 = vmatpush3.msra.mxu1 %v9205_v28 }
0x1500   :  { %8317 = vmatpush3.msra.mxu0 %v9206_v21  ;;  %8351 = vmatprep.subr.mxu1 %v11369_v18 }
0x1501   :  { %8318 = vmatprep.subr.mxu0 %v11369_v18  ;;  %8352 = vmatpush3.msra.mxu1 %v9207_v23 }
0x1502   :  { %8319 = vmatpush3.msra.mxu0 %v9208_v0  ;;  %8353 = vmatprep.subr.mxu1 %v11369_v18 }
0x1503   :  { %8320 = vmatprep.subr.mxu0 %v11369_v18  ;;  %8354 = vmatpush3.msra.mxu1 %v9209_v37 }
0x1504   :  { %8321 = vmatpush3.msra.mxu0 %v9210_v59  ;;  %8355 = vmatprep.subr.mxu1 %v11369_v18  ;;  %v9238_v59 = vld [vmem:[#allocation11 + $0x1c0] sm:$0x1] }
0x1505   :  { %8322 = vmatprep.subr.mxu0 %v11369_v18  ;;  %8356 = vmatpush3.msra.mxu1 %v9211_v6 }
0x1506   :  { %8323 = vmatpush3.msra.mxu0 %v9212_v20  ;;  %8357 = vmatprep.subr.mxu1 %v11369_v18 }
0x1507   :  { %8324 = vmatprep.subr.mxu0 %v11369_v18  ;;  %8358 = vmatpush3.msra.mxu1 %v9213_v27 }
0x1508   :  { %8325 = vmatpush3.msra.mxu0 %v9214_v47  ;;  %8359 = vmatprep.mubr.msk.f32.mxu1 %vm9525_vm10, %v11369_v18 }
0x1509   :  { %8326 = vmatprep.subr.mxu0 %v11369_v18  ;;  %8381 = vmatprep.subr.mxu1 %v11369_v18 }
0x150a   :  { %8327 = vmatpush3.msra.mxu0 %v9215_v14  ;;  %v9239_v14 = vld [vmem:[#allocation11 + $0x1c1] ss:$0 sm:$0xff] }
0x150b   :  { %8328 = vmatprep.subr.mxu0 %v11369_v18 }
0x150c   :  { %8329 = vmatpush3.msra.mxu0 %v9216_v1 }
0x150d   :  { %8330 = vmatprep.subr.mxu0 %v11369_v18 }
0x150e   :  { %8331 = vmatpush3.msra.mxu0 %v9217_v36 }
0x150f   :  { %8332 = vmatprep.subr.mxu0 %v11369_v18 }
0x1510   :  { %8333 = vmatpush3.msra.mxu0 %v9218_v3 }
0x1511   :  { %8334 = vmatprep.subr.mxu0 %v11369_v18 }
0x1512   :  { %8335 = vmatpush3.msra.mxu0 %v9219_v53 }
0x1513   :  { %8336 = vmatprep.subr.mxu0 %v11369_v18 }
0x1514   :  { %8337 = vmatpush3.msra.mxu0 %v9220_v9 }
0x1515   :  { %8338 = vmatprep.subr.mxu0 %v11369_v18 }
0x1516   :  { %8339 = vmatpush3.msra.mxu0 %v9221_v61 }
0x1517   :  { %8341 = vmatmul.mubr.f32.vlgmr.msra.gmra.mxu0 %v5727_v30  ;;  %8362 = vmatprep.subr.mxu0 %v11369_v18  ;;  %v9240_v30 = vld [vmem:[#allocation13 + $0xf8] sm:$0xff] }
0x1518   :  { %8363 = vmatpush3.msra.mxu0 %v11096_v8  ;;  %8378 = vmatprep.mubr.msk.f32.mxu0 %vm9525_vm10, %v11369_v18  ;;  %v9236_v8 = vld [vmem:[#allocation13 + $0x40] sm:$0xff] }
0x1519   :  { %8364 = vmatprep.subr.mxu0 %v11369_v18 }
0x151a   :  { %8365 = vmatpush3.msra.mxu0 %v11101_v55 }
0x151b   :  { %8366 = vmatprep.subr.mxu0 %v11369_v18 }
0x151c   :  { %8367 = vmatpush3.msra.mxu0 %v11106_v41 }
0x151d   :  { %8368 = vmatprep.subr.mxu0 %v11369_v18 }
0x151e   :  { %8369 = vmatpush3.msra.mxu0 %v9205_v28 }
0x151f   :  { %8370 = vmatprep.subr.mxu0 %v11369_v18 }
0x1520   :  { %8371 = vmatpush3.msra.mxu0 %v9207_v23 }
0x1521   :  { %8372 = vmatprep.subr.mxu0 %v11369_v18 }
0x1522   :  { %8373 = vmatpush3.msra.mxu0 %v9209_v37 }
0x1523   :  { %8374 = vmatprep.subr.mxu0 %v11369_v18 }
0x1524   :  { %8375 = vmatpush3.msra.mxu0 %v9211_v6 }
0x1525   :  { %8376 = vmatprep.subr.mxu0 %v11369_v18 }
0x1526   :  { %8377 = vmatpush3.msra.mxu0 %v9213_v27 }
0x1527   :  { %8400 = vmatprep.subr.mxu0 %v11369_v18 }
0x15b7   :  { %v5651_v35 = vpop.f32.mrf.mxu0  ;;  %v5721_v38 = vpop.f32.mrf.mxu1 }
0x15b8   :  { %v5722_v45 = vadd.f32 %v5721_v38, %v5651_v35  ;;  %v9241_v35 = vld [vmem:[#allocation13 + $0xb8] sm:$0xff]  ;;  %v9242_v38 = vld [vmem:[#allocation13 + $0xf0] sm:$0xff] }
0x15b9   :  { %v8272_v39 = vpop.f32.mrf.mxu0  ;;  %v8307_v42 = vpop.f32.mrf.mxu1 }
0x15ba   :  { %v9243_v39 = vld [vmem:[#allocation13 + $0xb0] sm:$0xff]  ;;  %v9244_v42 = vld [vmem:[#allocation13 + $0xe8] sm:$0xff] }
0x15d7   :  { %v5794_v51 = vpop.f32.mrf.mxu0 }
0x15d8   :  { %v11147_v60 = vadd.f32 %v5794_v51, %v5722_v45  ;;  %v9245_v45 = vld [vmem:[#allocation13 + $0xa8] sm:$0xff]  ;;  %v9246_v51 = vld [vmem:[#allocation13 + $0xe0] sm:$0xff] }
0x15d9   :  { %v8342_v5 = vpop.f32.mrf.mxu0 }
0x15da   :  { %v5799_v7 = vsel %vm2876_vm15, %v11147_v60, 0.0  ;;  %v5806_v63 = vmul.f32 %v11147_v60, %v11147_v60  ;;  %v9248_v5 = vld [vmem:[#allocation13 + $0xd8] sm:$0xff] }
0x15db   :  { %v5800_v50 = vrot.slane %v5799_v7, 4 }
0x15dc   :  { %v5807_v2 = vsel %vm2876_vm15, %v5806_v63, 0.0  ;;  %v9250_v63 = vld [vmem:[#allocation13 + $0xd0] sm:$0xff] }
0x15dd   :  { %v5801_v32 = vadd.f32 %v5800_v50, %v5799_v7  ;;  %v5808_v10 = vrot.slane %v5807_v2, 4  ;;  %v9249_v7 = vld [vmem:[#allocation13 + $0x98] sm:$0xff]  ;;  %v9251_v50 = vld [vmem:[#allocation13 + $0x90] sm:$0xff] }
0x15df   :  { %v5802_v58 = vrot.slane %v5801_v32, 2  ;;  %v5809_v15 = vadd.f32 %v5808_v10, %v5807_v2  ;;  %v9252_v2 = vld [vmem:[#allocation13 + $0xc8] sm:$0xff] }
0x15e1   :  { %v5803_v17 = vadd.f32 %v5802_v58, %v5801_v32  ;;  %v5810_v56 = vrot.slane %v5809_v15, 2  ;;  %v9253_v32 = vld [vmem:[#allocation13 + $0x88] sm:$0xff]  ;;  %v9254_v58 = vld [vmem:[#allocation13 + $0xc0] sm:$0xff] }
0x15e3   :  { %v5804_v19 = vrot.slane %v5803_v17, 1  ;;  %v5811_v22 = vadd.f32 %v5810_v56, %v5809_v15  ;;  %v9255_v15 = vld [vmem:[#allocation13 + $0x80] sm:$0xff] }
0x15e5   :  { %v5805_v29 = vadd.f32 %v5804_v19, %v5803_v17  ;;  %v5812_v48 = vrot.slane %v5811_v22, 1 }
0x15e7   :  { %8360 = vmatmul.mubr.msk.f32.vlgmr.msra.gmra.mxu1 %vm2892_vm4, %v5805_v29  ;;  %v5813_v46 = vadd.f32 %v5812_v48, %v5811_v22 }
0x15e8   :  { %8382 = vmatpush3.msra.mxu1 %v9222_v13  ;;  %8397 = vmatprep.mubr.msk.f32.mxu1 %vm9525_vm10, %v11369_v18 }
0x15e9   :  { %8379 = vmatmul.mubr.msk.f32.vlgmr.msra.gmra.mxu0 %vm2892_vm4, %v5813_v46  ;;  %8383 = vmatprep.subr.mxu1 %v11369_v18 }
0x15ea   :  { %8401 = vmatpush3.msra.mxu0 %v9223_v54  ;;  %8384 = vmatpush3.msra.mxu1 %v9224_v33 }
0x15eb   :  { %8402 = vmatprep.subr.mxu0 %v11369_v18  ;;  %8385 = vmatprep.subr.mxu1 %v11369_v18 }
0x15ec   :  { %8403 = vmatpush3.msra.mxu0 %v9225_v49  ;;  %8386 = vmatpush3.msra.mxu1 %v9226_v24 }
0x15ed   :  { %8404 = vmatprep.subr.mxu0 %v11369_v18  ;;  %8387 = vmatprep.subr.mxu1 %v11369_v18 }
0x15ee   :  { %8405 = vmatpush3.msra.mxu0 %v9227_v26  ;;  %8388 = vmatpush3.msra.mxu1 %v9228_v40 }
0x15ef   :  { %8406 = vmatprep.subr.mxu0 %v11369_v18  ;;  %8389 = vmatprep.subr.mxu1 %v11369_v18 }
0x15f0   :  { %8407 = vmatpush3.msra.mxu0 %v9229_v44  ;;  %8390 = vmatpush3.msra.mxu1 %v9230_v52 }
0x15f1   :  { %8408 = vmatprep.subr.mxu0 %v11369_v18  ;;  %8391 = vmatprep.subr.mxu1 %v11369_v18 }
0x15f2   :  { %8409 = vmatpush3.msra.mxu0 %v9231_v4  ;;  %8392 = vmatpush3.msra.mxu1 %v9232_v43 }
0x15f3   :  { %8410 = vmatprep.subr.mxu0 %v11369_v18  ;;  %8393 = vmatprep.subr.mxu1 %v11369_v18 }
0x15f4   :  { %8411 = vmatpush3.msra.mxu0 %v9233_v11  ;;  %8394 = vmatpush3.msra.mxu1 %v9234_v12 }
0x15f5   :  { %8412 = vmatprep.subr.mxu0 %v11369_v18  ;;  %8395 = vmatprep.subr.mxu1 %v11369_v18 }
0x15f6   :  { %8413 = vmatpush3.msra.mxu0 %v9235_v16  ;;  %8416 = vmatprep.mubr.msk.f32.mxu0 %vm9525_vm10, %v11369_v18 }
0x15f7   :  { %8414 = vmatprep.subr.mxu0 %v11369_v18  ;;  %8396 = vmatpush3.msra.mxu1 %v9236_v8 }
0x15f8   :  { %8415 = vmatpush3.msra.mxu0 %v9237_v25  ;;  %8419 = vmatprep.subr.mxu1 %v11369_v18 }
0x15f9   :  { %8438 = vmatprep.subr.mxu0 %v11369_v18 }
0x16a7   :  { %v5883_v55 = vpop.f32.mrf.mxu1 }
0x16a8   :  { %v5960_v34 = vmul.f32 %v5883_v55, %v5883_v55  ;;  %v5968_v0 = vrot.slane %v5883_v55, %v11371_v57  ;;  %v9256_v55 = vld [vmem:[#allocation17 + $0x38] sm:$0xff] }
0x16a9   :  { %v8361_v41 = vpop.f32.mrf.mxu1  ;;  %v5956_v62 = vpop.f32.mrf.mxu0 }
0x16aa   :  { %v5961_v28 = vsub.f32 %v5956_v62, %v5960_v34  ;;  %v5969_v20 = vsub.f32 %v11147_v60, %v5968_v0  ;;  %v9247_v60 = vld [vmem:[#allocation13 + $0xa0] sm:$0xff]  ;;  %v9258_v62 = vld [vmem:[#allocation17 + $0x30] sm:$0xff]  ;;  %v9262_v0 = vld [vmem:[#allocation14 + $0x8] sm:$0xff] }
0x16ab   :  { %v8380_v21 = vpop.f32.mrf.mxu0  ;;  %v9257_v34 = vld [vmem:[#allocation2] sm:$0x3] }
0x16ac   :  { %v5962_v23 = vadd.f32 1e-05, %v5961_v28  ;;  %v6464_v41 = vrot.slane %v9257_v34, 1  ;;  %v9259_v28 = vld [vmem:[#allocation14 + $0x10] sm:$0x3f]  ;;  %v9260_v21 = vld [vmem:[#allocation17 + $0x28] sm:$0xff] }
0x16ae   :  { %8564 = vrsqrt.f32 %v5962_v23  ;;  %v9261_v23 = vld [vmem:[#allocation17 + $0x20] sm:$0xff] }
0x16bb   :  { %v8565_v37 = vpop.eup %8564 }
0x16bc   :  { %v5964_v6 = vmul.f32 %v9238_v59, %v8565_v37  ;;  %v9263_v37 = vld [vmem:[#allocation17 + $0x18] sm:$0xff]  ;;  %v9264_v59 = vld [vmem:[#allocation14] sm:$0xff] }
0x16be   :  { %v5973_v27 = vrot.slane %v5964_v6, %v11371_v57  ;;  %v9265_v6 = vld [vmem:[#allocation17 + $0x10] sm:$0xff] }
0x16c0   :  { %v5974_v47 = vmul.f32 %v5973_v27, %v5969_v20  ;;  %v9266_v20 = vld [vmem:[#allocation17 + $0x8] sm:$0xff]  ;;  %v9267_v27 = vld [vmem:[#allocation17] sm:$0xff] }
0x16c2   :  { %v5975_v1 = vadd.f32 %v9239_v14, %v5974_v47 }
0x16c4   :  { %vm5976_vm13 = vcmp.ge.f32.partialorder %v5975_v1, 0.0  ;;  %v5977_v36 = vmul.f32 0.01, %v5975_v1 }
0x16c6   :  { %v5978_v3 = vsel %vm5976_vm13, %v5975_v1, %v5977_v36 }
0x16c7   :  { %v5980_v53 = vrot.slane %v5978_v3, 7 }
0x16c9   :  { %v5982_v31 = vsel %vm195_vm0, 0.0, %v5980_v53 }
0x16ca   :  { %v5983_v9 = vsel %vm1629_vm9, %v5982_v31, 0.0  ;;  %vm6689_vm9 = vcmask 17408  }
0x16cb   :  { %v5985_v61 = vrot.slane %v5983_v9, 1  ;;  %8417 = vmatmul.mubr.msk.f32.vlgmr.msra.gmra.mxu0 %vm2892_vm4, %v5983_v9  ;;  %v6130_v10 = vrot.slane %v5983_v9, 2 }
0x16cc   :  { %8439 = vmatpush3.msra.mxu0 %v9240_v30  ;;  %8454 = vmatprep.mubr.msk.f32.mxu0 %vm9525_vm10, %v11369_v18 }
0x16cd   :  { %8398 = vmatmul.mubr.msk.f32.vlgmr.msra.gmra.mxu1 %vm2892_vm4, %v5985_v61  ;;  %8440 = vmatprep.subr.mxu0 %v11369_v18 }
0x16ce   :  { %8420 = vmatpush3.msra.mxu1 %v9241_v35  ;;  %8435 = vmatprep.mubr.msk.f32.mxu1 %vm9525_vm10, %v11369_v18 }
0x16cf   :  { %8421 = vmatprep.subr.mxu1 %v11369_v18  ;;  %8441 = vmatpush3.msra.mxu0 %v9242_v38 }
0x16d0   :  { %8422 = vmatpush3.msra.mxu1 %v9243_v39  ;;  %8442 = vmatprep.subr.mxu0 %v11369_v18 }
0x16d1   :  { %8423 = vmatprep.subr.mxu1 %v11369_v18  ;;  %8443 = vmatpush3.msra.mxu0 %v9244_v42 }
0x16d2   :  { %8424 = vmatpush3.msra.mxu1 %v9245_v45  ;;  %8444 = vmatprep.subr.mxu0 %v11369_v18  ;;  %v9269_v45 = vld [vmem:[#allocation13 + $0x101] ss:$0 sm:$0xff] }
0x16d3   :  { %8425 = vmatprep.subr.mxu1 %v11369_v18  ;;  %8445 = vmatpush3.msra.mxu0 %v9246_v51 }
0x16d4   :  { %8426 = vmatpush3.msra.mxu1 %v9247_v60  ;;  %8446 = vmatprep.subr.mxu0 %v11369_v18 }
0x16d5   :  { %8427 = vmatprep.subr.mxu1 %v11369_v18  ;;  %8447 = vmatpush3.msra.mxu0 %v9248_v5 }
0x16d6   :  { %8428 = vmatpush3.msra.mxu1 %v9249_v7  ;;  %8448 = vmatprep.subr.mxu0 %v11369_v18 }
0x16d7   :  { %8429 = vmatprep.subr.mxu1 %v11369_v18  ;;  %8449 = vmatpush3.msra.mxu0 %v9250_v63 }
0x16d8   :  { %8430 = vmatpush3.msra.mxu1 %v9251_v50  ;;  %8450 = vmatprep.subr.mxu0 %v11369_v18 }
0x16d9   :  { %8431 = vmatprep.subr.mxu1 %v11369_v18  ;;  %8451 = vmatpush3.msra.mxu0 %v9252_v2 }
0x16da   :  { %8432 = vmatpush3.msra.mxu1 %v9253_v32  ;;  %8452 = vmatprep.subr.mxu0 %v11369_v18 }
0x16db   :  { %8433 = vmatprep.subr.mxu1 %v11369_v18  ;;  %8453 = vmatpush3.msra.mxu0 %v9254_v58 }
0x16dc   :  { %8434 = vmatpush3.msra.mxu1 %v9255_v15  ;;  %8476 = vmatprep.subr.mxu0 %v11369_v18  ;;  %v9270_v15 = vld [vmem:[#allocation16 + $0x18] sm:$0xff] }
0x16dd   :  { %8436 = vmatmul.mubr.msk.f32.vlgmr.msra.gmra.mxu1 %vm2892_vm4, %v6130_v10  ;;  %8457 = vmatprep.subr.mxu1 %v11369_v18 }
0x16de   :  { %8458 = vmatpush3.msra.mxu1 %v9240_v30  ;;  %8473 = vmatprep.mubr.msk.f32.mxu1 %vm9525_vm10, %v11369_v18  ;;  %v9268_v30 = vld [vmem:[#allocation13 + $0x100] sm:$0x1] }
0x16df   :  { %8459 = vmatprep.subr.mxu1 %v11369_v18 }
0x16e0   :  { %8460 = vmatpush3.msra.mxu1 %v9242_v38 }
0x16e1   :  { %8461 = vmatprep.subr.mxu1 %v11369_v18 }
0x16e2   :  { %8462 = vmatpush3.msra.mxu1 %v9244_v42 }
0x16e3   :  { %8463 = vmatprep.subr.mxu1 %v11369_v18 }
0x16e4   :  { %8464 = vmatpush3.msra.mxu1 %v9246_v51 }
0x16e5   :  { %8465 = vmatprep.subr.mxu1 %v11369_v18 }
0x16e6   :  { %8466 = vmatpush3.msra.mxu1 %v9248_v5 }
0x16e7   :  { %8467 = vmatprep.subr.mxu1 %v11369_v18 }
0x16e8   :  { %8468 = vmatpush3.msra.mxu1 %v9250_v63 }
0x16e9   :  { %8469 = vmatprep.subr.mxu1 %v11369_v18 }
0x16ea   :  { %8470 = vmatpush3.msra.mxu1 %v9252_v2 }
0x16eb   :  { %8471 = vmatprep.subr.mxu1 %v11369_v18 }
0x16ec   :  { %8472 = vmatpush3.msra.mxu1 %v9254_v58 }
0x16ed   :  { %8495 = vmatprep.subr.mxu1 %v11369_v18 }
0x178b   :  { %v6126_v17 = vpop.f32.mrf.mxu0 }
0x178d   :  { %v6054_v56 = vpop.f32.mrf.mxu1  ;;  %v8418_v19 = vpop.f32.mrf.mxu0 }
0x178e   :  { %v6127_v29 = vadd.f32 %v6126_v17, %v6054_v56  ;;  %v9272_v17 = vld [vmem:[#allocation16 + $0x8] sm:$0xff]  ;;  %v9273_v56 = vld [vmem:[#allocation16] sm:$0xff] }
0x178f   :  { %v8399_v22 = vpop.f32.mrf.mxu1 }
0x179d   :  { %v6199_v48 = vpop.f32.mrf.mxu1 }
0x179e   :  { %v11214_v46 = vadd.f32 %v6199_v48, %v6127_v29 }
0x179f   :  { %v8437_v13 = vpop.f32.mrf.mxu1 }
0x17a0   :  { %v6204_v54 = vsel %vm2876_vm15, %v11214_v46, 0.0  ;;  %v6211_v33 = vmul.f32 %v11214_v46, %v11214_v46 }
0x17a1   :  { %v6205_v49 = vrot.slane %v6204_v54, 4 }
0x17a2   :  { %v6212_v24 = vsel %vm2876_vm15, %v6211_v33, 0.0  ;;  %v9274_v33 = vld [vmem:[#allocation14 + $0x16] sm:$0x1] }
0x17a3   :  { %v6206_v26 = vadd.f32 %v6205_v49, %v6204_v54  ;;  %v6213_v40 = vrot.slane %v6212_v24, 4 }
0x17a5   :  { %v6207_v44 = vrot.slane %v6206_v26, 2  ;;  %v6214_v52 = vadd.f32 %v6213_v40, %v6212_v24 }
0x17a7   :  { %v6208_v4 = vadd.f32 %v6207_v44, %v6206_v26  ;;  %v6215_v43 = vrot.slane %v6214_v52, 2  ;;  %v190_v26 = vld [vmem:[#allocation16 + $0x20] sm:$0x1] }
0x17a9   :  { %v6209_v11 = vrot.slane %v6208_v4, 1  ;;  %v6216_v12 = vadd.f32 %v6215_v43, %v6214_v52  ;;  %v11375_v52 = vld [vmem:[#allocation34_spill] sm:$0xff] }
0x17ab   :  { %v6210_v16 = vadd.f32 %v6209_v11, %v6208_v4  ;;  %v6217_v8 = vrot.slane %v6216_v12, 1  ;;  %v3809_v4 = vadd.f32 %v11375_v52, %v190_v26 }
0x17ad   :  { %8455 = vmatmul.mubr.msk.f32.vlgmr.msra.gmra.mxu0 %vm2892_vm4, %v6210_v16  ;;  %v6218_v25 = vadd.f32 %v6217_v8, %v6216_v12 }
0x17ae   :  { %8477 = vmatpush3.msra.mxu0 %v9256_v55  ;;  %8492 = vmatprep.mubr.msk.f32.mxu0 %vm9525_vm10, %v11369_v18 }
0x17af   :  { %8474 = vmatmul.mubr.msk.f32.vlgmr.msra.gmra.mxu1 %vm2892_vm4, %v6218_v25  ;;  %8478 = vmatprep.subr.mxu0 %v11369_v18 }
0x17b0   :  { %8479 = vmatpush3.msra.mxu0 %v9258_v62  ;;  %8496 = vmatpush3.msk.msra.mxu1 %vm443_vm3, %v9259_v28 }
0x17b1   :  { %8480 = vmatprep.subr.mxu0 %v11369_v18  ;;  %8497 = vmatprep.mubr.msk.f32.mxu1 %vm9525_vm10, %v11369_v18 }
0x17b2   :  { %8481 = vmatpush3.msra.mxu0 %v9260_v21  ;;  %8500 = vmatprep.subr.mxu1 %v11369_v18 }
0x17b3   :  { %8482 = vmatprep.subr.mxu0 %v11369_v18  ;;  %8498 = vmatmul.mubr.msk.f32.vlgmr.msra.gmra.mxu1 %vm3585_vm7, %v6464_v41 }
0x17b4   :  { %8483 = vmatpush3.msra.mxu0 %v9261_v23  ;;  %8501 = vmatpush3.msra.mxu1 %v9262_v0 }
0x17b5   :  { %8484 = vmatprep.subr.mxu0 %v11369_v18  ;;  %8502 = vmatprep.subr.mxu1 %v11369_v18 }
0x17b6   :  { %8485 = vmatpush3.msra.mxu0 %v9263_v37  ;;  %8503 = vmatpush3.msra.mxu1 %v9264_v59 }
0x17b7   :  { %8486 = vmatprep.subr.mxu0 %v11369_v18  ;;  %8504 = vmatprep.mubr.msk.f32.mxu1 %vm9525_vm10, %v11369_v18 }
0x17b8   :  { %8487 = vmatpush3.msra.mxu0 %v9265_v6 }
0x17b9   :  { %8488 = vmatprep.subr.mxu0 %v11369_v18 }
0x17ba   :  { %8489 = vmatpush3.msra.mxu0 %v9266_v20 }
0x17bb   :  { %8490 = vmatprep.subr.mxu0 %v11369_v18 }
0x17bc   :  { %8491 = vmatpush3.msra.mxu0 %v9267_v27 }
0x17bd   :  { %8507 = vmatprep.subr.mxu0 %v11369_v18 }
0x186d   :  { %v6288_v47 = vpop.f32.mrf.mxu0 }
0x186e   :  { %v6365_v14 = vmul.f32 %v6288_v47, %v6288_v47  ;;  %v6373_v9 = vrot.slane %v6288_v47, %v11371_v57 }
0x186f   :  { %v8456_v1 = vpop.f32.mrf.mxu0  ;;  %v6361_v36 = vpop.f32.mrf.mxu1 }
0x1870   :  { %v6366_v3 = vsub.f32 %v6361_v36, %v6365_v14  ;;  %v6374_v38 = vsub.f32 %v11214_v46, %v6373_v9 }
0x1871   :  { %v8475_v53 = vpop.f32.mrf.mxu1 }
0x1872   :  { %v6367_v31 = vadd.f32 1e-05, %v6366_v3 }
0x1873   :  { %v6533_v19 = vpop.f32.mrf.mxu1 }
0x1874   :  { %8566 = vrsqrt.f32 %v6367_v31 }
0x1875   :  { %v8499_v22 = vpop.f32.mrf.mxu1 }
0x1881   :  { %v8567_v61 = vpop.eup %8566 }
0x1882   :  { %v6369_v35 = vmul.f32 %v9268_v30, %v8567_v61 }
0x1884   :  { %v6378_v39 = vrot.slane %v6369_v35, %v11371_v57  ;;  %v9271_v57 = vld [vmem:[#allocation16 + $0x10] sm:$0xff] }
0x1886   :  { %v6379_v42 = vmul.f32 %v6378_v39, %v6374_v38 }
0x1888   :  { %v6380_v51 = vadd.f32 %v9269_v45, %v6379_v42 }
0x188a   :  { %vm6381_vm3 = vcmp.ge.f32.partialorder %v6380_v51, 0.0  ;;  %v6382_v60 = vmul.f32 0.01, %v6380_v51 }
0x188c   :  { %v6383_v5 = vsel %vm6381_vm3, %v6380_v51, %v6382_v60 }
0x188d   :  { %v6384_v7 = vsel %vm2876_vm15, %v6383_v5, 0.0 }
0x188e   :  { %v6385_v63 = vrot.slane %v6384_v7, 4 }
0x1890   :  { %v6386_v50 = vadd.f32 %v6385_v63, %v6384_v7 }
0x1892   :  { %v6387_v2 = vrot.slane %v6386_v50, 2 }
0x1894   :  { %v6388_v32 = vadd.f32 %v6387_v2, %v6386_v50 }
0x1896   :  { %v6389_v10 = vrot.slane %v6388_v32, 1 }
0x1898   :  { %v6390_v58 = vadd.f32 %v6389_v10, %v6388_v32 }
0x189a   :  { %8493 = vmatmul.mubr.msk.f32.vlgmr.msra.gmra.mxu0 %vm2892_vm4, %v6390_v58 }
0x189b   :  { %8508 = vmatpush3.msra.mxu0 %v9270_v15  ;;  %8515 = vmatprep.mubr.msk.f32.mxu0 %vm9525_vm10, %v11369_v18 }
0x189c   :  { %8509 = vmatprep.subr.mxu0 %v11369_v18 }
0x189d   :  { %8510 = vmatpush3.msra.mxu0 %v9271_v57 }
0x189e   :  { %8511 = vmatprep.subr.mxu0 %v11369_v18 }
0x189f   :  { %8512 = vmatpush3.msra.mxu0 %v9272_v17 }
0x18a0   :  { %8513 = vmatprep.subr.mxu0 %v11369_v18 }
0x18a1   :  { %8514 = vmatpush3.msra.mxu0 %v9273_v56 }
0x195a   :  { %v6460_v29 = vpop.f32.mrf.mxu0 }
0x195b   :  { %8505 = vmatmul.mubr.msk.f32.vlgmr.msra.gmra.mxu1 %vm3662_vm12, %v6460_v29 }
0x195c   :  { %v8494_v48 = vpop.f32.mrf.mxu0 }
0x1a1b   :  { %v6606_v46 = vpop.f32.mrf.mxu1 }
0x1a1c   :  { %v6607_v13 = vadd.f32 %v6606_v46, %v6533_v19 }
0x1a1d   :  { %v8506_v54 = vpop.f32.mrf.mxu1 }
0x1a1e   :  { %v6610_v49 = vadd.f32 %v9274_v33, %v6607_v13 }
0x1a20   :  { %v6611_v24 = vmax.f32 %v6610_v49, 0.0 }
0x1a22   :  { %8516 = vmatmul.mubr.msk.f32.vlgmr.msra.gmra.mxu0 %vm3738_vm14, %v6611_v24 }
0x1ae2   :  { %v6681_v40 = vpop.f32.mrf.mxu0 }
0x1ae3   :  { %v6682_v44 = vadd.f32 %v6681_v40, %v190_v26 }
0x1ae4   :  { %v8517_v18 = vpop.f32.mrf.mxu0 }
0x1ae5   :  { %v6686_v43 = vrot.slane %v6682_v44, 7 }
0x1ae7   :  { %v6688_v11 = vsel %vm195_vm0, %v3809_v4, %v6686_v43 }
0x1ae8   :  { %6690 = vst.msk [vmem:[#allocation19] sm:$0x3] %vm6689_vm9, %v6688_v11 }
0x1ae9   :  { %9486 = shalt.err (!%p9483_p12)
}
0x1aea   :  { %6700 = dma.vmem_to_hbm [thread:$0]  %s6698_s26, 32, %s11269_s11, [#allocation4]  }
0x1aeb   :  { %9507 = dma.done.wait [#allocation4], 32  }
0x1aec   :  { %9508 = vsyncadd [#allocation4], 4294967264 }
0x1aed   :  { %6704 = vsyncpa [#allocation3], 1 }
0x1aee   :  { %6705 = vsyncpa [#allocation6], 1 }
0x1aef   :  { %6706 = vsyncpa [#allocation9], 1 }
0x1af0   :  { %6707 = vsyncpa [#allocation12], 1 }
0x1af1   :  { %6708 = vsyncpa [#allocation15], 1 }
0x1af2   :  { %6709 = vsyncpa [#allocation18], 1 }
0x1af3   :  { %6710 = vsyncpa [#allocation4], 1 }

</bundles_post_ra>
